<compile_context>
chip_gen: v5e
topology: v5e:2x2
jax: 0.10.0
libtpu: 0.0.40
codegen_flags: <defaults>
</compile_context>

<pallas_src>
import functools
import math

import jax
import jax.numpy as jnp
from jax import lax
from jax.experimental import pallas as pl
from jax.experimental.pallas import tpu as pltpu

# ----------------------------- model config (small, synthetic) ---------------
VOCAB = 64
HIDDEN = 32
HEADS = 4
HEAD_DIM = HIDDEN // HEADS
FF = 64          # BERT intermediate size
EXT_FF = 64      # ext_ff_size
BERT_LAYERS = 2
EXT_LAYERS = 2   # ext_layers
MAX_POS = 32     # max_pos <= 512 branch
TYPE_VOCAB = 2

B = 2            # batch
S = 16           # src sequence length
N_SENTS = 4      # number of sentences (clss positions)

_ATTN_SCALE = 1.0 / math.sqrt(HEAD_DIM)
_GELU_TANH_C = math.sqrt(2.0 / math.pi)
_INV_SQRT2 = 1.0 / math.sqrt(2.0)


# ----------------------------- in-kernel math helpers -------------------------
def _layernorm(x, g, b, eps):
    mu = jnp.mean(x, axis=-1, keepdims=True)
    var = jnp.mean(jnp.square(x - mu), axis=-1, keepdims=True)
    return (x - mu) * lax.rsqrt(var + eps) * g + b


def _erf(x):
    # Abramowitz & Stegun 7.1.26 polynomial (|err| < 1.5e-7, i.e. f32 noise).
    # Keeps the exact-erf BERT GeLU inside the fused kernel without relying on
    # a lax.erf lowering in Mosaic.
    a1, a2, a3, a4, a5 = 0.254829592, -0.284496736, 1.421413741, -1.453152027, 1.061405429
    p = 0.3275911
    ax = jnp.abs(x)
    t = 1.0 / (1.0 + p * ax)
    poly = ((((a5 * t + a4) * t + a3) * t + a2) * t + a1) * t
    y = 1.0 - poly * jnp.exp(-ax * ax)
    return jnp.where(x < 0.0, -y, y)


def _gelu_erf(x):
    return 0.5 * x * (1.0 + _erf(x * _INV_SQRT2))


def _gelu_tanh(x):
    # bertsum neural.gelu: 0.5*x*(1+tanh(sqrt(2/pi)*(x+0.044715*x^3)))
    return 0.5 * x * (1.0 + jnp.tanh(_GELU_TANH_C * (x + 0.044715 * x * x * x)))


def _mha(x, wqkv, bqkv, bias):
    """Multi-head self-attention on a flattened (B*T, H) activation.

    `bias` is a (B*T, B*T) additive bias that already encodes both the key
    padding mask and the block-diagonal cross-batch mask, so a single set of
    (B*T)-wide matmuls per head is exactly equivalent to per-batch attention.
    """
    qkv = jnp.dot(x, wqkv, preferred_element_type=jnp.float32) + bqkv  # (BT, 3H)
    heads = []
    for h in range(HEADS):
        c0 = h * HEAD_DIM
        q = qkv[:, c0:c0 + HEAD_DIM] * _ATTN_SCALE
        k = qkv[:, HIDDEN + c0:HIDDEN + c0 + HEAD_DIM]
        v = qkv[:, 2 * HIDDEN + c0:2 * HIDDEN + c0 + HEAD_DIM]
        s = lax.dot_general(q, k, (((1,), (1,)), ((), ())),
                            preferred_element_type=jnp.float32) + bias  # (BT, BT)
        s = s - jnp.max(s, axis=-1, keepdims=True)
        p = jnp.exp(s)
        p = p / jnp.sum(p, axis=-1, keepdims=True)
        heads.append(jnp.dot(p, v, preferred_element_type=jnp.float32))  # (BT, Dh)
    return jnp.concatenate(heads, axis=1)                                # (BT, H)


# ----------------------------- fused Pallas kernels ---------------------------
def _bert_kernel(emb_ref, mask_ref, cross_ref, emb_g_ref, emb_b_ref,
                 wqkv_ref, bqkv_ref, wo_ref, bo_ref,
                 ln1_g_ref, ln1_b_ref, w1_ref, b1_ref, w2_ref, b2_ref,
                 ln2_g_ref, ln2_b_ref, out_ref):
    # Embedding LayerNorm (eps=1e-12)
    x = _layernorm(emb_ref[...].astype(jnp.float32),
                   emb_g_ref[...], emb_b_ref[...], 1e-12)
    # extended attention mask: (1 - mask) * -10000, plus block-diag batch mask
    bias = cross_ref[...] + (1.0 - mask_ref[...].astype(jnp.float32)) * (-10000.0)
    for l in range(BERT_LAYERS):                      # static unroll
        ctx = _mha(x, wqkv_ref[l], bqkv_ref[l], bias)
        attn_out = jnp.dot(ctx, wo_ref[l],
                           preferred_element_type=jnp.float32) + bo_ref[l]
        h = _layernorm(attn_out + x, ln1_g_ref[l], ln1_b_ref[l], 1e-12)
        inter = _gelu_erf(jnp.dot(h, w1_ref[l],
                                  preferred_element_type=jnp.float32) + b1_ref[l])
        ffn = jnp.dot(inter, w2_ref[l],
                      preferred_element_type=jnp.float32) + b2_ref[l]
        x = _layernorm(ffn + h, ln2_g_ref[l], ln2_b_ref[l], 1e-12)
    out_ref[...] = x.astype(out_ref.dtype)


def _ext_kernel(x_ref, mask_ref, cross_ref,
                ln_g_ref, ln_b_ref, wqkv_ref, bqkv_ref, wo_ref, bo_ref,
                ff_ln_g_ref, ff_ln_b_ref, w1_ref, b1_ref, w2_ref, b2_ref,
                fin_g_ref, fin_b_ref, score_w_ref, score_b_ref, out_ref):
    x = x_ref[...].astype(jnp.float32)                     # (B*N, H), masked + PE
    maskf = mask_ref[...].astype(jnp.float32)              # (1, B*N)
    # mask-fill with -1e18 (additive is identical after softmax), + batch block mask
    bias = cross_ref[...] + (1.0 - maskf) * (-1e18)
    for l in range(EXT_LAYERS):                            # static unroll
        inp = _layernorm(x, ln_g_ref[l], ln_b_ref[l], 1e-6) if l != 0 else x
        ctx = _mha(inp, wqkv_ref[l], bqkv_ref[l], bias)
        ctx = jnp.dot(ctx, wo_ref[l],
                      preferred_element_type=jnp.float32) + bo_ref[l]
        res = ctx + x                                      # dropout == 0 in eval
        # PositionwiseFeedForward: LN -> w1 -> tanh-gelu -> w2 -> +residual
        h = _layernorm(res, ff_ln_g_ref[l], ff_ln_b_ref[l], 1e-6)
        h = _gelu_tanh(jnp.dot(h, w1_ref[l],
                               preferred_element_type=jnp.float32) + b1_ref[l])
        h = jnp.dot(h, w2_ref[l],
                    preferred_element_type=jnp.float32) + b2_ref[l]
        x = h + res
    # final LN -> Linear(H,1) -> sigmoid -> * mask, as one lane-dense (1, B*N) row
    xf = _layernorm(x, fin_g_ref[...], fin_b_ref[...], 1e-6)
    row = lax.dot_general(score_w_ref[...], xf, (((1,), (1,)), ((), ())),
                          preferred_element_type=jnp.float32)            # (1, B*N)
    out_ref[...] = (jax.nn.sigmoid(row + score_b_ref[...]) * maskf).astype(out_ref.dtype)


# ----------------------------- pallas_call wrappers ---------------------------
_VMEM = pl.BlockSpec(memory_space=pltpu.MemorySpace.VMEM)


def _block_cross_bias(n_blocks, block, penalty):
    """(n_blocks*block)^2 additive bias: 0 within a batch block, `penalty` across.

    Static given the shapes -> constant-folded by XLA; a few KB at most.
    """
    ids = jnp.arange(n_blocks * block) // block
    return jnp.where(ids[:, None] == ids[None, :], 0.0, penalty).astype(jnp.float32)


def bert_forward(emb2d, mask_flat, p):
    """emb2d: (B*S, H) summed embeddings; mask_flat: (1, B*S) float mask."""
    cross = _block_cross_bias(B, S, -1e9)
    inputs = (emb2d, mask_flat, cross, p["emb_ln_g"], p["emb_ln_b"],
              p["wqkv"], p["bqkv"], p["wo"], p["bo"],
              p["ln1_g"], p["ln1_b"], p["w1"], p["b1"], p["w2"], p["b2"],
              p["ln2_g"], p["ln2_b"])
    return pl.pallas_call(
        _bert_kernel,
        out_shape=jax.ShapeDtypeStruct(emb2d.shape, jnp.float32),
        in_specs=[_VMEM] * len(inputs),
        out_specs=_VMEM,
    )(*inputs)


def ext_forward(x2d, mask_flat, p):
    """x2d: (B*N, H) masked sentence vectors + PE; mask_flat: (1, B*N)."""
    cross = _block_cross_bias(B, N_SENTS, -1e18)
    inputs = (x2d, mask_flat, cross,
              p["ln_g"], p["ln_b"], p["wqkv"], p["bqkv"], p["wo"], p["bo"],
              p["ff_ln_g"], p["ff_ln_b"], p["w1"], p["b1"], p["w2"], p["b2"],
              p["fin_g"], p["fin_b"], p["score_w"], p["score_b"])
    return pl.pallas_call(
        _ext_kernel,
        out_shape=jax.ShapeDtypeStruct((1, x2d.shape[0]), jnp.float32),
        in_specs=[_VMEM] * len(inputs),
        out_specs=_VMEM,
    )(*inputs)


# ----------------------------- full forward (glue in plain JAX) ---------------
def ext_summarizer_forward(params, src, segs, clss, mask_src, mask_cls):
    bsz, seqlen = src.shape
    # ---- BERT embeddings (data-dependent table lookups stay in plain JAX) ----
    # TODO(synk): fold the embedding gathers / clss gather into the kernels via
    # scalar-prefetch + Element BlockSpecs if they ever matter at scale.
    emb = (jnp.take(params["word_emb"], src, axis=0)
           + params["pos_emb"][jnp.arange(seqlen)][None, :, :]
           + jnp.take(params["type_emb"], segs, axis=0))
    top2d = bert_forward(
        emb.reshape(bsz * seqlen, HIDDEN),
        mask_src.astype(jnp.float32).reshape(1, bsz * seqlen),
        params["bert"])
    top_vec = top2d.reshape(bsz, seqlen, HIDDEN)

    # ---- sentence vector gather + ExtTransformerEncoder prelude (tiny) ----
    maskf = mask_cls.astype(jnp.float32)
    n = clss.shape[1]
    sents_vec = top_vec[jnp.arange(bsz)[:, None], clss] * maskf[:, :, None]
    x = (sents_vec * maskf[:, :, None]
         + params["pe"][:n][None, :, :]).reshape(bsz * n, HIDDEN)

    # ---- fused ext transformer encoder + scorer ----
    scores_flat = ext_forward(x, maskf.reshape(1, bsz * n), params["ext"])
    sent_scores = scores_flat.reshape(bsz, n)
    return sent_scores, mask_cls


# ----------------------------- deterministic parameter init ------------------
def init_params(key):
    keys = iter(jax.random.split(key, 64))
    nk = lambda: next(keys)
    W = lambda shape: jax.random.normal(nk(), shape, jnp.float32) * 0.05
    Z = lambda shape: jnp.zeros(shape, jnp.float32)
    O = lambda shape: jnp.ones(shape, jnp.float32)
    Lb, Le = BERT_LAYERS, EXT_LAYERS

    bert = dict(
        emb_ln_g=O((1, HIDDEN)), emb_ln_b=Z((1, HIDDEN)),
        wqkv=W((Lb, HIDDEN, 3 * HIDDEN)), bqkv=Z((Lb, 1, 3 * HIDDEN)),
        wo=W((Lb, HIDDEN, HIDDEN)), bo=Z((Lb, 1, HIDDEN)),
        ln1_g=O((Lb, 1, HIDDEN)), ln1_b=Z((Lb, 1, HIDDEN)),
        w1=W((Lb, HIDDEN, FF)), b1=Z((Lb, 1, FF)),
        w2=W((Lb, FF, HIDDEN)), b2=Z((Lb, 1, HIDDEN)),
        ln2_g=O((Lb, 1, HIDDEN)), ln2_b=Z((Lb, 1, HIDDEN)),
    )
    ext = dict(
        ln_g=O((Le, 1, HIDDEN)), ln_b=Z((Le, 1, HIDDEN)),
        wqkv=W((Le, HIDDEN, 3 * HIDDEN)), bqkv=Z((Le, 1, 3 * HIDDEN)),
        wo=W((Le, HIDDEN, HIDDEN)), bo=Z((Le, 1, HIDDEN)),
        ff_ln_g=O((Le, 1, HIDDEN)), ff_ln_b=Z((Le, 1, HIDDEN)),
        w1=W((Le, HIDDEN, EXT_FF)), b1=Z((Le, 1, EXT_FF)),
        w2=W((Le, EXT_FF, HIDDEN)), b2=Z((Le, 1, HIDDEN)),
        fin_g=O((1, HIDDEN)), fin_b=Z((1, HIDDEN)),
        score_w=W((1, HIDDEN)), score_b=Z((1, 1)),   # Linear(H,1) stored row-major (1,H)
    )
    # fixed sinusoidal positional encoding used by ExtTransformerEncoder
    position = jnp.arange(MAX_POS, dtype=jnp.float32)[:, None]
    div_term = jnp.exp(jnp.arange(0, HIDDEN, 2, dtype=jnp.float32)
                       * -(math.log(10000.0) / HIDDEN))
    pe = jnp.zeros((MAX_POS, HIDDEN), jnp.float32)
    pe = pe.at[:, 0::2].set(jnp.sin(position * div_term))
    pe = pe.at[:, 1::2].set(jnp.cos(position * div_term))

    return {
        "word_emb": W((VOCAB, HIDDEN)),
        "pos_emb": W((MAX_POS, HIDDEN)),
        "type_emb": W((TYPE_VOCAB, HIDDEN)),
        "bert": bert,
        "ext": ext,
        "pe": pe,
    }


# ----------------------------- main -------------------------------------------
if __name__ == "__main__":
    root = jax.random.PRNGKey(0)
    kp, ks, kg = jax.random.split(root, 3)
    params = init_params(kp)

    src = jax.random.randint(ks, (B, S), 0, VOCAB, dtype=jnp.int32)
    segs = jnp.concatenate([jnp.zeros((B, S // 2), jnp.int32),
                            jnp.ones((B, S // 2), jnp.int32)], axis=1)
    clss = jnp.array([[0, 4, 8, 12],
                      [0, 5, 10, 15]], dtype=jnp.int32)          # (B, N_SENTS)
    mask_src = jnp.ones((B, S), dtype=jnp.float32).at[1, 14:].set(0.0)
    mask_cls = jnp.array([[True, True, True, False],
                          [True, True, False, False]])           # (B, N_SENTS)

    fwd = jax.jit(functools.partial(ext_summarizer_forward, params))
    sent_scores, out_mask = fwd(src, segs, clss, mask_src, mask_cls)
    jax.block_until_ready(sent_scores)
    jax.block_until_ready(out_mask)

    assert sent_scores.shape == (B, N_SENTS)
    assert bool(jnp.all(jnp.isfinite(sent_scores)))
    print("KERNEL_OK")
</pallas_src>

<mosaic_0001>
module attributes {stable_mosaic.version = 11 : i64} {
  func.func @_bert_kernel(%arg0: memref<32x32xf32, #tpu.memory_space<vmem>>, %arg1: memref<1x32xf32, #tpu.memory_space<vmem>>, %arg2: memref<32x32xf32, #tpu.memory_space<vmem>>, %arg3: memref<1x32xf32, #tpu.memory_space<vmem>>, %arg4: memref<1x32xf32, #tpu.memory_space<vmem>>, %arg5: memref<2x32x96xf32, #tpu.memory_space<vmem>>, %arg6: memref<2x1x96xf32, #tpu.memory_space<vmem>>, %arg7: memref<2x32x32xf32, #tpu.memory_space<vmem>>, %arg8: memref<2x1x32xf32, #tpu.memory_space<vmem>>, %arg9: memref<2x1x32xf32, #tpu.memory_space<vmem>>, %arg10: memref<2x1x32xf32, #tpu.memory_space<vmem>>, %arg11: memref<2x32x64xf32, #tpu.memory_space<vmem>>, %arg12: memref<2x1x64xf32, #tpu.memory_space<vmem>>, %arg13: memref<2x64x32xf32, #tpu.memory_space<vmem>>, %arg14: memref<2x1x32xf32, #tpu.memory_space<vmem>>, %arg15: memref<2x1x32xf32, #tpu.memory_space<vmem>>, %arg16: memref<2x1x32xf32, #tpu.memory_space<vmem>>, %arg17: memref<32x32xf32, #tpu.memory_space<vmem>>) attributes {dimension_semantics = [], scalar_prefetch = 0 : i64, scratch_operands = 0 : i64, tpu.core_type = #tpu.core_type<tc>} {
    %c0 = arith.constant 0 : index
    %c0_0 = arith.constant 0 : index
    %0 = vector.load %arg0[%c0, %c0_0] : memref<32x32xf32, #tpu.memory_space<vmem>>, vector<32x32xf32>
    %c0_1 = arith.constant 0 : index
    %c0_2 = arith.constant 0 : index
    %1 = vector.load %arg3[%c0_1, %c0_2] : memref<1x32xf32, #tpu.memory_space<vmem>>, vector<1x32xf32>
    %c0_3 = arith.constant 0 : index
    %c0_4 = arith.constant 0 : index
    %2 = vector.load %arg4[%c0_3, %c0_4] : memref<1x32xf32, #tpu.memory_space<vmem>>, vector<1x32xf32>
    %cst = arith.constant dense<0.000000e+00> : vector<32xf32>
    %3 = vector.multi_reduction <add>, %0, %cst [1] : vector<32x32xf32> to vector<32xf32>
    %4 = vector.shape_cast %3 : vector<32xf32> to vector<32x1xf32>
    %cst_5 = arith.constant 3.200000e+01 : f32
    %5 = vector.broadcast %cst_5 : f32 to vector<32x1xf32>
    %6 = arith.divf %4, %5 : vector<32x1xf32>
    %7 = vector.broadcast %6 : vector<32x1xf32> to vector<32x32xf32>
    %8 = arith.subf %0, %7 : vector<32x32xf32>
    %9 = arith.mulf %8, %8 : vector<32x32xf32>
    %cst_6 = arith.constant dense<0.000000e+00> : vector<32xf32>
    %10 = vector.multi_reduction <add>, %9, %cst_6 [1] : vector<32x32xf32> to vector<32xf32>
    %11 = vector.shape_cast %10 : vector<32xf32> to vector<32x1xf32>
    %cst_7 = arith.constant 3.200000e+01 : f32
    %12 = vector.broadcast %cst_7 : f32 to vector<32x1xf32>
    %13 = arith.divf %11, %12 : vector<32x1xf32>
    %14 = vector.broadcast %6 : vector<32x1xf32> to vector<32x32xf32>
    %15 = arith.subf %0, %14 : vector<32x32xf32>
    %cst_8 = arith.constant 9.99999996E-13 : f32
    %16 = vector.broadcast %cst_8 : f32 to vector<32x1xf32>
    %17 = arith.addf %13, %16 : vector<32x1xf32>
    %18 = math.rsqrt %17 : vector<32x1xf32>
    %19 = vector.broadcast %18 : vector<32x1xf32> to vector<32x32xf32>
    %20 = arith.mulf %15, %19 : vector<32x32xf32>
    %21 = vector.broadcast %1 : vector<1x32xf32> to vector<32x32xf32>
    %22 = arith.mulf %20, %21 : vector<32x32xf32>
    %23 = vector.broadcast %2 : vector<1x32xf32> to vector<32x32xf32>
    %24 = arith.addf %22, %23 : vector<32x32xf32>
    %c0_9 = arith.constant 0 : index
    %c0_10 = arith.constant 0 : index
    %25 = vector.load %arg2[%c0_9, %c0_10] : memref<32x32xf32, #tpu.memory_space<vmem>>, vector<32x32xf32>
    %c0_11 = arith.constant 0 : index
    %c0_12 = arith.constant 0 : index
    %26 = vector.load %arg1[%c0_11, %c0_12] : memref<1x32xf32, #tpu.memory_space<vmem>>, vector<1x32xf32>
    %cst_13 = arith.constant 1.000000e+00 : f32
    %27 = vector.broadcast %cst_13 : f32 to vector<1x32xf32>
    %28 = arith.subf %27, %26 : vector<1x32xf32>
    %cst_14 = arith.constant -1.000000e+04 : f32
    %29 = vector.broadcast %cst_14 : f32 to vector<1x32xf32>
    %30 = arith.mulf %28, %29 : vector<1x32xf32>
    %31 = vector.broadcast %30 : vector<1x32xf32> to vector<32x32xf32>
    %32 = arith.addf %25, %31 : vector<32x32xf32>
    %c0_15 = arith.constant 0 : index
    %c0_16 = arith.constant 0 : index
    %c0_17 = arith.constant 0 : index
    %33 = vector.load %arg5[%c0_15, %c0_16, %c0_17] : memref<2x32x96xf32, #tpu.memory_space<vmem>>, vector<1x32x96xf32>
    %34 = vector.shape_cast %33 : vector<1x32x96xf32> to vector<32x96xf32>
    %c0_18 = arith.constant 0 : index
    %c0_19 = arith.constant 0 : index
    %c0_20 = arith.constant 0 : index
    %35 = vector.load %arg6[%c0_18, %c0_19, %c0_20] : memref<2x1x96xf32, #tpu.memory_space<vmem>>, vector<1x1x96xf32>
    %36 = vector.shape_cast %35 : vector<1x1x96xf32> to vector<1x96xf32>
    %cst_21 = arith.constant dense<0.000000e+00> : vector<32x96xf32>
    %37 = tpu.matmul %24, %34, %cst_21 {dimension_numbers = #tpu.dot_dimension_numbers<[1], [0], [0], [1], [0, 0, 1, 1], [], []>} : vector<32x32xf32>, vector<32x96xf32>, vector<32x96xf32> -> vector<32x96xf32>
    %38 = vector.broadcast %36 : vector<1x96xf32> to vector<32x96xf32>
    %39 = arith.addf %37, %38 : vector<32x96xf32>
    %40 = vector.extract_strided_slice %39 {offsets = [0, 0], sizes = [32, 8], strides = [1, 1]} : vector<32x96xf32> to vector<32x8xf32>
    %cst_22 = arith.constant 0.353553385 : f32
    %41 = vector.broadcast %cst_22 : f32 to vector<32x8xf32>
    %42 = arith.mulf %40, %41 : vector<32x8xf32>
    %43 = vector.extract_strided_slice %39 {offsets = [0, 32], sizes = [32, 8], strides = [1, 1]} : vector<32x96xf32> to vector<32x8xf32>
    %44 = vector.extract_strided_slice %39 {offsets = [0, 64], sizes = [32, 8], strides = [1, 1]} : vector<32x96xf32> to vector<32x8xf32>
    %cst_23 = arith.constant dense<0.000000e+00> : vector<32x32xf32>
    %45 = tpu.matmul %42, %43, %cst_23 {dimension_numbers = #tpu.dot_dimension_numbers<[1], [1], [0], [0], [0, 0, 1, 0], [], []>} : vector<32x8xf32>, vector<32x8xf32>, vector<32x32xf32> -> vector<32x32xf32>
    %46 = arith.addf %45, %32 : vector<32x32xf32>
    %cst_24 = arith.constant dense<0xFF800000> : vector<32xf32>
    %47 = vector.multi_reduction <maximumf>, %46, %cst_24 [1] : vector<32x32xf32> to vector<32xf32>
    %48 = vector.shape_cast %47 : vector<32xf32> to vector<32x1xf32>
    %49 = vector.broadcast %48 : vector<32x1xf32> to vector<32x32xf32>
    %50 = arith.subf %46, %49 : vector<32x32xf32>
    %51 = math.exp %50 : vector<32x32xf32>
    %cst_25 = arith.constant dense<0.000000e+00> : vector<32xf32>
    %52 = vector.multi_reduction <add>, %51, %cst_25 [1] : vector<32x32xf32> to vector<32xf32>
    %53 = vector.shape_cast %52 : vector<32xf32> to vector<32x1xf32>
    %54 = vector.broadcast %53 : vector<32x1xf32> to vector<32x32xf32>
    %55 = arith.divf %51, %54 : vector<32x32xf32>
    %cst_26 = arith.constant dense<0.000000e+00> : vector<32x8xf32>
    %56 = tpu.matmul %55, %44, %cst_26 {dimension_numbers = #tpu.dot_dimension_numbers<[1], [0], [0], [1], [0, 0, 1, 1], [], []>} : vector<32x32xf32>, vector<32x8xf32>, vector<32x8xf32> -> vector<32x8xf32>
    %57 = vector.extract_strided_slice %39 {offsets = [0, 8], sizes = [32, 8], strides = [1, 1]} : vector<32x96xf32> to vector<32x8xf32>
    %cst_27 = arith.constant 0.353553385 : f32
    %58 = vector.broadcast %cst_27 : f32 to vector<32x8xf32>
    %59 = arith.mulf %57, %58 : vector<32x8xf32>
    %60 = vector.extract_strided_slice %39 {offsets = [0, 40], sizes = [32, 8], strides = [1, 1]} : vector<32x96xf32> to vector<32x8xf32>
    %61 = vector.extract_strided_slice %39 {offsets = [0, 72], sizes = [32, 8], strides = [1, 1]} : vector<32x96xf32> to vector<32x8xf32>
    %cst_28 = arith.constant dense<0.000000e+00> : vector<32x32xf32>
    %62 = tpu.matmul %59, %60, %cst_28 {dimension_numbers = #tpu.dot_dimension_numbers<[1], [1], [0], [0], [0, 0, 1, 0], [], []>} : vector<32x8xf32>, vector<32x8xf32>, vector<32x32xf32> -> vector<32x32xf32>
    %63 = arith.addf %62, %32 : vector<32x32xf32>
    %cst_29 = arith.constant dense<0xFF800000> : vector<32xf32>
    %64 = vector.multi_reduction <maximumf>, %63, %cst_29 [1] : vector<32x32xf32> to vector<32xf32>
    %65 = vector.shape_cast %64 : vector<32xf32> to vector<32x1xf32>
    %66 = vector.broadcast %65 : vector<32x1xf32> to vector<32x32xf32>
    %67 = arith.subf %63, %66 : vector<32x32xf32>
    %68 = math.exp %67 : vector<32x32xf32>
    %cst_30 = arith.constant dense<0.000000e+00> : vector<32xf32>
    %69 = vector.multi_reduction <add>, %68, %cst_30 [1] : vector<32x32xf32> to vector<32xf32>
    %70 = vector.shape_cast %69 : vector<32xf32> to vector<32x1xf32>
    %71 = vector.broadcast %70 : vector<32x1xf32> to vector<32x32xf32>
    %72 = arith.divf %68, %71 : vector<32x32xf32>
    %cst_31 = arith.constant dense<0.000000e+00> : vector<32x8xf32>
    %73 = tpu.matmul %72, %61, %cst_31 {dimension_numbers = #tpu.dot_dimension_numbers<[1], [0], [0], [1], [0, 0, 1, 1], [], []>} : vector<32x32xf32>, vector<32x8xf32>, vector<32x8xf32> -> vector<32x8xf32>
    %74 = vector.extract_strided_slice %39 {offsets = [0, 16], sizes = [32, 8], strides = [1, 1]} : vector<32x96xf32> to vector<32x8xf32>
    %cst_32 = arith.constant 0.353553385 : f32
    %75 = vector.broadcast %cst_32 : f32 to vector<32x8xf32>
    %76 = arith.mulf %74, %75 : vector<32x8xf32>
    %77 = vector.extract_strided_slice %39 {offsets = [0, 48], sizes = [32, 8], strides = [1, 1]} : vector<32x96xf32> to vector<32x8xf32>
    %78 = vector.extract_strided_slice %39 {offsets = [0, 80], sizes = [32, 8], strides = [1, 1]} : vector<32x96xf32> to vector<32x8xf32>
    %cst_33 = arith.constant dense<0.000000e+00> : vector<32x32xf32>
    %79 = tpu.matmul %76, %77, %cst_33 {dimension_numbers = #tpu.dot_dimension_numbers<[1], [1], [0], [0], [0, 0, 1, 0], [], []>} : vector<32x8xf32>, vector<32x8xf32>, vector<32x32xf32> -> vector<32x32xf32>
    %80 = arith.addf %79, %32 : vector<32x32xf32>
    %cst_34 = arith.constant dense<0xFF800000> : vector<32xf32>
    %81 = vector.multi_reduction <maximumf>, %80, %cst_34 [1] : vector<32x32xf32> to vector<32xf32>
    %82 = vector.shape_cast %81 : vector<32xf32> to vector<32x1xf32>
    %83 = vector.broadcast %82 : vector<32x1xf32> to vector<32x32xf32>
    %84 = arith.subf %80, %83 : vector<32x32xf32>
    %85 = math.exp %84 : vector<32x32xf32>
    %cst_35 = arith.constant dense<0.000000e+00> : vector<32xf32>
    %86 = vector.multi_reduction <add>, %85, %cst_35 [1] : vector<32x32xf32> to vector<32xf32>
    %87 = vector.shape_cast %86 : vector<32xf32> to vector<32x1xf32>
    %88 = vector.broadcast %87 : vector<32x1xf32> to vector<32x32xf32>
    %89 = arith.divf %85, %88 : vector<32x32xf32>
    %cst_36 = arith.constant dense<0.000000e+00> : vector<32x8xf32>
    %90 = tpu.matmul %89, %78, %cst_36 {dimension_numbers = #tpu.dot_dimension_numbers<[1], [0], [0], [1], [0, 0, 1, 1], [], []>} : vector<32x32xf32>, vector<32x8xf32>, vector<32x8xf32> -> vector<32x8xf32>
    %91 = vector.extract_strided_slice %39 {offsets = [0, 24], sizes = [32, 8], strides = [1, 1]} : vector<32x96xf32> to vector<32x8xf32>
    %cst_37 = arith.constant 0.353553385 : f32
    %92 = vector.broadcast %cst_37 : f32 to vector<32x8xf32>
    %93 = arith.mulf %91, %92 : vector<32x8xf32>
    %94 = vector.extract_strided_slice %39 {offsets = [0, 56], sizes = [32, 8], strides = [1, 1]} : vector<32x96xf32> to vector<32x8xf32>
    %95 = vector.extract_strided_slice %39 {offsets = [0, 88], sizes = [32, 8], strides = [1, 1]} : vector<32x96xf32> to vector<32x8xf32>
    %cst_38 = arith.constant dense<0.000000e+00> : vector<32x32xf32>
    %96 = tpu.matmul %93, %94, %cst_38 {dimension_numbers = #tpu.dot_dimension_numbers<[1], [1], [0], [0], [0, 0, 1, 0], [], []>} : vector<32x8xf32>, vector<32x8xf32>, vector<32x32xf32> -> vector<32x32xf32>
    %97 = arith.addf %96, %32 : vector<32x32xf32>
    %cst_39 = arith.constant dense<0xFF800000> : vector<32xf32>
    %98 = vector.multi_reduction <maximumf>, %97, %cst_39 [1] : vector<32x32xf32> to vector<32xf32>
    %99 = vector.shape_cast %98 : vector<32xf32> to vector<32x1xf32>
    %100 = vector.broadcast %99 : vector<32x1xf32> to vector<32x32xf32>
    %101 = arith.subf %97, %100 : vector<32x32xf32>
    %102 = math.exp %101 : vector<32x32xf32>
    %cst_40 = arith.constant dense<0.000000e+00> : vector<32xf32>
    %103 = vector.multi_reduction <add>, %102, %cst_40 [1] : vector<32x32xf32> to vector<32xf32>
    %104 = vector.shape_cast %103 : vector<32xf32> to vector<32x1xf32>
    %105 = vector.broadcast %104 : vector<32x1xf32> to vector<32x32xf32>
    %106 = arith.divf %102, %105 : vector<32x32xf32>
    %cst_41 = arith.constant dense<0.000000e+00> : vector<32x8xf32>
    %107 = tpu.matmul %106, %95, %cst_41 {dimension_numbers = #tpu.dot_dimension_numbers<[1], [0], [0], [1], [0, 0, 1, 1], [], []>} : vector<32x32xf32>, vector<32x8xf32>, vector<32x8xf32> -> vector<32x8xf32>
    %108 = tpu.concatenate %56, %73, %90, %107 in 1 : vector<32x8xf32>, vector<32x8xf32>, vector<32x8xf32>, vector<32x8xf32> -> vector<32x32xf32>
    %c0_42 = arith.constant 0 : index
    %c0_43 = arith.constant 0 : index
    %c0_44 = arith.constant 0 : index
    %109 = vector.load %arg7[%c0_42, %c0_43, %c0_44] : memref<2x32x32xf32, #tpu.memory_space<vmem>>, vector<1x32x32xf32>
    %110 = vector.shape_cast %109 : vector<1x32x32xf32> to vector<32x32xf32>
    %cst_45 = arith.constant dense<0.000000e+00> : vector<32x32xf32>
    %111 = tpu.matmul %108, %110, %cst_45 {dimension_numbers = #tpu.dot_dimension_numbers<[1], [0], [0], [1], [0, 0, 1, 1], [], []>} : vector<32x32xf32>, vector<32x32xf32>, vector<32x32xf32> -> vector<32x32xf32>
    %c0_46 = arith.constant 0 : index
    %c0_47 = arith.constant 0 : index
    %c0_48 = arith.constant 0 : index
    %112 = vector.load %arg8[%c0_46, %c0_47, %c0_48] : memref<2x1x32xf32, #tpu.memory_space<vmem>>, vector<1x1x32xf32>
    %113 = vector.shape_cast %112 : vector<1x1x32xf32> to vector<1x32xf32>
    %114 = vector.broadcast %113 : vector<1x32xf32> to vector<32x32xf32>
    %115 = arith.addf %111, %114 : vector<32x32xf32>
    %116 = arith.addf %115, %24 : vector<32x32xf32>
    %c0_49 = arith.constant 0 : index
    %c0_50 = arith.constant 0 : index
    %c0_51 = arith.constant 0 : index
    %117 = vector.load %arg9[%c0_49, %c0_50, %c0_51] : memref<2x1x32xf32, #tpu.memory_space<vmem>>, vector<1x1x32xf32>
    %118 = vector.shape_cast %117 : vector<1x1x32xf32> to vector<1x32xf32>
    %c0_52 = arith.constant 0 : index
    %c0_53 = arith.constant 0 : index
    %c0_54 = arith.constant 0 : index
    %119 = vector.load %arg10[%c0_52, %c0_53, %c0_54] : memref<2x1x32xf32, #tpu.memory_space<vmem>>, vector<1x1x32xf32>
    %120 = vector.shape_cast %119 : vector<1x1x32xf32> to vector<1x32xf32>
    %cst_55 = arith.constant dense<0.000000e+00> : vector<32xf32>
    %121 = vector.multi_reduction <add>, %116, %cst_55 [1] : vector<32x32xf32> to vector<32xf32>
    %122 = vector.shape_cast %121 : vector<32xf32> to vector<32x1xf32>
    %cst_56 = arith.constant 3.200000e+01 : f32
    %123 = vector.broadcast %cst_56 : f32 to vector<32x1xf32>
    %124 = arith.divf %122, %123 : vector<32x1xf32>
    %125 = vector.broadcast %124 : vector<32x1xf32> to vector<32x32xf32>
    %126 = arith.subf %116, %125 : vector<32x32xf32>
    %127 = arith.mulf %126, %126 : vector<32x32xf32>
    %cst_57 = arith.constant dense<0.000000e+00> : vector<32xf32>
    %128 = vector.multi_reduction <add>, %127, %cst_57 [1] : vector<32x32xf32> to vector<32xf32>
    %129 = vector.shape_cast %128 : vector<32xf32> to vector<32x1xf32>
    %cst_58 = arith.constant 3.200000e+01 : f32
    %130 = vector.broadcast %cst_58 : f32 to vector<32x1xf32>
    %131 = arith.divf %129, %130 : vector<32x1xf32>
    %132 = vector.broadcast %124 : vector<32x1xf32> to vector<32x32xf32>
    %133 = arith.subf %116, %132 : vector<32x32xf32>
    %cst_59 = arith.constant 9.99999996E-13 : f32
    %134 = vector.broadcast %cst_59 : f32 to vector<32x1xf32>
    %135 = arith.addf %131, %134 : vector<32x1xf32>
    %136 = math.rsqrt %135 : vector<32x1xf32>
    %137 = vector.broadcast %136 : vector<32x1xf32> to vector<32x32xf32>
    %138 = arith.mulf %133, %137 : vector<32x32xf32>
    %139 = vector.broadcast %118 : vector<1x32xf32> to vector<32x32xf32>
    %140 = arith.mulf %138, %139 : vector<32x32xf32>
    %141 = vector.broadcast %120 : vector<1x32xf32> to vector<32x32xf32>
    %142 = arith.addf %140, %141 : vector<32x32xf32>
    %c0_60 = arith.constant 0 : index
    %c0_61 = arith.constant 0 : index
    %c0_62 = arith.constant 0 : index
    %143 = vector.load %arg11[%c0_60, %c0_61, %c0_62] : memref<2x32x64xf32, #tpu.memory_space<vmem>>, vector<1x32x64xf32>
    %144 = vector.shape_cast %143 : vector<1x32x64xf32> to vector<32x64xf32>
    %cst_63 = arith.constant dense<0.000000e+00> : vector<32x64xf32>
    %145 = tpu.matmul %142, %144, %cst_63 {dimension_numbers = #tpu.dot_dimension_numbers<[1], [0], [0], [1], [0, 0, 1, 1], [], []>} : vector<32x32xf32>, vector<32x64xf32>, vector<32x64xf32> -> vector<32x64xf32>
    %c0_64 = arith.constant 0 : index
    %c0_65 = arith.constant 0 : index
    %c0_66 = arith.constant 0 : index
    %146 = vector.load %arg12[%c0_64, %c0_65, %c0_66] : memref<2x1x64xf32, #tpu.memory_space<vmem>>, vector<1x1x64xf32>
    %147 = vector.shape_cast %146 : vector<1x1x64xf32> to vector<1x64xf32>
    %148 = vector.broadcast %147 : vector<1x64xf32> to vector<32x64xf32>
    %149 = arith.addf %145, %148 : vector<32x64xf32>
    %cst_67 = arith.constant 5.000000e-01 : f32
    %150 = vector.broadcast %cst_67 : f32 to vector<32x64xf32>
    %151 = arith.mulf %150, %149 : vector<32x64xf32>
    %cst_68 = arith.constant 0.707106769 : f32
    %152 = vector.broadcast %cst_68 : f32 to vector<32x64xf32>
    %153 = arith.mulf %149, %152 : vector<32x64xf32>
    %154 = math.absf %153 : vector<32x64xf32>
    %cst_69 = arith.constant 0.327591091 : f32
    %155 = vector.broadcast %cst_69 : f32 to vector<32x64xf32>
    %156 = arith.mulf %155, %154 : vector<32x64xf32>
    %cst_70 = arith.constant 1.000000e+00 : f32
    %157 = vector.broadcast %cst_70 : f32 to vector<32x64xf32>
    %158 = arith.addf %157, %156 : vector<32x64xf32>
    %cst_71 = arith.constant 1.000000e+00 : f32
    %159 = vector.broadcast %cst_71 : f32 to vector<32x64xf32>
    %160 = arith.divf %159, %158 : vector<32x64xf32>
    %cst_72 = arith.constant 1.06140542 : f32
    %161 = vector.broadcast %cst_72 : f32 to vector<32x64xf32>
    %162 = arith.mulf %161, %160 : vector<32x64xf32>
    %cst_73 = arith.constant -1.45315206 : f32
    %163 = vector.broadcast %cst_73 : f32 to vector<32x64xf32>
    %164 = arith.addf %162, %163 : vector<32x64xf32>
    %165 = arith.mulf %164, %160 : vector<32x64xf32>
    %cst_74 = arith.constant 1.42141378 : f32
    %166 = vector.broadcast %cst_74 : f32 to vector<32x64xf32>
    %167 = arith.addf %165, %166 : vector<32x64xf32>
    %168 = arith.mulf %167, %160 : vector<32x64xf32>
    %cst_75 = arith.constant -0.284496725 : f32
    %169 = vector.broadcast %cst_75 : f32 to vector<32x64xf32>
    %170 = arith.addf %168, %169 : vector<32x64xf32>
    %171 = arith.mulf %170, %160 : vector<32x64xf32>
    %cst_76 = arith.constant 0.254829586 : f32
    %172 = vector.broadcast %cst_76 : f32 to vector<32x64xf32>
    %173 = arith.addf %171, %172 : vector<32x64xf32>
    %174 = arith.mulf %173, %160 : vector<32x64xf32>
    %cst_77 = arith.constant 0.000000e+00 : f32
    %175 = vector.broadcast %cst_77 : f32 to vector<32x64xf32>
    %176 = arith.subf %175, %154 : vector<32x64xf32>
    %177 = arith.mulf %176, %154 : vector<32x64xf32>
    %178 = math.exp %177 : vector<32x64xf32>
    %179 = arith.mulf %174, %178 : vector<32x64xf32>
    %cst_78 = arith.constant 1.000000e+00 : f32
    %180 = vector.broadcast %cst_78 : f32 to vector<32x64xf32>
    %181 = arith.subf %180, %179 : vector<32x64xf32>
    %cst_79 = arith.constant 0.000000e+00 : f32
    %182 = vector.broadcast %cst_79 : f32 to vector<32x64xf32>
    %183 = arith.cmpf olt, %153, %182 : vector<32x64xf32>
    %cst_80 = arith.constant 0.000000e+00 : f32
    %184 = vector.broadcast %cst_80 : f32 to vector<32x64xf32>
    %185 = arith.subf %184, %181 : vector<32x64xf32>
    %186 = arith.select %183, %185, %181 : vector<32x64xi1>, vector<32x64xf32>
    %cst_81 = arith.constant 1.000000e+00 : f32
    %187 = vector.broadcast %cst_81 : f32 to vector<32x64xf32>
    %188 = arith.addf %187, %186 : vector<32x64xf32>
    %189 = arith.mulf %151, %188 : vector<32x64xf32>
    %c0_82 = arith.constant 0 : index
    %c0_83 = arith.constant 0 : index
    %c0_84 = arith.constant 0 : index
    %190 = vector.load %arg13[%c0_82, %c0_83, %c0_84] : memref<2x64x32xf32, #tpu.memory_space<vmem>>, vector<1x64x32xf32>
    %191 = vector.shape_cast %190 : vector<1x64x32xf32> to vector<64x32xf32>
    %cst_85 = arith.constant dense<0.000000e+00> : vector<32x32xf32>
    %192 = tpu.matmul %189, %191, %cst_85 {dimension_numbers = #tpu.dot_dimension_numbers<[1], [0], [0], [1], [0, 0, 1, 1], [], []>} : vector<32x64xf32>, vector<64x32xf32>, vector<32x32xf32> -> vector<32x32xf32>
    %c0_86 = arith.constant 0 : index
    %c0_87 = arith.constant 0 : index
    %c0_88 = arith.constant 0 : index
    %193 = vector.load %arg14[%c0_86, %c0_87, %c0_88] : memref<2x1x32xf32, #tpu.memory_space<vmem>>, vector<1x1x32xf32>
    %194 = vector.shape_cast %193 : vector<1x1x32xf32> to vector<1x32xf32>
    %195 = vector.broadcast %194 : vector<1x32xf32> to vector<32x32xf32>
    %196 = arith.addf %192, %195 : vector<32x32xf32>
    %197 = arith.addf %196, %142 : vector<32x32xf32>
    %c0_89 = arith.constant 0 : index
    %c0_90 = arith.constant 0 : index
    %c0_91 = arith.constant 0 : index
    %198 = vector.load %arg15[%c0_89, %c0_90, %c0_91] : memref<2x1x32xf32, #tpu.memory_space<vmem>>, vector<1x1x32xf32>
    %199 = vector.shape_cast %198 : vector<1x1x32xf32> to vector<1x32xf32>
    %c0_92 = arith.constant 0 : index
    %c0_93 = arith.constant 0 : index
    %c0_94 = arith.constant 0 : index
    %200 = vector.load %arg16[%c0_92, %c0_93, %c0_94] : memref<2x1x32xf32, #tpu.memory_space<vmem>>, vector<1x1x32xf32>
    %201 = vector.shape_cast %200 : vector<1x1x32xf32> to vector<1x32xf32>
    %cst_95 = arith.constant dense<0.000000e+00> : vector<32xf32>
    %202 = vector.multi_reduction <add>, %197, %cst_95 [1] : vector<32x32xf32> to vector<32xf32>
    %203 = vector.shape_cast %202 : vector<32xf32> to vector<32x1xf32>
    %cst_96 = arith.constant 3.200000e+01 : f32
    %204 = vector.broadcast %cst_96 : f32 to vector<32x1xf32>
    %205 = arith.divf %203, %204 : vector<32x1xf32>
    %206 = vector.broadcast %205 : vector<32x1xf32> to vector<32x32xf32>
    %207 = arith.subf %197, %206 : vector<32x32xf32>
    %208 = arith.mulf %207, %207 : vector<32x32xf32>
    %cst_97 = arith.constant dense<0.000000e+00> : vector<32xf32>
    %209 = vector.multi_reduction <add>, %208, %cst_97 [1] : vector<32x32xf32> to vector<32xf32>
    %210 = vector.shape_cast %209 : vector<32xf32> to vector<32x1xf32>
    %cst_98 = arith.constant 3.200000e+01 : f32
    %211 = vector.broadcast %cst_98 : f32 to vector<32x1xf32>
    %212 = arith.divf %210, %211 : vector<32x1xf32>
    %213 = vector.broadcast %205 : vector<32x1xf32> to vector<32x32xf32>
    %214 = arith.subf %197, %213 : vector<32x32xf32>
    %cst_99 = arith.constant 9.99999996E-13 : f32
    %215 = vector.broadcast %cst_99 : f32 to vector<32x1xf32>
    %216 = arith.addf %212, %215 : vector<32x1xf32>
    %217 = math.rsqrt %216 : vector<32x1xf32>
    %218 = vector.broadcast %217 : vector<32x1xf32> to vector<32x32xf32>
    %219 = arith.mulf %214, %218 : vector<32x32xf32>
    %220 = vector.broadcast %199 : vector<1x32xf32> to vector<32x32xf32>
    %221 = arith.mulf %219, %220 : vector<32x32xf32>
    %222 = vector.broadcast %201 : vector<1x32xf32> to vector<32x32xf32>
    %223 = arith.addf %221, %222 : vector<32x32xf32>
    %c1 = arith.constant 1 : index
    %c0_100 = arith.constant 0 : index
    %c0_101 = arith.constant 0 : index
    %224 = vector.load %arg5[%c1, %c0_100, %c0_101] : memref<2x32x96xf32, #tpu.memory_space<vmem>>, vector<1x32x96xf32>
    %225 = vector.shape_cast %224 : vector<1x32x96xf32> to vector<32x96xf32>
    %c1_102 = arith.constant 1 : index
    %c0_103 = arith.constant 0 : index
    %c0_104 = arith.constant 0 : index
    %226 = vector.load %arg6[%c1_102, %c0_103, %c0_104] : memref<2x1x96xf32, #tpu.memory_space<vmem>>, vector<1x1x96xf32>
    %227 = vector.shape_cast %226 : vector<1x1x96xf32> to vector<1x96xf32>
    %cst_105 = arith.constant dense<0.000000e+00> : vector<32x96xf32>
    %228 = tpu.matmul %223, %225, %cst_105 {dimension_numbers = #tpu.dot_dimension_numbers<[1], [0], [0], [1], [0, 0, 1, 1], [], []>} : vector<32x32xf32>, vector<32x96xf32>, vector<32x96xf32> -> vector<32x96xf32>
    %229 = vector.broadcast %227 : vector<1x96xf32> to vector<32x96xf32>
    %230 = arith.addf %228, %229 : vector<32x96xf32>
    %231 = vector.extract_strided_slice %230 {offsets = [0, 0], sizes = [32, 8], strides = [1, 1]} : vector<32x96xf32> to vector<32x8xf32>
    %cst_106 = arith.constant 0.353553385 : f32
    %232 = vector.broadcast %cst_106 : f32 to vector<32x8xf32>
    %233 = arith.mulf %231, %232 : vector<32x8xf32>
    %234 = vector.extract_strided_slice %230 {offsets = [0, 32], sizes = [32, 8], strides = [1, 1]} : vector<32x96xf32> to vector<32x8xf32>
    %235 = vector.extract_strided_slice %230 {offsets = [0, 64], sizes = [32, 8], strides = [1, 1]} : vector<32x96xf32> to vector<32x8xf32>
    %cst_107 = arith.constant dense<0.000000e+00> : vector<32x32xf32>
    %236 = tpu.matmul %233, %234, %cst_107 {dimension_numbers = #tpu.dot_dimension_numbers<[1], [1], [0], [0], [0, 0, 1, 0], [], []>} : vector<32x8xf32>, vector<32x8xf32>, vector<32x32xf32> -> vector<32x32xf32>
    %237 = arith.addf %236, %32 : vector<32x32xf32>
    %cst_108 = arith.constant dense<0xFF800000> : vector<32xf32>
    %238 = vector.multi_reduction <maximumf>, %237, %cst_108 [1] : vector<32x32xf32> to vector<32xf32>
    %239 = vector.shape_cast %238 : vector<32xf32> to vector<32x1xf32>
    %240 = vector.broadcast %239 : vector<32x1xf32> to vector<32x32xf32>
    %241 = arith.subf %237, %240 : vector<32x32xf32>
    %242 = math.exp %241 : vector<32x32xf32>
    %cst_109 = arith.constant dense<0.000000e+00> : vector<32xf32>
    %243 = vector.multi_reduction <add>, %242, %cst_109 [1] : vector<32x32xf32> to vector<32xf32>
    %244 = vector.shape_cast %243 : vector<32xf32> to vector<32x1xf32>
    %245 = vector.broadcast %244 : vector<32x1xf32> to vector<32x32xf32>
    %246 = arith.divf %242, %245 : vector<32x32xf32>
    %cst_110 = arith.constant dense<0.000000e+00> : vector<32x8xf32>
    %247 = tpu.matmul %246, %235, %cst_110 {dimension_numbers = #tpu.dot_dimension_numbers<[1], [0], [0], [1], [0, 0, 1, 1], [], []>} : vector<32x32xf32>, vector<32x8xf32>, vector<32x8xf32> -> vector<32x8xf32>
    %248 = vector.extract_strided_slice %230 {offsets = [0, 8], sizes = [32, 8], strides = [1, 1]} : vector<32x96xf32> to vector<32x8xf32>
    %cst_111 = arith.constant 0.353553385 : f32
    %249 = vector.broadcast %cst_111 : f32 to vector<32x8xf32>
    %250 = arith.mulf %248, %249 : vector<32x8xf32>
    %251 = vector.extract_strided_slice %230 {offsets = [0, 40], sizes = [32, 8], strides = [1, 1]} : vector<32x96xf32> to vector<32x8xf32>
    %252 = vector.extract_strided_slice %230 {offsets = [0, 72], sizes = [32, 8], strides = [1, 1]} : vector<32x96xf32> to vector<32x8xf32>
    %cst_112 = arith.constant dense<0.000000e+00> : vector<32x32xf32>
    %253 = tpu.matmul %250, %251, %cst_112 {dimension_numbers = #tpu.dot_dimension_numbers<[1], [1], [0], [0], [0, 0, 1, 0], [], []>} : vector<32x8xf32>, vector<32x8xf32>, vector<32x32xf32> -> vector<32x32xf32>
    %254 = arith.addf %253, %32 : vector<32x32xf32>
    %cst_113 = arith.constant dense<0xFF800000> : vector<32xf32>
    %255 = vector.multi_reduction <maximumf>, %254, %cst_113 [1] : vector<32x32xf32> to vector<32xf32>
    %256 = vector.shape_cast %255 : vector<32xf32> to vector<32x1xf32>
    %257 = vector.broadcast %256 : vector<32x1xf32> to vector<32x32xf32>
    %258 = arith.subf %254, %257 : vector<32x32xf32>
    %259 = math.exp %258 : vector<32x32xf32>
    %cst_114 = arith.constant dense<0.000000e+00> : vector<32xf32>
    %260 = vector.multi_reduction <add>, %259, %cst_114 [1] : vector<32x32xf32> to vector<32xf32>
    %261 = vector.shape_cast %260 : vector<32xf32> to vector<32x1xf32>
    %262 = vector.broadcast %261 : vector<32x1xf32> to vector<32x32xf32>
    %263 = arith.divf %259, %262 : vector<32x32xf32>
    %cst_115 = arith.constant dense<0.000000e+00> : vector<32x8xf32>
    %264 = tpu.matmul %263, %252, %cst_115 {dimension_numbers = #tpu.dot_dimension_numbers<[1], [0], [0], [1], [0, 0, 1, 1], [], []>} : vector<32x32xf32>, vector<32x8xf32>, vector<32x8xf32> -> vector<32x8xf32>
    %265 = vector.extract_strided_slice %230 {offsets = [0, 16], sizes = [32, 8], strides = [1, 1]} : vector<32x96xf32> to vector<32x8xf32>
    %cst_116 = arith.constant 0.353553385 : f32
    %266 = vector.broadcast %cst_116 : f32 to vector<32x8xf32>
    %267 = arith.mulf %265, %266 : vector<32x8xf32>
    %268 = vector.extract_strided_slice %230 {offsets = [0, 48], sizes = [32, 8], strides = [1, 1]} : vector<32x96xf32> to vector<32x8xf32>
    %269 = vector.extract_strided_slice %230 {offsets = [0, 80], sizes = [32, 8], strides = [1, 1]} : vector<32x96xf32> to vector<32x8xf32>
    %cst_117 = arith.constant dense<0.000000e+00> : vector<32x32xf32>
    %270 = tpu.matmul %267, %268, %cst_117 {dimension_numbers = #tpu.dot_dimension_numbers<[1], [1], [0], [0], [0, 0, 1, 0], [], []>} : vector<32x8xf32>, vector<32x8xf32>, vector<32x32xf32> -> vector<32x32xf32>
    %271 = arith.addf %270, %32 : vector<32x32xf32>
    %cst_118 = arith.constant dense<0xFF800000> : vector<32xf32>
    %272 = vector.multi_reduction <maximumf>, %271, %cst_118 [1] : vector<32x32xf32> to vector<32xf32>
    %273 = vector.shape_cast %272 : vector<32xf32> to vector<32x1xf32>
    %274 = vector.broadcast %273 : vector<32x1xf32> to vector<32x32xf32>
    %275 = arith.subf %271, %274 : vector<32x32xf32>
    %276 = math.exp %275 : vector<32x32xf32>
    %cst_119 = arith.constant dense<0.000000e+00> : vector<32xf32>
    %277 = vector.multi_reduction <add>, %276, %cst_119 [1] : vector<32x32xf32> to vector<32xf32>
    %278 = vector.shape_cast %277 : vector<32xf32> to vector<32x1xf32>
    %279 = vector.broadcast %278 : vector<32x1xf32> to vector<32x32xf32>
    %280 = arith.divf %276, %279 : vector<32x32xf32>
    %cst_120 = arith.constant dense<0.000000e+00> : vector<32x8xf32>
    %281 = tpu.matmul %280, %269, %cst_120 {dimension_numbers = #tpu.dot_dimension_numbers<[1], [0], [0], [1], [0, 0, 1, 1], [], []>} : vector<32x32xf32>, vector<32x8xf32>, vector<32x8xf32> -> vector<32x8xf32>
    %282 = vector.extract_strided_slice %230 {offsets = [0, 24], sizes = [32, 8], strides = [1, 1]} : vector<32x96xf32> to vector<32x8xf32>
    %cst_121 = arith.constant 0.353553385 : f32
    %283 = vector.broadcast %cst_121 : f32 to vector<32x8xf32>
    %284 = arith.mulf %282, %283 : vector<32x8xf32>
    %285 = vector.extract_strided_slice %230 {offsets = [0, 56], sizes = [32, 8], strides = [1, 1]} : vector<32x96xf32> to vector<32x8xf32>
    %286 = vector.extract_strided_slice %230 {offsets = [0, 88], sizes = [32, 8], strides = [1, 1]} : vector<32x96xf32> to vector<32x8xf32>
    %cst_122 = arith.constant dense<0.000000e+00> : vector<32x32xf32>
    %287 = tpu.matmul %284, %285, %cst_122 {dimension_numbers = #tpu.dot_dimension_numbers<[1], [1], [0], [0], [0, 0, 1, 0], [], []>} : vector<32x8xf32>, vector<32x8xf32>, vector<32x32xf32> -> vector<32x32xf32>
    %288 = arith.addf %287, %32 : vector<32x32xf32>
    %cst_123 = arith.constant dense<0xFF800000> : vector<32xf32>
    %289 = vector.multi_reduction <maximumf>, %288, %cst_123 [1] : vector<32x32xf32> to vector<32xf32>
    %290 = vector.shape_cast %289 : vector<32xf32> to vector<32x1xf32>
    %291 = vector.broadcast %290 : vector<32x1xf32> to vector<32x32xf32>
    %292 = arith.subf %288, %291 : vector<32x32xf32>
    %293 = math.exp %292 : vector<32x32xf32>
    %cst_124 = arith.constant dense<0.000000e+00> : vector<32xf32>
    %294 = vector.multi_reduction <add>, %293, %cst_124 [1] : vector<32x32xf32> to vector<32xf32>
    %295 = vector.shape_cast %294 : vector<32xf32> to vector<32x1xf32>
    %296 = vector.broadcast %295 : vector<32x1xf32> to vector<32x32xf32>
    %297 = arith.divf %293, %296 : vector<32x32xf32>
    %cst_125 = arith.constant dense<0.000000e+00> : vector<32x8xf32>
    %298 = tpu.matmul %297, %286, %cst_125 {dimension_numbers = #tpu.dot_dimension_numbers<[1], [0], [0], [1], [0, 0, 1, 1], [], []>} : vector<32x32xf32>, vector<32x8xf32>, vector<32x8xf32> -> vector<32x8xf32>
    %299 = tpu.concatenate %247, %264, %281, %298 in 1 : vector<32x8xf32>, vector<32x8xf32>, vector<32x8xf32>, vector<32x8xf32> -> vector<32x32xf32>
    %c1_126 = arith.constant 1 : index
    %c0_127 = arith.constant 0 : index
    %c0_128 = arith.constant 0 : index
    %300 = vector.load %arg7[%c1_126, %c0_127, %c0_128] : memref<2x32x32xf32, #tpu.memory_space<vmem>>, vector<1x32x32xf32>
    %301 = vector.shape_cast %300 : vector<1x32x32xf32> to vector<32x32xf32>
    %cst_129 = arith.constant dense<0.000000e+00> : vector<32x32xf32>
    %302 = tpu.matmul %299, %301, %cst_129 {dimension_numbers = #tpu.dot_dimension_numbers<[1], [0], [0], [1], [0, 0, 1, 1], [], []>} : vector<32x32xf32>, vector<32x32xf32>, vector<32x32xf32> -> vector<32x32xf32>
    %c1_130 = arith.constant 1 : index
    %c0_131 = arith.constant 0 : index
    %c0_132 = arith.constant 0 : index
    %303 = vector.load %arg8[%c1_130, %c0_131, %c0_132] : memref<2x1x32xf32, #tpu.memory_space<vmem>>, vector<1x1x32xf32>
    %304 = vector.shape_cast %303 : vector<1x1x32xf32> to vector<1x32xf32>
    %305 = vector.broadcast %304 : vector<1x32xf32> to vector<32x32xf32>
    %306 = arith.addf %302, %305 : vector<32x32xf32>
    %307 = arith.addf %306, %223 : vector<32x32xf32>
    %c1_133 = arith.constant 1 : index
    %c0_134 = arith.constant 0 : index
    %c0_135 = arith.constant 0 : index
    %308 = vector.load %arg9[%c1_133, %c0_134, %c0_135] : memref<2x1x32xf32, #tpu.memory_space<vmem>>, vector<1x1x32xf32>
    %309 = vector.shape_cast %308 : vector<1x1x32xf32> to vector<1x32xf32>
    %c1_136 = arith.constant 1 : index
    %c0_137 = arith.constant 0 : index
    %c0_138 = arith.constant 0 : index
    %310 = vector.load %arg10[%c1_136, %c0_137, %c0_138] : memref<2x1x32xf32, #tpu.memory_space<vmem>>, vector<1x1x32xf32>
    %311 = vector.shape_cast %310 : vector<1x1x32xf32> to vector<1x32xf32>
    %cst_139 = arith.constant dense<0.000000e+00> : vector<32xf32>
    %312 = vector.multi_reduction <add>, %307, %cst_139 [1] : vector<32x32xf32> to vector<32xf32>
    %313 = vector.shape_cast %312 : vector<32xf32> to vector<32x1xf32>
    %cst_140 = arith.constant 3.200000e+01 : f32
    %314 = vector.broadcast %cst_140 : f32 to vector<32x1xf32>
    %315 = arith.divf %313, %314 : vector<32x1xf32>
    %316 = vector.broadcast %315 : vector<32x1xf32> to vector<32x32xf32>
    %317 = arith.subf %307, %316 : vector<32x32xf32>
    %318 = arith.mulf %317, %317 : vector<32x32xf32>
    %cst_141 = arith.constant dense<0.000000e+00> : vector<32xf32>
    %319 = vector.multi_reduction <add>, %318, %cst_141 [1] : vector<32x32xf32> to vector<32xf32>
    %320 = vector.shape_cast %319 : vector<32xf32> to vector<32x1xf32>
    %cst_142 = arith.constant 3.200000e+01 : f32
    %321 = vector.broadcast %cst_142 : f32 to vector<32x1xf32>
    %322 = arith.divf %320, %321 : vector<32x1xf32>
    %323 = vector.broadcast %315 : vector<32x1xf32> to vector<32x32xf32>
    %324 = arith.subf %307, %323 : vector<32x32xf32>
    %cst_143 = arith.constant 9.99999996E-13 : f32
    %325 = vector.broadcast %cst_143 : f32 to vector<32x1xf32>
    %326 = arith.addf %322, %325 : vector<32x1xf32>
    %327 = math.rsqrt %326 : vector<32x1xf32>
    %328 = vector.broadcast %327 : vector<32x1xf32> to vector<32x32xf32>
    %329 = arith.mulf %324, %328 : vector<32x32xf32>
    %330 = vector.broadcast %309 : vector<1x32xf32> to vector<32x32xf32>
    %331 = arith.mulf %329, %330 : vector<32x32xf32>
    %332 = vector.broadcast %311 : vector<1x32xf32> to vector<32x32xf32>
    %333 = arith.addf %331, %332 : vector<32x32xf32>
    %c1_144 = arith.constant 1 : index
    %c0_145 = arith.constant 0 : index
    %c0_146 = arith.constant 0 : index
    %334 = vector.load %arg11[%c1_144, %c0_145, %c0_146] : memref<2x32x64xf32, #tpu.memory_space<vmem>>, vector<1x32x64xf32>
    %335 = vector.shape_cast %334 : vector<1x32x64xf32> to vector<32x64xf32>
    %cst_147 = arith.constant dense<0.000000e+00> : vector<32x64xf32>
    %336 = tpu.matmul %333, %335, %cst_147 {dimension_numbers = #tpu.dot_dimension_numbers<[1], [0], [0], [1], [0, 0, 1, 1], [], []>} : vector<32x32xf32>, vector<32x64xf32>, vector<32x64xf32> -> vector<32x64xf32>
    %c1_148 = arith.constant 1 : index
    %c0_149 = arith.constant 0 : index
    %c0_150 = arith.constant 0 : index
    %337 = vector.load %arg12[%c1_148, %c0_149, %c0_150] : memref<2x1x64xf32, #tpu.memory_space<vmem>>, vector<1x1x64xf32>
    %338 = vector.shape_cast %337 : vector<1x1x64xf32> to vector<1x64xf32>
    %339 = vector.broadcast %338 : vector<1x64xf32> to vector<32x64xf32>
    %340 = arith.addf %336, %339 : vector<32x64xf32>
    %cst_151 = arith.constant 5.000000e-01 : f32
    %341 = vector.broadcast %cst_151 : f32 to vector<32x64xf32>
    %342 = arith.mulf %341, %340 : vector<32x64xf32>
    %cst_152 = arith.constant 0.707106769 : f32
    %343 = vector.broadcast %cst_152 : f32 to vector<32x64xf32>
    %344 = arith.mulf %340, %343 : vector<32x64xf32>
    %345 = math.absf %344 : vector<32x64xf32>
    %cst_153 = arith.constant 0.327591091 : f32
    %346 = vector.broadcast %cst_153 : f32 to vector<32x64xf32>
    %347 = arith.mulf %346, %345 : vector<32x64xf32>
    %cst_154 = arith.constant 1.000000e+00 : f32
    %348 = vector.broadcast %cst_154 : f32 to vector<32x64xf32>
    %349 = arith.addf %348, %347 : vector<32x64xf32>
    %cst_155 = arith.constant 1.000000e+00 : f32
    %350 = vector.broadcast %cst_155 : f32 to vector<32x64xf32>
    %351 = arith.divf %350, %349 : vector<32x64xf32>
    %cst_156 = arith.constant 1.06140542 : f32
    %352 = vector.broadcast %cst_156 : f32 to vector<32x64xf32>
    %353 = arith.mulf %352, %351 : vector<32x64xf32>
    %cst_157 = arith.constant -1.45315206 : f32
    %354 = vector.broadcast %cst_157 : f32 to vector<32x64xf32>
    %355 = arith.addf %353, %354 : vector<32x64xf32>
    %356 = arith.mulf %355, %351 : vector<32x64xf32>
    %cst_158 = arith.constant 1.42141378 : f32
    %357 = vector.broadcast %cst_158 : f32 to vector<32x64xf32>
    %358 = arith.addf %356, %357 : vector<32x64xf32>
    %359 = arith.mulf %358, %351 : vector<32x64xf32>
    %cst_159 = arith.constant -0.284496725 : f32
    %360 = vector.broadcast %cst_159 : f32 to vector<32x64xf32>
    %361 = arith.addf %359, %360 : vector<32x64xf32>
    %362 = arith.mulf %361, %351 : vector<32x64xf32>
    %cst_160 = arith.constant 0.254829586 : f32
    %363 = vector.broadcast %cst_160 : f32 to vector<32x64xf32>
    %364 = arith.addf %362, %363 : vector<32x64xf32>
    %365 = arith.mulf %364, %351 : vector<32x64xf32>
    %cst_161 = arith.constant 0.000000e+00 : f32
    %366 = vector.broadcast %cst_161 : f32 to vector<32x64xf32>
    %367 = arith.subf %366, %345 : vector<32x64xf32>
    %368 = arith.mulf %367, %345 : vector<32x64xf32>
    %369 = math.exp %368 : vector<32x64xf32>
    %370 = arith.mulf %365, %369 : vector<32x64xf32>
    %cst_162 = arith.constant 1.000000e+00 : f32
    %371 = vector.broadcast %cst_162 : f32 to vector<32x64xf32>
    %372 = arith.subf %371, %370 : vector<32x64xf32>
    %cst_163 = arith.constant 0.000000e+00 : f32
    %373 = vector.broadcast %cst_163 : f32 to vector<32x64xf32>
    %374 = arith.cmpf olt, %344, %373 : vector<32x64xf32>
    %cst_164 = arith.constant 0.000000e+00 : f32
    %375 = vector.broadcast %cst_164 : f32 to vector<32x64xf32>
    %376 = arith.subf %375, %372 : vector<32x64xf32>
    %377 = arith.select %374, %376, %372 : vector<32x64xi1>, vector<32x64xf32>
    %cst_165 = arith.constant 1.000000e+00 : f32
    %378 = vector.broadcast %cst_165 : f32 to vector<32x64xf32>
    %379 = arith.addf %378, %377 : vector<32x64xf32>
    %380 = arith.mulf %342, %379 : vector<32x64xf32>
    %c1_166 = arith.constant 1 : index
    %c0_167 = arith.constant 0 : index
    %c0_168 = arith.constant 0 : index
    %381 = vector.load %arg13[%c1_166, %c0_167, %c0_168] : memref<2x64x32xf32, #tpu.memory_space<vmem>>, vector<1x64x32xf32>
    %382 = vector.shape_cast %381 : vector<1x64x32xf32> to vector<64x32xf32>
    %cst_169 = arith.constant dense<0.000000e+00> : vector<32x32xf32>
    %383 = tpu.matmul %380, %382, %cst_169 {dimension_numbers = #tpu.dot_dimension_numbers<[1], [0], [0], [1], [0, 0, 1, 1], [], []>} : vector<32x64xf32>, vector<64x32xf32>, vector<32x32xf32> -> vector<32x32xf32>
    %c1_170 = arith.constant 1 : index
    %c0_171 = arith.constant 0 : index
    %c0_172 = arith.constant 0 : index
    %384 = vector.load %arg14[%c1_170, %c0_171, %c0_172] : memref<2x1x32xf32, #tpu.memory_space<vmem>>, vector<1x1x32xf32>
    %385 = vector.shape_cast %384 : vector<1x1x32xf32> to vector<1x32xf32>
    %386 = vector.broadcast %385 : vector<1x32xf32> to vector<32x32xf32>
    %387 = arith.addf %383, %386 : vector<32x32xf32>
    %388 = arith.addf %387, %333 : vector<32x32xf32>
    %c1_173 = arith.constant 1 : index
    %c0_174 = arith.constant 0 : index
    %c0_175 = arith.constant 0 : index
    %389 = vector.load %arg15[%c1_173, %c0_174, %c0_175] : memref<2x1x32xf32, #tpu.memory_space<vmem>>, vector<1x1x32xf32>
    %390 = vector.shape_cast %389 : vector<1x1x32xf32> to vector<1x32xf32>
    %c1_176 = arith.constant 1 : index
    %c0_177 = arith.constant 0 : index
    %c0_178 = arith.constant 0 : index
    %391 = vector.load %arg16[%c1_176, %c0_177, %c0_178] : memref<2x1x32xf32, #tpu.memory_space<vmem>>, vector<1x1x32xf32>
    %392 = vector.shape_cast %391 : vector<1x1x32xf32> to vector<1x32xf32>
    %cst_179 = arith.constant dense<0.000000e+00> : vector<32xf32>
    %393 = vector.multi_reduction <add>, %388, %cst_179 [1] : vector<32x32xf32> to vector<32xf32>
    %394 = vector.shape_cast %393 : vector<32xf32> to vector<32x1xf32>
    %cst_180 = arith.constant 3.200000e+01 : f32
    %395 = vector.broadcast %cst_180 : f32 to vector<32x1xf32>
    %396 = arith.divf %394, %395 : vector<32x1xf32>
    %397 = vector.broadcast %396 : vector<32x1xf32> to vector<32x32xf32>
    %398 = arith.subf %388, %397 : vector<32x32xf32>
    %399 = arith.mulf %398, %398 : vector<32x32xf32>
    %cst_181 = arith.constant dense<0.000000e+00> : vector<32xf32>
    %400 = vector.multi_reduction <add>, %399, %cst_181 [1] : vector<32x32xf32> to vector<32xf32>
    %401 = vector.shape_cast %400 : vector<32xf32> to vector<32x1xf32>
    %cst_182 = arith.constant 3.200000e+01 : f32
    %402 = vector.broadcast %cst_182 : f32 to vector<32x1xf32>
    %403 = arith.divf %401, %402 : vector<32x1xf32>
    %404 = vector.broadcast %396 : vector<32x1xf32> to vector<32x32xf32>
    %405 = arith.subf %388, %404 : vector<32x32xf32>
    %cst_183 = arith.constant 9.99999996E-13 : f32
    %406 = vector.broadcast %cst_183 : f32 to vector<32x1xf32>
    %407 = arith.addf %403, %406 : vector<32x1xf32>
    %408 = math.rsqrt %407 : vector<32x1xf32>
    %409 = vector.broadcast %408 : vector<32x1xf32> to vector<32x32xf32>
    %410 = arith.mulf %405, %409 : vector<32x32xf32>
    %411 = vector.broadcast %390 : vector<1x32xf32> to vector<32x32xf32>
    %412 = arith.mulf %410, %411 : vector<32x32xf32>
    %413 = vector.broadcast %392 : vector<1x32xf32> to vector<32x32xf32>
    %414 = arith.addf %412, %413 : vector<32x32xf32>
    %c0_184 = arith.constant 0 : index
    %c0_185 = arith.constant 0 : index
    %415 = vector.load %arg17[%c0_184, %c0_185] : memref<32x32xf32, #tpu.memory_space<vmem>>, vector<32x32xf32>
    tpu.vector_store %arg17[%c0_184, %c0_185], %414 {strides = array<i32>} : memref<32x32xf32, #tpu.memory_space<vmem>>, vector<32x32xf32>,
    return
  }
}

module attributes {stable_mosaic.version = 11 : i64} {
  func.func @_ext_kernel(%arg0: memref<8x32xf32, #tpu.memory_space<vmem>>, %arg1: memref<1x8xf32, #tpu.memory_space<vmem>>, %arg2: memref<8x8xf32, #tpu.memory_space<vmem>>, %arg3: memref<2x1x32xf32, #tpu.memory_space<vmem>>, %arg4: memref<2x1x32xf32, #tpu.memory_space<vmem>>, %arg5: memref<2x32x96xf32, #tpu.memory_space<vmem>>, %arg6: memref<2x1x96xf32, #tpu.memory_space<vmem>>, %arg7: memref<2x32x32xf32, #tpu.memory_space<vmem>>, %arg8: memref<2x1x32xf32, #tpu.memory_space<vmem>>, %arg9: memref<2x1x32xf32, #tpu.memory_space<vmem>>, %arg10: memref<2x1x32xf32, #tpu.memory_space<vmem>>, %arg11: memref<2x32x64xf32, #tpu.memory_space<vmem>>, %arg12: memref<2x1x64xf32, #tpu.memory_space<vmem>>, %arg13: memref<2x64x32xf32, #tpu.memory_space<vmem>>, %arg14: memref<2x1x32xf32, #tpu.memory_space<vmem>>, %arg15: memref<1x32xf32, #tpu.memory_space<vmem>>, %arg16: memref<1x32xf32, #tpu.memory_space<vmem>>, %arg17: memref<1x32xf32, #tpu.memory_space<vmem>>, %arg18: memref<1x1xf32, #tpu.memory_space<vmem>>, %arg19: memref<1x8xf32, #tpu.memory_space<vmem>>) attributes {dimension_semantics = [], scalar_prefetch = 0 : i64, scratch_operands = 0 : i64, tpu.core_type = #tpu.core_type<tc>} {
    %c0 = arith.constant 0 : index
    %c0_0 = arith.constant 0 : index
    %0 = vector.load %arg0[%c0, %c0_0] : memref<8x32xf32, #tpu.memory_space<vmem>>, vector<8x32xf32>
    %c0_1 = arith.constant 0 : index
    %c0_2 = arith.constant 0 : index
    %1 = vector.load %arg1[%c0_1, %c0_2] : memref<1x8xf32, #tpu.memory_space<vmem>>, vector<1x8xf32>
    %c0_3 = arith.constant 0 : index
    %c0_4 = arith.constant 0 : index
    %2 = vector.load %arg2[%c0_3, %c0_4] : memref<8x8xf32, #tpu.memory_space<vmem>>, vector<8x8xf32>
    %cst = arith.constant 1.000000e+00 : f32
    %3 = vector.broadcast %cst : f32 to vector<1x8xf32>
    %4 = arith.subf %3, %1 : vector<1x8xf32>
    %cst_5 = arith.constant -9.99999984E+17 : f32
    %5 = vector.broadcast %cst_5 : f32 to vector<1x8xf32>
    %6 = arith.mulf %4, %5 : vector<1x8xf32>
    %7 = vector.broadcast %6 : vector<1x8xf32> to vector<8x8xf32>
    %8 = arith.addf %2, %7 : vector<8x8xf32>
    %c0_6 = arith.constant 0 : index
    %c0_7 = arith.constant 0 : index
    %c0_8 = arith.constant 0 : index
    %9 = vector.load %arg5[%c0_6, %c0_7, %c0_8] : memref<2x32x96xf32, #tpu.memory_space<vmem>>, vector<1x32x96xf32>
    %10 = vector.shape_cast %9 : vector<1x32x96xf32> to vector<32x96xf32>
    %c0_9 = arith.constant 0 : index
    %c0_10 = arith.constant 0 : index
    %c0_11 = arith.constant 0 : index
    %11 = vector.load %arg6[%c0_9, %c0_10, %c0_11] : memref<2x1x96xf32, #tpu.memory_space<vmem>>, vector<1x1x96xf32>
    %12 = vector.shape_cast %11 : vector<1x1x96xf32> to vector<1x96xf32>
    %cst_12 = arith.constant dense<0.000000e+00> : vector<8x96xf32>
    %13 = tpu.matmul %0, %10, %cst_12 {dimension_numbers = #tpu.dot_dimension_numbers<[1], [0], [0], [1], [0, 0, 1, 1], [], []>} : vector<8x32xf32>, vector<32x96xf32>, vector<8x96xf32> -> vector<8x96xf32>
    %14 = vector.broadcast %12 : vector<1x96xf32> to vector<8x96xf32>
    %15 = arith.addf %13, %14 : vector<8x96xf32>
    %16 = vector.extract_strided_slice %15 {offsets = [0, 0], sizes = [8, 8], strides = [1, 1]} : vector<8x96xf32> to vector<8x8xf32>
    %cst_13 = arith.constant 0.353553385 : f32
    %17 = vector.broadcast %cst_13 : f32 to vector<8x8xf32>
    %18 = arith.mulf %16, %17 : vector<8x8xf32>
    %19 = vector.extract_strided_slice %15 {offsets = [0, 32], sizes = [8, 8], strides = [1, 1]} : vector<8x96xf32> to vector<8x8xf32>
    %20 = vector.extract_strided_slice %15 {offsets = [0, 64], sizes = [8, 8], strides = [1, 1]} : vector<8x96xf32> to vector<8x8xf32>
    %cst_14 = arith.constant dense<0.000000e+00> : vector<8x8xf32>
    %21 = tpu.matmul %18, %19, %cst_14 {dimension_numbers = #tpu.dot_dimension_numbers<[1], [1], [0], [0], [0, 0, 1, 0], [], []>} : vector<8x8xf32>, vector<8x8xf32>, vector<8x8xf32> -> vector<8x8xf32>
    %22 = arith.addf %21, %8 : vector<8x8xf32>
    %cst_15 = arith.constant dense<0xFF800000> : vector<8xf32>
    %23 = vector.multi_reduction <maximumf>, %22, %cst_15 [1] : vector<8x8xf32> to vector<8xf32>
    %24 = vector.shape_cast %23 : vector<8xf32> to vector<8x1xf32>
    %25 = vector.broadcast %24 : vector<8x1xf32> to vector<8x8xf32>
    %26 = arith.subf %22, %25 : vector<8x8xf32>
    %27 = math.exp %26 : vector<8x8xf32>
    %cst_16 = arith.constant dense<0.000000e+00> : vector<8xf32>
    %28 = vector.multi_reduction <add>, %27, %cst_16 [1] : vector<8x8xf32> to vector<8xf32>
    %29 = vector.shape_cast %28 : vector<8xf32> to vector<8x1xf32>
    %30 = vector.broadcast %29 : vector<8x1xf32> to vector<8x8xf32>
    %31 = arith.divf %27, %30 : vector<8x8xf32>
    %cst_17 = arith.constant dense<0.000000e+00> : vector<8x8xf32>
    %32 = tpu.matmul %31, %20, %cst_17 {dimension_numbers = #tpu.dot_dimension_numbers<[1], [0], [0], [1], [0, 0, 1, 1], [], []>} : vector<8x8xf32>, vector<8x8xf32>, vector<8x8xf32> -> vector<8x8xf32>
    %33 = vector.extract_strided_slice %15 {offsets = [0, 8], sizes = [8, 8], strides = [1, 1]} : vector<8x96xf32> to vector<8x8xf32>
    %cst_18 = arith.constant 0.353553385 : f32
    %34 = vector.broadcast %cst_18 : f32 to vector<8x8xf32>
    %35 = arith.mulf %33, %34 : vector<8x8xf32>
    %36 = vector.extract_strided_slice %15 {offsets = [0, 40], sizes = [8, 8], strides = [1, 1]} : vector<8x96xf32> to vector<8x8xf32>
    %37 = vector.extract_strided_slice %15 {offsets = [0, 72], sizes = [8, 8], strides = [1, 1]} : vector<8x96xf32> to vector<8x8xf32>
    %cst_19 = arith.constant dense<0.000000e+00> : vector<8x8xf32>
    %38 = tpu.matmul %35, %36, %cst_19 {dimension_numbers = #tpu.dot_dimension_numbers<[1], [1], [0], [0], [0, 0, 1, 0], [], []>} : vector<8x8xf32>, vector<8x8xf32>, vector<8x8xf32> -> vector<8x8xf32>
    %39 = arith.addf %38, %8 : vector<8x8xf32>
    %cst_20 = arith.constant dense<0xFF800000> : vector<8xf32>
    %40 = vector.multi_reduction <maximumf>, %39, %cst_20 [1] : vector<8x8xf32> to vector<8xf32>
    %41 = vector.shape_cast %40 : vector<8xf32> to vector<8x1xf32>
    %42 = vector.broadcast %41 : vector<8x1xf32> to vector<8x8xf32>
    %43 = arith.subf %39, %42 : vector<8x8xf32>
    %44 = math.exp %43 : vector<8x8xf32>
    %cst_21 = arith.constant dense<0.000000e+00> : vector<8xf32>
    %45 = vector.multi_reduction <add>, %44, %cst_21 [1] : vector<8x8xf32> to vector<8xf32>
    %46 = vector.shape_cast %45 : vector<8xf32> to vector<8x1xf32>
    %47 = vector.broadcast %46 : vector<8x1xf32> to vector<8x8xf32>
    %48 = arith.divf %44, %47 : vector<8x8xf32>
    %cst_22 = arith.constant dense<0.000000e+00> : vector<8x8xf32>
    %49 = tpu.matmul %48, %37, %cst_22 {dimension_numbers = #tpu.dot_dimension_numbers<[1], [0], [0], [1], [0, 0, 1, 1], [], []>} : vector<8x8xf32>, vector<8x8xf32>, vector<8x8xf32> -> vector<8x8xf32>
    %50 = vector.extract_strided_slice %15 {offsets = [0, 16], sizes = [8, 8], strides = [1, 1]} : vector<8x96xf32> to vector<8x8xf32>
    %cst_23 = arith.constant 0.353553385 : f32
    %51 = vector.broadcast %cst_23 : f32 to vector<8x8xf32>
    %52 = arith.mulf %50, %51 : vector<8x8xf32>
    %53 = vector.extract_strided_slice %15 {offsets = [0, 48], sizes = [8, 8], strides = [1, 1]} : vector<8x96xf32> to vector<8x8xf32>
    %54 = vector.extract_strided_slice %15 {offsets = [0, 80], sizes = [8, 8], strides = [1, 1]} : vector<8x96xf32> to vector<8x8xf32>
    %cst_24 = arith.constant dense<0.000000e+00> : vector<8x8xf32>
    %55 = tpu.matmul %52, %53, %cst_24 {dimension_numbers = #tpu.dot_dimension_numbers<[1], [1], [0], [0], [0, 0, 1, 0], [], []>} : vector<8x8xf32>, vector<8x8xf32>, vector<8x8xf32> -> vector<8x8xf32>
    %56 = arith.addf %55, %8 : vector<8x8xf32>
    %cst_25 = arith.constant dense<0xFF800000> : vector<8xf32>
    %57 = vector.multi_reduction <maximumf>, %56, %cst_25 [1] : vector<8x8xf32> to vector<8xf32>
    %58 = vector.shape_cast %57 : vector<8xf32> to vector<8x1xf32>
    %59 = vector.broadcast %58 : vector<8x1xf32> to vector<8x8xf32>
    %60 = arith.subf %56, %59 : vector<8x8xf32>
    %61 = math.exp %60 : vector<8x8xf32>
    %cst_26 = arith.constant dense<0.000000e+00> : vector<8xf32>
    %62 = vector.multi_reduction <add>, %61, %cst_26 [1] : vector<8x8xf32> to vector<8xf32>
    %63 = vector.shape_cast %62 : vector<8xf32> to vector<8x1xf32>
    %64 = vector.broadcast %63 : vector<8x1xf32> to vector<8x8xf32>
    %65 = arith.divf %61, %64 : vector<8x8xf32>
    %cst_27 = arith.constant dense<0.000000e+00> : vector<8x8xf32>
    %66 = tpu.matmul %65, %54, %cst_27 {dimension_numbers = #tpu.dot_dimension_numbers<[1], [0], [0], [1], [0, 0, 1, 1], [], []>} : vector<8x8xf32>, vector<8x8xf32>, vector<8x8xf32> -> vector<8x8xf32>
    %67 = vector.extract_strided_slice %15 {offsets = [0, 24], sizes = [8, 8], strides = [1, 1]} : vector<8x96xf32> to vector<8x8xf32>
    %cst_28 = arith.constant 0.353553385 : f32
    %68 = vector.broadcast %cst_28 : f32 to vector<8x8xf32>
    %69 = arith.mulf %67, %68 : vector<8x8xf32>
    %70 = vector.extract_strided_slice %15 {offsets = [0, 56], sizes = [8, 8], strides = [1, 1]} : vector<8x96xf32> to vector<8x8xf32>
    %71 = vector.extract_strided_slice %15 {offsets = [0, 88], sizes = [8, 8], strides = [1, 1]} : vector<8x96xf32> to vector<8x8xf32>
    %cst_29 = arith.constant dense<0.000000e+00> : vector<8x8xf32>
    %72 = tpu.matmul %69, %70, %cst_29 {dimension_numbers = #tpu.dot_dimension_numbers<[1], [1], [0], [0], [0, 0, 1, 0], [], []>} : vector<8x8xf32>, vector<8x8xf32>, vector<8x8xf32> -> vector<8x8xf32>
    %73 = arith.addf %72, %8 : vector<8x8xf32>
    %cst_30 = arith.constant dense<0xFF800000> : vector<8xf32>
    %74 = vector.multi_reduction <maximumf>, %73, %cst_30 [1] : vector<8x8xf32> to vector<8xf32>
    %75 = vector.shape_cast %74 : vector<8xf32> to vector<8x1xf32>
    %76 = vector.broadcast %75 : vector<8x1xf32> to vector<8x8xf32>
    %77 = arith.subf %73, %76 : vector<8x8xf32>
    %78 = math.exp %77 : vector<8x8xf32>
    %cst_31 = arith.constant dense<0.000000e+00> : vector<8xf32>
    %79 = vector.multi_reduction <add>, %78, %cst_31 [1] : vector<8x8xf32> to vector<8xf32>
    %80 = vector.shape_cast %79 : vector<8xf32> to vector<8x1xf32>
    %81 = vector.broadcast %80 : vector<8x1xf32> to vector<8x8xf32>
    %82 = arith.divf %78, %81 : vector<8x8xf32>
    %cst_32 = arith.constant dense<0.000000e+00> : vector<8x8xf32>
    %83 = tpu.matmul %82, %71, %cst_32 {dimension_numbers = #tpu.dot_dimension_numbers<[1], [0], [0], [1], [0, 0, 1, 1], [], []>} : vector<8x8xf32>, vector<8x8xf32>, vector<8x8xf32> -> vector<8x8xf32>
    %84 = tpu.concatenate %32, %49, %66, %83 in 1 : vector<8x8xf32>, vector<8x8xf32>, vector<8x8xf32>, vector<8x8xf32> -> vector<8x32xf32>
    %c0_33 = arith.constant 0 : index
    %c0_34 = arith.constant 0 : index
    %c0_35 = arith.constant 0 : index
    %85 = vector.load %arg7[%c0_33, %c0_34, %c0_35] : memref<2x32x32xf32, #tpu.memory_space<vmem>>, vector<1x32x32xf32>
    %86 = vector.shape_cast %85 : vector<1x32x32xf32> to vector<32x32xf32>
    %cst_36 = arith.constant dense<0.000000e+00> : vector<8x32xf32>
    %87 = tpu.matmul %84, %86, %cst_36 {dimension_numbers = #tpu.dot_dimension_numbers<[1], [0], [0], [1], [0, 0, 1, 1], [], []>} : vector<8x32xf32>, vector<32x32xf32>, vector<8x32xf32> -> vector<8x32xf32>
    %c0_37 = arith.constant 0 : index
    %c0_38 = arith.constant 0 : index
    %c0_39 = arith.constant 0 : index
    %88 = vector.load %arg8[%c0_37, %c0_38, %c0_39] : memref<2x1x32xf32, #tpu.memory_space<vmem>>, vector<1x1x32xf32>
    %89 = vector.shape_cast %88 : vector<1x1x32xf32> to vector<1x32xf32>
    %90 = vector.broadcast %89 : vector<1x32xf32> to vector<8x32xf32>
    %91 = arith.addf %87, %90 : vector<8x32xf32>
    %92 = arith.addf %91, %0 : vector<8x32xf32>
    %c0_40 = arith.constant 0 : index
    %c0_41 = arith.constant 0 : index
    %c0_42 = arith.constant 0 : index
    %93 = vector.load %arg9[%c0_40, %c0_41, %c0_42] : memref<2x1x32xf32, #tpu.memory_space<vmem>>, vector<1x1x32xf32>
    %94 = vector.shape_cast %93 : vector<1x1x32xf32> to vector<1x32xf32>
    %c0_43 = arith.constant 0 : index
    %c0_44 = arith.constant 0 : index
    %c0_45 = arith.constant 0 : index
    %95 = vector.load %arg10[%c0_43, %c0_44, %c0_45] : memref<2x1x32xf32, #tpu.memory_space<vmem>>, vector<1x1x32xf32>
    %96 = vector.shape_cast %95 : vector<1x1x32xf32> to vector<1x32xf32>
    %cst_46 = arith.constant dense<0.000000e+00> : vector<8xf32>
    %97 = vector.multi_reduction <add>, %92, %cst_46 [1] : vector<8x32xf32> to vector<8xf32>
    %98 = vector.shape_cast %97 : vector<8xf32> to vector<8x1xf32>
    %cst_47 = arith.constant 3.200000e+01 : f32
    %99 = vector.broadcast %cst_47 : f32 to vector<8x1xf32>
    %100 = arith.divf %98, %99 : vector<8x1xf32>
    %101 = vector.broadcast %100 : vector<8x1xf32> to vector<8x32xf32>
    %102 = arith.subf %92, %101 : vector<8x32xf32>
    %103 = arith.mulf %102, %102 : vector<8x32xf32>
    %cst_48 = arith.constant dense<0.000000e+00> : vector<8xf32>
    %104 = vector.multi_reduction <add>, %103, %cst_48 [1] : vector<8x32xf32> to vector<8xf32>
    %105 = vector.shape_cast %104 : vector<8xf32> to vector<8x1xf32>
    %cst_49 = arith.constant 3.200000e+01 : f32
    %106 = vector.broadcast %cst_49 : f32 to vector<8x1xf32>
    %107 = arith.divf %105, %106 : vector<8x1xf32>
    %108 = vector.broadcast %100 : vector<8x1xf32> to vector<8x32xf32>
    %109 = arith.subf %92, %108 : vector<8x32xf32>
    %cst_50 = arith.constant 9.99999997E-7 : f32
    %110 = vector.broadcast %cst_50 : f32 to vector<8x1xf32>
    %111 = arith.addf %107, %110 : vector<8x1xf32>
    %112 = math.rsqrt %111 : vector<8x1xf32>
    %113 = vector.broadcast %112 : vector<8x1xf32> to vector<8x32xf32>
    %114 = arith.mulf %109, %113 : vector<8x32xf32>
    %115 = vector.broadcast %94 : vector<1x32xf32> to vector<8x32xf32>
    %116 = arith.mulf %114, %115 : vector<8x32xf32>
    %117 = vector.broadcast %96 : vector<1x32xf32> to vector<8x32xf32>
    %118 = arith.addf %116, %117 : vector<8x32xf32>
    %c0_51 = arith.constant 0 : index
    %c0_52 = arith.constant 0 : index
    %c0_53 = arith.constant 0 : index
    %119 = vector.load %arg11[%c0_51, %c0_52, %c0_53] : memref<2x32x64xf32, #tpu.memory_space<vmem>>, vector<1x32x64xf32>
    %120 = vector.shape_cast %119 : vector<1x32x64xf32> to vector<32x64xf32>
    %cst_54 = arith.constant dense<0.000000e+00> : vector<8x64xf32>
    %121 = tpu.matmul %118, %120, %cst_54 {dimension_numbers = #tpu.dot_dimension_numbers<[1], [0], [0], [1], [0, 0, 1, 1], [], []>} : vector<8x32xf32>, vector<32x64xf32>, vector<8x64xf32> -> vector<8x64xf32>
    %c0_55 = arith.constant 0 : index
    %c0_56 = arith.constant 0 : index
    %c0_57 = arith.constant 0 : index
    %122 = vector.load %arg12[%c0_55, %c0_56, %c0_57] : memref<2x1x64xf32, #tpu.memory_space<vmem>>, vector<1x1x64xf32>
    %123 = vector.shape_cast %122 : vector<1x1x64xf32> to vector<1x64xf32>
    %124 = vector.broadcast %123 : vector<1x64xf32> to vector<8x64xf32>
    %125 = arith.addf %121, %124 : vector<8x64xf32>
    %cst_58 = arith.constant 5.000000e-01 : f32
    %126 = vector.broadcast %cst_58 : f32 to vector<8x64xf32>
    %127 = arith.mulf %126, %125 : vector<8x64xf32>
    %cst_59 = arith.constant 4.471500e-02 : f32
    %128 = vector.broadcast %cst_59 : f32 to vector<8x64xf32>
    %129 = arith.mulf %128, %125 : vector<8x64xf32>
    %130 = arith.mulf %129, %125 : vector<8x64xf32>
    %131 = arith.mulf %130, %125 : vector<8x64xf32>
    %132 = arith.addf %125, %131 : vector<8x64xf32>
    %cst_60 = arith.constant 0.797884583 : f32
    %133 = vector.broadcast %cst_60 : f32 to vector<8x64xf32>
    %134 = arith.mulf %133, %132 : vector<8x64xf32>
    %135 = math.tanh %134 : vector<8x64xf32>
    %cst_61 = arith.constant 1.000000e+00 : f32
    %136 = vector.broadcast %cst_61 : f32 to vector<8x64xf32>
    %137 = arith.addf %136, %135 : vector<8x64xf32>
    %138 = arith.mulf %127, %137 : vector<8x64xf32>
    %c0_62 = arith.constant 0 : index
    %c0_63 = arith.constant 0 : index
    %c0_64 = arith.constant 0 : index
    %139 = vector.load %arg13[%c0_62, %c0_63, %c0_64] : memref<2x64x32xf32, #tpu.memory_space<vmem>>, vector<1x64x32xf32>
    %140 = vector.shape_cast %139 : vector<1x64x32xf32> to vector<64x32xf32>
    %cst_65 = arith.constant dense<0.000000e+00> : vector<8x32xf32>
    %141 = tpu.matmul %138, %140, %cst_65 {dimension_numbers = #tpu.dot_dimension_numbers<[1], [0], [0], [1], [0, 0, 1, 1], [], []>} : vector<8x64xf32>, vector<64x32xf32>, vector<8x32xf32> -> vector<8x32xf32>
    %c0_66 = arith.constant 0 : index
    %c0_67 = arith.constant 0 : index
    %c0_68 = arith.constant 0 : index
    %142 = vector.load %arg14[%c0_66, %c0_67, %c0_68] : memref<2x1x32xf32, #tpu.memory_space<vmem>>, vector<1x1x32xf32>
    %143 = vector.shape_cast %142 : vector<1x1x32xf32> to vector<1x32xf32>
    %144 = vector.broadcast %143 : vector<1x32xf32> to vector<8x32xf32>
    %145 = arith.addf %141, %144 : vector<8x32xf32>
    %146 = arith.addf %145, %92 : vector<8x32xf32>
    %c1 = arith.constant 1 : index
    %c0_69 = arith.constant 0 : index
    %c0_70 = arith.constant 0 : index
    %147 = vector.load %arg3[%c1, %c0_69, %c0_70] : memref<2x1x32xf32, #tpu.memory_space<vmem>>, vector<1x1x32xf32>
    %148 = vector.shape_cast %147 : vector<1x1x32xf32> to vector<1x32xf32>
    %c1_71 = arith.constant 1 : index
    %c0_72 = arith.constant 0 : index
    %c0_73 = arith.constant 0 : index
    %149 = vector.load %arg4[%c1_71, %c0_72, %c0_73] : memref<2x1x32xf32, #tpu.memory_space<vmem>>, vector<1x1x32xf32>
    %150 = vector.shape_cast %149 : vector<1x1x32xf32> to vector<1x32xf32>
    %cst_74 = arith.constant dense<0.000000e+00> : vector<8xf32>
    %151 = vector.multi_reduction <add>, %146, %cst_74 [1] : vector<8x32xf32> to vector<8xf32>
    %152 = vector.shape_cast %151 : vector<8xf32> to vector<8x1xf32>
    %cst_75 = arith.constant 3.200000e+01 : f32
    %153 = vector.broadcast %cst_75 : f32 to vector<8x1xf32>
    %154 = arith.divf %152, %153 : vector<8x1xf32>
    %155 = vector.broadcast %154 : vector<8x1xf32> to vector<8x32xf32>
    %156 = arith.subf %146, %155 : vector<8x32xf32>
    %157 = arith.mulf %156, %156 : vector<8x32xf32>
    %cst_76 = arith.constant dense<0.000000e+00> : vector<8xf32>
    %158 = vector.multi_reduction <add>, %157, %cst_76 [1] : vector<8x32xf32> to vector<8xf32>
    %159 = vector.shape_cast %158 : vector<8xf32> to vector<8x1xf32>
    %cst_77 = arith.constant 3.200000e+01 : f32
    %160 = vector.broadcast %cst_77 : f32 to vector<8x1xf32>
    %161 = arith.divf %159, %160 : vector<8x1xf32>
    %162 = vector.broadcast %154 : vector<8x1xf32> to vector<8x32xf32>
    %163 = arith.subf %146, %162 : vector<8x32xf32>
    %cst_78 = arith.constant 9.99999997E-7 : f32
    %164 = vector.broadcast %cst_78 : f32 to vector<8x1xf32>
    %165 = arith.addf %161, %164 : vector<8x1xf32>
    %166 = math.rsqrt %165 : vector<8x1xf32>
    %167 = vector.broadcast %166 : vector<8x1xf32> to vector<8x32xf32>
    %168 = arith.mulf %163, %167 : vector<8x32xf32>
    %169 = vector.broadcast %148 : vector<1x32xf32> to vector<8x32xf32>
    %170 = arith.mulf %168, %169 : vector<8x32xf32>
    %171 = vector.broadcast %150 : vector<1x32xf32> to vector<8x32xf32>
    %172 = arith.addf %170, %171 : vector<8x32xf32>
    %c1_79 = arith.constant 1 : index
    %c0_80 = arith.constant 0 : index
    %c0_81 = arith.constant 0 : index
    %173 = vector.load %arg5[%c1_79, %c0_80, %c0_81] : memref<2x32x96xf32, #tpu.memory_space<vmem>>, vector<1x32x96xf32>
    %174 = vector.shape_cast %173 : vector<1x32x96xf32> to vector<32x96xf32>
    %c1_82 = arith.constant 1 : index
    %c0_83 = arith.constant 0 : index
    %c0_84 = arith.constant 0 : index
    %175 = vector.load %arg6[%c1_82, %c0_83, %c0_84] : memref<2x1x96xf32, #tpu.memory_space<vmem>>, vector<1x1x96xf32>
    %176 = vector.shape_cast %175 : vector<1x1x96xf32> to vector<1x96xf32>
    %cst_85 = arith.constant dense<0.000000e+00> : vector<8x96xf32>
    %177 = tpu.matmul %172, %174, %cst_85 {dimension_numbers = #tpu.dot_dimension_numbers<[1], [0], [0], [1], [0, 0, 1, 1], [], []>} : vector<8x32xf32>, vector<32x96xf32>, vector<8x96xf32> -> vector<8x96xf32>
    %178 = vector.broadcast %176 : vector<1x96xf32> to vector<8x96xf32>
    %179 = arith.addf %177, %178 : vector<8x96xf32>
    %180 = vector.extract_strided_slice %179 {offsets = [0, 0], sizes = [8, 8], strides = [1, 1]} : vector<8x96xf32> to vector<8x8xf32>
    %cst_86 = arith.constant 0.353553385 : f32
    %181 = vector.broadcast %cst_86 : f32 to vector<8x8xf32>
    %182 = arith.mulf %180, %181 : vector<8x8xf32>
    %183 = vector.extract_strided_slice %179 {offsets = [0, 32], sizes = [8, 8], strides = [1, 1]} : vector<8x96xf32> to vector<8x8xf32>
    %184 = vector.extract_strided_slice %179 {offsets = [0, 64], sizes = [8, 8], strides = [1, 1]} : vector<8x96xf32> to vector<8x8xf32>
    %cst_87 = arith.constant dense<0.000000e+00> : vector<8x8xf32>
    %185 = tpu.matmul %182, %183, %cst_87 {dimension_numbers = #tpu.dot_dimension_numbers<[1], [1], [0], [0], [0, 0, 1, 0], [], []>} : vector<8x8xf32>, vector<8x8xf32>, vector<8x8xf32> -> vector<8x8xf32>
    %186 = arith.addf %185, %8 : vector<8x8xf32>
    %cst_88 = arith.constant dense<0xFF800000> : vector<8xf32>
    %187 = vector.multi_reduction <maximumf>, %186, %cst_88 [1] : vector<8x8xf32> to vector<8xf32>
    %188 = vector.shape_cast %187 : vector<8xf32> to vector<8x1xf32>
    %189 = vector.broadcast %188 : vector<8x1xf32> to vector<8x8xf32>
    %190 = arith.subf %186, %189 : vector<8x8xf32>
    %191 = math.exp %190 : vector<8x8xf32>
    %cst_89 = arith.constant dense<0.000000e+00> : vector<8xf32>
    %192 = vector.multi_reduction <add>, %191, %cst_89 [1] : vector<8x8xf32> to vector<8xf32>
    %193 = vector.shape_cast %192 : vector<8xf32> to vector<8x1xf32>
    %194 = vector.broadcast %193 : vector<8x1xf32> to vector<8x8xf32>
    %195 = arith.divf %191, %194 : vector<8x8xf32>
    %cst_90 = arith.constant dense<0.000000e+00> : vector<8x8xf32>
    %196 = tpu.matmul %195, %184, %cst_90 {dimension_numbers = #tpu.dot_dimension_numbers<[1], [0], [0], [1], [0, 0, 1, 1], [], []>} : vector<8x8xf32>, vector<8x8xf32>, vector<8x8xf32> -> vector<8x8xf32>
    %197 = vector.extract_strided_slice %179 {offsets = [0, 8], sizes = [8, 8], strides = [1, 1]} : vector<8x96xf32> to vector<8x8xf32>
    %cst_91 = arith.constant 0.353553385 : f32
    %198 = vector.broadcast %cst_91 : f32 to vector<8x8xf32>
    %199 = arith.mulf %197, %198 : vector<8x8xf32>
    %200 = vector.extract_strided_slice %179 {offsets = [0, 40], sizes = [8, 8], strides = [1, 1]} : vector<8x96xf32> to vector<8x8xf32>
    %201 = vector.extract_strided_slice %179 {offsets = [0, 72], sizes = [8, 8], strides = [1, 1]} : vector<8x96xf32> to vector<8x8xf32>
    %cst_92 = arith.constant dense<0.000000e+00> : vector<8x8xf32>
    %202 = tpu.matmul %199, %200, %cst_92 {dimension_numbers = #tpu.dot_dimension_numbers<[1], [1], [0], [0], [0, 0, 1, 0], [], []>} : vector<8x8xf32>, vector<8x8xf32>, vector<8x8xf32> -> vector<8x8xf32>
    %203 = arith.addf %202, %8 : vector<8x8xf32>
    %cst_93 = arith.constant dense<0xFF800000> : vector<8xf32>
    %204 = vector.multi_reduction <maximumf>, %203, %cst_93 [1] : vector<8x8xf32> to vector<8xf32>
    %205 = vector.shape_cast %204 : vector<8xf32> to vector<8x1xf32>
    %206 = vector.broadcast %205 : vector<8x1xf32> to vector<8x8xf32>
    %207 = arith.subf %203, %206 : vector<8x8xf32>
    %208 = math.exp %207 : vector<8x8xf32>
    %cst_94 = arith.constant dense<0.000000e+00> : vector<8xf32>
    %209 = vector.multi_reduction <add>, %208, %cst_94 [1] : vector<8x8xf32> to vector<8xf32>
    %210 = vector.shape_cast %209 : vector<8xf32> to vector<8x1xf32>
    %211 = vector.broadcast %210 : vector<8x1xf32> to vector<8x8xf32>
    %212 = arith.divf %208, %211 : vector<8x8xf32>
    %cst_95 = arith.constant dense<0.000000e+00> : vector<8x8xf32>
    %213 = tpu.matmul %212, %201, %cst_95 {dimension_numbers = #tpu.dot_dimension_numbers<[1], [0], [0], [1], [0, 0, 1, 1], [], []>} : vector<8x8xf32>, vector<8x8xf32>, vector<8x8xf32> -> vector<8x8xf32>
    %214 = vector.extract_strided_slice %179 {offsets = [0, 16], sizes = [8, 8], strides = [1, 1]} : vector<8x96xf32> to vector<8x8xf32>
    %cst_96 = arith.constant 0.353553385 : f32
    %215 = vector.broadcast %cst_96 : f32 to vector<8x8xf32>
    %216 = arith.mulf %214, %215 : vector<8x8xf32>
    %217 = vector.extract_strided_slice %179 {offsets = [0, 48], sizes = [8, 8], strides = [1, 1]} : vector<8x96xf32> to vector<8x8xf32>
    %218 = vector.extract_strided_slice %179 {offsets = [0, 80], sizes = [8, 8], strides = [1, 1]} : vector<8x96xf32> to vector<8x8xf32>
    %cst_97 = arith.constant dense<0.000000e+00> : vector<8x8xf32>
    %219 = tpu.matmul %216, %217, %cst_97 {dimension_numbers = #tpu.dot_dimension_numbers<[1], [1], [0], [0], [0, 0, 1, 0], [], []>} : vector<8x8xf32>, vector<8x8xf32>, vector<8x8xf32> -> vector<8x8xf32>
    %220 = arith.addf %219, %8 : vector<8x8xf32>
    %cst_98 = arith.constant dense<0xFF800000> : vector<8xf32>
    %221 = vector.multi_reduction <maximumf>, %220, %cst_98 [1] : vector<8x8xf32> to vector<8xf32>
    %222 = vector.shape_cast %221 : vector<8xf32> to vector<8x1xf32>
    %223 = vector.broadcast %222 : vector<8x1xf32> to vector<8x8xf32>
    %224 = arith.subf %220, %223 : vector<8x8xf32>
    %225 = math.exp %224 : vector<8x8xf32>
    %cst_99 = arith.constant dense<0.000000e+00> : vector<8xf32>
    %226 = vector.multi_reduction <add>, %225, %cst_99 [1] : vector<8x8xf32> to vector<8xf32>
    %227 = vector.shape_cast %226 : vector<8xf32> to vector<8x1xf32>
    %228 = vector.broadcast %227 : vector<8x1xf32> to vector<8x8xf32>
    %229 = arith.divf %225, %228 : vector<8x8xf32>
    %cst_100 = arith.constant dense<0.000000e+00> : vector<8x8xf32>
    %230 = tpu.matmul %229, %218, %cst_100 {dimension_numbers = #tpu.dot_dimension_numbers<[1], [0], [0], [1], [0, 0, 1, 1], [], []>} : vector<8x8xf32>, vector<8x8xf32>, vector<8x8xf32> -> vector<8x8xf32>
    %231 = vector.extract_strided_slice %179 {offsets = [0, 24], sizes = [8, 8], strides = [1, 1]} : vector<8x96xf32> to vector<8x8xf32>
    %cst_101 = arith.constant 0.353553385 : f32
    %232 = vector.broadcast %cst_101 : f32 to vector<8x8xf32>
    %233 = arith.mulf %231, %232 : vector<8x8xf32>
    %234 = vector.extract_strided_slice %179 {offsets = [0, 56], sizes = [8, 8], strides = [1, 1]} : vector<8x96xf32> to vector<8x8xf32>
    %235 = vector.extract_strided_slice %179 {offsets = [0, 88], sizes = [8, 8], strides = [1, 1]} : vector<8x96xf32> to vector<8x8xf32>
    %cst_102 = arith.constant dense<0.000000e+00> : vector<8x8xf32>
    %236 = tpu.matmul %233, %234, %cst_102 {dimension_numbers = #tpu.dot_dimension_numbers<[1], [1], [0], [0], [0, 0, 1, 0], [], []>} : vector<8x8xf32>, vector<8x8xf32>, vector<8x8xf32> -> vector<8x8xf32>
    %237 = arith.addf %236, %8 : vector<8x8xf32>
    %cst_103 = arith.constant dense<0xFF800000> : vector<8xf32>
    %238 = vector.multi_reduction <maximumf>, %237, %cst_103 [1] : vector<8x8xf32> to vector<8xf32>
    %239 = vector.shape_cast %238 : vector<8xf32> to vector<8x1xf32>
    %240 = vector.broadcast %239 : vector<8x1xf32> to vector<8x8xf32>
    %241 = arith.subf %237, %240 : vector<8x8xf32>
    %242 = math.exp %241 : vector<8x8xf32>
    %cst_104 = arith.constant dense<0.000000e+00> : vector<8xf32>
    %243 = vector.multi_reduction <add>, %242, %cst_104 [1] : vector<8x8xf32> to vector<8xf32>
    %244 = vector.shape_cast %243 : vector<8xf32> to vector<8x1xf32>
    %245 = vector.broadcast %244 : vector<8x1xf32> to vector<8x8xf32>
    %246 = arith.divf %242, %245 : vector<8x8xf32>
    %cst_105 = arith.constant dense<0.000000e+00> : vector<8x8xf32>
    %247 = tpu.matmul %246, %235, %cst_105 {dimension_numbers = #tpu.dot_dimension_numbers<[1], [0], [0], [1], [0, 0, 1, 1], [], []>} : vector<8x8xf32>, vector<8x8xf32>, vector<8x8xf32> -> vector<8x8xf32>
    %248 = tpu.concatenate %196, %213, %230, %247 in 1 : vector<8x8xf32>, vector<8x8xf32>, vector<8x8xf32>, vector<8x8xf32> -> vector<8x32xf32>
    %c1_106 = arith.constant 1 : index
    %c0_107 = arith.constant 0 : index
    %c0_108 = arith.constant 0 : index
    %249 = vector.load %arg7[%c1_106, %c0_107, %c0_108] : memref<2x32x32xf32, #tpu.memory_space<vmem>>, vector<1x32x32xf32>
    %250 = vector.shape_cast %249 : vector<1x32x32xf32> to vector<32x32xf32>
    %cst_109 = arith.constant dense<0.000000e+00> : vector<8x32xf32>
    %251 = tpu.matmul %248, %250, %cst_109 {dimension_numbers = #tpu.dot_dimension_numbers<[1], [0], [0], [1], [0, 0, 1, 1], [], []>} : vector<8x32xf32>, vector<32x32xf32>, vector<8x32xf32> -> vector<8x32xf32>
    %c1_110 = arith.constant 1 : index
    %c0_111 = arith.constant 0 : index
    %c0_112 = arith.constant 0 : index
    %252 = vector.load %arg8[%c1_110, %c0_111, %c0_112] : memref<2x1x32xf32, #tpu.memory_space<vmem>>, vector<1x1x32xf32>
    %253 = vector.shape_cast %252 : vector<1x1x32xf32> to vector<1x32xf32>
    %254 = vector.broadcast %253 : vector<1x32xf32> to vector<8x32xf32>
    %255 = arith.addf %251, %254 : vector<8x32xf32>
    %256 = arith.addf %255, %146 : vector<8x32xf32>
    %c1_113 = arith.constant 1 : index
    %c0_114 = arith.constant 0 : index
    %c0_115 = arith.constant 0 : index
    %257 = vector.load %arg9[%c1_113, %c0_114, %c0_115] : memref<2x1x32xf32, #tpu.memory_space<vmem>>, vector<1x1x32xf32>
    %258 = vector.shape_cast %257 : vector<1x1x32xf32> to vector<1x32xf32>
    %c1_116 = arith.constant 1 : index
    %c0_117 = arith.constant 0 : index
    %c0_118 = arith.constant 0 : index
    %259 = vector.load %arg10[%c1_116, %c0_117, %c0_118] : memref<2x1x32xf32, #tpu.memory_space<vmem>>, vector<1x1x32xf32>
    %260 = vector.shape_cast %259 : vector<1x1x32xf32> to vector<1x32xf32>
    %cst_119 = arith.constant dense<0.000000e+00> : vector<8xf32>
    %261 = vector.multi_reduction <add>, %256, %cst_119 [1] : vector<8x32xf32> to vector<8xf32>
    %262 = vector.shape_cast %261 : vector<8xf32> to vector<8x1xf32>
    %cst_120 = arith.constant 3.200000e+01 : f32
    %263 = vector.broadcast %cst_120 : f32 to vector<8x1xf32>
    %264 = arith.divf %262, %263 : vector<8x1xf32>
    %265 = vector.broadcast %264 : vector<8x1xf32> to vector<8x32xf32>
    %266 = arith.subf %256, %265 : vector<8x32xf32>
    %267 = arith.mulf %266, %266 : vector<8x32xf32>
    %cst_121 = arith.constant dense<0.000000e+00> : vector<8xf32>
    %268 = vector.multi_reduction <add>, %267, %cst_121 [1] : vector<8x32xf32> to vector<8xf32>
    %269 = vector.shape_cast %268 : vector<8xf32> to vector<8x1xf32>
    %cst_122 = arith.constant 3.200000e+01 : f32
    %270 = vector.broadcast %cst_122 : f32 to vector<8x1xf32>
    %271 = arith.divf %269, %270 : vector<8x1xf32>
    %272 = vector.broadcast %264 : vector<8x1xf32> to vector<8x32xf32>
    %273 = arith.subf %256, %272 : vector<8x32xf32>
    %cst_123 = arith.constant 9.99999997E-7 : f32
    %274 = vector.broadcast %cst_123 : f32 to vector<8x1xf32>
    %275 = arith.addf %271, %274 : vector<8x1xf32>
    %276 = math.rsqrt %275 : vector<8x1xf32>
    %277 = vector.broadcast %276 : vector<8x1xf32> to vector<8x32xf32>
    %278 = arith.mulf %273, %277 : vector<8x32xf32>
    %279 = vector.broadcast %258 : vector<1x32xf32> to vector<8x32xf32>
    %280 = arith.mulf %278, %279 : vector<8x32xf32>
    %281 = vector.broadcast %260 : vector<1x32xf32> to vector<8x32xf32>
    %282 = arith.addf %280, %281 : vector<8x32xf32>
    %c1_124 = arith.constant 1 : index
    %c0_125 = arith.constant 0 : index
    %c0_126 = arith.constant 0 : index
    %283 = vector.load %arg11[%c1_124, %c0_125, %c0_126] : memref<2x32x64xf32, #tpu.memory_space<vmem>>, vector<1x32x64xf32>
    %284 = vector.shape_cast %283 : vector<1x32x64xf32> to vector<32x64xf32>
    %cst_127 = arith.constant dense<0.000000e+00> : vector<8x64xf32>
    %285 = tpu.matmul %282, %284, %cst_127 {dimension_numbers = #tpu.dot_dimension_numbers<[1], [0], [0], [1], [0, 0, 1, 1], [], []>} : vector<8x32xf32>, vector<32x64xf32>, vector<8x64xf32> -> vector<8x64xf32>
    %c1_128 = arith.constant 1 : index
    %c0_129 = arith.constant 0 : index
    %c0_130 = arith.constant 0 : index
    %286 = vector.load %arg12[%c1_128, %c0_129, %c0_130] : memref<2x1x64xf32, #tpu.memory_space<vmem>>, vector<1x1x64xf32>
    %287 = vector.shape_cast %286 : vector<1x1x64xf32> to vector<1x64xf32>
    %288 = vector.broadcast %287 : vector<1x64xf32> to vector<8x64xf32>
    %289 = arith.addf %285, %288 : vector<8x64xf32>
    %cst_131 = arith.constant 5.000000e-01 : f32
    %290 = vector.broadcast %cst_131 : f32 to vector<8x64xf32>
    %291 = arith.mulf %290, %289 : vector<8x64xf32>
    %cst_132 = arith.constant 4.471500e-02 : f32
    %292 = vector.broadcast %cst_132 : f32 to vector<8x64xf32>
    %293 = arith.mulf %292, %289 : vector<8x64xf32>
    %294 = arith.mulf %293, %289 : vector<8x64xf32>
    %295 = arith.mulf %294, %289 : vector<8x64xf32>
    %296 = arith.addf %289, %295 : vector<8x64xf32>
    %cst_133 = arith.constant 0.797884583 : f32
    %297 = vector.broadcast %cst_133 : f32 to vector<8x64xf32>
    %298 = arith.mulf %297, %296 : vector<8x64xf32>
    %299 = math.tanh %298 : vector<8x64xf32>
    %cst_134 = arith.constant 1.000000e+00 : f32
    %300 = vector.broadcast %cst_134 : f32 to vector<8x64xf32>
    %301 = arith.addf %300, %299 : vector<8x64xf32>
    %302 = arith.mulf %291, %301 : vector<8x64xf32>
    %c1_135 = arith.constant 1 : index
    %c0_136 = arith.constant 0 : index
    %c0_137 = arith.constant 0 : index
    %303 = vector.load %arg13[%c1_135, %c0_136, %c0_137] : memref<2x64x32xf32, #tpu.memory_space<vmem>>, vector<1x64x32xf32>
    %304 = vector.shape_cast %303 : vector<1x64x32xf32> to vector<64x32xf32>
    %cst_138 = arith.constant dense<0.000000e+00> : vector<8x32xf32>
    %305 = tpu.matmul %302, %304, %cst_138 {dimension_numbers = #tpu.dot_dimension_numbers<[1], [0], [0], [1], [0, 0, 1, 1], [], []>} : vector<8x64xf32>, vector<64x32xf32>, vector<8x32xf32> -> vector<8x32xf32>
    %c1_139 = arith.constant 1 : index
    %c0_140 = arith.constant 0 : index
    %c0_141 = arith.constant 0 : index
    %306 = vector.load %arg14[%c1_139, %c0_140, %c0_141] : memref<2x1x32xf32, #tpu.memory_space<vmem>>, vector<1x1x32xf32>
    %307 = vector.shape_cast %306 : vector<1x1x32xf32> to vector<1x32xf32>
    %308 = vector.broadcast %307 : vector<1x32xf32> to vector<8x32xf32>
    %309 = arith.addf %305, %308 : vector<8x32xf32>
    %310 = arith.addf %309, %256 : vector<8x32xf32>
    %c0_142 = arith.constant 0 : index
    %c0_143 = arith.constant 0 : index
    %311 = vector.load %arg15[%c0_142, %c0_143] : memref<1x32xf32, #tpu.memory_space<vmem>>, vector<1x32xf32>
    %c0_144 = arith.constant 0 : index
    %c0_145 = arith.constant 0 : index
    %312 = vector.load %arg16[%c0_144, %c0_145] : memref<1x32xf32, #tpu.memory_space<vmem>>, vector<1x32xf32>
    %cst_146 = arith.constant dense<0.000000e+00> : vector<8xf32>
    %313 = vector.multi_reduction <add>, %310, %cst_146 [1] : vector<8x32xf32> to vector<8xf32>
    %314 = vector.shape_cast %313 : vector<8xf32> to vector<8x1xf32>
    %cst_147 = arith.constant 3.200000e+01 : f32
    %315 = vector.broadcast %cst_147 : f32 to vector<8x1xf32>
    %316 = arith.divf %314, %315 : vector<8x1xf32>
    %317 = vector.broadcast %316 : vector<8x1xf32> to vector<8x32xf32>
    %318 = arith.subf %310, %317 : vector<8x32xf32>
    %319 = arith.mulf %318, %318 : vector<8x32xf32>
    %cst_148 = arith.constant dense<0.000000e+00> : vector<8xf32>
    %320 = vector.multi_reduction <add>, %319, %cst_148 [1] : vector<8x32xf32> to vector<8xf32>
    %321 = vector.shape_cast %320 : vector<8xf32> to vector<8x1xf32>
    %cst_149 = arith.constant 3.200000e+01 : f32
    %322 = vector.broadcast %cst_149 : f32 to vector<8x1xf32>
    %323 = arith.divf %321, %322 : vector<8x1xf32>
    %324 = vector.broadcast %316 : vector<8x1xf32> to vector<8x32xf32>
    %325 = arith.subf %310, %324 : vector<8x32xf32>
    %cst_150 = arith.constant 9.99999997E-7 : f32
    %326 = vector.broadcast %cst_150 : f32 to vector<8x1xf32>
    %327 = arith.addf %323, %326 : vector<8x1xf32>
    %328 = math.rsqrt %327 : vector<8x1xf32>
    %329 = vector.broadcast %328 : vector<8x1xf32> to vector<8x32xf32>
    %330 = arith.mulf %325, %329 : vector<8x32xf32>
    %331 = vector.broadcast %311 : vector<1x32xf32> to vector<8x32xf32>
    %332 = arith.mulf %330, %331 : vector<8x32xf32>
    %333 = vector.broadcast %312 : vector<1x32xf32> to vector<8x32xf32>
    %334 = arith.addf %332, %333 : vector<8x32xf32>
    %c0_151 = arith.constant 0 : index
    %c0_152 = arith.constant 0 : index
    %335 = vector.load %arg17[%c0_151, %c0_152] : memref<1x32xf32, #tpu.memory_space<vmem>>, vector<1x32xf32>
    %cst_153 = arith.constant dense<0.000000e+00> : vector<1x8xf32>
    %336 = tpu.matmul %335, %334, %cst_153 {dimension_numbers = #tpu.dot_dimension_numbers<[1], [1], [0], [0], [0, 0, 1, 0], [], []>} : vector<1x32xf32>, vector<8x32xf32>, vector<1x8xf32> -> vector<1x8xf32>
    %c0_154 = arith.constant 0 : index
    %c0_155 = arith.constant 0 : index
    %337 = vector.load %arg18[%c0_154, %c0_155] : memref<1x1xf32, #tpu.memory_space<vmem>>, vector<1x1xf32>
    %338 = vector.broadcast %337 : vector<1x1xf32> to vector<1x8xf32>
    %339 = arith.addf %336, %338 : vector<1x8xf32>
    %340 = arith.negf %339 : vector<1x8xf32>
    %341 = math.exp %340 : vector<1x8xf32>
    %cst_156 = arith.constant 1.000000e+00 : f32
    %342 = vector.broadcast %cst_156 : f32 to vector<1x8xf32>
    %343 = arith.addf %342, %341 : vector<1x8xf32>
    %344 = arith.divf %342, %343 : vector<1x8xf32>
    %345 = arith.mulf %344, %1 : vector<1x8xf32>
    %c0_157 = arith.constant 0 : index
    %c0_158 = arith.constant 0 : index
    %346 = vector.load %arg19[%c0_157, %c0_158] : memref<1x8xf32, #tpu.memory_space<vmem>>, vector<1x8xf32>
    tpu.vector_store %arg19[%c0_157, %c0_158], %345 {strides = array<i32>} : memref<1x8xf32, #tpu.memory_space<vmem>>, vector<1x8xf32>,
    return
  }
}

</mosaic_0001>

<bundles_post_ra>
// kernel: ext_summarizer_forward.3
= control target key start
LH: loop header
LB: loop body
LE: loop exit
PB: predicated region body
PF: predicated region fallthrough
CT: control target
= control target key end

     0   :  { %vm81_vm0 = vcmask 261120   ;;  %s1367_s30 = smov 64   ;;  %s1368_s21 = smov 96   ;;  %vm109_vm1 = vcmask 64512   ;;  %s1838_s5 = inlined_call_operand.vmem [shape: f32[2,32,96], index: 5, kind: input, shape index: {}]   ;;  %s1839_s6 = inlined_call_operand.vmem [shape: f32[2,1,96], index: 6, kind: input, shape index: {}]   ;;  %s1840_s0 = inlined_call_operand.vmem [shape: f32[8,32], index: 0, kind: input, shape index: {}]   ;;  %s1841_s1 = inlined_call_operand.vmem [shape: f32[1,8], index: 1, kind: input, shape index: {}]   ;;  %s1842_s2 = inlined_call_operand.vmem [shape: f32[8,8], index: 2, kind: input, shape index: {}]   ;;  %s1843_s8 = inlined_call_operand.vmem [shape: f32[2,1,32], index: 8, kind: input, shape index: {}, may-alias: {4,8,10,14}]   ;;  %s1844_s7 = inlined_call_operand.vmem [shape: f32[2,32,32], index: 7, kind: input, shape index: {}]   ;;  %s1845_s9 = inlined_call_operand.vmem [shape: f32[2,1,32], index: 9, kind: input, shape index: {}, may-alias: {3,9}]   ;;  %s1846_s10 = inlined_call_operand.vmem [shape: f32[2,1,32], index: 10, kind: input, shape index: {}, may-alias: {4,8,10,14}]   ;;  %s1847_s12 = inlined_call_operand.vmem [shape: f32[2,1,64], index: 12, kind: input, shape index: {}]   ;;  %s1848_s11 = inlined_call_operand.vmem [shape: f32[2,32,64], index: 11, kind: input, shape index: {}]   ;;  %s1849_s14 = inlined_call_operand.vmem [shape: f32[2,1,32], index: 14, kind: input, shape index: {}, may-alias: {4,8,10,14}]   ;;  %s1850_s13 = inlined_call_operand.vmem [shape: f32[2,64,32], index: 13, kind: input, shape index: {}]   ;;  %s1851_s3 = inlined_call_operand.vmem [shape: f32[2,1,32], index: 3, kind: input, shape index: {}, may-alias: {3,9}]   ;;  %s1852_s4 = inlined_call_operand.vmem [shape: f32[2,1,32], index: 4, kind: input, shape index: {}, may-alias: {4,8,10,14}]   ;;  %s1853_s15 = inlined_call_operand.vmem [shape: f32[1,32], index: 15, kind: input, shape index: {}]   ;;  %s1854_s16 = inlined_call_operand.vmem [shape: f32[1,32], index: 16, kind: input, shape index: {}]   ;;  %s1855_s18 = inlined_call_operand.<no memory space> [shape: f32[1,1], index: 18, kind: input, shape index: {}]   ;;  %s1856_s17 = inlined_call_operand.vmem [shape: f32[1,32], index: 17, kind: input, shape index: {}]   ;;  %s1857_s19 = inlined_call_operand.vmem [shape: f32[1,8], index: 19, kind: output, shape index: {}]  }
   0x1   :  { %1872 = sst [smem:[#allocation3_spill]] %s1838_s5  ;;  %s1866_s5 = smov 88   ;;  %v66_v20 = vld [vmem:[%s1842_s2] sm:$0xff] }
   0x2   :  { %1873 = sst [smem:[#allocation4_spill]] %s1839_s6  ;;  %s1369_s6 = smov 120  }
   0x3   :  { %1874 = sst [smem:[#allocation5_spill]] %s1840_s0  ;;  %s1871_s22 = smov 80  }
   0x4   :  { %1875 = sst [smem:[#allocation6_spill]] %s1841_s1  ;;  %s1864_s0 = smov 72  }
   0x5   :  { %s1876_s20 = sld [smem:[#allocation3_spill]]  ;;  %s1865_s23 = smov 112  }
   0x6   :  { %s1877_s26 = sld [smem:[#allocation5_spill]]  ;;  %s1867_s28 = smov 104  }
   0x7   :  { %s1878_s29 = sld [smem:[#allocation4_spill]]  ;;  %s1862_s2 = smov 40  }
   0x8   :  { %s1879_s1 = sld [smem:[#allocation6_spill]]  ;;  %s1863_s24 = smov 56  }
   0x9   :  { %s1861_s25 = smov 48   ;;  %s1868_s27 = smov 16  }
   0xb   :  { %v76_v0 = vld [vmem:[%s1876_s20 + $0x18] sm:$0xff]  ;;  %v75_v1 = vld [vmem:[%s1876_s20 + $0x10] sm:$0xff]  ;;  %v74_v2 = vld [vmem:[%s1876_s20 + $0x8] sm:$0xff] }
   0xc   :  { %97 = vmatpush.msra.mxu0 %v76_v0  ;;  %v73_v3 = vld [vmem:[%s1876_s20] sm:$0xff] }
   0xd   :  { %v1497_v4 = vld [vmem:[%s1877_s26] sm:$0xff]  ;;  %s1869_s26 = smov 8  }
   0xe   :  { %98 = vmatpush.msra.mxu0 %v75_v1  ;;  %v1299_v5 = vld [vmem:[%s1878_s29] ss:$0 sm:$0xff] }
   0xf   :  { %v65_v16 = vld [vmem:[%s1879_s1] sm:$0x1] }
  0x10   :  { %99 = vmatpush.msra.mxu0 %v74_v2  ;;  %v67_v17 = vsub.f32 1.0, %v65_v16 }
  0x12   :  { %100 = vmatpush.msra.mxu0 %v73_v3  ;;  %v68_v18 = vmul.f32 -1e+18, %v67_v17 }
  0x13   :  { %1219 = vmatmul.msk.f32.vlgmr.msra.gmra.mxu0 %vm81_vm0, %v1497_v4 }
  0x14   :  { %v70_v19 = vperm.slane %v68_v18, 0 }
  0x16   :  { %v1531_v21 = vadd.f32 %v70_v19, %v66_v20 }
  0x90   :  { %v102_v6 = vpop.f32.mrf.mxu0 }
  0x91   :  { %v1504_v7 = vadd.f32 %v1299_v5, %v102_v6 }
  0x93   :  { %187 = vrot.lane.b32.xlu2 %v1504_v7, %s1866_s5  ;;  %159 = vrot.lane.b32.xlu1 %v1504_v7, %s1367_s30  ;;  %v105_v8 = vmul.f32 0.35355338, %v1504_v7 }
  0x94   :  { %107 = vrot.lane.b32.xlu0 %v1504_v7, %s1368_s21 }
  0x9b   :  { %185 = vrot.lane.b32.xlu2 %v105_v8, %s1369_s6 }
  0xa3   :  { %265 = vrot.lane.b32.xlu2 %v1504_v7, %s1871_s22  ;;  %s1890_s22 = smov 16  }
  0xab   :  { %343 = vrot.lane.b32.xlu2 %v1504_v7, %s1864_s0  ;;  %s1886_s0 = smov 40  }
  0xb3   :  { %263 = vrot.lane.b32.xlu2 %v105_v8, %s1865_s23  ;;  %s1887_s23 = smov 48  }
  0xed   :  { %v188_v9 = vpop.permute.xlu2 %187 }
  0xf5   :  { %v186_v10 = vpop.permute.xlu2 %185 }
  0xfd   :  { %v266_v11 = vpop.permute.xlu2 %265 }
 0x105   :  { %v160_v12 = vpop.permute.xlu1 %159  ;;  %v344_v13 = vpop.permute.xlu2 %343 }
 0x106   :  { %v108_v14 = vpop.permute.xlu0 %107  ;;  %180 = vmatpush.msra.mxu3 %v160_v12  ;;  %1229 = vmatpush.xpose.msk.msrb.mxu0 %vm109_vm1, %v344_v13 }
 0x107   :  { %1220 = vmatpush.xpose.msk.msra.mxu1 %vm109_vm1, %v108_v14 }
 0x108   :  { %1223 = vmatpush.xpose.msk.msrb.mxu3 %vm109_vm1, %v188_v9 }
 0x10a   :  { %1221 = vmatmul.msk.f32.vlgmr.msra.gmra.mxu1 %vm109_vm1, %v105_v8 }
 0x10b   :  { %1226 = vmatpush.xpose.msk.msrb.mxu1 %vm109_vm1, %v266_v11 }
 0x10d   :  { %v264_v15 = vpop.permute.xlu2 %263 }
 0x112   :  { %1227 = vmatmul.msk.f32.vlgmr.msrb.gmra.mxu1 %vm109_vm1, %v264_v15 }
 0x187   :  { %v132_v22 = vpop.f32.mrf.mxu1 }
 0x188   :  { %v133_v23 = vadd.f32 %v132_v22, %v1531_v21 }
 0x18a   :  { %v135_v24 = vsel %vm109_vm1, %v133_v23, -inf }
 0x18b   :  { %136 = vmax.xlane.f32.xlu0 %v135_v24 }
 0x18f   :  { %v288_v30 = vpop.f32.mrf.mxu1 }
 0x190   :  { %v289_v31 = vadd.f32 %v288_v30, %v1531_v21 }
 0x192   :  { %v291_v32 = vsel %vm109_vm1, %v289_v31, -inf }
 0x1fe   :  { %v137_v25 = vpop.xlane.xlu0 %136 }
 0x1ff   :  { %v138_v26 = vsub.f32 %v133_v23, %v137_v25 }
 0x201   :  { %v139_v27 = vmul.f32 1.442695, %v138_v26 }
 0x203   :  { %1315 = vpow2.f32 %v139_v27 }
 0x209   :  { %v1316_v28 = vpop.eup %1315 }
 0x20a   :  { %v141_v29 = vsel %vm109_vm1, %v1316_v28, 0.0 }
 0x20b   :  { %142 = vadd.xlane.f32.xlu1 %v141_v29 }
 0x224   :  { %341 = vrot.lane.b32.xlu1 %v105_v8, %s1867_s28  ;;  %s1888_s28 = smov 8  }
 0x24e   :  { %292 = vmax.xlane.f32.xlu1 %v291_v32 }
 0x267   :  { %393 = vrot.lane.b32.xlu1 %v1504_v7, %s1862_s2  ;;  %s1889_s2 = smov 24  }
 0x27e   :  { %v143_v33 = vpop.xlane.xlu1 %142 }
 0x27f   :  { %1317 = vrcp.f32 %v143_v33  ;;  %v155_v37 = vand.u32 2147483648, %v143_v33  ;;  %v153_v39 = vand.u32 2147483647, %v143_v33  ;;  %vm149_vm3 = vweird.f32 %v143_v33 }
 0x281   :  { %v156_v41 = vor.u32 1.1754944e-38, %v155_v37  ;;  %vm154_vm5 = vcmp.eq.f32.partialorder %v153_v39, 8.507059e+37 }
 0x285   :  { %v1318_v34 = vpop.eup %1317 }
 0x286   :  { %v145_v35 = vmul.f32 %v1318_v34, %v143_v33  ;;  %vm150_vm2 = vweird.f32 %v1318_v34 }
 0x287   :  { %vm151_vm4 = vmor %vm149_vm3, %vm150_vm2 }
 0x288   :  { %v146_v36 = vsub.f32 1.0, %v145_v35 }
 0x28a   :  { %v147_v38 = vmul.f32 %v1318_v34, %v146_v36 }
 0x28c   :  { %v148_v40 = vadd.f32 %v1318_v34, %v147_v38 }
 0x28e   :  { %v152_v42 = vsel %vm151_vm4, %v1318_v34, %v148_v40  ;;  %vm432_vm4 = vcmask 130048  }
 0x28f   :  { %v157_v43 = vsel %vm154_vm5, %v156_v41, %v152_v42  ;;  %vm434_vm5 = vcmask 195584  }
 0x290   :  { %v158_v44 = vmul.f32 %v1316_v28, %v157_v43 }
 0x292   :  { %1222 = vmatmul.msk.f32.vlgmr.msra.gmra.mxu3 %vm109_vm1, %v158_v44 }
 0x296   :  { %v342_v45 = vpop.permute.xlu1 %341 }
 0x297   :  { %1230 = vmatmul.msk.f32.vlgmr.msrb.gmra.mxu0 %vm109_vm1, %v342_v45 }
 0x29a   :  { %1224 = vmatmul.msk.f32.vlgmr.msrb.gmra.mxu3 %vm109_vm1, %v186_v10 }
 0x2c1   :  { %v293_v46 = vpop.xlane.xlu1 %292 }
 0x2c2   :  { %v294_v47 = vsub.f32 %v289_v31, %v293_v46 }
 0x2c4   :  { %v295_v48 = vmul.f32 1.442695, %v294_v47 }
 0x2c6   :  { %1319 = vpow2.f32 %v295_v48  ;;  %v439_v48 = vld [vmem:[%s1844_s7 + $0x18] sm:$0xff] }
 0x2c7   :  { %459 = vmatpush.msra.mxu1 %v439_v48 }
 0x2cc   :  { %v1548_v53 = vpop.eup %1319 }
 0x2cd   :  { %v297_v56 = vsel %vm109_vm1, %v1548_v53, 0.0 }
 0x2d9   :  { %v394_v3 = vpop.permute.xlu1 %393 }
 0x314   :  { %v366_v49 = vpop.f32.mrf.mxu0 }
 0x315   :  { %v367_v50 = vadd.f32 %v366_v49, %v1531_v21  ;;  %v1545_v51 = vpop.f32.mrf.mxu3  ;;  %v438_v49 = vld [vmem:[%s1844_s7 + $0x10] sm:$0xff] }
 0x316   :  { %460 = vmatpush.msra.mxu1 %v438_v49 }
 0x317   :  { %v369_v52 = vsel %vm109_vm1, %v367_v50, -inf }
 0x318   :  { %370 = vmax.xlane.f32.xlu0 %v369_v52  ;;  %v436_v52 = vld [vmem:[%s1844_s7] sm:$0xff] }
 0x31d   :  { %v210_v54 = vpop.f32.mrf.mxu3 }
 0x31e   :  { %v211_v55 = vadd.f32 %v210_v54, %v1531_v21 }
 0x320   :  { %298 = vadd.xlane.f32.xlu0 %v297_v56  ;;  %v213_v57 = vsel %vm109_vm1, %v211_v55, -inf }
 0x321   :  { %214 = vmax.xlane.f32.xlu2 %v213_v57 }
 0x339   :  { %237 = vrot.lane.b32.xlu2 %v1504_v7, %s1863_s24 }
 0x38b   :  { %v371_v58 = vpop.xlane.xlu0 %370 }
 0x38c   :  { %v372_v59 = vsub.f32 %v367_v50, %v371_v58  ;;  %v437_v50 = vld [vmem:[%s1844_s7 + $0x8] sm:$0xff] }
 0x38d   :  { %461 = vmatpush.msra.mxu1 %v437_v50 }
 0x38e   :  { %v373_v60 = vmul.f32 1.442695, %v372_v59  ;;  %v1300_v59 = vld [vmem:[%s1843_s8] ss:$0 sm:$0xff] }
 0x38f   :  { %462 = vmatpush.msra.mxu1 %v436_v52  ;;  %v1304_v52 = vld [vmem:[%s1849_s14] ss:$0 sm:$0xff] }
 0x390   :  { %1321 = vpow2.f32 %v373_v60 }
 0x393   :  { %v299_v8 = vpop.xlane.xlu0 %298 }
 0x394   :  { %v215_v61 = vpop.xlane.xlu2 %214  ;;  %vm305_vm7 = vweird.f32 %v299_v8  ;;  %v311_v22 = vand.u32 2147483648, %v299_v8 }
 0x395   :  { %v216_v62 = vsub.f32 %v211_v55, %v215_v61 }
 0x396   :  { %v1556_v63 = vpop.eup %1321  ;;  %v312_v29 = vor.u32 1.1754944e-38, %v311_v22 }
 0x397   :  { %v217_v0 = vmul.f32 1.442695, %v216_v62  ;;  %v375_v1 = vsel %vm109_vm1, %v1556_v63, 0.0 }
 0x398   :  { %376 = vadd.xlane.f32.xlu0 %v375_v1 }
 0x399   :  { %1323 = vpow2.f32 %v217_v0 }
 0x39a   :  { %1325 = vrcp.f32 %v299_v8 }
 0x39c   :  { %v238_v2 = vpop.permute.xlu2 %237 }
 0x39d   :  { %258 = vmatpush.msra.mxu2 %v238_v2 }
 0x39f   :  { %414 = vmatpush.msrb.mxu2 %v394_v3  ;;  %v1324_v5 = vpop.eup %1323 }
 0x3a0   :  { %v219_v6 = vsel %vm109_vm1, %v1324_v5, 0.0  ;;  %v1326_v10 = vpop.eup %1325 }
 0x3a1   :  { %220 = vadd.xlane.f32.xlu0 %v219_v6  ;;  %v301_v11 = vmul.f32 %v1326_v10, %v299_v8  ;;  %vm306_vm6 = vweird.f32 %v1326_v10 }
 0x3a2   :  { %vm307_vm8 = vmor %vm305_vm7, %vm306_vm6 }
 0x3a3   :  { %v302_v12 = vsub.f32 1.0, %v301_v11 }
 0x3a5   :  { %v303_v15 = vmul.f32 %v1326_v10, %v302_v12  ;;  %v510_v12 = vld [vmem:[%s1848_s11 + $0x18] sm:$0xff] }
 0x3a7   :  { %v304_v18 = vadd.f32 %v1326_v10, %v303_v15  ;;  %v507_v15 = vld [vmem:[%s1848_s11] sm:$0xff] }
 0x3a9   :  { %v308_v24 = vsel %vm307_vm8, %v1326_v10, %v304_v18 }
 0x3b5   :  { %315 = vrot.lane.b32.xlu0 %v1504_v7, %s1861_s25  ;;  %v309_v7 = vand.u32 2147483647, %v299_v8  ;;  %s1870_s25 = smov 24  }
 0x3b7   :  { %vm310_vm10 = vcmp.eq.f32.partialorder %v309_v7, 8.507059e+37 }
 0x3b8   :  { %v313_v31 = vsel %vm310_vm10, %v312_v29, %v308_v24  ;;  %vm559_vm10 = vcmask 523264  }
 0x3b9   :  { %v314_v40 = vmul.f32 %v1548_v53, %v313_v31  ;;  %v554_v31 = vld [vmem:[%s1850_s13 + $0x38] sm:$0xff] }
 0x3ba   :  { %571 = vmatpush.msra.mxu0 %v554_v31 }
 0x40b   :  { %v377_v9 = vpop.xlane.xlu0 %376 }
 0x40c   :  { %1327 = vrcp.f32 %v377_v9  ;;  %v389_v35 = vand.u32 2147483648, %v377_v9  ;;  %vm383_vm15 = vweird.f32 %v377_v9  ;;  %v387_v37 = vand.u32 2147483647, %v377_v9 }
 0x40e   :  { %v390_v42 = vor.u32 1.1754944e-38, %v389_v35  ;;  %vm388_vm3 = vcmp.eq.f32.partialorder %v387_v37, 8.507059e+37  ;;  %v550_v35 = vld [vmem:[%s1850_s13 + $0x18] sm:$0xff]  ;;  %v548_v37 = vld [vmem:[%s1850_s13 + $0x8] sm:$0xff] }
 0x412   :  { %v1328_v14 = vpop.eup %1327 }
 0x413   :  { %v379_v16 = vmul.f32 %v1328_v14, %v377_v9  ;;  %vm384_vm13 = vweird.f32 %v1328_v14 }
 0x414   :  { %v221_v13 = vpop.xlane.xlu0 %220  ;;  %vm385_vm2 = vmor %vm383_vm15, %vm384_vm13 }
 0x415   :  { %1329 = vrcp.f32 %v221_v13  ;;  %v380_v19 = vsub.f32 1.0, %v379_v16  ;;  %v233_v25 = vand.u32 2147483648, %v221_v13  ;;  %v231_v28 = vand.u32 2147483647, %v221_v13 }
 0x416   :  { %vm227_vm11 = vweird.f32 %v221_v13 }
 0x417   :  { %v381_v26 = vmul.f32 %v1328_v14, %v380_v19  ;;  %v234_v32 = vor.u32 1.1754944e-38, %v233_v25  ;;  %vm232_vm14 = vcmp.eq.f32.partialorder %v231_v28, 8.507059e+37  ;;  %v1301_v25 = vld [vmem:[%s1845_s9] ss:$0 sm:$0xff] }
 0x418   :  { %v1302_v28 = vld [vmem:[%s1846_s10] ss:$0 sm:$0xff] }
 0x419   :  { %v382_v33 = vadd.f32 %v1328_v14, %v381_v26 }
 0x41b   :  { %v1330_v17 = vpop.eup %1329  ;;  %v386_v41 = vsel %vm385_vm2, %v1328_v14, %v382_v33  ;;  %v508_v14 = vld [vmem:[%s1848_s11 + $0x8] sm:$0xff] }
 0x41c   :  { %v223_v20 = vmul.f32 %v1330_v17, %v221_v13  ;;  %vm228_vm9 = vweird.f32 %v1330_v17  ;;  %v391_v43 = vsel %vm388_vm3, %v390_v42, %v386_v41  ;;  %v509_v13 = vld [vmem:[%s1848_s11 + $0x10] sm:$0xff]  ;;  %v552_v33 = vld [vmem:[%s1850_s13 + $0x28] sm:$0xff] }
 0x41d   :  { %vm229_vm12 = vmor %vm227_vm11, %vm228_vm9  ;;  %v392_v44 = vmul.f32 %v1556_v63, %v391_v43  ;;  %v1380_v63 = vmov 32.0  }
 0x41e   :  { %v224_v23 = vsub.f32 1.0, %v223_v20  ;;  %1331 = vrcp.f32 %v1380_v63  ;;  %v1238_v63 = vld [vmem:[%s1876_s20 + $0x28] sm:$0xff] }
 0x420   :  { %v225_v27 = vmul.f32 %v1330_v17, %v224_v23 }
 0x422   :  { %v226_v30 = vadd.f32 %v1330_v17, %v225_v27 }
 0x424   :  { %v230_v34 = vsel %vm229_vm12, %v1330_v17, %v226_v30  ;;  %v1332_v0 = vpop.eup %1331 }
 0x425   :  { %v235_v36 = vsel %vm232_vm14, %v234_v32, %v230_v34  ;;  %v474_v1 = vmul.f32 32.0, %v1332_v0  ;;  %vm478_vm6 = vweird.f32 %v1332_v0  ;;  %v553_v32 = vld [vmem:[%s1850_s13 + $0x30] sm:$0xff]  ;;  %v551_v34 = vld [vmem:[%s1850_s13 + $0x20] sm:$0xff] }
 0x426   :  { %v236_v38 = vmul.f32 %v1324_v5, %v235_v36  ;;  %572 = vmatpush.msra.mxu0 %v553_v32  ;;  %v549_v36 = vld [vmem:[%s1850_s13 + $0x10] sm:$0xff] }
 0x427   :  { %v316_v39 = vpop.permute.xlu0 %315  ;;  %v475_v2 = vsub.f32 1.0, %v474_v1 }
 0x428   :  { %1225 = vmatmul.msk.f32.vlgmr.msra.gmra.mxu2 %vm109_vm1, %v236_v38  ;;  %336 = vmatpush.msra.mxu3 %v316_v39  ;;  %v547_v38 = vld [vmem:[%s1850_s13] sm:$0xff] }
 0x429   :  { %1228 = vmatmul.msk.f32.vlgmr.msra.gmra.mxu3 %vm109_vm1, %v314_v40  ;;  %v476_v3 = vmul.f32 %v1332_v0, %v475_v2  ;;  %573 = vmatpush.msra.mxu0 %v552_v33  ;;  %v1303_v39 = vld [vmem:[%s1847_s12] ss:$0 sm:$0xff] }
 0x42a   :  { %530 = vmatpush.msrb.mxu3 %v510_v12  ;;  %v1305_v12 = vld [vmem:[%s1851_s3 + $0x1] ss:$0 sm:$0xff]  ;;  %s1880_s3 = smov 80  }
 0x42b   :  { %v477_v5 = vadd.f32 %v1332_v0, %v476_v3  ;;  %574 = vmatpush.msra.mxu0 %v551_v34 }
 0x42c   :  { %531 = vmatpush.msrb.mxu3 %v509_v13 }
 0x42d   :  { %v1596_v6 = vsel %vm478_vm6, %v1332_v0, %v477_v5  ;;  %575 = vmatpush.msra.mxu0 %v550_v35  ;;  %v1237_v0 = vld [vmem:[%s1876_s20 + $0x20] sm:$0xff] }
 0x42e   :  { %532 = vmatpush.msrb.mxu3 %v508_v14 }
 0x42f   :  { %576 = vmatpush.msra.mxu0 %v549_v36 }
 0x430   :  { %1231 = vmatmul.msk.f32.vlgmr.msrb.gmra.mxu2 %vm109_vm1, %v392_v44  ;;  %533 = vmatpush.msrb.mxu3 %v507_v15  ;;  %v1306_v15 = vld [vmem:[%s1852_s4 + $0x1] ss:$0 sm:$0xff]  ;;  %s1881_s4 = smov 104  }
 0x431   :  { %577 = vmatpush.msra.mxu0 %v548_v37 }
 0x433   :  { %578 = vmatpush.msra.mxu0 %v547_v38 }
 0x4ab   :  { %v260_v45 = vpop.f32.mrf.mxu2 }
 0x4ac   :  { %420 = vrot.lane.b32.xlu0 %v260_v45, %s1869_s26  ;;  %v338_v46 = vpop.f32.mrf.mxu3 }
 0x4ad   :  { %424 = vrot.lane.b32.xlu2 %v338_v46, %s1868_s27 }
 0x4b3   :  { %v416_v47 = vpop.f32.mrf.mxu2 }
 0x4b4   :  { %428 = vrot.lane.b32.xlu1 %v416_v47, %s1870_s25 }
 0x507   :  { %v425_v55 = vpop.permute.xlu2 %424 }
 0x51e   :  { %v421_v53 = vpop.permute.xlu0 %420 }
 0x51f   :  { %v431_v54 = vsel %vm109_vm1, %v1545_v51, %v421_v53 }
 0x520   :  { %v433_v56 = vsel %vm432_vm4, %v431_v54, %v425_v55 }
 0x526   :  { %v429_v57 = vpop.permute.xlu1 %428 }
 0x527   :  { %v435_v58 = vsel %vm434_vm5, %v433_v56, %v429_v57 }
 0x528   :  { %1232 = vmatmul.msk.f32.vlgmr.msra.gmra.mxu1 %vm81_vm0, %v435_v58 }
 0x5a5   :  { %v464_v60 = vpop.f32.mrf.mxu1 }
 0x5a6   :  { %v465_v61 = vadd.f32 %v1300_v59, %v464_v60 }
 0x5a8   :  { %v1592_v62 = vadd.f32 %v465_v61, %v1497_v4 }
 0x5aa   :  { %v470_v51 = vsel %vm81_vm0, %v1592_v62, 0.0 }
 0x5ab   :  { %471 = vadd.xlane.f32.xlu0 %v470_v51  ;;  %v1240_v51 = vld [vmem:[%s1876_s20 + $0x38] sm:$0xff] }
 0x5ac   :  { %643 = vmatpush.msra.mxu2 %v1240_v51 }
 0x61e   :  { %v472_v8 = vpop.xlane.xlu0 %471 }
 0x61f   :  { %v480_v9 = vmul.f32 %v1596_v6, %v472_v8 }
 0x621   :  { %v481_v4 = vsub.f32 %v1592_v62, %v480_v9 }
 0x623   :  { %v482_v10 = vmul.f32 %v481_v4, %v481_v4 }
 0x625   :  { %v483_v11 = vsel %vm81_vm0, %v482_v10, 0.0 }
 0x626   :  { %484 = vadd.xlane.f32.xlu2 %v483_v11 }
 0x699   :  { %v485_v16 = vpop.xlane.xlu2 %484 }
 0x69a   :  { %v486_v17 = vmul.f32 %v485_v16, %v1596_v6 }
 0x69c   :  { %v487_v18 = vadd.f32 1e-06, %v486_v17 }
 0x69e   :  { %1333 = vrsqrt.f32 %v487_v18  ;;  %vm494_vm8 = vweird.f32 %v487_v18 }
 0x6a4   :  { %v1334_v19 = vpop.eup %1333 }
 0x6a5   :  { %v489_v20 = vmul.f32 %v1334_v19, %v487_v18  ;;  %vm495_vm7 = vweird.f32 %v1334_v19  ;;  %v1307_v18 = vld [vmem:[%s1878_s29 + $0x1] ss:$0 sm:$0xff]  ;;  %s1882_s29 = smov 88  }
 0x6a6   :  { %vm496_vm9 = vmor %vm494_vm8, %vm495_vm7 }
 0x6a7   :  { %v490_v22 = vmul.f32 %v1334_v19, %v489_v20 }
 0x6a9   :  { %v491_v7 = vmul.f32 0.5, %v490_v22 }
 0x6ab   :  { %v492_v23 = vsub.f32 1.5, %v491_v7 }
 0x6ad   :  { %v493_v24 = vmul.f32 %v1334_v19, %v492_v23 }
 0x6af   :  { %v497_v26 = vsel %vm496_vm9, %v1334_v19, %v493_v24 }
 0x6b0   :  { %v498_v27 = vmul.f32 %v497_v26, %v481_v4 }
 0x6b2   :  { %v502_v29 = vmul.f32 %v1301_v25, %v498_v27 }
 0x6b4   :  { %v506_v30 = vadd.f32 %v1302_v28, %v502_v29 }
 0x6b6   :  { %1233 = vmatmul.msk.f32.vlgmr.msrb.gmra.mxu3 %vm81_vm0, %v506_v30 }
 0x739   :  { %v535_v40 = vpop.f32.mrf.mxu3 }
 0x73a   :  { %v536_v41 = vadd.f32 %v1303_v39, %v535_v40 }
 0x73c   :  { %v539_v42 = vmul.f32 0.044715, %v536_v41  ;;  %v538_v48 = vmul.f32 0.5, %v536_v41 }
 0x73e   :  { %v540_v43 = vmul.f32 %v539_v42, %v536_v41 }
 0x740   :  { %v541_v44 = vmul.f32 %v540_v43, %v536_v41 }
 0x742   :  { %v542_v45 = vadd.f32 %v541_v44, %v536_v41 }
 0x744   :  { %v543_v46 = vmul.f32 0.7978846, %v542_v45 }
 0x746   :  { %1335 = vtanh.f32 %v543_v46 }
 0x74c   :  { %v1336_v47 = vpop.eup %1335 }
 0x74d   :  { %v545_v49 = vadd.f32 1.0, %v1336_v47 }
 0x74f   :  { %v546_v50 = vmul.f32 %v545_v49, %v538_v48 }
 0x751   :  { %1234 = vmatmul.msk.f32.vlgmr.msra.gmra.mxu0 %vm559_vm10, %v546_v50 }
 0x7ce   :  { %v580_v53 = vpop.f32.mrf.mxu0 }
 0x7cf   :  { %v581_v54 = vadd.f32 %v1304_v52, %v580_v53 }
 0x7d1   :  { %v1653_v55 = vadd.f32 %v581_v54, %v1592_v62  ;;  %v1239_v62 = vld [vmem:[%s1876_s20 + $0x30] sm:$0xff] }
 0x7d2   :  { %644 = vmatpush.msra.mxu2 %v1239_v62 }
 0x7d3   :  { %v588_v56 = vsel %vm81_vm0, %v1653_v55, 0.0 }
 0x7d4   :  { %589 = vadd.xlane.f32.xlu1 %v588_v56  ;;  %645 = vmatpush.msra.mxu2 %v1238_v63 }
 0x7d6   :  { %646 = vmatpush.msra.mxu2 %v1237_v0 }
 0x847   :  { %v590_v57 = vpop.xlane.xlu1 %589 }
 0x848   :  { %v591_v58 = vmul.f32 %v590_v57, %v1596_v6 }
 0x84a   :  { %v592_v59 = vsub.f32 %v1653_v55, %v591_v58 }
 0x84c   :  { %v593_v60 = vmul.f32 %v592_v59, %v592_v59 }
 0x84e   :  { %v594_v61 = vsel %vm81_vm0, %v593_v60, 0.0 }
 0x84f   :  { %595 = vadd.xlane.f32.xlu0 %v594_v61 }
 0x8c2   :  { %v596_v1 = vpop.xlane.xlu0 %595 }
 0x8c3   :  { %v597_v2 = vmul.f32 %v596_v1, %v1596_v6 }
 0x8c5   :  { %v598_v3 = vadd.f32 1e-06, %v597_v2 }
 0x8c7   :  { %1337 = vrsqrt.f32 %v598_v3  ;;  %vm605_vm12 = vweird.f32 %v598_v3 }
 0x8cd   :  { %v1338_v5 = vpop.eup %1337 }
 0x8ce   :  { %v600_v8 = vmul.f32 %v1338_v5, %v598_v3  ;;  %vm606_vm11 = vweird.f32 %v1338_v5 }
 0x8cf   :  { %vm607_vm13 = vmor %vm605_vm12, %vm606_vm11 }
 0x8d0   :  { %v601_v9 = vmul.f32 %v1338_v5, %v600_v8 }
 0x8d2   :  { %v602_v4 = vmul.f32 0.5, %v601_v9 }
 0x8d4   :  { %v603_v10 = vsub.f32 1.5, %v602_v4 }
 0x8d6   :  { %v604_v11 = vmul.f32 %v1338_v5, %v603_v10 }
 0x8d8   :  { %v608_v13 = vsel %vm607_vm13, %v1338_v5, %v604_v11 }
 0x8d9   :  { %v609_v14 = vmul.f32 %v608_v13, %v592_v59 }
 0x8db   :  { %v613_v16 = vmul.f32 %v1305_v12, %v609_v14 }
 0x8dd   :  { %v617_v17 = vadd.f32 %v1306_v15, %v613_v16 }
 0x8df   :  { %1242 = vmatmul.msk.f32.vlgmr.msra.gmra.mxu2 %vm81_vm0, %v617_v17 }
 0x962   :  { %v648_v19 = vpop.f32.mrf.mxu2 }
 0x963   :  { %v1683_v20 = vadd.f32 %v1307_v18, %v648_v19 }
 0x965   :  { %704 = vrot.lane.b32.xlu0 %v1683_v20, %s1367_s30  ;;  %653 = vrot.lane.b32.xlu2 %v1683_v20, %s1368_s21  ;;  %v651_v22 = vmul.f32 0.35355338, %v1683_v20  ;;  %s1883_s30 = smov 112   ;;  %s1884_s21 = smov 72  }
 0x96d   :  { %730 = vrot.lane.b32.xlu2 %v651_v22, %s1369_s6  ;;  %s1885_s6 = smov 56  }
 0x975   :  { %810 = vrot.lane.b32.xlu2 %v1683_v20, %s1880_s3 }
 0x97d   :  { %886 = vrot.lane.b32.xlu2 %v651_v22, %s1881_s4 }
 0x9bf   :  { %v654_v7 = vpop.permute.xlu2 %653 }
 0x9c0   :  { %1243 = vmatpush.xpose.msk.msrb.mxu1 %vm109_vm1, %v654_v7 }
 0x9c3   :  { %1244 = vmatmul.msk.f32.vlgmr.msrb.gmra.mxu1 %vm109_vm1, %v651_v22 }
 0x9c7   :  { %v731_v23 = vpop.permute.xlu2 %730 }
 0x9cf   :  { %v811_v25 = vpop.permute.xlu2 %810 }
 0x9d7   :  { %v705_v24 = vpop.permute.xlu0 %704  ;;  %v887_v48 = vpop.permute.xlu2 %886 }
 0x9d8   :  { %725 = vmatpush.msra.mxu3 %v705_v24 }
 0x9da   :  { %1249 = vmatpush.xpose.msk.msrb.mxu3 %vm109_vm1, %v811_v25 }
 0xa40   :  { %v677_v26 = vpop.f32.mrf.mxu1 }
 0xa41   :  { %v678_v27 = vadd.f32 %v677_v26, %v1531_v21 }
 0xa43   :  { %v680_v28 = vsel %vm109_vm1, %v678_v27, -inf }
 0xa44   :  { %681 = vmax.xlane.f32.xlu1 %v680_v28 }
 0xa5d   :  { %732 = vrot.lane.b32.xlu1 %v1683_v20, %s1882_s29 }
 0xa65   :  { %808 = vrot.lane.b32.xlu1 %v651_v22, %s1883_s30 }
 0xab7   :  { %v682_v29 = vpop.xlane.xlu1 %681 }
 0xab8   :  { %v683_v30 = vsub.f32 %v678_v27, %v682_v29 }
 0xaba   :  { %v684_v31 = vmul.f32 1.442695, %v683_v30 }
 0xabc   :  { %1339 = vpow2.f32 %v684_v31 }
 0xac2   :  { %v1340_v32 = vpop.eup %1339 }
 0xac3   :  { %v686_v33 = vsel %vm109_vm1, %v1340_v32, 0.0 }
 0xac4   :  { %687 = vadd.xlane.f32.xlu0 %v686_v33 }
 0xacf   :  { %v733_v34 = vpop.permute.xlu1 %732 }
 0xad0   :  { %1246 = vmatpush.xpose.msk.msrb.mxu2 %vm109_vm1, %v733_v34 }
 0xad3   :  { %1247 = vmatmul.msk.f32.vlgmr.msrb.gmra.mxu2 %vm109_vm1, %v731_v23 }
 0xad7   :  { %v809_v49 = vpop.permute.xlu1 %808 }
 0xad8   :  { %888 = vrot.lane.b32.xlu0 %v1683_v20, %s1884_s21 }
 0xb37   :  { %v688_v35 = vpop.xlane.xlu0 %687 }
 0xb38   :  { %1341 = vrcp.f32 %v688_v35  ;;  %v700_v39 = vand.u32 2147483648, %v688_v35  ;;  %v698_v41 = vand.u32 2147483647, %v688_v35  ;;  %vm694_vm15 = vweird.f32 %v688_v35 }
 0xb3a   :  { %v701_v43 = vor.u32 1.1754944e-38, %v700_v39  ;;  %vm699_vm3 = vcmp.eq.f32.partialorder %v698_v41, 8.507059e+37 }
 0xb3e   :  { %v1342_v36 = vpop.eup %1341 }
 0xb3f   :  { %v690_v37 = vmul.f32 %v1342_v36, %v688_v35  ;;  %vm695_vm14 = vweird.f32 %v1342_v36 }
 0xb40   :  { %vm696_vm2 = vmor %vm694_vm15, %vm695_vm14 }
 0xb41   :  { %v691_v38 = vsub.f32 1.0, %v690_v37 }
 0xb43   :  { %v692_v40 = vmul.f32 %v1342_v36, %v691_v38 }
 0xb45   :  { %v693_v42 = vadd.f32 %v1342_v36, %v692_v40 }
 0xb47   :  { %v697_v44 = vsel %vm696_vm2, %v1342_v36, %v693_v42 }
 0xb48   :  { %v702_v45 = vsel %vm699_vm3, %v701_v43, %v697_v44 }
 0xb49   :  { %v703_v46 = vmul.f32 %v1340_v32, %v702_v45 }
 0xb4a   :  { %v889_v47 = vpop.permute.xlu0 %888 }
 0xb4b   :  { %1245 = vmatmul.msk.f32.vlgmr.msra.gmra.mxu3 %vm109_vm1, %v703_v46  ;;  %1252 = vmatpush.xpose.msk.msra.mxu2 %vm109_vm1, %v889_v47 }
 0xb4e   :  { %1253 = vmatmul.msk.f32.vlgmr.msra.gmra.mxu2 %vm109_vm1, %v887_v48 }
 0xb53   :  { %1250 = vmatmul.msk.f32.vlgmr.msrb.gmra.mxu3 %vm109_vm1, %v809_v49 }
 0xb56   :  { %v755_v50 = vpop.f32.mrf.mxu2 }
 0xb57   :  { %v756_v52 = vadd.f32 %v755_v50, %v1531_v21 }
 0xb59   :  { %v758_v53 = vsel %vm109_vm1, %v756_v52, -inf }
 0xb5a   :  { %759 = vmax.xlane.f32.xlu0 %v758_v53 }
 0xbcd   :  { %v760_v54 = vpop.xlane.xlu0 %759 }
 0xbce   :  { %v761_v56 = vsub.f32 %v756_v52, %v760_v54  ;;  %v1713_v57 = vpop.f32.mrf.mxu3 }
 0xbd0   :  { %v762_v58 = vmul.f32 1.442695, %v761_v56 }
 0xbd1   :  { %v911_v59 = vpop.f32.mrf.mxu2 }
 0xbd2   :  { %1343 = vpow2.f32 %v762_v58  ;;  %v912_v60 = vadd.f32 %v911_v59, %v1531_v21  ;;  %v1258_v58 = vld [vmem:[%s1844_s7 + $0x38] sm:$0xff]  ;;  %v1257_v59 = vld [vmem:[%s1844_s7 + $0x30] sm:$0xff] }
 0xbd3   :  { %1004 = vmatpush.msra.mxu3 %v1258_v58 }
 0xbd4   :  { %v914_v61 = vsel %vm109_vm1, %v912_v60, -inf }
 0xbd5   :  { %915 = vmax.xlane.f32.xlu2 %v914_v61  ;;  %1005 = vmatpush.msra.mxu3 %v1257_v59  ;;  %v1255_v61 = vld [vmem:[%s1844_s7 + $0x20] sm:$0xff] }
 0xbd6   :  { %v833_v51 = vpop.f32.mrf.mxu3 }
 0xbd7   :  { %v834_v62 = vadd.f32 %v833_v51, %v1531_v21 }
 0xbd8   :  { %v1344_v63 = vpop.eup %1343 }
 0xbd9   :  { %v764_v0 = vsel %vm109_vm1, %v1344_v63, 0.0  ;;  %v836_v1 = vsel %vm109_vm1, %v834_v62, -inf }
 0xbda   :  { %765 = vadd.xlane.f32.xlu0 %v764_v0  ;;  %837 = vmax.xlane.f32.xlu1 %v836_v1 }
 0xbee   :  { %782 = vrot.lane.b32.xlu0 %v1683_v20, %s1885_s6 }
 0xc48   :  { %v916_v2 = vpop.xlane.xlu2 %915 }
 0xc49   :  { %v917_v3 = vsub.f32 %v912_v60, %v916_v2  ;;  %v1256_v60 = vld [vmem:[%s1844_s7 + $0x28] sm:$0xff] }
 0xc4a   :  { %1006 = vmatpush.msra.mxu3 %v1256_v60 }
 0xc4b   :  { %v918_v5 = vmul.f32 1.442695, %v917_v3  ;;  %v1308_v3 = vld [vmem:[%s1843_s8 + $0x1] ss:$0 sm:$0xff] }
 0xc4c   :  { %1007 = vmatpush.msra.mxu3 %v1255_v61 }
 0xc4d   :  { %1345 = vpow2.f32 %v918_v5  ;;  %v766_v8 = vpop.xlane.xlu0 %765  ;;  %v838_v9 = vpop.xlane.xlu1 %837 }
 0xc4e   :  { %1347 = vrcp.f32 %v766_v8  ;;  %v839_v4 = vsub.f32 %v834_v62, %v838_v9  ;;  %v778_v15 = vand.u32 2147483648, %v766_v8  ;;  %v776_v18 = vand.u32 2147483647, %v766_v8 }
 0xc4f   :  { %vm772_vm7 = vweird.f32 %v766_v8 }
 0xc50   :  { %v840_v10 = vmul.f32 1.442695, %v839_v4  ;;  %v779_v7 = vor.u32 1.1754944e-38, %v778_v15  ;;  %vm777_vm9 = vcmp.eq.f32.partialorder %v776_v18, 8.507059e+37  ;;  %v1263_v15 = vld [vmem:[%s1848_s11 + $0x20] sm:$0xff] }
 0xc52   :  { %1349 = vpow2.f32 %v840_v10 }
 0xc53   :  { %v1346_v21 = vpop.eup %1345 }
 0xc54   :  { %v1348_v11 = vpop.eup %1347  ;;  %v920_v12 = vsel %vm109_vm1, %v1346_v21, 0.0 }
 0xc55   :  { %v768_v13 = vmul.f32 %v1348_v11, %v766_v8  ;;  %921 = vadd.xlane.f32.xlu2 %v920_v12  ;;  %vm773_vm6 = vweird.f32 %v1348_v11 }
 0xc56   :  { %vm774_vm8 = vmor %vm772_vm7, %vm773_vm6 }
 0xc57   :  { %v769_v14 = vsub.f32 1.0, %v768_v13  ;;  %v1266_v13 = vld [vmem:[%s1848_s11 + $0x38] sm:$0xff] }
 0xc58   :  { %v1350_v16 = vpop.eup %1349 }
 0xc59   :  { %v770_v17 = vmul.f32 %v1348_v11, %v769_v14  ;;  %v842_v19 = vsel %vm109_vm1, %v1350_v16, 0.0  ;;  %v1264_v14 = vld [vmem:[%s1848_s11 + $0x28] sm:$0xff] }
 0xc5a   :  { %843 = vadd.xlane.f32.xlu1 %v842_v19 }
 0xc5b   :  { %v771_v22 = vadd.f32 %v1348_v11, %v770_v17 }
 0xc5d   :  { %v775_v23 = vsel %vm774_vm8, %v1348_v11, %v771_v22 }
 0xc5e   :  { %v780_v24 = vsel %vm777_vm9, %v779_v7, %v775_v23 }
 0xc5f   :  { %v781_v25 = vmul.f32 %v1344_v63, %v780_v24 }
 0xc60   :  { %v783_v26 = vpop.permute.xlu0 %782 }
 0xc61   :  { %803 = vmatpush.msra.mxu1 %v783_v26  ;;  %v1309_v26 = vld [vmem:[%s1845_s9 + $0x1] ss:$0 sm:$0xff] }
 0xc62   :  { %1248 = vmatmul.msk.f32.vlgmr.msra.gmra.mxu1 %vm109_vm1, %v781_v25 }
 0xc6d   :  { %938 = vrot.lane.b32.xlu2 %v1683_v20, %s1886_s0 }
 0xc73   :  { %860 = vrot.lane.b32.xlu1 %v1683_v20, %s1887_s23 }
 0xcc8   :  { %v922_v27 = vpop.xlane.xlu2 %921 }
 0xcc9   :  { %1351 = vrcp.f32 %v922_v27  ;;  %v934_v33 = vand.u32 2147483648, %v922_v27  ;;  %v932_v35 = vand.u32 2147483647, %v922_v27  ;;  %vm928_vm12 = vweird.f32 %v922_v27 }
 0xccb   :  { %v935_v39 = vor.u32 1.1754944e-38, %v934_v33  ;;  %vm933_vm14 = vcmp.eq.f32.partialorder %v932_v35, 8.507059e+37  ;;  %v1275_v33 = vld [vmem:[%s1850_s13 + $0x70] sm:$0xff]  ;;  %v1273_v35 = vld [vmem:[%s1850_s13 + $0x60] sm:$0xff] }
 0xccd   :  { %v844_v28 = vpop.xlane.xlu1 %843 }
 0xcce   :  { %1353 = vrcp.f32 %v844_v28  ;;  %v856_v45 = vand.u32 2147483648, %v844_v28  ;;  %vm850_vm2 = vweird.f32 %v844_v28  ;;  %v854_v46 = vand.u32 2147483647, %v844_v28 }
 0xccf   :  { %v1352_v29 = vpop.eup %1351 }
 0xcd0   :  { %v924_v30 = vmul.f32 %v1352_v29, %v922_v27  ;;  %v939_v31 = vpop.permute.xlu2 %938  ;;  %vm929_vm11 = vweird.f32 %v1352_v29  ;;  %v857_v49 = vor.u32 1.1754944e-38, %v856_v45  ;;  %vm855_vm6 = vcmp.eq.f32.partialorder %v854_v46, 8.507059e+37 }
 0xcd1   :  { %959 = vmatpush.msrb.mxu1 %v939_v31  ;;  %vm930_vm13 = vmor %vm928_vm12, %vm929_vm11 }
 0xcd2   :  { %v925_v32 = vsub.f32 1.0, %v924_v30 }
 0xcd4   :  { %v926_v34 = vmul.f32 %v1352_v29, %v925_v32  ;;  %v1354_v36 = vpop.eup %1353  ;;  %v1276_v32 = vld [vmem:[%s1850_s13 + $0x78] sm:$0xff] }
 0xcd5   :  { %v846_v38 = vmul.f32 %v1354_v36, %v844_v28  ;;  %vm851_vm15 = vweird.f32 %v1354_v36  ;;  %1114 = vmatpush.msrb.mxu2 %v1276_v32 }
 0xcd6   :  { %v927_v37 = vadd.f32 %v1352_v29, %v926_v34  ;;  %vm852_vm3 = vmor %vm850_vm2, %vm851_vm15  ;;  %v1274_v34 = vld [vmem:[%s1850_s13 + $0x68] sm:$0xff] }
 0xcd7   :  { %v847_v40 = vsub.f32 1.0, %v846_v38  ;;  %1115 = vmatpush.msrb.mxu2 %v1275_v33  ;;  %v1270_v38 = vld [vmem:[%s1850_s13 + $0x48] sm:$0xff] }
 0xcd8   :  { %v931_v20 = vsel %vm930_vm13, %v1352_v29, %v927_v37  ;;  %v1310_v29 = vld [vmem:[%s1846_s10 + $0x1] ss:$0 sm:$0xff]  ;;  %v1271_v37 = vld [vmem:[%s1850_s13 + $0x50] sm:$0xff]  ;;  %vm1213_vm13 = vcmask 57344  }
 0xcd9   :  { %v936_v41 = vsel %vm933_vm14, %v935_v39, %v931_v20  ;;  %v848_v42 = vmul.f32 %v1354_v36, %v847_v40  ;;  %1116 = vmatpush.msrb.mxu2 %v1274_v34  ;;  %v1269_v39 = vld [vmem:[%s1850_s13 + $0x40] sm:$0xff] }
 0xcda   :  { %v937_v43 = vmul.f32 %v1346_v21, %v936_v41  ;;  %v1311_v20 = vld [vmem:[%s1847_s12 + $0x1] ss:$0 sm:$0xff]  ;;  %v1365_v34 = vld [vmem:[%s1879_s1] sm:$0x1] }
 0xcdb   :  { %v849_v44 = vadd.f32 %v1354_v36, %v848_v42  ;;  %1117 = vmatpush.msrb.mxu2 %v1273_v35 }
 0xcdc   :  { %1254 = vmatmul.msk.f32.vlgmr.msrb.gmra.mxu1 %vm109_vm1, %v937_v43 }
 0xcdd   :  { %v853_v48 = vsel %vm852_vm3, %v1354_v36, %v849_v44  ;;  %v1272_v36 = vld [vmem:[%s1850_s13 + $0x58] sm:$0xff] }
 0xcde   :  { %v858_v50 = vsel %vm855_vm6, %v857_v49, %v853_v48  ;;  %1118 = vmatpush.msrb.mxu2 %v1272_v36 }
 0xcdf   :  { %v805_v47 = vpop.f32.mrf.mxu1  ;;  %v859_v53 = vmul.f32 %v1350_v16, %v858_v50 }
 0xce0   :  { %965 = vrot.lane.b32.xlu0 %v805_v47, %s1888_s28  ;;  %1119 = vmatpush.msrb.mxu2 %v1271_v37 }
 0xce2   :  { %1120 = vmatpush.msrb.mxu2 %v1270_v38 }
 0xce4   :  { %1121 = vmatpush.msrb.mxu2 %v1269_v39 }
 0xce5   :  { %v861_v52 = vpop.permute.xlu1 %860 }
 0xce6   :  { %881 = vmatpush.msrb.mxu0 %v861_v52  ;;  %v1312_v52 = vld [vmem:[%s1849_s14 + $0x1] ss:$0 sm:$0xff] }
 0xce7   :  { %1251 = vmatmul.msk.f32.vlgmr.msrb.gmra.mxu0 %vm109_vm1, %v859_v53 }
 0xce8   :  { %1072 = vmatpush.msra.mxu0 %v1266_v13  ;;  %v1314_v13 = vld [vmem:[%s1854_s16] ss:$0 sm:$0xff] }
 0xd52   :  { %v966_v51 = vpop.permute.xlu0 %965 }
 0xd53   :  { %v976_v62 = vsel %vm109_vm1, %v1713_v57, %v966_v51 }
 0xd59   :  { %v961_v54 = vpop.f32.mrf.mxu1 }
 0xd5a   :  { %973 = vrot.lane.b32.xlu1 %v961_v54, %s1889_s2 }
 0xd64   :  { %v883_v56 = vpop.f32.mrf.mxu0 }
 0xd65   :  { %969 = vrot.lane.b32.xlu0 %v883_v56, %s1890_s22 }
 0xdcc   :  { %v974_v0 = vpop.permute.xlu1 %973 }
 0xdd7   :  { %v970_v63 = vpop.permute.xlu0 %969 }
 0xdd8   :  { %v977_v1 = vsel %vm432_vm4, %v976_v62, %v970_v63 }
 0xdd9   :  { %v978_v2 = vsel %vm434_vm5, %v977_v1, %v974_v0  ;;  %v24_v0 = vstv %s1855_s18 }
 0xdda   :  { %1260 = vmatmul.msk.f32.vlgmr.msra.gmra.mxu3 %vm81_vm0, %v978_v2  ;;  %v1381_v2 = vmov 0   ;;  %25 = vst [vmem:[#allocation2] sm:$0x1] %v24_v0 }
 0xddb   :  { %1298 = vset.pattern.permute.xlu0 %v1381_v2 }
 0xe5d   :  { %v1009_v5 = vpop.f32.mrf.mxu3 }
 0xe5e   :  { %v1010_v8 = vadd.f32 %v1308_v3, %v1009_v5  ;;  %v1160_v5 = vld [vmem:[#allocation2] sm:$0x1] }
 0xe60   :  { %v1755_v9 = vadd.f32 %v1010_v8, %v1653_v55  ;;  %v1265_v55 = vld [vmem:[%s1848_s11 + $0x30] sm:$0xff] }
 0xe61   :  { %1073 = vmatpush.msra.mxu0 %v1265_v55 }
 0xe62   :  { %v1017_v57 = vsel %vm81_vm0, %v1755_v9, 0.0 }
 0xe63   :  { %1018 = vadd.xlane.f32.xlu2 %v1017_v57  ;;  %1074 = vmatpush.msra.mxu0 %v1264_v14 }
 0xe65   :  { %1075 = vmatpush.msra.mxu0 %v1263_v15  ;;  %v1159_v15 = vld [vmem:[%s1856_s17] sm:$0x1] }
 0xed6   :  { %v1019_v4 = vpop.xlane.xlu2 %1018 }
 0xed7   :  { %v1020_v10 = vmul.f32 %v1019_v4, %v1596_v6 }
 0xed9   :  { %v1021_v21 = vsub.f32 %v1755_v9, %v1020_v10 }
 0xedb   :  { %v1022_v11 = vmul.f32 %v1021_v21, %v1021_v21 }
 0xedd   :  { %v1023_v12 = vsel %vm81_vm0, %v1022_v11, 0.0  ;;  %v1313_v11 = vld [vmem:[%s1853_s15] ss:$0 sm:$0xff] }
 0xede   :  { %1024 = vadd.xlane.f32.xlu0 %v1023_v12 }
 0xef2   :  { %1163 = vperm.xlu0 %1298, %v1160_v5  }
 0xf51   :  { %v1025_v16 = vpop.xlane.xlu0 %1024 }
 0xf52   :  { %v1026_v17 = vmul.f32 %v1025_v16, %v1596_v6 }
 0xf54   :  { %v1027_v18 = vadd.f32 1e-06, %v1026_v17 }
 0xf56   :  { %1355 = vrsqrt.f32 %v1027_v18  ;;  %vm1034_vm4 = vweird.f32 %v1027_v18 }
 0xf5c   :  { %v1356_v19 = vpop.eup %1355 }
 0xf5d   :  { %v1029_v22 = vmul.f32 %v1356_v19, %v1027_v18  ;;  %vm1035_vm1 = vweird.f32 %v1356_v19 }
 0xf5e   :  { %vm1036_vm5 = vmor %vm1034_vm4, %vm1035_vm1 }
 0xf5f   :  { %v1030_v7 = vmul.f32 %v1356_v19, %v1029_v22 }
 0xf61   :  { %v1031_v23 = vmul.f32 0.5, %v1030_v7 }
 0xf63   :  { %v1032_v24 = vsub.f32 1.5, %v1031_v23 }
 0xf64   :  { %v1164_v16 = vpop.permute.xlu0 %1163 }
 0xf65   :  { %v1033_v25 = vmul.f32 %v1356_v19, %v1032_v24  ;;  %v1166_v17 = vperm.slane %v1164_v16, 0 }
 0xf67   :  { %v1037_v27 = vsel %vm1036_vm5, %v1356_v19, %v1033_v25 }
 0xf68   :  { %v1038_v28 = vmul.f32 %v1037_v27, %v1021_v21 }
 0xf6a   :  { %v1042_v30 = vmul.f32 %v1309_v26, %v1038_v28 }
 0xf6c   :  { %v1046_v31 = vadd.f32 %v1310_v29, %v1042_v30 }
 0xf6e   :  { %1268 = vmatmul.msk.f32.vlgmr.msra.gmra.mxu0 %vm81_vm0, %v1046_v31 }
 0xfeb   :  { %v1077_v40 = vpop.f32.mrf.mxu0 }
 0xfec   :  { %v1078_v41 = vadd.f32 %v1311_v20, %v1077_v40 }
 0xfee   :  { %v1081_v42 = vmul.f32 0.044715, %v1078_v41  ;;  %v1080_v48 = vmul.f32 0.5, %v1078_v41 }
 0xff0   :  { %v1082_v43 = vmul.f32 %v1081_v42, %v1078_v41 }
 0xff2   :  { %v1083_v44 = vmul.f32 %v1082_v43, %v1078_v41 }
 0xff4   :  { %v1084_v45 = vadd.f32 %v1083_v44, %v1078_v41 }
 0xff6   :  { %v1085_v46 = vmul.f32 0.7978846, %v1084_v45 }
 0xff8   :  { %1357 = vtanh.f32 %v1085_v46 }
 0xffe   :  { %v1358_v47 = vpop.eup %1357 }
 0xfff   :  { %v1087_v49 = vadd.f32 1.0, %v1358_v47 }
0x1001   :  { %v1088_v50 = vmul.f32 %v1087_v49, %v1080_v48 }
0x1003   :  { %1278 = vmatmul.msk.f32.vlgmr.msrb.gmra.mxu2 %vm559_vm10, %v1088_v50 }
0x1086   :  { %v1123_v53 = vpop.f32.mrf.mxu2 }
0x1087   :  { %v1124_v54 = vadd.f32 %v1312_v52, %v1123_v53 }
0x1089   :  { %v1126_v56 = vadd.f32 %v1124_v54, %v1755_v9 }
0x108b   :  { %v1129_v58 = vsel %vm81_vm0, %v1126_v56, 0.0 }
0x108c   :  { %1130 = vadd.xlane.f32.xlu1 %v1129_v58 }
0x10ff   :  { %v1131_v59 = vpop.xlane.xlu1 %1130 }
0x1100   :  { %v1132_v60 = vmul.f32 %v1131_v59, %v1596_v6 }
0x1102   :  { %v1133_v61 = vsub.f32 %v1126_v56, %v1132_v60 }
0x1104   :  { %v1134_v51 = vmul.f32 %v1133_v61, %v1133_v61 }
0x1106   :  { %v1135_v62 = vsel %vm81_vm0, %v1134_v51, 0.0 }
0x1107   :  { %1136 = vadd.xlane.f32.xlu2 %v1135_v62 }
0x117a   :  { %v1137_v63 = vpop.xlane.xlu2 %1136 }
0x117b   :  { %v1138_v1 = vmul.f32 %v1137_v63, %v1596_v6 }
0x117d   :  { %v1139_v3 = vadd.f32 1e-06, %v1138_v1 }
0x117f   :  { %1359 = vrsqrt.f32 %v1139_v3  ;;  %vm1146_vm7 = vweird.f32 %v1139_v3 }
0x1185   :  { %v1360_v8 = vpop.eup %1359 }
0x1186   :  { %v1141_v9 = vmul.f32 %v1360_v8, %v1139_v3  ;;  %vm1147_vm10 = vweird.f32 %v1360_v8 }
0x1187   :  { %vm1148_vm8 = vmor %vm1146_vm7, %vm1147_vm10 }
0x1188   :  { %v1142_v57 = vmul.f32 %v1360_v8, %v1141_v9 }
0x118a   :  { %v1143_v4 = vmul.f32 0.5, %v1142_v57 }
0x118c   :  { %v1144_v10 = vsub.f32 1.5, %v1143_v4 }
0x118e   :  { %v1145_v21 = vmul.f32 %v1360_v8, %v1144_v10 }
0x1190   :  { %v1149_v6 = vsel %vm1148_vm8, %v1360_v8, %v1145_v21 }
0x1191   :  { %v1150_v12 = vmul.f32 %v1149_v6, %v1133_v61 }
0x1193   :  { %v1154_v55 = vmul.f32 %v1313_v11, %v1150_v12 }
0x1195   :  { %v1158_v14 = vadd.f32 %v1314_v13, %v1154_v55 }
0x1197   :  { %1279 = vmatpush.xpose.msk.msra.mxu1 %vm81_vm0, %v1158_v14 }
0x119a   :  { %1280 = vmatmul.msk.f32.vlgmr.msra.gmra.mxu1 %vm81_vm0, %v1159_v15 }
0x1217   :  { %v1190_v18 = vpop.f32.mrf.mxu1 }
0x1218   :  { %v1191_v19 = vadd.f32 %v1190_v18, %v1166_v17 }
0x121a   :  { %v1281_v22 = vmul.f32 -1.442695, %v1191_v19 }
0x121c   :  { %1361 = vpow2.f32 %v1281_v22 }
0x1222   :  { %v1362_v7 = vpop.eup %1361 }
0x1223   :  { %v1196_v23 = vadd.f32 1.0, %v1362_v7 }
0x1225   :  { %1363 = vrcp.f32 %v1196_v23  ;;  %v1208_v27 = vand.u32 2147483648, %v1196_v23  ;;  %v1206_v29 = vand.u32 2147483647, %v1196_v23  ;;  %vm1202_vm11 = vweird.f32 %v1196_v23 }
0x1227   :  { %v1209_v31 = vor.u32 1.1754944e-38, %v1208_v27  ;;  %vm1207_vm0 = vcmp.eq.f32.partialorder %v1206_v29, 8.507059e+37 }
0x122b   :  { %v1364_v24 = vpop.eup %1363 }
0x122c   :  { %v1198_v25 = vmul.f32 %v1364_v24, %v1196_v23  ;;  %vm1203_vm9 = vweird.f32 %v1364_v24 }
0x122d   :  { %vm1204_vm12 = vmor %vm1202_vm11, %vm1203_vm9 }
0x122e   :  { %v1199_v26 = vsub.f32 1.0, %v1198_v25 }
0x1230   :  { %v1200_v28 = vmul.f32 %v1364_v24, %v1199_v26 }
0x1232   :  { %v1201_v30 = vadd.f32 %v1364_v24, %v1200_v28 }
0x1234   :  { %v1205_v32 = vsel %vm1204_vm12, %v1364_v24, %v1201_v30 }
0x1235   :  { %v1210_v33 = vsel %vm1207_vm0, %v1209_v31, %v1205_v32 }
0x1236   :  { %v1212_v35 = vmul.f32 %v1365_v34, %v1210_v33 }
0x1238   :  { %1214 = vst.msk [vmem:[%s1857_s19] sm:$0x1] %vm1213_vm13, %v1212_v35 }

// kernel: ext_summarizer_forward.2
= control target key start
LH: loop header
LB: loop body
LE: loop exit
PB: predicated region body
PF: predicated region fallthrough
CT: control target
= control target key end

     0   :  { %vm62_vm0 = vcmask 261120   ;;  %v3641_v8 = vmov 32.0   ;;  %s3642_s18 = smov 96   ;;  %s3643_s19 = smov 88   ;;  %vm251_vm14 = vcmask 64512   ;;  %s5187_s0 = inlined_call_operand.vmem [shape: f32[32,32], index: 0, kind: input, shape index: {}]   ;;  %s5188_s3 = inlined_call_operand.vmem [shape: f32[1,32], index: 3, kind: input, shape index: {}]   ;;  %s5189_s4 = inlined_call_operand.vmem [shape: f32[1,32], index: 4, kind: input, shape index: {}]   ;;  %s5190_s6 = inlined_call_operand.vmem [shape: f32[2,1,96], index: 6, kind: input, shape index: {}]   ;;  %s5191_s5 = inlined_call_operand.vmem [shape: f32[2,32,96], index: 5, kind: input, shape index: {}]   ;;  %s5192_s1 = inlined_call_operand.vmem [shape: f32[1,32], index: 1, kind: input, shape index: {}]   ;;  %s5193_s2 = inlined_call_operand.vmem [shape: f32[32,32], index: 2, kind: input, shape index: {}]   ;;  %s5194_s8 = inlined_call_operand.vmem [shape: f32[2,1,32], index: 8, kind: input, shape index: {}, may-alias: {8,10,14,16}]   ;;  %s5195_s7 = inlined_call_operand.vmem [shape: f32[2,32,32], index: 7, kind: input, shape index: {}]   ;;  %s5196_s9 = inlined_call_operand.vmem [shape: f32[2,1,32], index: 9, kind: input, shape index: {}, may-alias: {9,15}]   ;;  %s5197_s10 = inlined_call_operand.vmem [shape: f32[2,1,32], index: 10, kind: input, shape index: {}, may-alias: {8,10,14,16}]   ;;  %s5198_s12 = inlined_call_operand.vmem [shape: f32[2,1,64], index: 12, kind: input, shape index: {}]   ;;  %s5199_s11 = inlined_call_operand.vmem [shape: f32[2,32,64], index: 11, kind: input, shape index: {}]   ;;  %s5200_s14 = inlined_call_operand.vmem [shape: f32[2,1,32], index: 14, kind: input, shape index: {}, may-alias: {8,10,14,16}]   ;;  %s5201_s13 = inlined_call_operand.vmem [shape: f32[2,64,32], index: 13, kind: input, shape index: {}]   ;;  %s5202_s15 = inlined_call_operand.vmem [shape: f32[2,1,32], index: 15, kind: input, shape index: {}, may-alias: {9,15}]   ;;  %s5203_s16 = inlined_call_operand.vmem [shape: f32[2,1,32], index: 16, kind: input, shape index: {}, may-alias: {8,10,14,16}]   ;;  %s5204_s17 = inlined_call_operand.vmem [shape: f32[32,32], index: 17, kind: output, shape index: {}]  }
   0x1   :  { %5214 = sst [smem:[#allocation2_spill]] %s5187_s0  ;;  %3439 = vrcp.f32 %v3641_v8  ;;  %v189_v35 = vld [vmem:[%s5191_s5 + $0x18] sm:$0xff]  ;;  %v188_v36 = vld [vmem:[%s5191_s5 + $0x10] sm:$0xff]  ;;  %v187_v37 = vld [vmem:[%s5191_s5 + $0x8] sm:$0xff]  ;;  %s3645_s20 = smov 120  }
   0x2   :  { %5215 = sst [smem:[#allocation3_spill]] %s5188_s3  ;;  %218 = vmatpush.msra.mxu0 %v189_v35  ;;  %v186_v38 = vld [vmem:[%s5191_s5] sm:$0xff]  ;;  %s3644_s3 = smov 64  }
   0x3   :  { %s5216_s26 = sld [smem:[#allocation2_spill]]  ;;  %s3646_s21 = smov 80  }
   0x4   :  { %219 = vmatpush.msra.mxu0 %v188_v36  ;;  %s5217_s28 = sld [smem:[#allocation3_spill]]  ;;  %s3647_s22 = smov 72  }
   0x5   :  { %s3649_s30 = smov 104   ;;  %s3650_s23 = smov 56  }
   0x6   :  { %220 = vmatpush.msra.mxu0 %v187_v37  ;;  %s5208_s24 = smov 40   ;;  %s5206_s25 = smov 48  }
   0x7   :  { %v3440_v9 = vpop.eup %3439  ;;  %s5212_s27 = smov 24  }
   0x8   :  { %v76_v10 = vmul.f32 32.0, %v3440_v9  ;;  %vm80_vm1 = vweird.f32 %v3440_v9  ;;  %221 = vmatpush.msra.mxu0 %v186_v38 }
   0x9   :  { %v58_v0 = vld [vmem:[%s5216_s26 + $0x10] sm:$0xff]  ;;  %v56_v1 = vld [vmem:[%s5216_s26] sm:$0xff]  ;;  %v59_v4 = vld [vmem:[%s5216_s26 + $0x18] sm:$0xff] }
   0xa   :  { %v69_v2 = vsel %vm62_vm0, %v58_v0, 0.0  ;;  %v63_v3 = vsel %vm62_vm0, %v56_v1, 0.0  ;;  %v57_v5 = vld [vmem:[%s5216_s26 + $0x8] sm:$0xff]  ;;  %v72_v6 = vsel %vm62_vm0, %v59_v4, 0.0  ;;  %v77_v11 = vsub.f32 1.0, %v76_v10  ;;  %s5210_s26 = smov 8  }
   0xb   :  { %70 = vadd.xlane.f32.xlu1 %v69_v2  ;;  %64 = vadd.xlane.f32.xlu0 %v63_v3  ;;  %v66_v7 = vsel %vm62_vm0, %v57_v5, 0.0 }
   0xc   :  { %v78_v12 = vmul.f32 %v3440_v9, %v77_v11 }
   0xe   :  { %v79_v13 = vadd.f32 %v3440_v9, %v78_v12 }
  0x10   :  { %v3762_v14 = vsel %vm80_vm1, %v3440_v9, %v79_v13 }
  0x13   :  { %73 = vadd.xlane.f32.xlu1 %v72_v6  ;;  %67 = vadd.xlane.f32.xlu0 %v66_v7 }
  0x7e   :  { %v71_v15 = vpop.xlane.xlu1 %70  ;;  %v65_v16 = vpop.xlane.xlu0 %64 }
  0x7f   :  { %v84_v17 = vmul.f32 %v3762_v14, %v71_v15  ;;  %v82_v18 = vmul.f32 %v3762_v14, %v65_v16 }
  0x81   :  { %v3766_v19 = vsub.f32 %v58_v0, %v84_v17  ;;  %v3768_v20 = vsub.f32 %v56_v1, %v82_v18  ;;  %v3421_v1 = vld [vmem:[%s5217_s28] ss:$0 sm:$0xff]  ;;  %s3655_s28 = smov 16  }
  0x83   :  { %v92_v21 = vmul.f32 %v3766_v19, %v3766_v19  ;;  %v90_v22 = vmul.f32 %v3768_v20, %v3768_v20 }
  0x85   :  { %v100_v23 = vsel %vm62_vm0, %v92_v21, 0.0  ;;  %v94_v24 = vsel %vm62_vm0, %v90_v22, 0.0 }
  0x86   :  { %v74_v25 = vpop.xlane.xlu1 %73  ;;  %101 = vadd.xlane.f32.xlu0 %v100_v23  ;;  %95 = vadd.xlane.f32.xlu2 %v94_v24  ;;  %v68_v26 = vpop.xlane.xlu0 %67 }
  0x87   :  { %v85_v27 = vmul.f32 %v3762_v14, %v74_v25  ;;  %v83_v28 = vmul.f32 %v3762_v14, %v68_v26 }
  0x89   :  { %v3778_v29 = vsub.f32 %v59_v4, %v85_v27  ;;  %v3780_v30 = vsub.f32 %v57_v5, %v83_v28  ;;  %v3422_v5 = vld [vmem:[%s5189_s4] ss:$0 sm:$0xff] }
  0x8b   :  { %v93_v31 = vmul.f32 %v3778_v29, %v3778_v29  ;;  %v91_v32 = vmul.f32 %v3780_v30, %v3780_v30 }
  0x8d   :  { %v103_v33 = vsel %vm62_vm0, %v93_v31, 0.0  ;;  %v97_v34 = vsel %vm62_vm0, %v91_v32, 0.0  ;;  %v3423_v32 = vld [vmem:[%s5190_s6] ss:$0 sm:$0xff] }
  0x8e   :  { %104 = vadd.xlane.f32.xlu1 %v103_v33  ;;  %98 = vadd.xlane.f32.xlu2 %v97_v34 }
  0xf9   :  { %v96_v39 = vpop.xlane.xlu2 %95  ;;  %v102_v40 = vpop.xlane.xlu0 %101 }
  0xfa   :  { %v106_v41 = vmul.f32 %v96_v39, %v3762_v14  ;;  %v108_v42 = vmul.f32 %v102_v40, %v3762_v14 }
  0xfc   :  { %v110_v43 = vadd.f32 1e-12, %v106_v41  ;;  %v112_v44 = vadd.f32 1e-12, %v108_v42 }
  0xfe   :  { %3441 = vrsqrt.f32 %v110_v43  ;;  %vm120_vm3 = vweird.f32 %v110_v43  ;;  %vm140_vm5 = vweird.f32 %v112_v44 }
  0xff   :  { %3443 = vrsqrt.f32 %v112_v44 }
 0x101   :  { %v105_v45 = vpop.xlane.xlu1 %104  ;;  %v99_v46 = vpop.xlane.xlu2 %98 }
 0x102   :  { %v109_v47 = vmul.f32 %v105_v45, %v3762_v14  ;;  %v107_v48 = vmul.f32 %v99_v46, %v3762_v14 }
 0x104   :  { %v3442_v49 = vpop.eup %3441  ;;  %v113_v50 = vadd.f32 1e-12, %v109_v47  ;;  %v111_v51 = vadd.f32 1e-12, %v107_v48 }
 0x105   :  { %v3444_v52 = vpop.eup %3443  ;;  %v115_v53 = vmul.f32 %v3442_v49, %v110_v43  ;;  %vm121_vm2 = vweird.f32 %v3442_v49 }
 0x106   :  { %v135_v54 = vmul.f32 %v3444_v52, %v112_v44  ;;  %3445 = vrsqrt.f32 %v113_v50  ;;  %vm122_vm4 = vmor %vm120_vm3, %vm121_vm2  ;;  %vm141_vm6 = vweird.f32 %v3444_v52  ;;  %vm130_vm9 = vweird.f32 %v111_v51 }
 0x107   :  { %v116_v55 = vmul.f32 %v3442_v49, %v115_v53  ;;  %3447 = vrsqrt.f32 %v111_v51  ;;  %vm142_vm8 = vmor %vm140_vm5, %vm141_vm6  ;;  %vm150_vm11 = vweird.f32 %v113_v50 }
 0x108   :  { %v136_v57 = vmul.f32 %v3444_v52, %v135_v54 }
 0x109   :  { %v117_v56 = vmul.f32 0.5, %v116_v55 }
 0x10a   :  { %v137_v62 = vmul.f32 0.5, %v136_v57 }
 0x10b   :  { %v118_v58 = vsub.f32 1.5, %v117_v56 }
 0x10c   :  { %v3446_v59 = vpop.eup %3445  ;;  %v138_v6 = vsub.f32 1.5, %v137_v62 }
 0x10d   :  { %v3448_v60 = vpop.eup %3447  ;;  %v119_v61 = vmul.f32 %v3442_v49, %v118_v58  ;;  %v145_v63 = vmul.f32 %v3446_v59, %v113_v50  ;;  %vm151_vm12 = vweird.f32 %v3446_v59 }
 0x10e   :  { %v125_v0 = vmul.f32 %v3448_v60, %v111_v51  ;;  %vm131_vm7 = vweird.f32 %v3448_v60  ;;  %v139_v12 = vmul.f32 %v3444_v52, %v138_v6  ;;  %vm152_vm13 = vmor %vm150_vm11, %vm151_vm12  ;;  %v172_v6 = vld [vmem:[%s5193_s2] sm:$0xff] }
 0x10f   :  { %v123_v2 = vsel %vm122_vm4, %v3442_v49, %v119_v61  ;;  %v146_v7 = vmul.f32 %v3446_v59, %v145_v63  ;;  %vm132_vm10 = vmor %vm130_vm9, %vm131_vm7 }
 0x110   :  { %v126_v3 = vmul.f32 %v3448_v60, %v125_v0  ;;  %v154_v4 = vmul.f32 %v123_v2, %v3768_v20  ;;  %v143_v20 = vsel %vm142_vm8, %v3444_v52, %v139_v12  ;;  %v176_v2 = vld [vmem:[%s5192_s1] sm:$0x1] }
 0x111   :  { %v147_v13 = vmul.f32 0.5, %v146_v7  ;;  %v156_v23 = vmul.f32 %v143_v20, %v3766_v19 }
 0x112   :  { %v127_v8 = vmul.f32 0.5, %v126_v3  ;;  %v161_v9 = vmul.f32 %v3421_v1, %v154_v4  ;;  %v177_v3 = vsub.f32 1.0, %v176_v2 }
 0x113   :  { %v148_v18 = vsub.f32 1.5, %v147_v13  ;;  %v163_v25 = vmul.f32 %v3421_v1, %v156_v23 }
 0x114   :  { %v128_v10 = vsub.f32 1.5, %v127_v8  ;;  %v3811_v11 = vadd.f32 %v3422_v5, %v161_v9  ;;  %v178_v4 = vmul.f32 -10000.0, %v177_v3 }
 0x115   :  { %v149_v24 = vmul.f32 %v3446_v59, %v148_v18  ;;  %v3821_v27 = vadd.f32 %v3422_v5, %v163_v25  ;;  %v175_v25 = vld [vmem:[%s5193_s2 + $0x18] sm:$0xff] }
 0x116   :  { %v129_v15 = vmul.f32 %v3448_v60, %v128_v10  ;;  %3170 = vmatmul.msk.f32.vlgmr.msra.gmra.mxu0 %vm62_vm0, %v3811_v11  ;;  %v173_v10 = vld [vmem:[%s5193_s2 + $0x8] sm:$0xff] }
 0x117   :  { %v153_v26 = vsel %vm152_vm13, %v3446_v59, %v149_v24 }
 0x118   :  { %v133_v16 = vsel %vm132_vm10, %v3448_v60, %v129_v15  ;;  %v157_v28 = vmul.f32 %v153_v26, %v3778_v29 }
 0x119   :  { %v155_v17 = vmul.f32 %v133_v16, %v3780_v30 }
 0x11a   :  { %v164_v30 = vmul.f32 %v3421_v1, %v157_v28 }
 0x11b   :  { %v162_v21 = vmul.f32 %v3421_v1, %v155_v17  ;;  %v174_v17 = vld [vmem:[%s5193_s2 + $0x10] sm:$0xff]  ;;  %s3648_s2 = smov 112  }
 0x11c   :  { %v3826_v31 = vadd.f32 %v3422_v5, %v164_v30 }
 0x11d   :  { %v3816_v22 = vadd.f32 %v3422_v5, %v162_v21  ;;  %v180_v5 = vperm.slane %v178_v4, 0 }
 0x11f   :  { %3171 = vmatmul.msk.f32.gmra.mxu0 %vm62_vm0, %v3816_v22  ;;  %v3908_v7 = vadd.f32 %v180_v5, %v172_v6  ;;  %v3915_v13 = vadd.f32 %v180_v5, %v173_v10  ;;  %v3922_v20 = vadd.f32 %v180_v5, %v174_v17  ;;  %v3933_v26 = vadd.f32 %v180_v5, %v175_v25 }
 0x127   :  { %3172 = vmatmul.msk.f32.gmra.mxu0 %vm62_vm0, %v3821_v27 }
 0x12f   :  { %3173 = vmatmul.msk.f32.gmra.mxu0 %vm62_vm0, %v3826_v31 }
 0x193   :  { %v223_v19 = vpop.f32.mrf.mxu0 }
 0x194   :  { %v3840_v36 = vadd.f32 %v3423_v32, %v223_v19 }
 0x196   :  { %v3854_v41 = vmul.f32 0.35355338, %v3840_v36 }
 0x19c   :  { %v226_v33 = vpop.f32.mrf.mxu0 }
 0x19d   :  { %v3833_v34 = vadd.f32 %v3423_v32, %v226_v33 }
 0x19f   :  { %245 = vrot.lane.b32.xlu1 %v3833_v34, %s3642_s18  ;;  %v3844_v39 = vpack.i.bf16 %v3840_v36, %v3833_v34  ;;  %v3862_v42 = vmul.f32 0.35355338, %v3833_v34 }
 0x1a4   :  { %v229_v29 = vpop.f32.mrf.mxu0 }
 0x1a5   :  { %v230_v35 = vadd.f32 %v3423_v32, %v229_v29 }
 0x1a7   :  { %460 = vrot.lane.b32.xlu1 %v3833_v34, %s3643_s19  ;;  %247 = vrot.lane.b32.xlu0 %v230_v35, %s3642_s18  ;;  %v3867_v43 = vmul.f32 0.35355338, %v230_v35 }
 0x1ac   :  { %v232_v37 = vpop.f32.mrf.mxu0 }
 0x1ad   :  { %v233_v38 = vadd.f32 %v3423_v32, %v232_v37 }
 0x1af   :  { %458 = vrot.lane.b32.xlu1 %v3840_v36, %s3643_s19  ;;  %249 = vrot.lane.b32.xlu2 %v233_v38, %s3642_s18  ;;  %v3849_v40 = vpack.i.bf16 %v230_v35, %v233_v38  ;;  %v3892_v56 = vmul.f32 0.35355338, %v233_v38 }
 0x1b0   :  { %3342 = vrot.lane.b32.xlu0 %v3844_v39, %s3644_s3 }
 0x1b7   :  { %464 = vrot.lane.b32.xlu1 %v233_v38, %s3643_s19  ;;  %243 = vrot.lane.b32.xlu2 %v3840_v36, %s3642_s18 }
 0x1b8   :  { %450 = vrot.lane.b32.xlu0 %v3854_v41, %s3645_s20 }
 0x1bf   :  { %462 = vrot.lane.b32.xlu2 %v230_v35, %s3643_s19 }
 0x1c0   :  { %452 = vrot.lane.b32.xlu0 %v3862_v42, %s3645_s20 }
 0x1c7   :  { %672 = vrot.lane.b32.xlu2 %v230_v35, %s3646_s21 }
 0x1c8   :  { %454 = vrot.lane.b32.xlu0 %v3867_v43, %s3645_s20 }
 0x1d0   :  { %882 = vrot.lane.b32.xlu0 %v230_v35, %s3647_s22 }
 0x1d8   :  { %3347 = vrot.lane.b32.xlu0 %v3849_v40, %s3644_s3 }
 0x1e0   :  { %674 = vrot.lane.b32.xlu0 %v233_v38, %s3646_s21 }
 0x1e8   :  { %884 = vrot.lane.b32.xlu0 %v233_v38, %s3647_s22 }
 0x209   :  { %v250_v44 = vpop.permute.xlu2 %249 }
 0x20a   :  { %3174 = vmatpush.xpose.msk.msra.mxu1 %vm251_vm14, %v250_v44 }
 0x211   :  { %v246_v45 = vpop.permute.xlu1 %245  ;;  %v244_v49 = vpop.permute.xlu2 %243 }
 0x219   :  { %v461_v46 = vpop.permute.xlu1 %460  ;;  %v248_v47 = vpop.permute.xlu0 %247 }
 0x21a   :  { %3175 = vmatpush.xpose.msk.msra.mxu1 %vm251_vm14, %v248_v47  ;;  %v463_v53 = vpop.permute.xlu2 %462 }
 0x21e   :  { %3176 = vmatpush.xpose.msk.msra.mxu1 %vm251_vm14, %v246_v45 }
 0x221   :  { %v459_v48 = vpop.permute.xlu1 %458 }
 0x222   :  { %v3343_v50 = vpop.permute.xlu0 %3342  ;;  %3177 = vmatpush.xpose.msk.msra.mxu1 %vm251_vm14, %v244_v49  ;;  %v673_v0 = vpop.permute.xlu2 %672 }
 0x223   :  { %v3344_v61 = vunpack.i.l.bf16 %v3343_v50  ;;  %v3345_v62 = vunpack.i.h.bf16 %v3343_v50 }
 0x225   :  { %3178 = vmatmul.msk.f32.vlgmr.msra.gmra.mxu1 %vm251_vm14, %v3854_v41 }
 0x229   :  { %v465_v51 = vpop.permute.xlu1 %464 }
 0x22a   :  { %v451_v52 = vpop.permute.xlu0 %450  ;;  %3186 = vmatpush.xpose.msk.msra.mxu3 %vm251_vm14, %v465_v51 }
 0x22d   :  { %3179 = vmatmul.msk.f32.gmra.mxu1 %vm251_vm14, %v3862_v42 }
 0x22e   :  { %3187 = vmatpush.xpose.msk.msra.mxu3 %vm251_vm14, %v463_v53 }
 0x232   :  { %v453_v54 = vpop.permute.xlu0 %452  ;;  %3188 = vmatpush.xpose.msk.msra.mxu3 %vm251_vm14, %v461_v46 }
 0x235   :  { %3180 = vmatmul.msk.f32.gmra.mxu1 %vm251_vm14, %v3867_v43 }
 0x236   :  { %3189 = vmatpush.xpose.msk.msra.mxu3 %vm251_vm14, %v459_v48 }
 0x239   :  { %3190 = vmatmul.msk.f32.vlgmr.msra.gmra.mxu3 %vm251_vm14, %v451_v52 }
 0x23a   :  { %v455_v55 = vpop.permute.xlu0 %454 }
 0x23d   :  { %3181 = vmatmul.msk.f32.gmra.mxu1 %vm251_vm14, %v3892_v56 }
 0x241   :  { %3191 = vmatmul.msk.f32.gmra.mxu3 %vm251_vm14, %v453_v54 }
 0x242   :  { %v883_v57 = vpop.permute.xlu0 %882 }
 0x249   :  { %3192 = vmatmul.msk.f32.gmra.mxu3 %vm251_vm14, %v455_v55 }
 0x24a   :  { %v3348_v58 = vpop.permute.xlu0 %3347 }
 0x24b   :  { %v3349_v59 = vunpack.i.l.bf16 %v3348_v58  ;;  %v3350_v60 = vunpack.i.h.bf16 %v3348_v58 }
 0x24d   :  { %433 = vmatpush.msra.mxu2 %v3349_v59 }
 0x24f   :  { %434 = vmatpush.msra.mxu2 %v3350_v60 }
 0x251   :  { %435 = vmatpush.msra.mxu2 %v3344_v61 }
 0x252   :  { %v675_v63 = vpop.permute.xlu0 %674 }
 0x253   :  { %436 = vmatpush.msra.mxu2 %v3345_v62 }
 0x255   :  { %3198 = vmatpush.xpose.msk.msrb.mxu2 %vm251_vm14, %v675_v63 }
 0x259   :  { %3199 = vmatpush.xpose.msk.msrb.mxu2 %vm251_vm14, %v673_v0 }
 0x25a   :  { %v885_v1 = vpop.permute.xlu0 %884 }
 0x25b   :  { %3210 = vmatpush.xpose.msk.msrb.mxu3 %vm251_vm14, %v885_v1 }
 0x25f   :  { %3211 = vmatpush.xpose.msk.msrb.mxu3 %vm251_vm14, %v883_v57 }
 0x2a2   :  { %v289_v8 = vpop.f32.mrf.mxu1 }
 0x2a3   :  { %v290_v9 = vadd.f32 %v289_v8, %v3908_v7 }
 0x2a5   :  { %v301_v12 = vsel %vm62_vm0, %v290_v9, -inf }
 0x2a6   :  { %302 = vmax.xlane.f32.xlu0 %v301_v12 }
 0x2aa   :  { %v292_v15 = vpop.f32.mrf.mxu1 }
 0x2ab   :  { %v293_v16 = vadd.f32 %v292_v15, %v3915_v13 }
 0x2ad   :  { %v304_v18 = vsel %vm62_vm0, %v293_v16, -inf }
 0x2ae   :  { %305 = vmax.xlane.f32.xlu2 %v304_v18 }
 0x2b2   :  { %v295_v21 = vpop.f32.mrf.mxu1 }
 0x2b3   :  { %v296_v23 = vadd.f32 %v295_v21, %v3922_v20 }
 0x2b5   :  { %v307_v24 = vsel %vm62_vm0, %v296_v23, -inf }
 0x2b6   :  { %308 = vmax.xlane.f32.xlu1 %v307_v24 }
 0x2ba   :  { %670 = vrot.lane.b32.xlu0 %v3833_v34, %s3646_s21  ;;  %v298_v28 = vpop.f32.mrf.mxu1 }
 0x2bb   :  { %v299_v30 = vadd.f32 %v298_v28, %v3933_v26 }
 0x2bc   :  { %v499_v60 = vpop.f32.mrf.mxu3 }
 0x2bd   :  { %v310_v19 = vsel %vm62_vm0, %v299_v30, -inf  ;;  %v3967_v61 = vadd.f32 %v499_v60, %v3908_v7 }
 0x2bf   :  { %v511_v62 = vsel %vm62_vm0, %v3967_v61, -inf }
 0x2c4   :  { %v502_v4 = vpop.f32.mrf.mxu3 }
 0x2cf   :  { %456 = vrot.lane.b32.xlu1 %v3892_v56, %s3645_s20 }
 0x2e4   :  { %311 = vmax.xlane.f32.xlu0 %v310_v19 }
 0x2f8   :  { %880 = vrot.lane.b32.xlu0 %v3833_v34, %s3647_s22 }
 0x319   :  { %v303_v32 = vpop.xlane.xlu0 %302 }
 0x31a   :  { %v313_v33 = vsub.f32 %v290_v9, %v303_v32  ;;  %v3990_v32 = vadd.f32 %v502_v4, %v3915_v13 }
 0x31c   :  { %v317_v29 = vmul.f32 1.442695, %v313_v33 }
 0x31e   :  { %3449 = vpow2.f32 %v317_v29 }
 0x321   :  { %v306_v35 = vpop.xlane.xlu2 %305 }
 0x322   :  { %v314_v37 = vsub.f32 %v293_v16, %v306_v35 }
 0x324   :  { %v3939_v38 = vpop.eup %3449  ;;  %v319_v44 = vmul.f32 1.442695, %v314_v37  ;;  %v514_v37 = vsel %vm62_vm0, %v3990_v32, -inf }
 0x325   :  { %v325_v45 = vsel %vm62_vm0, %v3939_v38, 0.0 }
 0x326   :  { %3451 = vpow2.f32 %v319_v44  ;;  %326 = vadd.xlane.f32.xlu2 %v325_v45 }
 0x329   :  { %v309_v48 = vpop.xlane.xlu1 %308 }
 0x32a   :  { %v315_v50 = vsub.f32 %v296_v23, %v309_v48  ;;  %v505_v23 = vpop.f32.mrf.mxu3 }
 0x32c   :  { %v3943_v46 = vpop.eup %3451  ;;  %v671_v47 = vpop.permute.xlu0 %670  ;;  %v321_v53 = vmul.f32 1.442695, %v315_v50 }
 0x32d   :  { %3200 = vmatpush.xpose.msk.msrb.mxu2 %vm251_vm14, %v671_v47  ;;  %v328_v34 = vsel %vm62_vm0, %v3943_v46, 0.0 }
 0x32e   :  { %329 = vadd.xlane.f32.xlu0 %v328_v34 }
 0x33e   :  { %668 = vrot.lane.b32.xlu2 %v3840_v36, %s3646_s21 }
 0x341   :  { %v457_v49 = vpop.permute.xlu1 %456 }
 0x342   :  { %878 = vrot.lane.b32.xlu0 %v3840_v36, %s3647_s22  ;;  %3193 = vmatmul.msk.f32.gmra.mxu3 %vm251_vm14, %v457_v49 }
 0x34a   :  { %662 = vrot.lane.b32.xlu0 %v3862_v42, %s3648_s2 }
 0x352   :  { %874 = vrot.lane.b32.xlu0 %v3867_v43, %s3649_s30 }
 0x357   :  { %v312_v51 = vpop.xlane.xlu0 %311 }
 0x358   :  { %v316_v52 = vsub.f32 %v299_v30, %v312_v51  ;;  %v3987_v30 = vadd.f32 %v505_v23, %v3922_v20 }
 0x35a   :  { %v323_v54 = vmul.f32 1.442695, %v316_v52  ;;  %v517_v35 = vsel %vm62_vm0, %v3987_v30, -inf }
 0x35c   :  { %3453 = vpow2.f32 %v323_v54 }
 0x35d   :  { %3455 = vpow2.f32 %v321_v53 }
 0x362   :  { %v3957_v55 = vpop.eup %3453 }
 0x363   :  { %v3959_v36 = vpop.eup %3455  ;;  %v334_v57 = vsel %vm62_vm0, %v3957_v55, 0.0 }
 0x364   :  { %335 = vadd.xlane.f32.xlu1 %v334_v57  ;;  %v331_v58 = vsel %vm62_vm0, %v3959_v36, 0.0 }
 0x367   :  { %332 = vadd.xlane.f32.xlu2 %v331_v58 }
 0x36a   :  { %v881_v59 = vpop.permute.xlu0 %880 }
 0x36b   :  { %3212 = vmatpush.xpose.msk.msrb.mxu3 %vm251_vm14, %v881_v59 }
 0x37c   :  { %512 = vmax.xlane.f32.xlu0 %v511_v62 }
 0x37d   :  { %870 = vrot.lane.b32.xlu1 %v3854_v41, %s3649_s30 }
 0x37f   :  { %660 = vrot.lane.b32.xlu2 %v3854_v41, %s3648_s2 }
 0x385   :  { %664 = vrot.lane.b32.xlu1 %v3867_v43, %s3648_s2 }
 0x387   :  { %872 = vrot.lane.b32.xlu2 %v3862_v42, %s3649_s30 }
 0x38d   :  { %876 = vrot.lane.b32.xlu1 %v3892_v56, %s3649_s30 }
 0x38f   :  { %666 = vrot.lane.b32.xlu2 %v3892_v56, %s3648_s2 }
 0x399   :  { %v327_v63 = vpop.xlane.xlu2 %326 }
 0x39a   :  { %3457 = vrcp.f32 %v327_v63  ;;  %v348_v43 = vand.u32 2147483648, %v327_v63  ;;  %v346_v42 = vand.u32 2147483647, %v327_v63  ;;  %vm342_vm1 = vweird.f32 %v327_v63 }
 0x39c   :  { %v349_v56 = vor.u32 1.1754944e-38, %v348_v43  ;;  %vm347_vm3 = vcmp.eq.f32.partialorder %v346_v42, 8.507059e+37 }
 0x3a0   :  { %v3458_v0 = vpop.eup %3457 }
 0x3a1   :  { %v338_v1 = vmul.f32 %v3458_v0, %v327_v63  ;;  %v669_v2 = vpop.permute.xlu2 %668  ;;  %v330_v3 = vpop.xlane.xlu0 %329  ;;  %vm343_vm15 = vweird.f32 %v3458_v0 }
 0x3a2   :  { %3459 = vrcp.f32 %v330_v3  ;;  %3201 = vmatpush.xpose.msk.msrb.mxu2 %vm251_vm14, %v669_v2  ;;  %vm344_vm2 = vmor %vm342_vm1, %vm343_vm15  ;;  %v363_v17 = vand.u32 2147483648, %v330_v3  ;;  %v361_v21 = vand.u32 2147483647, %v330_v3  ;;  %vm357_vm5 = vweird.f32 %v330_v3 }
 0x3a3   :  { %v339_v41 = vsub.f32 1.0, %v338_v1 }
 0x3a4   :  { %v364_v25 = vor.u32 1.1754944e-38, %v363_v17  ;;  %vm362_vm7 = vcmp.eq.f32.partialorder %v361_v21, 8.507059e+37 }
 0x3a5   :  { %v340_v5 = vmul.f32 %v3458_v0, %v339_v41 }
 0x3a7   :  { %v341_v6 = vadd.f32 %v3458_v0, %v340_v5 }
 0x3a8   :  { %v3460_v8 = vpop.eup %3459 }
 0x3a9   :  { %v353_v9 = vmul.f32 %v3460_v8, %v330_v3  ;;  %v345_v10 = vsel %vm344_vm2, %v3458_v0, %v341_v6  ;;  %vm358_vm4 = vweird.f32 %v3460_v8 }
 0x3aa   :  { %v350_v12 = vsel %vm347_vm3, %v349_v56, %v345_v10  ;;  %vm359_vm6 = vmor %vm357_vm5, %vm358_vm4 }
 0x3ab   :  { %v354_v15 = vsub.f32 1.0, %v353_v9  ;;  %v351_v16 = vmul.f32 %v3939_v38, %v350_v12 }
 0x3ad   :  { %3182 = vmatmul.msk.f32.vlgmr.msra.gmra.mxu2 %vm62_vm0, %v351_v16  ;;  %v355_v18 = vmul.f32 %v3460_v8, %v354_v15 }
 0x3af   :  { %v356_v24 = vadd.f32 %v3460_v8, %v355_v18 }
 0x3b1   :  { %v360_v28 = vsel %vm359_vm6, %v3460_v8, %v356_v24 }
 0x3b2   :  { %v365_v19 = vsel %vm362_vm7, %v364_v25, %v360_v28 }
 0x3b3   :  { %v366_v33 = vmul.f32 %v3943_v46, %v365_v19 }
 0x3b4   :  { %v879_v29 = vpop.permute.xlu0 %878 }
 0x3b5   :  { %3183 = vmatmul.msk.f32.gmra.mxu2 %vm62_vm0, %v366_v33  ;;  %3213 = vmatpush.xpose.msk.msrb.mxu3 %vm251_vm14, %v879_v29 }
 0x3b7   :  { %518 = vmax.xlane.f32.xlu1 %v517_v35 }
 0x3b8   :  { %515 = vmax.xlane.f32.xlu2 %v514_v37 }
 0x3bc   :  { %v663_v8 = vpop.permute.xlu0 %662 }
 0x3c4   :  { %v875_v9 = vpop.permute.xlu0 %874 }
 0x3c5   :  { %v508_v38 = vpop.f32.mrf.mxu3 }
 0x3c6   :  { %v4000_v44 = vadd.f32 %v508_v38, %v3933_v26 }
 0x3c8   :  { %v520_v45 = vsel %vm62_vm0, %v4000_v44, -inf }
 0x3c9   :  { %521 = vmax.xlane.f32.xlu2 %v520_v45 }
 0x3d7   :  { %v336_v46 = vpop.xlane.xlu1 %335 }
 0x3d8   :  { %3461 = vrcp.f32 %v336_v46  ;;  %v393_v1 = vand.u32 2147483648, %v336_v46  ;;  %vm387_vm13 = vweird.f32 %v336_v46  ;;  %v391_v3 = vand.u32 2147483647, %v336_v46 }
 0x3da   :  { %v333_v47 = vpop.xlane.xlu2 %332  ;;  %v394_v5 = vor.u32 1.1754944e-38, %v393_v1  ;;  %vm392_vm1 = vcmp.eq.f32.partialorder %v391_v3, 8.507059e+37 }
 0x3db   :  { %3463 = vrcp.f32 %v333_v47  ;;  %v378_v53 = vand.u32 2147483648, %v333_v47  ;;  %v376_v57 = vand.u32 2147483647, %v333_v47  ;;  %vm372_vm9 = vweird.f32 %v333_v47 }
 0x3dd   :  { %v379_v60 = vor.u32 1.1754944e-38, %v378_v53  ;;  %vm377_vm11 = vcmp.eq.f32.partialorder %v376_v57, 8.507059e+37 }
 0x3de   :  { %v3462_v34 = vpop.eup %3461 }
 0x3df   :  { %v383_v48 = vmul.f32 %v3462_v34, %v336_v46  ;;  %vm388_vm12 = vweird.f32 %v3462_v34 }
 0x3e0   :  { %vm389_vm15 = vmor %vm387_vm13, %vm388_vm12 }
 0x3e1   :  { %v3464_v49 = vpop.eup %3463  ;;  %v384_v50 = vsub.f32 1.0, %v383_v48 }
 0x3e2   :  { %v368_v51 = vmul.f32 %v3464_v49, %v333_v47  ;;  %vm373_vm8 = vweird.f32 %v3464_v49  ;;  %v661_v41 = vpop.permute.xlu2 %660 }
 0x3e3   :  { %v385_v58 = vmul.f32 %v3462_v34, %v384_v50  ;;  %vm374_vm10 = vmor %vm372_vm9, %vm373_vm8 }
 0x3e4   :  { %v369_v52 = vsub.f32 1.0, %v368_v51 }
 0x3e5   :  { %v386_v63 = vadd.f32 %v3462_v34, %v385_v58 }
 0x3e6   :  { %v370_v54 = vmul.f32 %v3464_v49, %v369_v52 }
 0x3e7   :  { %v390_v43 = vsel %vm389_vm15, %v3462_v34, %v386_v63 }
 0x3e8   :  { %v371_v59 = vadd.f32 %v3464_v49, %v370_v54  ;;  %v395_v42 = vsel %vm392_vm1, %v394_v5, %v390_v43 }
 0x3e9   :  { %v396_v6 = vmul.f32 %v3957_v55, %v395_v42 }
 0x3ea   :  { %v375_v62 = vsel %vm374_vm10, %v3464_v49, %v371_v59  ;;  %v873_v56 = vpop.permute.xlu2 %872 }
 0x3eb   :  { %v380_v0 = vsel %vm377_vm11, %v379_v60, %v375_v62 }
 0x3ec   :  { %v381_v2 = vmul.f32 %v3959_v36, %v380_v0 }
 0x3ee   :  { %3184 = vmatmul.msk.f32.gmra.mxu2 %vm62_vm0, %v381_v2 }
 0x3ef   :  { %v871_v4 = vpop.permute.xlu1 %870  ;;  %v513_v17 = vpop.xlane.xlu0 %512 }
 0x3f0   :  { %3214 = vmatmul.msk.f32.vlgmr.msrb.gmra.mxu3 %vm251_vm14, %v871_v4  ;;  %v523_v23 = vsub.f32 %v3967_v61, %v513_v17 }
 0x3f2   :  { %v667_v55 = vpop.permute.xlu2 %666  ;;  %v527_v25 = vmul.f32 1.442695, %v523_v23 }
 0x3f4   :  { %3465 = vpow2.f32 %v527_v25 }
 0x3f6   :  { %3185 = vmatmul.msk.f32.gmra.mxu2 %vm62_vm0, %v396_v6 }
 0x3f7   :  { %v665_v36 = vpop.permute.xlu1 %664 }
 0x3f8   :  { %3215 = vmatmul.msk.f32.gmra.mxu3 %vm251_vm14, %v873_v56 }
 0x3fa   :  { %v4036_v45 = vpop.eup %3465 }
 0x3fb   :  { %v535_v48 = vsel %vm62_vm0, %v4036_v45, 0.0 }
 0x3fe   :  { %3202 = vmatmul.msk.f32.vlgmr.msrb.gmra.mxu2 %vm251_vm14, %v661_v41 }
 0x3ff   :  { %v877_v10 = vpop.permute.xlu1 %876 }
 0x400   :  { %3216 = vmatmul.msk.f32.gmra.mxu3 %vm251_vm14, %v875_v9 }
 0x406   :  { %3203 = vmatmul.msk.f32.gmra.mxu2 %vm251_vm14, %v663_v8 }
 0x408   :  { %3217 = vmatmul.msk.f32.gmra.mxu3 %vm251_vm14, %v877_v10 }
 0x40e   :  { %3204 = vmatmul.msk.f32.gmra.mxu2 %vm251_vm14, %v665_v36 }
 0x416   :  { %3205 = vmatmul.msk.f32.gmra.mxu2 %vm251_vm14, %v667_v55 }
 0x42a   :  { %v519_v49 = vpop.xlane.xlu1 %518 }
 0x42b   :  { %v516_v19 = vpop.xlane.xlu2 %515  ;;  %v525_v53 = vsub.f32 %v3987_v30, %v519_v49 }
 0x42c   :  { %v524_v35 = vsub.f32 %v3990_v32, %v516_v19 }
 0x42d   :  { %v531_v58 = vmul.f32 1.442695, %v525_v53 }
 0x42e   :  { %v529_v61 = vmul.f32 1.442695, %v524_v35 }
 0x430   :  { %v4016_v12 = vpop.f32.mrf.mxu2  ;;  %3467 = vpow2.f32 %v529_v61 }
 0x431   :  { %3469 = vpow2.f32 %v531_v58 }
 0x436   :  { %v4045_v50 = vpop.eup %3467 }
 0x437   :  { %v538_v54 = vsel %vm62_vm0, %v4045_v50, 0.0  ;;  %v4065_v5 = vpop.eup %3469 }
 0x438   :  { %v4018_v15 = vpop.f32.mrf.mxu2 }
 0x43c   :  { %v522_v60 = vpop.xlane.xlu2 %521 }
 0x43d   :  { %v526_v30 = vsub.f32 %v4000_v44, %v522_v60  ;;  %v541_v44 = vsel %vm62_vm0, %v4065_v5, 0.0 }
 0x43f   :  { %v533_v41 = vmul.f32 1.442695, %v526_v30 }
 0x441   :  { %3471 = vpow2.f32 %v533_v41 }
 0x447   :  { %v4071_v6 = vpop.eup %3471 }
 0x448   :  { %v544_v8 = vsel %vm62_vm0, %v4071_v6, 0.0 }
 0x471   :  { %v4020_v16 = vpop.f32.mrf.mxu2 }
 0x473   :  { %v919_v18 = vpop.f32.mrf.mxu3 }
 0x474   :  { %v4023_v21 = vadd.f32 %v919_v18, %v3908_v7 }
 0x476   :  { %v931_v24 = vsel %vm62_vm0, %v4023_v21, -inf }
 0x477   :  { %932 = vmax.xlane.f32.xlu1 %v931_v24 }
 0x479   :  { %v4028_v28 = vpop.f32.mrf.mxu2 }
 0x47b   :  { %v922_v33 = vpop.f32.mrf.mxu3 }
 0x47c   :  { %v4031_v29 = vadd.f32 %v922_v33, %v3915_v13 }
 0x47e   :  { %v934_v37 = vsel %vm62_vm0, %v4031_v29, -inf }
 0x47f   :  { %935 = vmax.xlane.f32.xlu0 %v934_v37 }
 0x481   :  { %v709_v38 = vpop.f32.mrf.mxu2 }
 0x482   :  { %v710_v62 = vadd.f32 %v709_v38, %v3908_v7 }
 0x483   :  { %v925_v46 = vpop.f32.mrf.mxu3 }
 0x484   :  { %v4039_v47 = vadd.f32 %v925_v46, %v3922_v20  ;;  %v721_v2 = vsel %vm62_vm0, %v710_v62, -inf }
 0x486   :  { %v937_v34 = vsel %vm62_vm0, %v4039_v47, -inf }
 0x487   :  { %938 = vmax.xlane.f32.xlu2 %v937_v34  ;;  %536 = vadd.xlane.f32.xlu0 %v535_v48 }
 0x489   :  { %v712_v32 = vpop.f32.mrf.mxu2 }
 0x48a   :  { %v713_v63 = vadd.f32 %v712_v32, %v3915_v13 }
 0x48b   :  { %v928_v51 = vpop.f32.mrf.mxu3 }
 0x48c   :  { %v4048_v52 = vadd.f32 %v928_v51, %v3933_v26  ;;  %v724_v3 = vsel %vm62_vm0, %v713_v63, -inf }
 0x48e   :  { %v940_v57 = vsel %vm62_vm0, %v4048_v52, -inf }
 0x48f   :  { %539 = vadd.xlane.f32.xlu0 %v538_v54  ;;  %941 = vmax.xlane.f32.xlu2 %v940_v57 }
 0x491   :  { %v715_v59 = vpop.f32.mrf.mxu2 }
 0x492   :  { %v716_v0 = vadd.f32 %v715_v59, %v3922_v20 }
 0x494   :  { %v727_v1 = vsel %vm62_vm0, %v716_v0, -inf }
 0x495   :  { %728 = vmax.xlane.f32.xlu1 %v727_v1 }
 0x497   :  { %722 = vmax.xlane.f32.xlu0 %v721_v2  ;;  %725 = vmax.xlane.f32.xlu2 %v724_v3 }
 0x499   :  { %v718_v43 = vpop.f32.mrf.mxu2 }
 0x49a   :  { %v4063_v4 = vadd.f32 %v718_v43, %v3933_v26 }
 0x49c   :  { %v730_v42 = vsel %vm62_vm0, %v4063_v4, -inf }
 0x49d   :  { %731 = vmax.xlane.f32.xlu1 %v730_v42 }
 0x49f   :  { %542 = vadd.xlane.f32.xlu2 %v541_v44 }
 0x4a7   :  { %545 = vadd.xlane.f32.xlu2 %v544_v8 }
 0x4ab   :  { %3357 = vrot.lane.b32.xlu0 %v3844_v39, %s3650_s23 }
 0x4b6   :  { %3352 = vrot.lane.b32.xlu1 %v3849_v40, %s3650_s23 }
 0x4ea   :  { %v933_v56 = vpop.xlane.xlu1 %932 }
 0x4eb   :  { %v943_v36 = vsub.f32 %v4023_v21, %v933_v56 }
 0x4ed   :  { %v947_v9 = vmul.f32 1.442695, %v943_v36 }
 0x4ef   :  { %3473 = vpow2.f32 %v947_v9 }
 0x4f2   :  { %v936_v10 = vpop.xlane.xlu0 %935 }
 0x4f3   :  { %v944_v46 = vsub.f32 %v4031_v29, %v936_v10 }
 0x4f5   :  { %v4080_v55 = vpop.eup %3473  ;;  %v949_v49 = vmul.f32 1.442695, %v944_v46 }
 0x4f6   :  { %v955_v17 = vsel %vm62_vm0, %v4080_v55, 0.0 }
 0x4f7   :  { %956 = vadd.xlane.f32.xlu0 %v955_v17 }
 0x4fa   :  { %v939_v18 = vpop.xlane.xlu2 %938  ;;  %v4084_v23 = vpop.xlane.xlu0 %536 }
 0x4fb   :  { %v945_v32 = vsub.f32 %v4039_v47, %v939_v18  ;;  %v558_v17 = vand.u32 2147483648, %v4084_v23  ;;  %vm552_vm3 = vweird.f32 %v4084_v23 }
 0x4fd   :  { %v951_v51 = vmul.f32 1.442695, %v945_v32  ;;  %v559_v46 = vor.u32 1.1754944e-38, %v558_v17 }
 0x502   :  { %v4086_v24 = vpop.xlane.xlu0 %539  ;;  %v942_v25 = vpop.xlane.xlu2 %941 }
 0x503   :  { %v946_v47 = vsub.f32 %v4048_v52, %v942_v25  ;;  %vm567_vm7 = vweird.f32 %v4086_v24 }
 0x508   :  { %v729_v19 = vpop.xlane.xlu1 %728 }
 0x509   :  { %v735_v33 = vsub.f32 %v716_v0, %v729_v19  ;;  %v556_v19 = vand.u32 2147483647, %v4084_v23 }
 0x50a   :  { %v723_v35 = vpop.xlane.xlu0 %722  ;;  %v726_v37 = vpop.xlane.xlu2 %725 }
 0x50b   :  { %v741_v21 = vmul.f32 1.442695, %v735_v33  ;;  %v733_v61 = vsub.f32 %v710_v62, %v723_v35  ;;  %v734_v38 = vsub.f32 %v713_v63, %v726_v37  ;;  %v953_v63 = vmul.f32 1.442695, %v946_v47 }
 0x50c   :  { %vm557_vm5 = vcmp.eq.f32.partialorder %v556_v19, 8.507059e+37  ;;  %v573_v47 = vand.u32 2147483648, %v4086_v24 }
 0x50d   :  { %3475 = vpow2.f32 %v741_v21  ;;  %v737_v34 = vmul.f32 1.442695, %v733_v61  ;;  %v739_v48 = vmul.f32 1.442695, %v734_v38 }
 0x50f   :  { %3477 = vpow2.f32 %v737_v34 }
 0x510   :  { %3479 = vpow2.f32 %v739_v48  ;;  %v4116_v43 = vpop.xlane.xlu1 %731 }
 0x511   :  { %3481 = vrcp.f32 %v4084_v23 }
 0x512   :  { %3483 = vpow2.f32 %v949_v49  ;;  %v4110_v30 = vpop.xlane.xlu2 %542 }
 0x513   :  { %v4091_v53 = vpop.eup %3475  ;;  %3485 = vpow2.f32 %v951_v51  ;;  %vm582_vm11 = vweird.f32 %v4110_v30 }
 0x514   :  { %v751_v54 = vsel %vm62_vm0, %v4091_v53, 0.0  ;;  %3487 = vrcp.f32 %v4086_v24 }
 0x515   :  { %v4095_v57 = vpop.eup %3477  ;;  %752 = vadd.xlane.f32.xlu0 %v751_v54  ;;  %3489 = vpow2.f32 %v953_v63 }
 0x516   :  { %v4097_v29 = vpop.eup %3479  ;;  %v745_v58 = vsel %vm62_vm0, %v4095_v57, 0.0  ;;  %3491 = vrcp.f32 %v4110_v30 }
 0x517   :  { %v3482_v59 = vpop.eup %3481  ;;  %v748_v60 = vsel %vm62_vm0, %v4097_v29, 0.0  ;;  %746 = vadd.xlane.f32.xlu2 %v745_v58 }
 0x518   :  { %749 = vadd.xlane.f32.xlu1 %v748_v60  ;;  %v548_v62 = vmul.f32 %v3482_v59, %v4084_v23  ;;  %v4106_v0 = vpop.eup %3483  ;;  %vm553_vm2 = vweird.f32 %v3482_v59 }
 0x519   :  { %v4108_v1 = vpop.eup %3485  ;;  %v958_v2 = vsel %vm62_vm0, %v4106_v0, 0.0  ;;  %vm4129_vm4 = vmor %vm552_vm3, %vm553_vm2 }
 0x51a   :  { %v549_v52 = vsub.f32 1.0, %v548_v62  ;;  %v3488_v3 = vpop.eup %3487  ;;  %v961_v41 = vsel %vm62_vm0, %v4108_v1, 0.0  ;;  %v4122_v36 = vpop.xlane.xlu2 %545 }
 0x51b   :  { %v563_v44 = vmul.f32 %v3488_v3, %v4086_v24  ;;  %v4120_v8 = vpop.eup %3489  ;;  %3493 = vrcp.f32 %v4122_v36  ;;  %vm568_vm6 = vweird.f32 %v3488_v3  ;;  %vm597_vm1 = vweird.f32 %v4122_v36 }
 0x51c   :  { %v550_v42 = vmul.f32 %v3482_v59, %v549_v52  ;;  %v3492_v10 = vpop.eup %3491  ;;  %v964_v18 = vsel %vm62_vm0, %v4120_v8, 0.0  ;;  %vm569_vm8 = vmor %vm567_vm7, %vm568_vm6  ;;  %v574_v52 = vor.u32 1.1754944e-38, %v573_v47 }
 0x51d   :  { %v564_v56 = vsub.f32 1.0, %v563_v44  ;;  %v578_v37 = vmul.f32 %v3492_v10, %v4110_v30  ;;  %v3358_v21 = vpop.permute.xlu0 %3357  ;;  %vm583_vm10 = vweird.f32 %v3492_v10  ;;  %v586_v44 = vand.u32 2147483647, %v4110_v30 }
 0x51e   :  { %v551_v9 = vadd.f32 %v3482_v59, %v550_v42  ;;  %v3359_v34 = vunpack.i.l.bf16 %v3358_v21  ;;  %v3360_v54 = vunpack.i.h.bf16 %v3358_v21  ;;  %vm584_vm12 = vmor %vm582_vm11, %vm583_vm10 }
 0x51f   :  { %959 = vadd.xlane.f32.xlu2 %v958_v2  ;;  %v565_v38 = vmul.f32 %v3488_v3, %v564_v56  ;;  %v579_v32 = vsub.f32 1.0, %v578_v37  ;;  %vm587_vm13 = vcmp.eq.f32.partialorder %v586_v44, 8.507059e+37 }
 0x520   :  { %962 = vadd.xlane.f32.xlu1 %v961_v41  ;;  %v555_v61 = vsel %vm4129_vm4, %v3482_v59, %v551_v9  ;;  %v571_v59 = vand.u32 2147483647, %v4086_v24 }
 0x521   :  { %v560_v48 = vsel %vm557_vm5, %v559_v46, %v555_v61  ;;  %v566_v49 = vadd.f32 %v3488_v3, %v565_v38  ;;  %v3494_v51 = vpop.eup %3493  ;;  %v580_v60 = vmul.f32 %v3492_v10, %v579_v32 }
 0x522   :  { %v561_v58 = vmul.f32 %v4036_v45, %v560_v48  ;;  %v593_v62 = vmul.f32 %v3494_v51, %v4122_v36  ;;  %vm572_vm9 = vcmp.eq.f32.partialorder %v571_v59, 8.507059e+37  ;;  %v588_v45 = vand.u32 2147483648, %v4110_v30 }
 0x523   :  { %v570_v63 = vsel %vm569_vm8, %v3488_v3, %v566_v49  ;;  %v581_v42 = vadd.f32 %v3492_v10, %v580_v60  ;;  %vm598_vm15 = vweird.f32 %v3494_v51  ;;  %v601_v30 = vand.u32 2147483647, %v4122_v36 }
 0x524   :  { %v575_v2 = vsel %vm572_vm9, %v574_v52, %v570_v63  ;;  %v594_v41 = vsub.f32 1.0, %v593_v62  ;;  %v589_v9 = vor.u32 1.1754944e-38, %v588_v45  ;;  %vm599_vm2 = vmor %vm597_vm1, %vm598_vm15 }
 0x525   :  { %v576_v24 = vmul.f32 %v4045_v50, %v575_v2  ;;  %v585_v56 = vsel %vm584_vm12, %v3492_v10, %v581_v42  ;;  %vm602_vm3 = vcmp.eq.f32.partialorder %v601_v30, 8.507059e+37 }
 0x526   :  { %v595_v3 = vmul.f32 %v3494_v51, %v594_v41  ;;  %v590_v17 = vsel %vm587_vm13, %v589_v9, %v585_v56 }
 0x527   :  { %v591_v50 = vmul.f32 %v4065_v5, %v590_v17 }
 0x528   :  { %965 = vadd.xlane.f32.xlu1 %v964_v18  ;;  %v3353_v25 = vpop.permute.xlu1 %3352  ;;  %v596_v18 = vadd.f32 %v3494_v51, %v595_v3 }
 0x529   :  { %3377 = vrot.lane.b32.xlu0 %v3844_v39, %s5208_s24  ;;  %v3354_v35 = vunpack.i.l.bf16 %v3353_v25  ;;  %v3355_v23 = vunpack.i.h.bf16 %v3353_v25  ;;  %v603_v25 = vand.u32 2147483648, %v4122_v36 }
 0x52a   :  { %v600_v10 = vsel %vm599_vm2, %v3494_v51, %v596_v18 }
 0x52b   :  { %643 = vmatpush.msrb.mxu0 %v3354_v35  ;;  %v604_v19 = vor.u32 1.1754944e-38, %v603_v25 }
 0x52d   :  { %644 = vmatpush.msrb.mxu0 %v3355_v23  ;;  %v605_v33 = vsel %vm602_vm3, %v604_v19, %v600_v10 }
 0x52e   :  { %v606_v35 = vmul.f32 %v4071_v6, %v605_v33 }
 0x52f   :  { %645 = vmatpush.msrb.mxu0 %v3359_v34 }
 0x531   :  { %646 = vmatpush.msrb.mxu0 %v3360_v54 }
 0x532   :  { %3194 = vmatmul.msk.f32.vlgmr.msrb.gmra.mxu0 %vm62_vm0, %v561_v58 }
 0x537   :  { %3362 = vrot.lane.b32.xlu2 %v3849_v40, %s5206_s25 }
 0x53a   :  { %3195 = vmatmul.msk.f32.gmra.mxu0 %vm62_vm0, %v576_v24 }
 0x53f   :  { %3367 = vrot.lane.b32.xlu2 %v3849_v40, %s5208_s24  ;;  %v736_v40 = vsub.f32 %v4063_v4, %v4116_v43 }
 0x541   :  { %v743_v5 = vmul.f32 1.442695, %v736_v40 }
 0x542   :  { %3196 = vmatmul.msk.f32.gmra.mxu0 %vm62_vm0, %v591_v50 }
 0x543   :  { %3495 = vpow2.f32 %v743_v5 }
 0x547   :  { %3372 = vrot.lane.b32.xlu2 %v3844_v39, %s5206_s25 }
 0x549   :  { %v4165_v36 = vpop.eup %3495 }
 0x54a   :  { %3197 = vmatmul.msk.f32.gmra.mxu0 %vm62_vm0, %v606_v35  ;;  %v754_v37 = vsel %vm62_vm0, %v4165_v36, 0.0 }
 0x56a   :  { %v957_v21 = vpop.xlane.xlu0 %956 }
 0x56b   :  { %3497 = vrcp.f32 %v957_v21  ;;  %vm972_vm5 = vweird.f32 %v957_v21  ;;  %v978_v45 = vand.u32 2147483648, %v957_v21  ;;  %v976_v44 = vand.u32 2147483647, %v957_v21 }
 0x56d   :  { %v979_v19 = vor.u32 1.1754944e-38, %v978_v45  ;;  %vm977_vm8 = vcmp.eq.f32.partialorder %v976_v44, 8.507059e+37 }
 0x570   :  { %755 = vadd.xlane.f32.xlu2 %v754_v37 }
 0x571   :  { %v3498_v6 = vpop.eup %3497 }
 0x572   :  { %v968_v4 = vmul.f32 %v3498_v6, %v957_v21  ;;  %vm973_vm4 = vweird.f32 %v3498_v6 }
 0x573   :  { %vm4201_vm6 = vmor %vm972_vm5, %vm973_vm4 }
 0x574   :  { %v969_v23 = vsub.f32 1.0, %v968_v4 }
 0x576   :  { %v970_v49 = vmul.f32 %v3498_v6, %v969_v23 }
 0x578   :  { %v971_v62 = vadd.f32 %v3498_v6, %v970_v49 }
 0x57a   :  { %v975_v56 = vsel %vm4201_vm6, %v3498_v6, %v971_v62 }
 0x57b   :  { %v980_v5 = vsel %vm977_vm8, %v979_v19, %v975_v56 }
 0x588   :  { %v4186_v51 = vpop.xlane.xlu0 %752 }
 0x589   :  { %v798_v21 = vand.u32 2147483648, %v4186_v51 }
 0x58a   :  { %v4169_v61 = vpop.xlane.xlu2 %746 }
 0x58b   :  { %v4171_v39 = vpop.xlane.xlu1 %749  ;;  %3499 = vrcp.f32 %v4169_v61  ;;  %v768_v33 = vand.u32 2147483648, %v4169_v61  ;;  %vm762_vm9 = vweird.f32 %v4169_v61  ;;  %v766_v40 = vand.u32 2147483647, %v4169_v61 }
 0x58c   :  { %v783_v44 = vand.u32 2147483648, %v4171_v39  ;;  %vm777_vm2 = vweird.f32 %v4171_v39 }
 0x58d   :  { %v769_v49 = vor.u32 1.1754944e-38, %v768_v33  ;;  %vm767_vm12 = vcmp.eq.f32.partialorder %v766_v40, 8.507059e+37 }
 0x591   :  { %v4177_v43 = vpop.eup %3499 }
 0x592   :  { %v4174_v38 = vpop.xlane.xlu2 %959  ;;  %v758_v34 = vmul.f32 %v4177_v43, %v4169_v61  ;;  %vm763_vm7 = vweird.f32 %v4177_v43 }
 0x593   :  { %3501 = vrcp.f32 %v4174_v38  ;;  %v4180_v46 = vpop.xlane.xlu1 %962  ;;  %vm4220_vm10 = vmor %vm762_vm9, %vm763_vm7  ;;  %vm987_vm13 = vweird.f32 %v4174_v38  ;;  %v991_v62 = vand.u32 2147483647, %v4174_v38 }
 0x594   :  { %3503 = vrcp.f32 %v4171_v39  ;;  %v759_v58 = vsub.f32 1.0, %v758_v34  ;;  %v1008_v19 = vand.u32 2147483648, %v4180_v46  ;;  %vm1002_vm6 = vweird.f32 %v4180_v46 }
 0x595   :  { %3505 = vrcp.f32 %v4180_v46  ;;  %vm992_vm3 = vcmp.eq.f32.partialorder %v991_v62, 8.507059e+37 }
 0x596   :  { %3507 = vrcp.f32 %v4186_v51  ;;  %v760_v52 = vmul.f32 %v4177_v43, %v759_v58 }
 0x598   :  { %v761_v25 = vadd.f32 %v4177_v43, %v760_v52 }
 0x599   :  { %v4184_v48 = vpop.eup %3501 }
 0x59a   :  { %v3363_v32 = vpop.permute.xlu2 %3362  ;;  %v4189_v47 = vpop.eup %3503  ;;  %v983_v59 = vmul.f32 %v4184_v48, %v4174_v38  ;;  %v765_v34 = vsel %vm4220_vm10, %v4177_v43, %v761_v25  ;;  %vm988_vm11 = vweird.f32 %v4184_v48  ;;  %vm792_vm10 = vweird.f32 %v4186_v51 }
 0x59b   :  { %v3364_v54 = vunpack.i.l.bf16 %v3363_v32  ;;  %v3365_v60 = vunpack.i.h.bf16 %v3363_v32  ;;  %v773_v63 = vmul.f32 %v4189_v47, %v4171_v39  ;;  %v4197_v41 = vpop.xlane.xlu1 %965  ;;  %v4199_v42 = vpop.eup %3505  ;;  %v770_v52 = vsel %vm767_vm12, %v769_v49, %v765_v34  ;;  %vm4238_vm15 = vmor %vm987_vm13, %vm988_vm11 }
 0x59c   :  { %v984_v2 = vsub.f32 1.0, %v983_v59  ;;  %3509 = vrcp.f32 %v4197_v41  ;;  %v4208_v18 = vpop.eup %3507  ;;  %v998_v30 = vmul.f32 %v4199_v42, %v4180_v46  ;;  %v3378_v10 = vpop.permute.xlu0 %3377  ;;  %vm778_vm1 = vweird.f32 %v4189_v47 }
 0x59d   :  { %853 = vmatpush.msrb.mxu1 %v3364_v54  ;;  %v774_v9 = vsub.f32 1.0, %v773_v63  ;;  %v788_v37 = vmul.f32 %v4208_v18, %v4186_v51  ;;  %v3379_v4 = vunpack.i.l.bf16 %v3378_v10  ;;  %v993_v54 = vand.u32 2147483648, %v4174_v38  ;;  %vm779_vm4 = vmor %vm777_vm2, %vm778_vm1 }
 0x59e   :  { %v985_v50 = vmul.f32 %v4184_v48, %v984_v2  ;;  %v999_v23 = vsub.f32 1.0, %v998_v30  ;;  %v3380_v58 = vunpack.i.h.bf16 %v3378_v10  ;;  %vm1003_vm5 = vweird.f32 %v4199_v42 }
 0x59f   :  { %854 = vmatpush.msrb.mxu1 %v3365_v60  ;;  %v775_v6 = vmul.f32 %v4189_v47, %v774_v9  ;;  %v981_v60 = vmul.f32 %v4080_v55, %v980_v5  ;;  %v789_v43 = vsub.f32 1.0, %v788_v37  ;;  %v771_v9 = vmul.f32 %v4095_v57, %v770_v52  ;;  %vm1004_vm8 = vmor %vm1002_vm6, %vm1003_vm5 }
 0x5a0   :  { %v986_v32 = vadd.f32 %v4184_v48, %v985_v50  ;;  %v1000_v45 = vmul.f32 %v4199_v42, %v999_v23  ;;  %vm793_vm9 = vweird.f32 %v4208_v18  ;;  %v1023_v49 = vand.u32 2147483648, %v4197_v41 }
 0x5a1   :  { %v776_v38 = vadd.f32 %v4189_v47, %v775_v6  ;;  %v790_v25 = vmul.f32 %v4208_v18, %v789_v43  ;;  %v1009_v6 = vor.u32 1.1754944e-38, %v1008_v19  ;;  %vm794_vm12 = vmor %vm792_vm10, %vm793_vm9  ;;  %vm1137_vm9 = vcmask 195584  }
 0x5a2   :  { %v3368_v3 = vpop.permute.xlu2 %3367  ;;  %v4230_v61 = vpop.eup %3509  ;;  %v990_v55 = vsel %vm4238_vm15, %v4184_v48, %v986_v32  ;;  %v1001_v57 = vadd.f32 %v4199_v42, %v1000_v45  ;;  %v799_v32 = vor.u32 1.1754944e-38, %v798_v21  ;;  %vm1017_vm15 = vweird.f32 %v4197_v41 }
 0x5a3   :  { %v3369_v17 = vunpack.i.l.bf16 %v3368_v3  ;;  %v3370_v35 = vunpack.i.h.bf16 %v3368_v3  ;;  %v1013_v24 = vmul.f32 %v4230_v61, %v4197_v41  ;;  %v994_v3 = vor.u32 1.1754944e-38, %v993_v54 }
 0x5a4   :  { %v780_v10 = vsel %vm779_vm4, %v4189_v47, %v776_v38  ;;  %v1005_v47 = vsel %vm1004_vm8, %v4199_v42, %v1001_v57  ;;  %v791_v37 = vadd.f32 %v4208_v18, %v790_v25  ;;  %vm1018_vm13 = vweird.f32 %v4230_v61  ;;  %v1143_v57 = vld [vmem:[%s5195_s7 + $0x8] sm:$0xff] }
 0x5a5   :  { %1063 = vmatpush.msra.mxu0 %v3369_v17  ;;  %v781_v17 = vand.u32 2147483647, %v4171_v39  ;;  %v995_v30 = vsel %vm992_vm3, %v994_v3, %v990_v55  ;;  %v1014_v48 = vsub.f32 1.0, %v1013_v24  ;;  %v784_v39 = vor.u32 1.1754944e-38, %v783_v44  ;;  %vm1019_vm2 = vmor %vm1017_vm15, %vm1018_vm13 }
 0x5a6   :  { %v996_v33 = vmul.f32 %v4106_v0, %v995_v30  ;;  %v795_v42 = vsel %vm794_vm12, %v4208_v18, %v791_v37  ;;  %vm1132_vm8 = vcmask 130048  }
 0x5a7   :  { %1064 = vmatpush.msra.mxu0 %v3370_v35  ;;  %vm782_vm7 = vcmp.eq.f32.partialorder %v781_v17, 8.507059e+37  ;;  %v1006_v35 = vand.u32 2147483647, %v4180_v46  ;;  %v1015_v5 = vmul.f32 %v4230_v61, %v1014_v48  ;;  %v796_v46 = vand.u32 2147483647, %v4186_v51  ;;  %v1145_v48 = vld [vmem:[%s5195_s7 + $0x18] sm:$0xff] }
 0x5a8   :  { %v785_v40 = vsel %vm782_vm7, %v784_v39, %v780_v10  ;;  %v1021_v51 = vand.u32 2147483647, %v4197_v41  ;;  %v1144_v10 = vld [vmem:[%s5195_s7 + $0x10] sm:$0xff]  ;;  %1174 = vmatpush.msra.mxu2 %v1145_v48  ;;  %v1142_v39 = vld [vmem:[%s5195_s7] sm:$0xff] }
 0x5a9   :  { %1065 = vmatpush.msra.mxu0 %v3379_v4  ;;  %v786_v0 = vmul.f32 %v4097_v29, %v785_v40  ;;  %vm1007_vm11 = vcmp.eq.f32.partialorder %v1006_v35, 8.507059e+37  ;;  %v1016_v34 = vadd.f32 %v4230_v61, %v1015_v5  ;;  %vm797_vm1 = vcmp.eq.f32.partialorder %v796_v46, 8.507059e+37 }
 0x5aa   :  { %v3373_v59 = vpop.permute.xlu2 %3372  ;;  %v1010_v23 = vsel %vm1007_vm11, %v1009_v6, %v1005_v47  ;;  %v800_v54 = vsel %vm797_vm1, %v799_v32, %v795_v42  ;;  %vm1022_vm3 = vcmp.eq.f32.partialorder %v1021_v51, 8.507059e+37  ;;  %1175 = vmatpush.msra.mxu2 %v1144_v10 }
 0x5ab   :  { %1066 = vmatpush.msra.mxu0 %v3380_v58  ;;  %v3374_v63 = vunpack.i.l.bf16 %v3373_v59  ;;  %v3375_v56 = vunpack.i.h.bf16 %v3373_v59  ;;  %v1011_v29 = vmul.f32 %v4108_v1, %v1010_v23  ;;  %v1020_v18 = vsel %vm1019_vm2, %v4230_v61, %v1016_v34 }
 0x5ac   :  { %3218 = vmatmul.msk.f32.vlgmr.msra.gmra.mxu0 %vm62_vm0, %v981_v60  ;;  %v1024_v58 = vor.u32 1.1754944e-38, %v1023_v49  ;;  %v801_v59 = vmul.f32 %v4091_v53, %v800_v54  ;;  %1176 = vmatpush.msra.mxu2 %v1143_v57 }
 0x5ad   :  { %855 = vmatpush.msrb.mxu1 %v3374_v63 }
 0x5ae   :  { %v1025_v62 = vsel %vm1022_vm3, %v1024_v58, %v1020_v18  ;;  %1177 = vmatpush.msra.mxu2 %v1142_v39 }
 0x5af   :  { %v648_v50 = vpop.f32.mrf.mxu0  ;;  %856 = vmatpush.msrb.mxu1 %v3375_v56  ;;  %v1026_v1 = vmul.f32 %v4120_v8, %v1025_v62 }
 0x5b0   :  { %3206 = vmatmul.msk.f32.vlgmr.msrb.gmra.mxu1 %vm62_vm0, %v771_v9  ;;  %1084 = vrot.lane.b32.xlu1 %v648_v50, %s5210_s26 }
 0x5b4   :  { %3219 = vmatmul.msk.f32.gmra.mxu0 %vm62_vm0, %v996_v33 }
 0x5b7   :  { %v651_v4 = vpop.f32.mrf.mxu0 }
 0x5b8   :  { %3207 = vmatmul.msk.f32.gmra.mxu1 %vm62_vm0, %v786_v0  ;;  %1086 = vrot.lane.b32.xlu1 %v651_v4, %s5210_s26 }
 0x5bc   :  { %3220 = vmatmul.msk.f32.gmra.mxu0 %vm62_vm0, %v1011_v29 }
 0x5bf   :  { %v654_v60 = vpop.f32.mrf.mxu0 }
 0x5c0   :  { %3208 = vmatmul.msk.f32.gmra.mxu1 %vm62_vm0, %v801_v59  ;;  %1088 = vrot.lane.b32.xlu1 %v654_v60, %s5210_s26 }
 0x5c4   :  { %3221 = vmatmul.msk.f32.gmra.mxu0 %vm62_vm0, %v1026_v1 }
 0x5c7   :  { %v657_v44 = vpop.f32.mrf.mxu0 }
 0x5e3   :  { %v756_v41 = vpop.xlane.xlu2 %755 }
 0x5e4   :  { %3511 = vrcp.f32 %v756_v41  ;;  %v813_v61 = vand.u32 2147483648, %v756_v41  ;;  %v811_v53 = vand.u32 2147483647, %v756_v41  ;;  %vm807_vm5 = vweird.f32 %v756_v41 }
 0x5e6   :  { %v814_v24 = vor.u32 1.1754944e-38, %v813_v61  ;;  %vm812_vm7 = vcmp.eq.f32.partialorder %v811_v53, 8.507059e+37 }
 0x5ea   :  { %v3512_v43 = vpop.eup %3511 }
 0x5eb   :  { %v803_v63 = vmul.f32 %v3512_v43, %v756_v41  ;;  %vm808_vm4 = vweird.f32 %v3512_v43 }
 0x5ec   :  { %vm809_vm6 = vmor %vm807_vm5, %vm808_vm4 }
 0x5ed   :  { %v804_v52 = vsub.f32 1.0, %v803_v63 }
 0x5ef   :  { %v805_v2 = vmul.f32 %v3512_v43, %v804_v52 }
 0x5f1   :  { %v806_v45 = vadd.f32 %v3512_v43, %v805_v2 }
 0x5f3   :  { %v810_v55 = vsel %vm809_vm6, %v3512_v43, %v806_v45 }
 0x5f4   :  { %v815_v38 = vsel %vm812_vm7, %v814_v24, %v810_v55 }
 0x5f5   :  { %v816_v8 = vmul.f32 %v4165_v36, %v815_v38 }
 0x5f7   :  { %3209 = vmatmul.msk.f32.gmra.mxu1 %vm62_vm0, %v816_v8 }
 0x622   :  { %v1085_v19 = vpop.permute.xlu1 %1084 }
 0x623   :  { %v1128_v40 = vsel %vm251_vm14, %v4016_v12, %v1085_v19 }
 0x629   :  { %v1068_v3 = vpop.f32.mrf.mxu0 }
 0x62a   :  { %1116 = vrot.lane.b32.xlu0 %v1068_v3, %s5212_s27  ;;  %v1087_v35 = vpop.permute.xlu1 %1086 }
 0x62b   :  { %v1129_v21 = vsel %vm251_vm14, %v4018_v15, %v1087_v35  ;;  %v1302_v35 = vld [vmem:[%s5199_s11 + $0x18] sm:$0xff] }
 0x62c   :  { %1331 = vmatpush.msra.mxu1 %v1302_v35  ;;  %v4410_v35 = vld [vmem:[%s5198_s12] ss:$0 sm:$0xff] }
 0x62d   :  { %v858_v56 = vpop.f32.mrf.mxu1 }
 0x631   :  { %v1071_v9 = vpop.f32.mrf.mxu0 }
 0x632   :  { %1100 = vrot.lane.b32.xlu0 %v858_v56, %s3655_s28  ;;  %1118 = vrot.lane.b32.xlu2 %v1071_v9, %s5212_s27  ;;  %v1089_v0 = vpop.permute.xlu1 %1088 }
 0x633   :  { %v1130_v12 = vsel %vm251_vm14, %v4020_v16, %v1089_v0  ;;  %v3424_v16 = vld [vmem:[%s5194_s8] ss:$0 sm:$0xff] }
 0x635   :  { %v861_v17 = vpop.f32.mrf.mxu1 }
 0x639   :  { %v1074_v25 = vpop.f32.mrf.mxu0 }
 0x63a   :  { %1102 = vrot.lane.b32.xlu0 %v861_v17, %s3655_s28  ;;  %1120 = vrot.lane.b32.xlu1 %v1074_v25, %s5212_s27 }
 0x63d   :  { %v864_v36 = vpop.f32.mrf.mxu1 }
 0x641   :  { %v1077_v50 = vpop.f32.mrf.mxu0 }
 0x642   :  { %1104 = vrot.lane.b32.xlu0 %v864_v36, %s3655_s28 }
 0x64a   :  { %1090 = vrot.lane.b32.xlu0 %v657_v44, %s5210_s26 }
 0x652   :  { %1122 = vrot.lane.b32.xlu0 %v1077_v50, %s5212_s27 }
 0x674   :  { %v867_v30 = vpop.f32.mrf.mxu1 }
 0x675   :  { %1106 = vrot.lane.b32.xlu1 %v867_v30, %s3655_s28 }
 0x68c   :  { %v1119_v46 = vpop.permute.xlu2 %1118 }
 0x69c   :  { %v1117_v33 = vpop.permute.xlu0 %1116 }
 0x6a4   :  { %v1101_v5 = vpop.permute.xlu0 %1100 }
 0x6a5   :  { %v1133_v47 = vsel %vm1132_vm8, %v1128_v40, %v1101_v5  ;;  %v1301_v40 = vld [vmem:[%s5199_s11 + $0x10] sm:$0xff]  ;;  %v1300_v5 = vld [vmem:[%s5199_s11 + $0x8] sm:$0xff] }
 0x6a6   :  { %v1138_v37 = vsel %vm1137_vm9, %v1133_v47, %v1117_v33  ;;  %1332 = vmatpush.msra.mxu1 %v1301_v40  ;;  %v1299_v47 = vld [vmem:[%s5199_s11] sm:$0xff] }
 0x6a7   :  { %3222 = vmatmul.msk.f32.vlgmr.msra.gmra.mxu2 %vm62_vm0, %v1138_v37 }
 0x6a8   :  { %1333 = vmatpush.msra.mxu1 %v1300_v5 }
 0x6aa   :  { %1334 = vmatpush.msra.mxu1 %v1299_v47 }
 0x6ac   :  { %v1103_v6 = vpop.permute.xlu0 %1102  ;;  %v1121_v34 = vpop.permute.xlu1 %1120 }
 0x6ad   :  { %v1134_v4 = vsel %vm1132_vm8, %v1129_v21, %v1103_v6 }
 0x6ae   :  { %v1139_v23 = vsel %vm1137_vm9, %v1134_v4, %v1119_v46 }
 0x6af   :  { %3223 = vmatmul.msk.f32.gmra.mxu2 %vm62_vm0, %v1139_v23 }
 0x6b4   :  { %v1105_v42 = vpop.permute.xlu0 %1104 }
 0x6b5   :  { %v1135_v32 = vsel %vm1132_vm8, %v1130_v12, %v1105_v42 }
 0x6b6   :  { %v1140_v49 = vsel %vm1137_vm9, %v1135_v32, %v1121_v34 }
 0x6b7   :  { %3224 = vmatmul.msk.f32.gmra.mxu2 %vm62_vm0, %v1140_v49 }
 0x6bc   :  { %v1091_v15 = vpop.permute.xlu0 %1090 }
 0x6bd   :  { %v1131_v29 = vsel %vm251_vm14, %v4028_v28, %v1091_v15 }
 0x6c4   :  { %v1123_v54 = vpop.permute.xlu0 %1122 }
 0x6e7   :  { %v1107_v51 = vpop.permute.xlu1 %1106 }
 0x6e8   :  { %v1136_v18 = vsel %vm1132_vm8, %v1131_v29, %v1107_v51 }
 0x6e9   :  { %v1141_v58 = vsel %vm1137_vm9, %v1136_v18, %v1123_v54 }
 0x6ea   :  { %3225 = vmatmul.msk.f32.gmra.mxu2 %vm62_vm0, %v1141_v58  ;;  %v3425_v58 = vld [vmem:[%s5196_s9] ss:$0 sm:$0xff] }
 0x72a   :  { %v1179_v59 = vpop.f32.mrf.mxu2 }
 0x72b   :  { %v1180_v60 = vadd.f32 %v3424_v16, %v1179_v59 }
 0x72d   :  { %v1191_v62 = vadd.f32 %v1180_v60, %v3811_v11 }
 0x72f   :  { %v1197_v1 = vsel %vm62_vm0, %v1191_v62, 0.0 }
 0x730   :  { %1198 = vadd.xlane.f32.xlu2 %v1197_v1 }
 0x732   :  { %v1182_v28 = vpop.f32.mrf.mxu2 }
 0x733   :  { %v1183_v41 = vadd.f32 %v3424_v16, %v1182_v28 }
 0x735   :  { %v1192_v43 = vadd.f32 %v1183_v41, %v3816_v22 }
 0x737   :  { %v1200_v63 = vsel %vm62_vm0, %v1192_v43, 0.0 }
 0x738   :  { %1201 = vadd.xlane.f32.xlu1 %v1200_v63 }
 0x73a   :  { %v1185_v52 = vpop.f32.mrf.mxu2 }
 0x73b   :  { %v1186_v61 = vadd.f32 %v3424_v16, %v1185_v52 }
 0x73d   :  { %v1193_v2 = vadd.f32 %v1186_v61, %v3821_v27 }
 0x73f   :  { %v1203_v53 = vsel %vm62_vm0, %v1193_v2, 0.0 }
 0x740   :  { %1204 = vadd.xlane.f32.xlu0 %v1203_v53 }
 0x76d   :  { %v1188_v45 = vpop.f32.mrf.mxu2 }
 0x76e   :  { %v1189_v24 = vadd.f32 %v3424_v16, %v1188_v45 }
 0x770   :  { %v1194_v11 = vadd.f32 %v1189_v24, %v3826_v31 }
 0x772   :  { %v1206_v55 = vsel %vm62_vm0, %v1194_v11, 0.0 }
 0x773   :  { %1207 = vadd.xlane.f32.xlu2 %v1206_v55 }
 0x7a3   :  { %v1199_v38 = vpop.xlane.xlu2 %1198 }
 0x7a4   :  { %v1209_v22 = vmul.f32 %v1199_v38, %v3762_v14 }
 0x7a6   :  { %v1213_v8 = vsub.f32 %v1191_v62, %v1209_v22  ;;  %v3426_v62 = vld [vmem:[%s5197_s10] ss:$0 sm:$0xff] }
 0x7a8   :  { %v1217_v44 = vmul.f32 %v1213_v8, %v1213_v8 }
 0x7aa   :  { %v1221_v3 = vsel %vm62_vm0, %v1217_v44, 0.0 }
 0x7ab   :  { %1222 = vadd.xlane.f32.xlu1 %v1221_v3  ;;  %v1202_v56 = vpop.xlane.xlu1 %1201 }
 0x7ac   :  { %v1210_v27 = vmul.f32 %v1202_v56, %v3762_v14 }
 0x7ae   :  { %v4349_v9 = vsub.f32 %v1192_v43, %v1210_v27 }
 0x7b0   :  { %v1218_v17 = vmul.f32 %v4349_v9, %v4349_v9 }
 0x7b2   :  { %v1224_v31 = vsel %vm62_vm0, %v1218_v17, 0.0 }
 0x7b3   :  { %1225 = vadd.xlane.f32.xlu0 %v1224_v31  ;;  %v1205_v25 = vpop.xlane.xlu0 %1204 }
 0x7b4   :  { %v1211_v36 = vmul.f32 %v1205_v25, %v3762_v14 }
 0x7b6   :  { %v4355_v50 = vsub.f32 %v1193_v2, %v1211_v36 }
 0x7b8   :  { %v1219_v30 = vmul.f32 %v4355_v50, %v4355_v50 }
 0x7ba   :  { %v1227_v48 = vsel %vm62_vm0, %v1219_v30, 0.0 }
 0x7bb   :  { %1228 = vadd.xlane.f32.xlu2 %v1227_v48 }
 0x7e6   :  { %v1208_v10 = vpop.xlane.xlu2 %1207 }
 0x7e7   :  { %v1212_v57 = vmul.f32 %v1208_v10, %v3762_v14 }
 0x7e9   :  { %v4361_v39 = vsub.f32 %v1194_v11, %v1212_v57 }
 0x7eb   :  { %v1220_v19 = vmul.f32 %v4361_v39, %v4361_v39 }
 0x7ed   :  { %v1230_v33 = vsel %vm62_vm0, %v1220_v19, 0.0 }
 0x7ee   :  { %1231 = vadd.xlane.f32.xlu1 %v1230_v33 }
 0x81e   :  { %v1223_v37 = vpop.xlane.xlu1 %1222 }
 0x81f   :  { %v1233_v21 = vmul.f32 %v1223_v37, %v3762_v14 }
 0x821   :  { %v1237_v6 = vadd.f32 1e-12, %v1233_v21 }
 0x823   :  { %3513 = vrsqrt.f32 %v1237_v6  ;;  %vm1247_vm11 = vweird.f32 %v1237_v6 }
 0x826   :  { %v1226_v0 = vpop.xlane.xlu0 %1225 }
 0x827   :  { %v1234_v46 = vmul.f32 %v1226_v0, %v3762_v14 }
 0x829   :  { %v3514_v4 = vpop.eup %3513  ;;  %v1238_v23 = vadd.f32 1e-12, %v1234_v46 }
 0x82a   :  { %v1242_v12 = vmul.f32 %v3514_v4, %v1237_v6  ;;  %vm1248_vm10 = vweird.f32 %v3514_v4 }
 0x82b   :  { %3515 = vrsqrt.f32 %v1238_v23  ;;  %vm1249_vm12 = vmor %vm1247_vm11, %vm1248_vm10  ;;  %vm1257_vm15 = vweird.f32 %v1238_v23 }
 0x82c   :  { %v1243_v42 = vmul.f32 %v3514_v4, %v1242_v12  ;;  %v1514_v12 = vld [vmem:[%s5201_s13 + $0x30] sm:$0xff] }
 0x82e   :  { %v1244_v34 = vmul.f32 0.5, %v1243_v42  ;;  %v1229_v32 = vpop.xlane.xlu2 %1228 }
 0x82f   :  { %v1235_v49 = vmul.f32 %v1229_v32, %v3762_v14 }
 0x830   :  { %v1245_v15 = vsub.f32 1.5, %v1244_v34 }
 0x831   :  { %v3516_v29 = vpop.eup %3515  ;;  %v1239_v51 = vadd.f32 1e-12, %v1235_v49 }
 0x832   :  { %v1246_v54 = vmul.f32 %v3514_v4, %v1245_v15  ;;  %v1252_v18 = vmul.f32 %v3516_v29, %v1238_v23  ;;  %vm1258_vm13 = vweird.f32 %v3516_v29  ;;  %v1513_v15 = vld [vmem:[%s5201_s13 + $0x28] sm:$0xff] }
 0x833   :  { %3517 = vrsqrt.f32 %v1239_v51  ;;  %vm1259_vm1 = vmor %vm1257_vm15, %vm1258_vm13  ;;  %vm1267_vm3 = vweird.f32 %v1239_v51 }
 0x834   :  { %v1250_v16 = vsel %vm1249_vm12, %v3514_v4, %v1246_v54  ;;  %v1253_v59 = vmul.f32 %v3516_v29, %v1252_v18  ;;  %v1515_v4 = vld [vmem:[%s5201_s13 + $0x38] sm:$0xff]  ;;  %v1512_v18 = vld [vmem:[%s5201_s13 + $0x20] sm:$0xff] }
 0x835   :  { %v1281_v60 = vmul.f32 %v1250_v16, %v1213_v8  ;;  %1541 = vmatpush.msra.mxu3 %v1515_v4 }
 0x836   :  { %v1254_v1 = vmul.f32 0.5, %v1253_v59 }
 0x837   :  { %v1288_v28 = vmul.f32 %v3425_v58, %v1281_v60  ;;  %1542 = vmatpush.msra.mxu3 %v1514_v12 }
 0x838   :  { %v1255_v41 = vsub.f32 1.5, %v1254_v1  ;;  %v1511_v1 = vld [vmem:[%s5201_s13 + $0x18] sm:$0xff] }
 0x839   :  { %v3518_v43 = vpop.eup %3517  ;;  %v4387_v63 = vadd.f32 %v3426_v62, %v1288_v28  ;;  %1543 = vmatpush.msra.mxu3 %v1513_v15 }
 0x83a   :  { %v1256_v52 = vmul.f32 %v3516_v29, %v1255_v41  ;;  %v1262_v61 = vmul.f32 %v3518_v43, %v1239_v51  ;;  %vm1268_vm2 = vweird.f32 %v3518_v43  ;;  %v1510_v41 = vld [vmem:[%s5201_s13 + $0x10] sm:$0xff] }
 0x83b   :  { %3226 = vmatmul.msk.f32.vlgmr.msra.gmra.mxu1 %vm62_vm0, %v4387_v63  ;;  %vm1269_vm4 = vmor %vm1267_vm3, %vm1268_vm2  ;;  %1544 = vmatpush.msra.mxu3 %v1512_v18 }
 0x83c   :  { %v1260_v2 = vsel %vm1259_vm1, %v3516_v29, %v1256_v52  ;;  %v1263_v53 = vmul.f32 %v3518_v43, %v1262_v61  ;;  %v1509_v52 = vld [vmem:[%s5201_s13 + $0x8] sm:$0xff] }
 0x83d   :  { %v1282_v45 = vmul.f32 %v1260_v2, %v4349_v9  ;;  %1545 = vmatpush.msra.mxu3 %v1511_v1 }
 0x83e   :  { %v1264_v24 = vmul.f32 0.5, %v1263_v53 }
 0x83f   :  { %v1289_v11 = vmul.f32 %v3425_v58, %v1282_v45  ;;  %1546 = vmatpush.msra.mxu3 %v1510_v41 }
 0x840   :  { %v1265_v55 = vsub.f32 1.5, %v1264_v24  ;;  %v1508_v24 = vld [vmem:[%s5201_s13] sm:$0xff] }
 0x841   :  { %v4392_v38 = vadd.f32 %v3426_v62, %v1289_v11  ;;  %1547 = vmatpush.msra.mxu3 %v1509_v52 }
 0x842   :  { %v1266_v22 = vmul.f32 %v3518_v43, %v1265_v55 }
 0x843   :  { %3227 = vmatmul.msk.f32.gmra.mxu1 %vm62_vm0, %v4392_v38  ;;  %1548 = vmatpush.msra.mxu3 %v1508_v24 }
 0x844   :  { %v1270_v8 = vsel %vm1269_vm4, %v3518_v43, %v1266_v22 }
 0x845   :  { %v1283_v44 = vmul.f32 %v1270_v8, %v4355_v50 }
 0x847   :  { %v1290_v3 = vmul.f32 %v3425_v58, %v1283_v44 }
 0x849   :  { %v4397_v56 = vadd.f32 %v3426_v62, %v1290_v3 }
 0x84b   :  { %3228 = vmatmul.msk.f32.gmra.mxu1 %vm62_vm0, %v4397_v56 }
 0x861   :  { %v1232_v27 = vpop.xlane.xlu1 %1231 }
 0x862   :  { %v1236_v9 = vmul.f32 %v1232_v27, %v3762_v14 }
 0x864   :  { %v1240_v17 = vadd.f32 1e-12, %v1236_v9 }
 0x866   :  { %3519 = vrsqrt.f32 %v1240_v17  ;;  %vm1277_vm6 = vweird.f32 %v1240_v17 }
 0x86c   :  { %v3520_v31 = vpop.eup %3519 }
 0x86d   :  { %v1272_v25 = vmul.f32 %v3520_v31, %v1240_v17  ;;  %vm1278_vm5 = vweird.f32 %v3520_v31 }
 0x86e   :  { %vm1279_vm7 = vmor %vm1277_vm6, %vm1278_vm5 }
 0x86f   :  { %v1273_v36 = vmul.f32 %v3520_v31, %v1272_v25 }
 0x871   :  { %v1274_v30 = vmul.f32 0.5, %v1273_v36 }
 0x873   :  { %v1275_v48 = vsub.f32 1.5, %v1274_v30 }
 0x875   :  { %v1276_v10 = vmul.f32 %v3520_v31, %v1275_v48 }
 0x877   :  { %v1280_v50 = vsel %vm1279_vm7, %v3520_v31, %v1276_v10 }
 0x878   :  { %v1284_v57 = vmul.f32 %v1280_v50, %v4361_v39 }
 0x87a   :  { %v1291_v19 = vmul.f32 %v3425_v58, %v1284_v57 }
 0x87c   :  { %v4403_v33 = vadd.f32 %v3426_v62, %v1291_v19 }
 0x87e   :  { %3229 = vmatmul.msk.f32.gmra.mxu1 %vm62_vm0, %v4403_v33 }
 0x8b8   :  { %v1336_v40 = vpop.f32.mrf.mxu1 }
 0x8b9   :  { %v4413_v5 = vadd.f32 %v4410_v35, %v1336_v40 }
 0x8bb   :  { %v4416_v47 = vmul.f32 0.70710677, %v4413_v5 }
 0x8bd   :  { %v1356_v39 = vand.u32 2147483647, %v4416_v47 }
 0x8bf   :  { %v1360_v37 = vmul.f32 0.3275911, %v1356_v39  ;;  %v1464_v55 = vsub.f32 0.0, %v1356_v39 }
 0x8c0   :  { %v1339_v21 = vpop.f32.mrf.mxu1 }
 0x8c1   :  { %v1364_v6 = vadd.f32 1.0, %v1360_v37  ;;  %v4420_v0 = vadd.f32 %v4410_v35, %v1339_v21  ;;  %v1468_v9 = vmul.f32 %v1464_v55, %v1356_v39 }
 0x8c3   :  { %3521 = vrcp.f32 %v1364_v6  ;;  %v4423_v46 = vmul.f32 0.70710677, %v4420_v0  ;;  %v1379_v16 = vand.u32 2147483648, %v1364_v6  ;;  %v1377_v62 = vand.u32 2147483647, %v1364_v6 }
 0x8c4   :  { %vm1373_vm11 = vweird.f32 %v1364_v6  ;;  %v1472_v57 = vmul.f32 1.442695, %v1468_v9 }
 0x8c5   :  { %v4429_v23 = vand.u32 2147483647, %v4423_v46  ;;  %v1380_v61 = vor.u32 1.1754944e-38, %v1379_v16  ;;  %vm1378_vm13 = vcmp.eq.f32.partialorder %v1377_v62, 8.507059e+37 }
 0x8c7   :  { %v1361_v42 = vmul.f32 0.3275911, %v4429_v23  ;;  %v1465_v37 = vsub.f32 0.0, %v4429_v23 }
 0x8c8   :  { %v1342_v34 = vpop.f32.mrf.mxu1 }
 0x8c9   :  { %v3522_v32 = vpop.eup %3521  ;;  %v4436_v49 = vadd.f32 %v4410_v35, %v1342_v34  ;;  %v1365_v51 = vadd.f32 1.0, %v1361_v42 }
 0x8ca   :  { %v1369_v29 = vmul.f32 %v3522_v32, %v1364_v6  ;;  %vm1374_vm10 = vweird.f32 %v3522_v32 }
 0x8cb   :  { %v4442_v54 = vmul.f32 0.70710677, %v4436_v49  ;;  %3523 = vrcp.f32 %v1365_v51  ;;  %vm1375_vm12 = vmor %vm1373_vm11, %vm1374_vm10  ;;  %v1394_v27 = vand.u32 2147483648, %v1365_v51  ;;  %v1392_v31 = vand.u32 2147483647, %v1365_v51 }
 0x8cc   :  { %v1370_v58 = vsub.f32 1.0, %v1369_v29  ;;  %vm1388_vm1 = vweird.f32 %v1365_v51  ;;  %v1469_v29 = vmul.f32 %v1465_v37, %v4429_v23  ;;  %vm1488_vm10 = vcmp.lt.f32.partialorder %v4416_v47, 0.0 }
 0x8cd   :  { %v4448_v59 = vand.u32 2147483647, %v4442_v54  ;;  %v1395_v10 = vor.u32 1.1754944e-38, %v1394_v27  ;;  %vm1393_vm3 = vcmp.eq.f32.partialorder %v1392_v31, 8.507059e+37  ;;  %v1348_v31 = vmul.f32 0.5, %v4413_v5 }
 0x8ce   :  { %v1371_v60 = vmul.f32 %v3522_v32, %v1370_v58  ;;  %vm1520_vm11 = vcmask 523264   ;;  %v1349_v5 = vmul.f32 0.5, %v4420_v0 }
 0x8cf   :  { %v1362_v28 = vmul.f32 0.3275911, %v4448_v59  ;;  %v1466_v62 = vsub.f32 0.0, %v4448_v59 }
 0x8d0   :  { %v1372_v43 = vadd.f32 %v3522_v32, %v1371_v60 }
 0x8d1   :  { %v1366_v2 = vadd.f32 1.0, %v1362_v28  ;;  %v3524_v53 = vpop.eup %3523  ;;  %v1470_v23 = vmul.f32 %v1466_v62, %v4448_v59 }
 0x8d2   :  { %v1376_v45 = vsel %vm1375_vm12, %v3522_v32, %v1372_v43  ;;  %v1384_v22 = vmul.f32 %v3524_v53, %v1365_v51  ;;  %vm1389_vm15 = vweird.f32 %v3524_v53  ;;  %v1474_v43 = vmul.f32 1.442695, %v1469_v29 }
 0x8d3   :  { %v1381_v11 = vsel %vm1378_vm13, %v1380_v61, %v1376_v45  ;;  %3525 = vrcp.f32 %v1366_v2  ;;  %vm1390_vm2 = vmor %vm1388_vm1, %vm1389_vm15  ;;  %v1409_v39 = vand.u32 2147483648, %v1366_v2  ;;  %v1407_v34 = vand.u32 2147483647, %v1366_v2 }
 0x8d4   :  { %v1428_v8 = vmul.f32 1.0614054, %v1381_v11  ;;  %v1385_v44 = vsub.f32 1.0, %v1384_v22  ;;  %3527 = vpow2.f32 %v1472_v57  ;;  %vm1403_vm5 = vweird.f32 %v1366_v2 }
 0x8d5   :  { %v1410_v18 = vor.u32 1.1754944e-38, %v1409_v39  ;;  %vm1408_vm7 = vcmp.eq.f32.partialorder %v1407_v34, 8.507059e+37  ;;  %3529 = vpow2.f32 %v1474_v43  ;;  %v1476_v27 = vmul.f32 1.442695, %v1470_v23 }
 0x8d6   :  { %v1432_v3 = vadd.f32 -1.4531521, %v1428_v8  ;;  %v1386_v17 = vmul.f32 %v3524_v53, %v1385_v44  ;;  %vm1489_vm12 = vcmp.lt.f32.partialorder %v4423_v46, 0.0  ;;  %vm1490_vm13 = vcmp.lt.f32.partialorder %v4442_v54, 0.0 }
 0x8d7   :  { %3531 = vpow2.f32 %v1476_v27  ;;  %v1350_v46 = vmul.f32 0.5, %v4436_v49 }
 0x8d8   :  { %v1436_v25 = vmul.f32 %v1432_v3, %v1381_v11  ;;  %v1387_v30 = vadd.f32 %v3524_v53, %v1386_v17 }
 0x8d9   :  { %v3526_v36 = vpop.eup %3525 }
 0x8da   :  { %v1440_v48 = vadd.f32 1.4214138, %v1436_v25  ;;  %v1399_v50 = vmul.f32 %v3526_v36, %v1366_v2  ;;  %v1391_v19 = vsel %vm1390_vm2, %v3524_v53, %v1387_v30  ;;  %vm1404_vm4 = vweird.f32 %v3526_v36  ;;  %v3528_v61 = vpop.eup %3527 }
 0x8db   :  { %v1396_v6 = vsel %vm1393_vm3, %v1395_v10, %v1391_v19  ;;  %vm1405_vm6 = vmor %vm1403_vm5, %vm1404_vm4  ;;  %v3530_v30 = vpop.eup %3529 }
 0x8dc   :  { %v1444_v40 = vmul.f32 %v1440_v48, %v1381_v11  ;;  %v1400_v21 = vsub.f32 1.0, %v1399_v50  ;;  %v1429_v4 = vmul.f32 1.0614054, %v1396_v6 }
 0x8dd   :  { %v3532_v37 = vpop.eup %3531 }
 0x8de   :  { %v1448_v12 = vadd.f32 -0.28449672, %v1444_v40  ;;  %v1401_v42 = vmul.f32 %v3526_v36, %v1400_v21  ;;  %v1433_v32 = vadd.f32 -1.4531521, %v1429_v4 }
 0x8e0   :  { %v1452_v15 = vmul.f32 %v1448_v12, %v1381_v11  ;;  %v1402_v51 = vadd.f32 %v3526_v36, %v1401_v42  ;;  %v1437_v58 = vmul.f32 %v1433_v32, %v1396_v6 }
 0x8e2   :  { %v1456_v16 = vadd.f32 0.2548296, %v1452_v15  ;;  %v1406_v60 = vsel %vm1405_vm6, %v3526_v36, %v1402_v51  ;;  %v1441_v1 = vadd.f32 1.4214138, %v1437_v58 }
 0x8e3   :  { %v1411_v28 = vsel %vm1408_vm7, %v1410_v18, %v1406_v60 }
 0x8e4   :  { %v1460_v41 = vmul.f32 %v1456_v16, %v1381_v11  ;;  %v1430_v52 = vmul.f32 1.0614054, %v1411_v28  ;;  %v1445_v53 = vmul.f32 %v1441_v1, %v1396_v6 }
 0x8e6   :  { %v1480_v45 = vmul.f32 %v3528_v61, %v1460_v41  ;;  %v1434_v24 = vadd.f32 -1.4531521, %v1430_v52  ;;  %v1449_v2 = vadd.f32 -0.28449672, %v1445_v53 }
 0x8e8   :  { %v1484_v55 = vsub.f32 1.0, %v1480_v45  ;;  %v1438_v22 = vmul.f32 %v1434_v24, %v1411_v28  ;;  %v1453_v8 = vmul.f32 %v1449_v2, %v1396_v6 }
 0x8ea   :  { %v1492_v44 = vsub.f32 0.0, %v1484_v55  ;;  %v1442_v3 = vadd.f32 1.4214138, %v1438_v22  ;;  %v1457_v9 = vadd.f32 0.2548296, %v1453_v8 }
 0x8ec   :  { %v1496_v11 = vsel %vm1488_vm10, %v1492_v44, %v1484_v55  ;;  %v1446_v17 = vmul.f32 %v1442_v3, %v1411_v28  ;;  %v1461_v36 = vmul.f32 %v1457_v9, %v1396_v6 }
 0x8ed   :  { %v1500_v25 = vadd.f32 1.0, %v1496_v11 }
 0x8ee   :  { %v1450_v59 = vadd.f32 -0.28449672, %v1446_v17  ;;  %v1481_v10 = vmul.f32 %v3530_v30, %v1461_v36 }
 0x8ef   :  { %v1504_v48 = vmul.f32 %v1500_v25, %v1348_v31 }
 0x8f0   :  { %v1454_v50 = vmul.f32 %v1450_v59, %v1411_v28  ;;  %v1485_v57 = vsub.f32 1.0, %v1481_v10 }
 0x8f1   :  { %3230 = vmatmul.msk.f32.vlgmr.msra.gmra.mxu3 %vm1520_vm11, %v1504_v48  ;;  %v3428_v48 = vld [vmem:[%s5200_s14] ss:$0 sm:$0xff] }
 0x8f2   :  { %v1458_v19 = vadd.f32 0.2548296, %v1454_v50  ;;  %v1493_v47 = vsub.f32 0.0, %v1485_v57 }
 0x8f4   :  { %v1462_v40 = vmul.f32 %v1458_v19, %v1411_v28  ;;  %v1497_v21 = vsel %vm1489_vm12, %v1493_v47, %v1485_v57 }
 0x8f5   :  { %v1501_v6 = vadd.f32 1.0, %v1497_v21 }
 0x8f6   :  { %v1482_v39 = vmul.f32 %v3532_v37, %v1462_v40 }
 0x8f7   :  { %v1505_v4 = vmul.f32 %v1501_v6, %v1349_v5 }
 0x8f8   :  { %v1486_v12 = vsub.f32 1.0, %v1482_v39 }
 0x8f9   :  { %3231 = vmatmul.msk.f32.gmra.mxu3 %vm1520_vm11, %v1505_v4 }
 0x8fa   :  { %v1494_v42 = vsub.f32 0.0, %v1486_v12 }
 0x8fb   :  { %v1345_v34 = vpop.f32.mrf.mxu1 }
 0x8fc   :  { %v1346_v32 = vadd.f32 %v4410_v35, %v1345_v34  ;;  %v1498_v15 = vsel %vm1490_vm13, %v1494_v42, %v1486_v12 }
 0x8fd   :  { %v1502_v29 = vadd.f32 1.0, %v1498_v15 }
 0x8fe   :  { %v1355_v51 = vmul.f32 0.70710677, %v1346_v32  ;;  %v1351_v36 = vmul.f32 0.5, %v1346_v32 }
 0x8ff   :  { %v1506_v18 = vmul.f32 %v1502_v29, %v1350_v46 }
 0x900   :  { %v1359_v58 = vand.u32 2147483647, %v1355_v51  ;;  %vm1491_vm4 = vcmp.lt.f32.partialorder %v1355_v51, 0.0 }
 0x901   :  { %3232 = vmatmul.msk.f32.gmra.mxu3 %vm1520_vm11, %v1506_v18 }
 0x902   :  { %v1363_v0 = vmul.f32 0.3275911, %v1359_v58  ;;  %v1467_v52 = vsub.f32 0.0, %v1359_v58 }
 0x904   :  { %v1367_v16 = vadd.f32 1.0, %v1363_v0  ;;  %v1471_v24 = vmul.f32 %v1467_v52, %v1359_v58  ;;  %v3236_v52 = vld [vmem:[%s5191_s5 + $0x30] sm:$0xff] }
 0x906   :  { %3533 = vrcp.f32 %v1367_v16  ;;  %v1424_v28 = vand.u32 2147483648, %v1367_v16  ;;  %v1422_v41 = vand.u32 2147483647, %v1367_v16  ;;  %vm1418_vm1 = vweird.f32 %v1367_v16 }
 0x907   :  { %v1478_v55 = vmul.f32 1.442695, %v1471_v24 }
 0x908   :  { %v1425_v49 = vor.u32 1.1754944e-38, %v1424_v28  ;;  %vm1423_vm3 = vcmp.eq.f32.partialorder %v1422_v41, 8.507059e+37 }
 0x909   :  { %3535 = vpow2.f32 %v1478_v55 }
 0x90c   :  { %v3534_v60 = vpop.eup %3533 }
 0x90d   :  { %v1414_v62 = vmul.f32 %v3534_v60, %v1367_v16  ;;  %vm1419_vm15 = vweird.f32 %v3534_v60 }
 0x90e   :  { %vm1420_vm2 = vmor %vm1418_vm1, %vm1419_vm15 }
 0x90f   :  { %v1415_v1 = vsub.f32 1.0, %v1414_v62  ;;  %v3536_v9 = vpop.eup %3535 }
 0x911   :  { %v1416_v54 = vmul.f32 %v3534_v60, %v1415_v1 }
 0x913   :  { %v1417_v35 = vadd.f32 %v3534_v60, %v1416_v54 }
 0x915   :  { %v1421_v43 = vsel %vm1420_vm2, %v3534_v60, %v1417_v35 }
 0x916   :  { %v1426_v61 = vsel %vm1423_vm3, %v1425_v49, %v1421_v43  ;;  %v3237_v43 = vld [vmem:[%s5191_s5 + $0x38] sm:$0xff] }
 0x917   :  { %v1431_v53 = vmul.f32 1.0614054, %v1426_v61  ;;  %1704 = vmatpush.msrb.mxu0 %v3237_v43 }
 0x919   :  { %v1435_v45 = vadd.f32 -1.4531521, %v1431_v53  ;;  %1705 = vmatpush.msrb.mxu0 %v3236_v52  ;;  %v3234_v53 = vld [vmem:[%s5191_s5 + $0x20] sm:$0xff] }
 0x91b   :  { %v1439_v23 = vmul.f32 %v1435_v45, %v1426_v61 }
 0x91d   :  { %v1443_v2 = vadd.f32 1.4214138, %v1439_v23 }
 0x91f   :  { %v1447_v22 = vmul.f32 %v1443_v2, %v1426_v61 }
 0x921   :  { %v1451_v8 = vadd.f32 -0.28449672, %v1447_v22 }
 0x923   :  { %v1455_v44 = vmul.f32 %v1451_v8, %v1426_v61 }
 0x925   :  { %v1459_v3 = vadd.f32 0.2548296, %v1455_v44 }
 0x927   :  { %v1463_v27 = vmul.f32 %v1459_v3, %v1426_v61  ;;  %v3235_v61 = vld [vmem:[%s5191_s5 + $0x28] sm:$0xff] }
 0x928   :  { %1706 = vmatpush.msrb.mxu0 %v3235_v61  ;;  %v3431_v61 = vld [vmem:[%s5190_s6 + $0x1] ss:$0 sm:$0xff]  ;;  %s5226_s6 = smov 40  }
 0x929   :  { %v1483_v11 = vmul.f32 %v3536_v9, %v1463_v27 }
 0x92a   :  { %1707 = vmatpush.msrb.mxu0 %v3234_v53 }
 0x92b   :  { %v1487_v17 = vsub.f32 1.0, %v1483_v11 }
 0x92d   :  { %v1495_v31 = vsub.f32 0.0, %v1487_v17 }
 0x92f   :  { %v1499_v25 = vsel %vm1491_vm4, %v1495_v31, %v1487_v17 }
 0x930   :  { %v1503_v30 = vadd.f32 1.0, %v1499_v25 }
 0x932   :  { %v1507_v59 = vmul.f32 %v1503_v30, %v1351_v36  ;;  %v3429_v30 = vld [vmem:[%s5202_s15] ss:$0 sm:$0xff] }
 0x934   :  { %3233 = vmatmul.msk.f32.gmra.mxu3 %vm1520_vm11, %v1507_v59 }
 0x974   :  { %v1550_v10 = vpop.f32.mrf.mxu3 }
 0x975   :  { %v1551_v50 = vadd.f32 %v3428_v48, %v1550_v10 }
 0x977   :  { %v1562_v57 = vadd.f32 %v1551_v50, %v4387_v63 }
 0x979   :  { %v1568_v19 = vsel %vm62_vm0, %v1562_v57, 0.0 }
 0x97a   :  { %1569 = vadd.xlane.f32.xlu0 %v1568_v19 }
 0x97c   :  { %v1553_v47 = vpop.f32.mrf.mxu3 }
 0x97d   :  { %v1554_v40 = vadd.f32 %v3428_v48, %v1553_v47 }
 0x97f   :  { %v1563_v37 = vadd.f32 %v1554_v40, %v4392_v38 }
 0x981   :  { %v1571_v21 = vsel %vm62_vm0, %v1563_v37, 0.0 }
 0x982   :  { %1572 = vadd.xlane.f32.xlu2 %v1571_v21 }
 0x984   :  { %v1556_v5 = vpop.f32.mrf.mxu3 }
 0x985   :  { %v1557_v6 = vadd.f32 %v3428_v48, %v1556_v5 }
 0x987   :  { %v1564_v39 = vadd.f32 %v1557_v6, %v4397_v56 }
 0x989   :  { %v1574_v4 = vsel %vm62_vm0, %v1564_v39, 0.0 }
 0x98a   :  { %1575 = vadd.xlane.f32.xlu1 %v1574_v4 }
 0x9b7   :  { %v1559_v12 = vpop.f32.mrf.mxu3 }
 0x9b8   :  { %v1560_v42 = vadd.f32 %v3428_v48, %v1559_v12 }
 0x9ba   :  { %v1565_v63 = vadd.f32 %v1560_v42, %v4403_v33 }
 0x9bc   :  { %v1577_v34 = vsel %vm62_vm0, %v1565_v63, 0.0 }
 0x9bd   :  { %1578 = vadd.xlane.f32.xlu0 %v1577_v34 }
 0x9ed   :  { %v1570_v32 = vpop.xlane.xlu0 %1569 }
 0x9ee   :  { %v1580_v38 = vmul.f32 %v1570_v32, %v3762_v14 }
 0x9f0   :  { %v1584_v15 = vsub.f32 %v1562_v57, %v1580_v38  ;;  %v3430_v57 = vld [vmem:[%s5203_s16] ss:$0 sm:$0xff] }
 0x9f2   :  { %v1588_v46 = vmul.f32 %v1584_v15, %v1584_v15 }
 0x9f4   :  { %v1592_v29 = vsel %vm62_vm0, %v1588_v46, 0.0 }
 0x9f5   :  { %1593 = vadd.xlane.f32.xlu2 %v1592_v29  ;;  %v1573_v51 = vpop.xlane.xlu2 %1572 }
 0x9f6   :  { %v1581_v56 = vmul.f32 %v1573_v51, %v3762_v14 }
 0x9f8   :  { %v4492_v18 = vsub.f32 %v1563_v37, %v1581_v56 }
 0x9fa   :  { %v1589_v58 = vmul.f32 %v4492_v18, %v4492_v18 }
 0x9fc   :  { %v1595_v33 = vsel %vm62_vm0, %v1589_v58, 0.0 }
 0x9fd   :  { %v1576_v0 = vpop.xlane.xlu1 %1575  ;;  %1596 = vadd.xlane.f32.xlu1 %v1595_v33 }
 0x9fe   :  { %v1582_v16 = vmul.f32 %v1576_v0, %v3762_v14 }
 0xa00   :  { %v4498_v60 = vsub.f32 %v1564_v39, %v1582_v16 }
 0xa02   :  { %v1590_v62 = vmul.f32 %v4498_v60, %v4498_v60 }
 0xa04   :  { %v1598_v1 = vsel %vm62_vm0, %v1590_v62, 0.0 }
 0xa05   :  { %1599 = vadd.xlane.f32.xlu0 %v1598_v1 }
 0xa30   :  { %v1579_v28 = vpop.xlane.xlu0 %1578 }
 0xa31   :  { %v1583_v54 = vmul.f32 %v1579_v28, %v3762_v14 }
 0xa33   :  { %v4504_v41 = vsub.f32 %v1565_v63, %v1583_v54 }
 0xa35   :  { %v1591_v35 = vmul.f32 %v4504_v41, %v4504_v41 }
 0xa37   :  { %v1601_v49 = vsel %vm62_vm0, %v1591_v35, 0.0 }
 0xa38   :  { %1602 = vadd.xlane.f32.xlu2 %v1601_v49 }
 0xa68   :  { %v1594_v45 = vpop.xlane.xlu2 %1593 }
 0xa69   :  { %v1604_v24 = vmul.f32 %v1594_v45, %v3762_v14 }
 0xa6b   :  { %v1608_v23 = vadd.f32 1e-12, %v1604_v24 }
 0xa6d   :  { %3537 = vrsqrt.f32 %v1608_v23  ;;  %vm1618_vm6 = vweird.f32 %v1608_v23 }
 0xa70   :  { %v1597_v2 = vpop.xlane.xlu1 %1596 }
 0xa71   :  { %v1605_v55 = vmul.f32 %v1597_v2, %v3762_v14 }
 0xa73   :  { %v3538_v22 = vpop.eup %3537  ;;  %v1609_v44 = vadd.f32 1e-12, %v1605_v55 }
 0xa74   :  { %v1613_v8 = vmul.f32 %v3538_v22, %v1608_v23  ;;  %vm1619_vm5 = vweird.f32 %v3538_v22 }
 0xa75   :  { %3539 = vrsqrt.f32 %v1609_v44  ;;  %vm1620_vm7 = vmor %vm1618_vm6, %vm1619_vm5  ;;  %vm1628_vm12 = vweird.f32 %v1609_v44 }
 0xa76   :  { %v1614_v3 = vmul.f32 %v3538_v22, %v1613_v8 }
 0xa78   :  { %v1615_v27 = vmul.f32 0.5, %v1614_v3  ;;  %v1600_v9 = vpop.xlane.xlu0 %1599 }
 0xa79   :  { %v1606_v17 = vmul.f32 %v1600_v9, %v3762_v14 }
 0xa7a   :  { %v1616_v11 = vsub.f32 1.5, %v1615_v27 }
 0xa7b   :  { %v3540_v31 = vpop.eup %3539  ;;  %v1610_v36 = vadd.f32 1e-12, %v1606_v17 }
 0xa7c   :  { %v1617_v25 = vmul.f32 %v3538_v22, %v1616_v11  ;;  %v1623_v59 = vmul.f32 %v3540_v31, %v1609_v44  ;;  %vm1629_vm10 = vweird.f32 %v3540_v31 }
 0xa7d   :  { %3541 = vrsqrt.f32 %v1610_v36  ;;  %vm1630_vm13 = vmor %vm1628_vm12, %vm1629_vm10  ;;  %vm1638_vm1 = vweird.f32 %v1610_v36 }
 0xa7e   :  { %v1621_v48 = vsel %vm1620_vm7, %v3538_v22, %v1617_v25  ;;  %v1624_v50 = vmul.f32 %v3540_v31, %v1623_v59 }
 0xa7f   :  { %v1652_v10 = vmul.f32 %v1621_v48, %v1584_v15 }
 0xa80   :  { %v1625_v47 = vmul.f32 0.5, %v1624_v50 }
 0xa81   :  { %v1659_v19 = vmul.f32 %v3429_v30, %v1652_v10 }
 0xa82   :  { %v1626_v40 = vsub.f32 1.5, %v1625_v47 }
 0xa83   :  { %v4530_v37 = vadd.f32 %v3430_v57, %v1659_v19  ;;  %v3542_v21 = vpop.eup %3541 }
 0xa84   :  { %v1627_v5 = vmul.f32 %v3540_v31, %v1626_v40  ;;  %v1633_v6 = vmul.f32 %v3542_v21, %v1610_v36  ;;  %vm1639_vm15 = vweird.f32 %v3542_v21 }
 0xa85   :  { %3239 = vmatmul.msk.f32.vlgmr.msrb.gmra.mxu0 %vm62_vm0, %v4530_v37  ;;  %vm1640_vm2 = vmor %vm1638_vm1, %vm1639_vm15 }
 0xa86   :  { %v1631_v39 = vsel %vm1630_vm13, %v3540_v31, %v1627_v5  ;;  %v1634_v4 = vmul.f32 %v3542_v21, %v1633_v6 }
 0xa87   :  { %v1653_v12 = vmul.f32 %v1631_v39, %v4492_v18 }
 0xa88   :  { %v1635_v42 = vmul.f32 0.5, %v1634_v4 }
 0xa89   :  { %v1660_v63 = vmul.f32 %v3429_v30, %v1653_v12 }
 0xa8a   :  { %v1636_v34 = vsub.f32 1.5, %v1635_v42 }
 0xa8b   :  { %v4535_v32 = vadd.f32 %v3430_v57, %v1660_v63 }
 0xa8c   :  { %v1637_v38 = vmul.f32 %v3542_v21, %v1636_v34 }
 0xa8d   :  { %3240 = vmatmul.msk.f32.gmra.mxu0 %vm62_vm0, %v4535_v32 }
 0xa8e   :  { %v1641_v15 = vsel %vm1640_vm2, %v3542_v21, %v1637_v38 }
 0xa8f   :  { %v1654_v46 = vmul.f32 %v1641_v15, %v4498_v60 }
 0xa91   :  { %v1661_v29 = vmul.f32 %v3429_v30, %v1654_v46 }
 0xa93   :  { %v4540_v51 = vadd.f32 %v3430_v57, %v1661_v29 }
 0xa95   :  { %3241 = vmatmul.msk.f32.gmra.mxu0 %vm62_vm0, %v4540_v51 }
 0xaab   :  { %v1603_v56 = vpop.xlane.xlu2 %1602 }
 0xaac   :  { %v1607_v18 = vmul.f32 %v1603_v56, %v3762_v14 }
 0xaae   :  { %v1611_v58 = vadd.f32 1e-12, %v1607_v18 }
 0xab0   :  { %3543 = vrsqrt.f32 %v1611_v58  ;;  %vm1648_vm4 = vweird.f32 %v1611_v58 }
 0xab6   :  { %v3544_v33 = vpop.eup %3543 }
 0xab7   :  { %v1643_v0 = vmul.f32 %v3544_v33, %v1611_v58  ;;  %vm1649_vm3 = vweird.f32 %v3544_v33 }
 0xab8   :  { %vm1650_vm5 = vmor %vm1648_vm4, %vm1649_vm3 }
 0xab9   :  { %v1644_v16 = vmul.f32 %v3544_v33, %v1643_v0 }
 0xabb   :  { %v1645_v62 = vmul.f32 0.5, %v1644_v16 }
 0xabd   :  { %v1646_v1 = vsub.f32 1.5, %v1645_v62 }
 0xabf   :  { %v1647_v28 = vmul.f32 %v3544_v33, %v1646_v1 }
 0xac1   :  { %v1651_v60 = vsel %vm1650_vm5, %v3544_v33, %v1647_v28 }
 0xac2   :  { %v1655_v54 = vmul.f32 %v1651_v60, %v4504_v41 }
 0xac4   :  { %v1662_v35 = vmul.f32 %v3429_v30, %v1655_v54 }
 0xac6   :  { %v4546_v49 = vadd.f32 %v3430_v57, %v1662_v35 }
 0xac8   :  { %3242 = vmatmul.msk.f32.gmra.mxu0 %vm62_vm0, %v4546_v49 }
 0xb02   :  { %v1709_v43 = vpop.f32.mrf.mxu0 }
 0xb03   :  { %v1710_v24 = vadd.f32 %v3431_v61, %v1709_v43 }
 0xb05   :  { %v1721_v8 = vmul.f32 0.35355338, %v1710_v24 }
 0xb0a   :  { %v1712_v52 = vpop.f32.mrf.mxu0 }
 0xb0b   :  { %v1713_v41 = vadd.f32 %v3431_v61, %v1712_v52 }
 0xb0d   :  { %v4556_v23 = vmul.f32 0.35355338, %v1713_v41  ;;  %v4595_v11 = vpack.i.bf16 %v1710_v24, %v1713_v41 }
 0xb12   :  { %v1715_v53 = vpop.f32.mrf.mxu0 }
 0xb13   :  { %v1716_v45 = vadd.f32 %v3431_v61, %v1715_v53 }
 0xb15   :  { %1947 = vrot.lane.b32.xlu0 %v1716_v45, %s3643_s19  ;;  %1733 = vrot.lane.b32.xlu2 %v1716_v45, %s3642_s18  ;;  %v1723_v44 = vmul.f32 0.35355338, %v1716_v45 }
 0xb1d   :  { %1729 = vrot.lane.b32.xlu2 %v1710_v24, %s3642_s18 }
 0xb25   :  { %1937 = vrot.lane.b32.xlu2 %v4556_v23, %s3645_s20 }
 0xb2d   :  { %2153 = vrot.lane.b32.xlu2 %v1710_v24, %s3646_s21 }
 0xb45   :  { %v1718_v2 = vpop.f32.mrf.mxu0 }
 0xb46   :  { %v1719_v55 = vadd.f32 %v3431_v61, %v1718_v2 }
 0xb48   :  { %1735 = vrot.lane.b32.xlu1 %v1719_v55, %s3642_s18  ;;  %1949 = vrot.lane.b32.xlu0 %v1719_v55, %s3643_s19  ;;  %v4564_v22 = vmul.f32 0.35355338, %v1719_v55  ;;  %v4580_v3 = vpack.i.bf16 %v1716_v45, %v1719_v55 }
 0xb49   :  { %2369 = vrot.lane.b32.xlu2 %v1719_v55, %s3647_s22 }
 0xb50   :  { %1731 = vrot.lane.b32.xlu1 %v1713_v41, %s3642_s18  ;;  %1945 = vrot.lane.b32.xlu0 %v1713_v41, %s3643_s19  ;;  %s5227_s18 = smov 48  }
 0xb51   :  { %1941 = vrot.lane.b32.xlu2 %v4564_v22, %s3645_s20 }
 0xb58   :  { %1943 = vrot.lane.b32.xlu1 %v1710_v24, %s3643_s19  ;;  %1935 = vrot.lane.b32.xlu0 %v1721_v8, %s3645_s20  ;;  %s5234_s19 = smov 8  }
 0xb59   :  { %2355 = vrot.lane.b32.xlu2 %v1721_v8, %s3649_s30 }
 0xb60   :  { %2367 = vrot.lane.b32.xlu0 %v1716_v45, %s3647_s22  ;;  %1939 = vrot.lane.b32.xlu1 %v1723_v44, %s3645_s20 }
 0xb61   :  { %2149 = vrot.lane.b32.xlu2 %v1723_v44, %s3648_s2 }
 0xb68   :  { %2159 = vrot.lane.b32.xlu0 %v1719_v55, %s3646_s21  ;;  %2157 = vrot.lane.b32.xlu1 %v1716_v45, %s3646_s21 }
 0xb69   :  { %2361 = vrot.lane.b32.xlu2 %v4564_v22, %s3649_s30 }
 0xb6f   :  { %v1734_v27 = vpop.permute.xlu2 %1733 }
 0xb70   :  { %2365 = vrot.lane.b32.xlu0 %v1713_v41, %s3647_s22  ;;  %2155 = vrot.lane.b32.xlu1 %v1713_v41, %s3646_s21 }
 0xb71   :  { %3382 = vrot.lane.b32.xlu2 %v4580_v3, %s3644_s3 }
 0xb77   :  { %v1730_v9 = vpop.permute.xlu2 %1729 }
 0xb78   :  { %2145 = vrot.lane.b32.xlu0 %v1721_v8, %s3648_s2  ;;  %2363 = vrot.lane.b32.xlu1 %v1710_v24, %s3647_s22 }
 0xb7f   :  { %v1938_v17 = vpop.permute.xlu2 %1937 }
 0xb80   :  { %2357 = vrot.lane.b32.xlu0 %v4556_v23, %s3649_s30  ;;  %2147 = vrot.lane.b32.xlu1 %v4556_v23, %s3648_s2 }
 0xb87   :  { %v2154_v31 = vpop.permute.xlu2 %2153  ;;  %v1948_v30 = vpop.permute.xlu0 %1947 }
 0xb88   :  { %2151 = vrot.lane.b32.xlu0 %v4564_v22, %s3648_s2  ;;  %2359 = vrot.lane.b32.xlu1 %v1723_v44, %s3649_s30 }
 0xb90   :  { %3392 = vrot.lane.b32.xlu0 %v4595_v11, %s3644_s3  ;;  %3387 = vrot.lane.b32.xlu1 %v4580_v3, %s3650_s23  ;;  %s5235_s3 = smov 24  }
 0xb98   :  { %3397 = vrot.lane.b32.xlu1 %v4595_v11, %s3650_s23 }
 0xba3   :  { %v2370_v25 = vpop.permute.xlu2 %2369 }
 0xbab   :  { %v1942_v36 = vpop.permute.xlu2 %1941 }
 0xbb3   :  { %v2356_v59 = vpop.permute.xlu2 %2355 }
 0xbba   :  { %v1736_v48 = vpop.permute.xlu1 %1735  ;;  %v1950_v10 = vpop.permute.xlu0 %1949 }
 0xbbb   :  { %v2150_v50 = vpop.permute.xlu2 %2149  ;;  %3243 = vmatpush.xpose.msk.msrb.mxu2 %vm251_vm14, %v1736_v48  ;;  %3255 = vmatpush.xpose.msk.msrb.mxu3 %vm251_vm14, %v1950_v10 }
 0xbbf   :  { %3244 = vmatpush.xpose.msk.msrb.mxu2 %vm251_vm14, %v1734_v27  ;;  %3256 = vmatpush.xpose.msk.msrb.mxu3 %vm251_vm14, %v1948_v30 }
 0xbc2   :  { %v1732_v57 = vpop.permute.xlu1 %1731  ;;  %v1946_v19 = vpop.permute.xlu0 %1945 }
 0xbc3   :  { %v2362_v47 = vpop.permute.xlu2 %2361  ;;  %3245 = vmatpush.xpose.msk.msrb.mxu2 %vm251_vm14, %v1732_v57  ;;  %3257 = vmatpush.xpose.msk.msrb.mxu3 %vm251_vm14, %v1946_v19 }
 0xbc7   :  { %3246 = vmatpush.xpose.msk.msrb.mxu2 %vm251_vm14, %v1730_v9 }
 0xbca   :  { %v1944_v40 = vpop.permute.xlu1 %1943  ;;  %v1936_v21 = vpop.permute.xlu0 %1935  ;;  %3247 = vmatmul.msk.f32.vlgmr.msrb.gmra.mxu2 %vm251_vm14, %v1721_v8 }
 0xbcb   :  { %v3383_v5 = vpop.permute.xlu2 %3382  ;;  %3258 = vmatpush.xpose.msk.msrb.mxu3 %vm251_vm14, %v1944_v40 }
 0xbcc   :  { %v3384_v6 = vunpack.i.l.bf16 %v3383_v5  ;;  %v3385_v39 = vunpack.i.h.bf16 %v3383_v5 }
 0xbce   :  { %1918 = vmatpush.msrb.mxu1 %v3384_v6  ;;  %3259 = vmatmul.msk.f32.vlgmr.msrb.gmra.mxu3 %vm251_vm14, %v1936_v21 }
 0xbcf   :  { %3279 = vmatpush.xpose.msk.msra.mxu3 %vm251_vm14, %v2370_v25 }
 0xbd0   :  { %1919 = vmatpush.msrb.mxu1 %v3385_v39 }
 0xbd2   :  { %v2368_v4 = vpop.permute.xlu0 %2367  ;;  %3248 = vmatmul.msk.f32.gmra.mxu2 %vm251_vm14, %v4556_v23  ;;  %v1940_v12 = vpop.permute.xlu1 %1939 }
 0xbd3   :  { %3280 = vmatpush.xpose.msk.msra.mxu3 %vm251_vm14, %v2368_v4 }
 0xbd6   :  { %3260 = vmatmul.msk.f32.gmra.mxu3 %vm251_vm14, %v1938_v17 }
 0xbda   :  { %v2160_v42 = vpop.permute.xlu0 %2159  ;;  %v2158_v63 = vpop.permute.xlu1 %2157  ;;  %3249 = vmatmul.msk.f32.gmra.mxu2 %vm251_vm14, %v1723_v44 }
 0xbdb   :  { %3267 = vmatpush.xpose.msk.msra.mxu2 %vm251_vm14, %v2160_v42 }
 0xbde   :  { %3261 = vmatmul.msk.f32.gmra.mxu3 %vm251_vm14, %v1940_v12 }
 0xbdf   :  { %3268 = vmatpush.xpose.msk.msra.mxu2 %vm251_vm14, %v2158_v63 }
 0xbe2   :  { %v2366_v34 = vpop.permute.xlu0 %2365  ;;  %v2156_v38 = vpop.permute.xlu1 %2155  ;;  %3250 = vmatmul.msk.f32.gmra.mxu2 %vm251_vm14, %v4564_v22 }
 0xbe3   :  { %3269 = vmatpush.xpose.msk.msra.mxu2 %vm251_vm14, %v2156_v38  ;;  %3281 = vmatpush.xpose.msk.msra.mxu3 %vm251_vm14, %v2366_v34 }
 0xbe6   :  { %3262 = vmatmul.msk.f32.gmra.mxu3 %vm251_vm14, %v1942_v36 }
 0xbe7   :  { %3270 = vmatpush.xpose.msk.msra.mxu2 %vm251_vm14, %v2154_v31 }
 0xbea   :  { %v2146_v15 = vpop.permute.xlu0 %2145  ;;  %v2364_v46 = vpop.permute.xlu1 %2363 }
 0xbeb   :  { %3271 = vmatmul.msk.f32.vlgmr.msra.gmra.mxu2 %vm251_vm14, %v2146_v15  ;;  %3282 = vmatpush.xpose.msk.msra.mxu3 %vm251_vm14, %v2364_v46 }
 0xbee   :  { %3283 = vmatmul.msk.f32.vlgmr.msra.gmra.mxu3 %vm251_vm14, %v2356_v59 }
 0xbf2   :  { %v2358_v29 = vpop.permute.xlu0 %2357  ;;  %v2148_v56 = vpop.permute.xlu1 %2147 }
 0xbf3   :  { %3272 = vmatmul.msk.f32.gmra.mxu2 %vm251_vm14, %v2148_v56 }
 0xbf6   :  { %3284 = vmatmul.msk.f32.gmra.mxu3 %vm251_vm14, %v2358_v29 }
 0xbfa   :  { %v2152_v18 = vpop.permute.xlu0 %2151  ;;  %v2360_v58 = vpop.permute.xlu1 %2359 }
 0xbfb   :  { %3273 = vmatmul.msk.f32.gmra.mxu2 %vm251_vm14, %v2150_v50 }
 0xbfe   :  { %3285 = vmatmul.msk.f32.gmra.mxu3 %vm251_vm14, %v2360_v58 }
 0xc02   :  { %v3393_v33 = vpop.permute.xlu0 %3392  ;;  %v3388_v0 = vpop.permute.xlu1 %3387 }
 0xc03   :  { %v3394_v16 = vunpack.i.l.bf16 %v3393_v33  ;;  %v3389_v62 = vunpack.i.l.bf16 %v3388_v0  ;;  %3274 = vmatmul.msk.f32.gmra.mxu2 %vm251_vm14, %v2152_v18  ;;  %v3395_v1 = vunpack.i.h.bf16 %v3393_v33  ;;  %v3390_v28 = vunpack.i.h.bf16 %v3388_v0 }
 0xc05   :  { %1920 = vmatpush.msrb.mxu1 %v3394_v16  ;;  %2128 = vmatpush.msra.mxu0 %v3389_v62 }
 0xc06   :  { %3286 = vmatmul.msk.f32.gmra.mxu3 %vm251_vm14, %v2362_v47 }
 0xc07   :  { %1921 = vmatpush.msrb.mxu1 %v3395_v1  ;;  %2129 = vmatpush.msra.mxu0 %v3390_v28 }
 0xc0a   :  { %v3398_v60 = vpop.permute.xlu1 %3397 }
 0xc0b   :  { %v3399_v54 = vunpack.i.l.bf16 %v3398_v60  ;;  %v3400_v35 = vunpack.i.h.bf16 %v3398_v60 }
 0xc0d   :  { %2130 = vmatpush.msra.mxu0 %v3399_v54 }
 0xc0f   :  { %2131 = vmatpush.msra.mxu0 %v3400_v35 }
 0xc4d   :  { %v1774_v43 = vpop.f32.mrf.mxu2 }
 0xc4e   :  { %v4638_v52 = vadd.f32 %v1774_v43, %v3908_v7 }
 0xc50   :  { %v1786_v61 = vsel %vm62_vm0, %v4638_v52, -inf }
 0xc51   :  { %v1984_v53 = vpop.f32.mrf.mxu3  ;;  %1787 = vmax.xlane.f32.xlu1 %v1786_v61 }
 0xc52   :  { %v4643_v45 = vadd.f32 %v1984_v53, %v3908_v7 }
 0xc54   :  { %v1996_v24 = vsel %vm62_vm0, %v4643_v45, -inf }
 0xc55   :  { %1997 = vmax.xlane.f32.xlu0 %v1996_v24  ;;  %v1777_v41 = vpop.f32.mrf.mxu2 }
 0xc56   :  { %v4648_v23 = vadd.f32 %v1777_v41, %v3915_v13 }
 0xc58   :  { %v1789_v2 = vsel %vm62_vm0, %v4648_v23, -inf }
 0xc59   :  { %v1987_v55 = vpop.f32.mrf.mxu3  ;;  %1790 = vmax.xlane.f32.xlu2 %v1789_v2 }
 0xc5a   :  { %v4653_v22 = vadd.f32 %v1987_v55, %v3915_v13 }
 0xc5c   :  { %v1999_v8 = vsel %vm62_vm0, %v4653_v22, -inf }
 0xc5d   :  { %2000 = vmax.xlane.f32.xlu1 %v1999_v8  ;;  %v1780_v44 = vpop.f32.mrf.mxu2 }
 0xc5e   :  { %v4658_v27 = vadd.f32 %v1780_v44, %v3922_v20 }
 0xc60   :  { %v1792_v9 = vsel %vm62_vm0, %v4658_v27, -inf }
 0xc61   :  { %v1990_v17 = vpop.f32.mrf.mxu3  ;;  %1793 = vmax.xlane.f32.xlu0 %v1792_v9 }
 0xc62   :  { %v4663_v31 = vadd.f32 %v1990_v17, %v3922_v20 }
 0xc64   :  { %v2002_v25 = vsel %vm62_vm0, %v4663_v31, -inf }
 0xc65   :  { %2003 = vmax.xlane.f32.xlu2 %v2002_v25  ;;  %v1783_v36 = vpop.f32.mrf.mxu2 }
 0xc66   :  { %v4668_v30 = vadd.f32 %v1783_v36, %v3933_v26 }
 0xc68   :  { %v1795_v59 = vsel %vm62_vm0, %v4668_v30, -inf }
 0xc69   :  { %v1993_v48 = vpop.f32.mrf.mxu3  ;;  %1796 = vmax.xlane.f32.xlu1 %v1795_v59 }
 0xc6a   :  { %v4673_v10 = vadd.f32 %v1993_v48, %v3933_v26 }
 0xc6c   :  { %v2005_v50 = vsel %vm62_vm0, %v4673_v10, -inf }
 0xc6d   :  { %2006 = vmax.xlane.f32.xlu0 %v2005_v50 }
 0xc6e   :  { %v2194_v57 = vpop.f32.mrf.mxu2 }
 0xc6f   :  { %v4678_v19 = vadd.f32 %v2194_v57, %v3908_v7 }
 0xc71   :  { %v2404_v47 = vpop.f32.mrf.mxu3  ;;  %v2206_v40 = vsel %vm62_vm0, %v4678_v19, -inf }
 0xc72   :  { %v4683_v21 = vadd.f32 %v2404_v47, %v3908_v7  ;;  %2207 = vmax.xlane.f32.xlu2 %v2206_v40 }
 0xc74   :  { %v2416_v5 = vsel %vm62_vm0, %v4683_v21, -inf }
 0xc75   :  { %2417 = vmax.xlane.f32.xlu1 %v2416_v5 }
 0xc76   :  { %v2197_v6 = vpop.f32.mrf.mxu2 }
 0xc77   :  { %v4688_v39 = vadd.f32 %v2197_v6, %v3915_v13 }
 0xc79   :  { %v2407_v4 = vpop.f32.mrf.mxu3  ;;  %v2209_v12 = vsel %vm62_vm0, %v4688_v39, -inf }
 0xc7a   :  { %v4693_v42 = vadd.f32 %v2407_v4, %v3915_v13  ;;  %2210 = vmax.xlane.f32.xlu0 %v2209_v12 }
 0xc7c   :  { %v2419_v7 = vsel %vm62_vm0, %v4693_v42, -inf }
 0xc7d   :  { %2420 = vmax.xlane.f32.xlu2 %v2419_v7 }
 0xc7e   :  { %v2200_v63 = vpop.f32.mrf.mxu2 }
 0xc7f   :  { %v4698_v34 = vadd.f32 %v2200_v63, %v3922_v20 }
 0xc81   :  { %v2410_v38 = vpop.f32.mrf.mxu3  ;;  %v2212_v15 = vsel %vm62_vm0, %v4698_v34, -inf }
 0xc82   :  { %v4703_v46 = vadd.f32 %v2410_v38, %v3922_v20  ;;  %2213 = vmax.xlane.f32.xlu1 %v2212_v15 }
 0xc84   :  { %v2422_v13 = vsel %vm62_vm0, %v4703_v46, -inf }
 0xc85   :  { %2423 = vmax.xlane.f32.xlu0 %v2422_v13 }
 0xc86   :  { %v2203_v29 = vpop.f32.mrf.mxu2 }
 0xc87   :  { %v4708_v56 = vadd.f32 %v2203_v29, %v3933_v26 }
 0xc89   :  { %v2413_v18 = vpop.f32.mrf.mxu3  ;;  %v2215_v20 = vsel %vm62_vm0, %v4708_v56, -inf }
 0xc8a   :  { %v4711_v58 = vadd.f32 %v2413_v18, %v3933_v26 }
 0xc8c   :  { %v2425_v33 = vsel %vm62_vm0, %v4711_v58, -inf }
 0xc8d   :  { %2426 = vmax.xlane.f32.xlu2 %v2425_v33  ;;  %2216 = vmax.xlane.f32.xlu0 %v2215_v20 }
 0xcc4   :  { %v1788_v0 = vpop.xlane.xlu1 %1787 }
 0xcc5   :  { %v1798_v16 = vsub.f32 %v4638_v52, %v1788_v0 }
 0xcc7   :  { %v1802_v62 = vmul.f32 1.442695, %v1798_v16 }
 0xcc8   :  { %v1998_v1 = vpop.xlane.xlu0 %1997 }
 0xcc9   :  { %3545 = vpow2.f32 %v1802_v62  ;;  %v2008_v28 = vsub.f32 %v4643_v45, %v1998_v1 }
 0xccb   :  { %v2012_v60 = vmul.f32 1.442695, %v2008_v28 }
 0xccc   :  { %v1791_v54 = vpop.xlane.xlu2 %1790 }
 0xccd   :  { %3547 = vpow2.f32 %v2012_v60  ;;  %v1799_v26 = vsub.f32 %v4648_v23, %v1791_v54 }
 0xccf   :  { %v4720_v35 = vpop.eup %3545  ;;  %v1804_v43 = vmul.f32 1.442695, %v1799_v26 }
 0xcd0   :  { %v2001_v61 = vpop.xlane.xlu1 %2000  ;;  %v1810_v53 = vsel %vm62_vm0, %v4720_v35, 0.0 }
 0xcd1   :  { %v2009_v24 = vsub.f32 %v4653_v22, %v2001_v61  ;;  %1811 = vadd.xlane.f32.xlu2 %v1810_v53  ;;  %3549 = vpow2.f32 %v1804_v43 }
 0xcd3   :  { %v4725_v52 = vpop.eup %3547  ;;  %v2014_v41 = vmul.f32 1.442695, %v2009_v24 }
 0xcd4   :  { %v1794_v45 = vpop.xlane.xlu0 %1793  ;;  %v2020_v2 = vsel %vm62_vm0, %v4725_v52, 0.0 }
 0xcd5   :  { %3551 = vpow2.f32 %v2014_v41  ;;  %v1800_v23 = vsub.f32 %v4658_v27, %v1794_v45  ;;  %2021 = vadd.xlane.f32.xlu1 %v2020_v2 }
 0xcd7   :  { %v1806_v55 = vmul.f32 1.442695, %v1800_v23  ;;  %v4730_v44 = vpop.eup %3549 }
 0xcd8   :  { %v2004_v8 = vpop.xlane.xlu2 %2003  ;;  %v1813_v36 = vsel %vm62_vm0, %v4730_v44, 0.0 }
 0xcd9   :  { %v2010_v9 = vsub.f32 %v4663_v31, %v2004_v8  ;;  %3553 = vpow2.f32 %v1806_v55 }
 0xcdb   :  { %v4733_v22 = vpop.eup %3551  ;;  %v2016_v17 = vmul.f32 1.442695, %v2010_v9 }
 0xcdc   :  { %v1797_v25 = vpop.xlane.xlu1 %1796  ;;  %v2023_v59 = vsel %vm62_vm0, %v4733_v22, 0.0 }
 0xcdd   :  { %3555 = vpow2.f32 %v2016_v17  ;;  %v1801_v27 = vsub.f32 %v4668_v30, %v1797_v25  ;;  %1814 = vadd.xlane.f32.xlu1 %v1813_v36  ;;  %2024 = vadd.xlane.f32.xlu0 %v2023_v59 }
 0xcdf   :  { %v1808_v48 = vmul.f32 1.442695, %v1801_v27  ;;  %v4740_v57 = vpop.eup %3553 }
 0xce0   :  { %v2007_v50 = vpop.xlane.xlu0 %2006  ;;  %v1816_v6 = vsel %vm62_vm0, %v4740_v57, 0.0 }
 0xce1   :  { %v2011_v31 = vsub.f32 %v4673_v10, %v2007_v50  ;;  %3557 = vpow2.f32 %v1808_v48 }
 0xce3   :  { %v4743_v47 = vpop.eup %3555  ;;  %v2018_v40 = vmul.f32 1.442695, %v2011_v31 }
 0xce4   :  { %v2026_v5 = vsel %vm62_vm0, %v4743_v47, 0.0 }
 0xce5   :  { %3559 = vpow2.f32 %v2018_v40  ;;  %2027 = vadd.xlane.f32.xlu2 %v2026_v5  ;;  %v2208_v30 = vpop.xlane.xlu2 %2207  ;;  %1817 = vadd.xlane.f32.xlu0 %v1816_v6 }
 0xce6   :  { %v2218_v4 = vsub.f32 %v4678_v19, %v2208_v30 }
 0xce7   :  { %v4750_v63 = vpop.eup %3557 }
 0xce8   :  { %v2222_v12 = vmul.f32 1.442695, %v2218_v4  ;;  %v2418_v7 = vpop.xlane.xlu1 %2417  ;;  %v1819_v13 = vsel %vm62_vm0, %v4750_v63, 0.0 }
 0xce9   :  { %v2428_v10 = vsub.f32 %v4683_v21, %v2418_v7 }
 0xcea   :  { %3561 = vpow2.f32 %v2222_v12 }
 0xceb   :  { %v4753_v38 = vpop.eup %3559  ;;  %v2432_v15 = vmul.f32 1.442695, %v2428_v10 }
 0xcec   :  { %v2029_v29 = vsel %vm62_vm0, %v4753_v38, 0.0 }
 0xced   :  { %1820 = vadd.xlane.f32.xlu0 %v1819_v13  ;;  %2030 = vadd.xlane.f32.xlu1 %v2029_v29  ;;  %3563 = vpow2.f32 %v2432_v15  ;;  %v2211_v26 = vpop.xlane.xlu0 %2210 }
 0xcee   :  { %v2219_v43 = vsub.f32 %v4688_v39, %v2211_v26 }
 0xcf0   :  { %v4759_v18 = vpop.eup %3561  ;;  %v2421_v19 = vpop.xlane.xlu2 %2420  ;;  %v2224_v61 = vmul.f32 1.442695, %v2219_v43 }
 0xcf1   :  { %v2429_v33 = vsub.f32 %v4693_v42, %v2421_v19  ;;  %v2230_v21 = vsel %vm62_vm0, %v4759_v18, 0.0 }
 0xcf2   :  { %2231 = vadd.xlane.f32.xlu2 %v2230_v21 }
 0xcf3   :  { %v2434_v20 = vmul.f32 1.442695, %v2429_v33  ;;  %v4764_v16 = vpop.eup %3563 }
 0xcf4   :  { %v2440_v28 = vsel %vm62_vm0, %v4764_v16, 0.0 }
 0xcf5   :  { %3565 = vpow2.f32 %v2434_v20  ;;  %v2214_v0 = vpop.xlane.xlu1 %2213 }
 0xcf6   :  { %v2220_v62 = vsub.f32 %v4698_v34, %v2214_v0 }
 0xcf8   :  { %v2226_v1 = vmul.f32 1.442695, %v2220_v62  ;;  %v2424_v53 = vpop.xlane.xlu0 %2423 }
 0xcf9   :  { %v2430_v41 = vsub.f32 %v4703_v46, %v2424_v53 }
 0xcfa   :  { %2441 = vadd.xlane.f32.xlu2 %v2440_v28  ;;  %3567 = vpow2.f32 %v2226_v1 }
 0xcfb   :  { %v4769_v60 = vpop.eup %3565  ;;  %3569 = vpow2.f32 %v2224_v61  ;;  %v2436_v2 = vmul.f32 1.442695, %v2430_v41 }
 0xcfc   :  { %v2443_v42 = vsel %vm62_vm0, %v4769_v60, 0.0 }
 0xcfd   :  { %2444 = vadd.xlane.f32.xlu1 %v2443_v42  ;;  %3571 = vpow2.f32 %v2436_v2 }
 0xd00   :  { %v4773_v54 = vpop.eup %3567  ;;  %v2217_v25 = vpop.xlane.xlu0 %2216 }
 0xd01   :  { %3407 = vrot.lane.b32.xlu0 %v4580_v3, %s5226_s6  ;;  %v2236_v34 = vsel %vm62_vm0, %v4773_v54, 0.0  ;;  %v4784_v24 = vpop.eup %3569  ;;  %v2221_v19 = vsub.f32 %v4708_v56, %v2217_v25 }
 0xd02   :  { %v2233_v45 = vsel %vm62_vm0, %v4784_v24, 0.0 }
 0xd03   :  { %v4790_v39 = vpop.eup %3571 }
 0xd04   :  { %v2446_v8 = vsel %vm62_vm0, %v4790_v39, 0.0 }
 0xd05   :  { %2237 = vadd.xlane.f32.xlu1 %v2236_v34 }
 0xd12   :  { %3402 = vrot.lane.b32.xlu2 %v4580_v3, %s5227_s18  ;;  %v2427_v3 = vpop.xlane.xlu2 %2426 }
 0xd13   :  { %v2431_v23 = vsub.f32 %v4711_v58, %v2427_v3 }
 0xd15   :  { %v2438_v55 = vmul.f32 1.442695, %v2431_v23 }
 0xd17   :  { %3573 = vpow2.f32 %v2438_v55 }
 0xd1d   :  { %v4796_v46 = vpop.eup %3573 }
 0xd1e   :  { %3412 = vrot.lane.b32.xlu1 %v4595_v11, %s5227_s18  ;;  %v2449_v17 = vsel %vm62_vm0, %v4796_v46, 0.0 }
 0xd2b   :  { %2234 = vadd.xlane.f32.xlu0 %v2233_v45 }
 0xd3b   :  { %2447 = vadd.xlane.f32.xlu2 %v2446_v8 }
 0xd3f   :  { %3417 = vrot.lane.b32.xlu0 %v4595_v11, %s5226_s6 }
 0xd44   :  { %v1812_v9 = vpop.xlane.xlu2 %1811 }
 0xd45   :  { %3575 = vrcp.f32 %v1812_v9  ;;  %v1831_v50 = vand.u32 2147483647, %v1812_v9  ;;  %v1833_v31 = vand.u32 2147483648, %v1812_v9  ;;  %vm1827_vm7 = vweird.f32 %v1812_v9 }
 0xd47   :  { %vm1832_vm12 = vcmp.eq.f32.partialorder %v1831_v50, 8.507059e+37  ;;  %v1834_v12 = vor.u32 1.1754944e-38, %v1833_v31 }
 0xd48   :  { %v2022_v58 = vpop.xlane.xlu1 %2021  ;;  %2450 = vadd.xlane.f32.xlu1 %v2449_v17 }
 0xd49   :  { %3577 = vrcp.f32 %v2022_v58  ;;  %v2043_v7 = vand.u32 2147483648, %v2022_v58  ;;  %v2041_v13 = vand.u32 2147483647, %v2022_v58  ;;  %vm2037_vm15 = vweird.f32 %v2022_v58 }
 0xd4b   :  { %v3576_v36 = vpop.eup %3575  ;;  %v2044_v0 = vor.u32 1.1754944e-38, %v2043_v7  ;;  %vm2042_vm2 = vcmp.eq.f32.partialorder %v2041_v13, 8.507059e+37 }
 0xd4c   :  { %v1823_v59 = vmul.f32 %v3576_v36, %v1812_v9  ;;  %vm1828_vm6 = vweird.f32 %v3576_v36 }
 0xd4d   :  { %vm1829_vm10 = vmor %vm1827_vm7, %vm1828_vm6 }
 0xd4e   :  { %v1824_v27 = vsub.f32 1.0, %v1823_v59 }
 0xd4f   :  { %v3578_v48 = vpop.eup %3577 }
 0xd50   :  { %v1825_v40 = vmul.f32 %v3576_v36, %v1824_v27  ;;  %v2033_v11 = vmul.f32 %v3578_v48, %v2022_v58  ;;  %v4800_v5 = vpop.xlane.xlu1 %1814  ;;  %v4802_v6 = vpop.xlane.xlu0 %2024  ;;  %vm2038_vm13 = vweird.f32 %v3578_v48 }
 0xd51   :  { %3579 = vrcp.f32 %v4800_v5  ;;  %vm2039_vm1 = vmor %vm2037_vm15, %vm2038_vm13  ;;  %v1848_v45 = vand.u32 2147483648, %v4800_v5  ;;  %v2058_v2 = vand.u32 2147483648, %v4802_v6  ;;  %v1846_v23 = vand.u32 2147483647, %v4800_v5 }
 0xd52   :  { %v1826_v30 = vadd.f32 %v3576_v36, %v1825_v40  ;;  %v2034_v4 = vsub.f32 1.0, %v2033_v11  ;;  %3581 = vrcp.f32 %v4802_v6  ;;  %v2056_v55 = vand.u32 2147483647, %v4802_v6 }
 0xd53   :  { %vm1842_vm4 = vweird.f32 %v4800_v5  ;;  %vm2052_vm5 = vweird.f32 %v4802_v6  ;;  %v1849_v58 = vor.u32 1.1754944e-38, %v1848_v45 }
 0xd54   :  { %v1830_v10 = vsel %vm1829_vm10, %v3576_v36, %v1826_v30  ;;  %v2035_v15 = vmul.f32 %v3578_v48, %v2034_v4  ;;  %v2059_v36 = vor.u32 1.1754944e-38, %v2058_v2  ;;  %vm1847_vm10 = vcmp.eq.f32.partialorder %v1846_v23, 8.507059e+37 }
 0xd55   :  { %v1835_v29 = vsel %vm1832_vm12, %v1834_v12, %v1830_v10  ;;  %vm2057_vm12 = vcmp.eq.f32.partialorder %v2056_v55, 8.507059e+37 }
 0xd56   :  { %v2036_v33 = vadd.f32 %v3578_v48, %v2035_v15  ;;  %v1836_v21 = vmul.f32 %v4720_v35, %v1835_v29  ;;  %v2228_v35 = vmul.f32 1.442695, %v2221_v19 }
 0xd57   :  { %v3580_v20 = vpop.eup %3579 }
 0xd58   :  { %v3582_v62 = vpop.eup %3581  ;;  %v2040_v1 = vsel %vm2039_vm1, %v3578_v48, %v2036_v33  ;;  %v1838_v28 = vmul.f32 %v3580_v20, %v4800_v5  ;;  %3251 = vmatmul.msk.f32.vlgmr.msrb.gmra.mxu1 %vm62_vm0, %v1836_v21  ;;  %v4810_v42 = vpop.xlane.xlu2 %2027  ;;  %vm1843_vm3 = vweird.f32 %v3580_v20 }
 0xd59   :  { %v4812_v34 = vpop.xlane.xlu0 %1817  ;;  %v2045_v26 = vsel %vm2042_vm2, %v2044_v0, %v2040_v1  ;;  %v2048_v56 = vmul.f32 %v3582_v62, %v4802_v6  ;;  %3583 = vrcp.f32 %v4810_v42  ;;  %vm4825_vm6 = vmor %vm1842_vm4, %vm1843_vm3  ;;  %vm2053_vm7 = vweird.f32 %v3582_v62 }
 0xd5a   :  { %v1839_v43 = vsub.f32 1.0, %v1838_v28  ;;  %3585 = vrcp.f32 %v4812_v34  ;;  %v2046_v53 = vmul.f32 %v4725_v52, %v2045_v26  ;;  %v2073_v11 = vand.u32 2147483648, %v4810_v42  ;;  %vm2054_vm13 = vmor %vm2052_vm5, %vm2053_vm7 }
 0xd5b   :  { %v2049_v61 = vsub.f32 1.0, %v2048_v56  ;;  %3587 = vpow2.f32 %v2228_v35  ;;  %v1863_v5 = vand.u32 2147483648, %v4812_v34  ;;  %v1861_v7 = vand.u32 2147483647, %v4812_v34 }
 0xd5c   :  { %v1840_v41 = vmul.f32 %v3580_v20, %v1839_v43  ;;  %3263 = vmatmul.msk.f32.vlgmr.msra.gmra.mxu0 %vm62_vm0, %v2046_v53  ;;  %v2071_v6 = vand.u32 2147483647, %v4810_v42  ;;  %vm2067_vm2 = vweird.f32 %v4810_v42  ;;  %vm1857_vm3 = vweird.f32 %v4812_v34 }
 0xd5d   :  { %v2050_v3 = vmul.f32 %v3582_v62, %v2049_v61  ;;  %v2074_v1 = vor.u32 1.1754944e-38, %v2073_v11  ;;  %v1864_v28 = vor.u32 1.1754944e-38, %v1863_v5 }
 0xd5e   :  { %v1841_v8 = vadd.f32 %v3580_v20, %v1840_v41  ;;  %vm2072_vm7 = vcmp.eq.f32.partialorder %v2071_v6, 8.507059e+37 }
 0xd5f   :  { %v3584_v9 = vpop.eup %3583  ;;  %v2051_v17 = vadd.f32 %v3582_v62, %v2050_v3 }
 0xd60   :  { %v3586_v25 = vpop.eup %3585  ;;  %v2063_v59 = vmul.f32 %v3584_v9, %v4810_v42  ;;  %v4830_v27 = vpop.xlane.xlu1 %2030  ;;  %v1845_v50 = vsel %vm4825_vm6, %v3580_v20, %v1841_v8  ;;  %vm2068_vm15 = vweird.f32 %v3584_v9  ;;  %vm1862_vm6 = vcmp.eq.f32.partialorder %v1861_v7, 8.507059e+37 }
 0xd61   :  { %v4832_v48 = vpop.xlane.xlu0 %1820  ;;  %v1853_v31 = vmul.f32 %v3586_v25, %v4812_v34  ;;  %3589 = vrcp.f32 %v4830_v27  ;;  %v1850_v4 = vsel %vm1847_vm10, %v1849_v58, %v1845_v50  ;;  %v2055_v12 = vsel %vm2054_vm13, %v3582_v62, %v2051_v17  ;;  %v4845_v10 = vpop.eup %3587  ;;  %vm2069_vm4 = vmor %vm2067_vm2, %vm2068_vm15 }
 0xd62   :  { %v2064_v40 = vsub.f32 1.0, %v2063_v59  ;;  %3591 = vrcp.f32 %v4832_v48  ;;  %v1851_v13 = vmul.f32 %v4730_v44, %v1850_v4  ;;  %v2060_v29 = vsel %vm2057_vm12, %v2059_v36, %v2055_v12 }
 0xd63   :  { %v1854_v30 = vsub.f32 1.0, %v1853_v31  ;;  %v2061_v33 = vmul.f32 %v4733_v22, %v2060_v29  ;;  %vm1858_vm1 = vweird.f32 %v3586_v25  ;;  %v2239_v44 = vsel %vm62_vm0, %v4845_v10, 0.0 }
 0xd64   :  { %v2065_v15 = vmul.f32 %v3584_v9, %v2064_v40  ;;  %3252 = vmatmul.msk.f32.gmra.mxu1 %vm62_vm0, %v1851_v13  ;;  %vm1859_vm5 = vmor %vm1857_vm3, %vm1858_vm1  ;;  %v2088_v3 = vand.u32 2147483648, %v4830_v27  ;;  %v1878_v55 = vand.u32 2147483648, %v4832_v48  ;;  %v2086_v52 = vand.u32 2147483647, %v4830_v27 }
 0xd65   :  { %v1855_v19 = vmul.f32 %v3586_v25, %v1854_v30  ;;  %v4849_v21 = vpop.xlane.xlu2 %2231  ;;  %3264 = vmatmul.msk.f32.gmra.mxu0 %vm62_vm0, %v2061_v33  ;;  %vm2082_vm13 = vweird.f32 %v4830_v27  ;;  %vm1872_vm15 = vweird.f32 %v4832_v48 }
 0xd66   :  { %v2066_v62 = vadd.f32 %v3584_v9, %v2065_v15  ;;  %v2089_v17 = vor.u32 1.1754944e-38, %v2088_v3  ;;  %3593 = vrcp.f32 %v4849_v21  ;;  %v2251_v33 = vand.u32 2147483647, %v4849_v21 }
 0xd67   :  { %v3590_v20 = vpop.eup %3589  ;;  %v1856_v0 = vadd.f32 %v3586_v25, %v1855_v19  ;;  %v2253_v19 = vand.u32 2147483648, %v4849_v21 }
 0xd68   :  { %v3592_v22 = vpop.eup %3591  ;;  %v2078_v26 = vmul.f32 %v3590_v20, %v4830_v27  ;;  %v2070_v56 = vsel %vm2069_vm4, %v3584_v9, %v2066_v62  ;;  %vm2083_vm10 = vweird.f32 %v3590_v20  ;;  %v1876_v9 = vand.u32 2147483647, %v4832_v48 }
 0xd69   :  { %v1868_v42 = vmul.f32 %v3592_v22, %v4832_v48  ;;  %2240 = vadd.xlane.f32.xlu0 %v2239_v44  ;;  %v1860_v34 = vsel %vm1859_vm5, %v3586_v25, %v1856_v0  ;;  %v2075_v61 = vsel %vm2072_vm7, %v2074_v1, %v2070_v56  ;;  %vm1873_vm12 = vweird.f32 %v3592_v22  ;;  %vm2084_vm1 = vmor %vm2082_vm13, %vm2083_vm10 }
 0xd6a   :  { %v2079_v35 = vsub.f32 1.0, %v2078_v26  ;;  %v1865_v43 = vsel %vm1862_vm6, %v1864_v28, %v1860_v34  ;;  %v2076_v45 = vmul.f32 %v4743_v47, %v2075_v61  ;;  %v1879_v25 = vor.u32 1.1754944e-38, %v1878_v55  ;;  %vm1874_vm2 = vmor %vm1872_vm15, %vm1873_vm12 }
 0xd6b   :  { %v1869_v53 = vsub.f32 1.0, %v1868_v42  ;;  %v1866_v41 = vmul.f32 %v4740_v57, %v1865_v43  ;;  %vm1877_vm3 = vcmp.eq.f32.partialorder %v1876_v9, 8.507059e+37  ;;  %vm2087_vm4 = vcmp.eq.f32.partialorder %v2086_v52, 8.507059e+37 }
 0xd6c   :  { %v2080_v2 = vmul.f32 %v3590_v20, %v2079_v35  ;;  %v3594_v12 = vpop.eup %3593  ;;  %vm2247_vm6 = vweird.f32 %v4849_v21  ;;  %vm2252_vm10 = vcmp.eq.f32.partialorder %v2251_v33, 8.507059e+37 }
 0xd6d   :  { %v1870_v23 = vmul.f32 %v3592_v22, %v1869_v53  ;;  %v4865_v8 = vpop.xlane.xlu2 %2441  ;;  %3253 = vmatmul.msk.f32.gmra.mxu1 %vm62_vm0, %v1866_v41  ;;  %3265 = vmatmul.msk.f32.gmra.mxu0 %vm62_vm0, %v2076_v45  ;;  %v2243_v7 = vmul.f32 %v3594_v12, %v4849_v21  ;;  %vm2248_vm5 = vweird.f32 %v3594_v12 }
 0xd6e   :  { %v2081_v47 = vadd.f32 %v3590_v20, %v2080_v2  ;;  %vm2249_vm7 = vmor %vm2247_vm6, %vm2248_vm5  ;;  %3595 = vrcp.f32 %v4865_v8 }
 0xd6f   :  { %v1871_v57 = vadd.f32 %v3592_v22, %v1870_v23 }
 0xd70   :  { %v2085_v36 = vsel %vm2084_vm1, %v3590_v20, %v2081_v47  ;;  %v2254_v20 = vor.u32 1.1754944e-38, %v2253_v19  ;;  %vm2457_vm1 = vweird.f32 %v4865_v8 }
 0xd71   :  { %v1875_v58 = vsel %vm1874_vm2, %v3592_v22, %v1871_v57  ;;  %v2090_v31 = vsel %vm2087_vm4, %v2089_v17, %v2085_v36  ;;  %v2463_v57 = vand.u32 2147483648, %v4865_v8  ;;  %v2461_v17 = vand.u32 2147483647, %v4865_v8 }
 0xd72   :  { %v1880_v50 = vsel %vm1877_vm3, %v1879_v25, %v1875_v58  ;;  %v2091_v11 = vmul.f32 %v4753_v38, %v2090_v31  ;;  %v2244_v38 = vsub.f32 1.0, %v2243_v7 }
 0xd73   :  { %v3408_v59 = vpop.permute.xlu0 %3407  ;;  %v1881_v27 = vmul.f32 %v4750_v63, %v1880_v50  ;;  %v4879_v63 = vpop.xlane.xlu1 %2444 }
 0xd74   :  { %v3409_v40 = vunpack.i.l.bf16 %v3408_v59  ;;  %v3410_v48 = vunpack.i.h.bf16 %v3408_v59  ;;  %v2245_v15 = vmul.f32 %v3594_v12, %v2244_v38  ;;  %v3596_v28 = vpop.eup %3595 }
 0xd75   :  { %v3403_v5 = vpop.permute.xlu2 %3402  ;;  %3254 = vmatmul.msk.f32.gmra.mxu1 %vm62_vm0, %v1881_v27  ;;  %3266 = vmatmul.msk.f32.gmra.mxu0 %vm62_vm0, %v2091_v11  ;;  %v2453_v42 = vmul.f32 %v3596_v28, %v4865_v8  ;;  %vm2458_vm13 = vweird.f32 %v3596_v28  ;;  %v2464_v11 = vor.u32 1.1754944e-38, %v2463_v57 }
 0xd76   :  { %v3404_v30 = vunpack.i.l.bf16 %v3403_v5  ;;  %2548 = vmatpush.msrb.mxu0 %v3409_v40  ;;  %v3405_v4 = vunpack.i.h.bf16 %v3403_v5  ;;  %v2246_v29 = vadd.f32 %v3594_v12, %v2245_v15  ;;  %vm4901_vm3 = vmor %vm2457_vm1, %vm2458_vm13 }
 0xd77   :  { %v2454_v56 = vsub.f32 1.0, %v2453_v42 }
 0xd78   :  { %2338 = vmatpush.msra.mxu1 %v3404_v30  ;;  %2549 = vmatpush.msrb.mxu0 %v3410_v48  ;;  %v2250_v6 = vsel %vm2249_vm7, %v3594_v12, %v2246_v29  ;;  %vm2462_vm7 = vcmp.eq.f32.partialorder %v2461_v17, 8.507059e+37 }
 0xd79   :  { %v2255_v0 = vsel %vm2252_vm10, %v2254_v20, %v2250_v6  ;;  %v2455_v53 = vmul.f32 %v3596_v28, %v2454_v56  ;;  %v2476_v20 = vand.u32 2147483647, %v4879_v63 }
 0xd7a   :  { %2339 = vmatpush.msra.mxu1 %v3405_v4  ;;  %v2256_v1 = vmul.f32 %v4759_v18, %v2255_v0 }
 0xd7b   :  { %v4881_v13 = vpop.xlane.xlu1 %2237  ;;  %v2456_v9 = vadd.f32 %v3596_v28, %v2455_v53 }
 0xd7c   :  { %3597 = vrcp.f32 %v4881_v13  ;;  %v2283_v25 = vand.u32 2147483648, %v4881_v13  ;;  %vm2277_vm6 = vweird.f32 %v4881_v13  ;;  %v2281_v48 = vand.u32 2147483647, %v4881_v13 }
 0xd7d   :  { %3599 = vrcp.f32 %v4879_v63  ;;  %v2460_v40 = vsel %vm4901_vm3, %v3596_v28, %v2456_v9 }
 0xd7e   :  { %v2465_v12 = vsel %vm2462_vm7, %v2464_v11, %v2460_v40  ;;  %v2284_v15 = vor.u32 1.1754944e-38, %v2283_v25  ;;  %vm2282_vm13 = vcmp.eq.f32.partialorder %v2281_v48, 8.507059e+37 }
 0xd7f   :  { %v2466_v33 = vmul.f32 %v4764_v16, %v2465_v12 }
 0xd82   :  { %v3598_v26 = vpop.eup %3597 }
 0xd83   :  { %v2273_v34 = vmul.f32 %v3598_v26, %v4881_v13  ;;  %v4893_v35 = vpop.eup %3599  ;;  %vm2278_vm5 = vweird.f32 %v3598_v26 }
 0xd84   :  { %v2468_v41 = vmul.f32 %v4893_v35, %v4879_v63  ;;  %vm4911_vm10 = vmor %vm2277_vm6, %vm2278_vm5 }
 0xd85   :  { %v2274_v43 = vsub.f32 1.0, %v2273_v34 }
 0xd86   :  { %v2469_v52 = vsub.f32 1.0, %v2468_v41 }
 0xd87   :  { %v2275_v3 = vmul.f32 %v3598_v26, %v2274_v43 }
 0xd88   :  { %v2470_v27 = vmul.f32 %v4893_v35, %v2469_v52 }
 0xd89   :  { %v2276_v31 = vadd.f32 %v3598_v26, %v2275_v3 }
 0xd8a   :  { %v2471_v29 = vadd.f32 %v4893_v35, %v2470_v27 }
 0xd8b   :  { %v2280_v38 = vsel %vm4911_vm10, %v3598_v26, %v2276_v31 }
 0xd8c   :  { %v2285_v6 = vsel %vm2282_vm13, %v2284_v15, %v2280_v38 }
 0xd90   :  { %v3413_v44 = vpop.permute.xlu1 %3412 }
 0xd91   :  { %v3414_v62 = vunpack.i.l.bf16 %v3413_v44  ;;  %v3415_v22 = vunpack.i.h.bf16 %v3413_v44 }
 0xd93   :  { %2340 = vmatpush.msra.mxu1 %v3414_v62 }
 0xd95   :  { %2341 = vmatpush.msra.mxu1 %v3415_v22 }
 0xd96   :  { %3275 = vmatmul.msk.f32.vlgmr.msra.gmra.mxu1 %vm62_vm0, %v2256_v1  ;;  %v2286_v1 = vmul.f32 %v4773_v54, %v2285_v6  ;;  %v3292_v6 = vld [vmem:[%s5195_s7 + $0x28] sm:$0xff] }
 0xd9e   :  { %v2235_v21 = vpop.xlane.xlu0 %2234 }
 0xd9f   :  { %3601 = vrcp.f32 %v2235_v21  ;;  %v2268_v2 = vand.u32 2147483648, %v2235_v21  ;;  %v2266_v55 = vand.u32 2147483647, %v2235_v21  ;;  %vm2262_vm15 = vweird.f32 %v2235_v21 }
 0xda1   :  { %v2269_v58 = vor.u32 1.1754944e-38, %v2268_v2  ;;  %vm2267_vm4 = vcmp.eq.f32.partialorder %v2266_v55, 8.507059e+37 }
 0xda5   :  { %v3602_v18 = vpop.eup %3601 }
 0xda6   :  { %v2258_v61 = vmul.f32 %v3602_v18, %v2235_v21  ;;  %vm2263_vm12 = vweird.f32 %v3602_v18 }
 0xda7   :  { %vm2264_vm2 = vmor %vm2262_vm15, %vm2263_vm12  ;;  %vm2473_vm12 = vweird.f32 %v4893_v35  ;;  %vm2472_vm15 = vweird.f32 %v4879_v63 }
 0xda8   :  { %v2259_v45 = vsub.f32 1.0, %v2258_v61  ;;  %vm2474_vm1 = vmor %vm2472_vm15, %vm2473_vm12 }
 0xda9   :  { %v2475_v0 = vsel %vm2474_vm1, %v4893_v35, %v2471_v29 }
 0xdaa   :  { %v2260_v23 = vmul.f32 %v3602_v18, %v2259_v45 }
 0xdac   :  { %v2261_v47 = vadd.f32 %v3602_v18, %v2260_v23 }
 0xdae   :  { %v2448_v59 = vpop.xlane.xlu2 %2447  ;;  %v2265_v50 = vsel %vm2264_vm2, %v3602_v18, %v2261_v47  ;;  %vm2477_vm2 = vcmp.eq.f32.partialorder %v2476_v20, 8.507059e+37  ;;  %v3291_v20 = vld [vmem:[%s5195_s7 + $0x20] sm:$0xff] }
 0xdaf   :  { %3603 = vrcp.f32 %v2448_v59  ;;  %v2270_v8 = vsel %vm2267_vm4, %v2269_v58, %v2265_v50  ;;  %v2493_v26 = vand.u32 2147483648, %v2448_v59  ;;  %vm2487_vm4 = vweird.f32 %v2448_v59 }
 0xdb0   :  { %v2271_v5 = vmul.f32 %v4784_v24, %v2270_v8  ;;  %v2478_v24 = vand.u32 2147483648, %v4879_v63  ;;  %v2491_v34 = vand.u32 2147483647, %v2448_v59 }
 0xdb1   :  { %v3418_v30 = vpop.permute.xlu0 %3417  ;;  %v2494_v35 = vor.u32 1.1754944e-38, %v2493_v26 }
 0xdb2   :  { %v3419_v7 = vunpack.i.l.bf16 %v3418_v30  ;;  %3276 = vmatmul.msk.f32.gmra.mxu1 %vm62_vm0, %v2271_v5  ;;  %v3420_v13 = vunpack.i.h.bf16 %v3418_v30  ;;  %v2479_v62 = vor.u32 1.1754944e-38, %v2478_v24  ;;  %vm2492_vm6 = vcmp.eq.f32.partialorder %v2491_v34, 8.507059e+37 }
 0xdb4   :  { %2550 = vmatpush.msrb.mxu0 %v3419_v7  ;;  %v2480_v21 = vsel %vm2477_vm2, %v2479_v62, %v2475_v0 }
 0xdb5   :  { %v3604_v19 = vpop.eup %3603  ;;  %v2481_v42 = vmul.f32 %v4769_v60, %v2480_v21 }
 0xdb6   :  { %v2483_v44 = vmul.f32 %v3604_v19, %v2448_v59  ;;  %2551 = vmatpush.msrb.mxu0 %v3420_v13  ;;  %vm2488_vm3 = vweird.f32 %v3604_v19 }
 0xdb7   :  { %3287 = vmatmul.msk.f32.vlgmr.msrb.gmra.mxu0 %vm62_vm0, %v2466_v33  ;;  %vm2489_vm5 = vmor %vm2487_vm4, %vm2488_vm3  ;;  %v3293_v33 = vld [vmem:[%s5195_s7 + $0x30] sm:$0xff] }
 0xdb8   :  { %v2484_v22 = vsub.f32 1.0, %v2483_v44 }
 0xdba   :  { %v2485_v28 = vmul.f32 %v3604_v19, %v2484_v22  ;;  %3277 = vmatmul.msk.f32.gmra.mxu1 %vm62_vm0, %v2286_v1 }
 0xdbb   :  { %v2451_v16 = vpop.xlane.xlu1 %2450 }
 0xdbc   :  { %3605 = vrcp.f32 %v2451_v16  ;;  %v2486_v63 = vadd.f32 %v3604_v19, %v2485_v28  ;;  %v2508_v41 = vand.u32 2147483648, %v2451_v16  ;;  %v2506_v2 = vand.u32 2147483647, %v2451_v16 }
 0xdbd   :  { %vm2502_vm10 = vweird.f32 %v2451_v16 }
 0xdbe   :  { %v2490_v56 = vsel %vm2489_vm5, %v3604_v19, %v2486_v63  ;;  %v2509_v3 = vor.u32 1.1754944e-38, %v2508_v41  ;;  %vm2507_vm13 = vcmp.eq.f32.partialorder %v2506_v2, 8.507059e+37  ;;  %v3294_v19 = vld [vmem:[%s5195_s7 + $0x38] sm:$0xff] }
 0xdbf   :  { %3288 = vmatmul.msk.f32.gmra.mxu0 %vm62_vm0, %v2481_v42  ;;  %v2495_v18 = vsel %vm2492_vm6, %v2494_v35, %v2490_v56  ;;  %2659 = vmatpush.msrb.mxu2 %v3294_v19 }
 0xdc0   :  { %v2496_v53 = vmul.f32 %v4790_v39, %v2495_v18 }
 0xdc1   :  { %2660 = vmatpush.msrb.mxu2 %v3293_v33 }
 0xdc2   :  { %v3606_v54 = vpop.eup %3605 }
 0xdc3   :  { %v2498_v43 = vmul.f32 %v3606_v54, %v2451_v16  ;;  %vm2503_vm7 = vweird.f32 %v3606_v54  ;;  %2661 = vmatpush.msrb.mxu2 %v3292_v6  ;;  %v3305_v6 = vld [vmem:[%s5199_s11 + $0x38] sm:$0xff] }
 0xdc4   :  { %vm2504_vm12 = vmor %vm2502_vm10, %vm2503_vm7  ;;  %2820 = vmatpush.msrb.mxu1 %v3305_v6 }
 0xdc5   :  { %v2499_v61 = vsub.f32 1.0, %v2498_v43  ;;  %2662 = vmatpush.msrb.mxu2 %v3291_v20  ;;  %v3304_v20 = vld [vmem:[%s5199_s11 + $0x30] sm:$0xff] }
 0xdc6   :  { %2821 = vmatpush.msrb.mxu1 %v3304_v20 }
 0xdc7   :  { %v2500_v45 = vmul.f32 %v3606_v54, %v2499_v61  ;;  %3289 = vmatmul.msk.f32.gmra.mxu0 %vm62_vm0, %v2496_v53 }
 0xdc9   :  { %v2501_v60 = vadd.f32 %v3606_v54, %v2500_v45 }
 0xdcb   :  { %v2505_v23 = vsel %vm2504_vm12, %v3606_v54, %v2501_v60 }
 0xdcc   :  { %v2510_v55 = vsel %vm2507_vm13, %v2509_v3, %v2505_v23  ;;  %v3432_v23 = vld [vmem:[%s5194_s8 + $0x1] ss:$0 sm:$0xff] }
 0xdcd   :  { %v2511_v9 = vmul.f32 %v4796_v46, %v2510_v55 }
 0xdcf   :  { %3290 = vmatmul.msk.f32.gmra.mxu0 %vm62_vm0, %v2511_v9 }
 0xdd5   :  { %v1923_v8 = vpop.f32.mrf.mxu1 }
 0xdd9   :  { %v2133_v52 = vpop.f32.mrf.mxu0 }
 0xdda   :  { %2569 = vrot.lane.b32.xlu2 %v2133_v52, %s5234_s19 }
 0xddc   :  { %v2241_v39 = vpop.xlane.xlu0 %2240 }
 0xddd   :  { %3607 = vrcp.f32 %v2241_v39  ;;  %v2298_v58 = vand.u32 2147483648, %v2241_v39  ;;  %v2296_v59 = vand.u32 2147483647, %v2241_v39  ;;  %vm2292_vm1 = vweird.f32 %v2241_v39 }
 0xddf   :  { %v2299_v46 = vor.u32 1.1754944e-38, %v2298_v58  ;;  %vm2297_vm3 = vcmp.eq.f32.partialorder %v2296_v59, 8.507059e+37 }
 0xde1   :  { %v1926_v11 = vpop.f32.mrf.mxu1 }
 0xde2   :  { %v2136_v17 = vpop.f32.mrf.mxu0 }
 0xde3   :  { %v3608_v57 = vpop.eup %3607  ;;  %2571 = vrot.lane.b32.xlu2 %v2136_v17, %s5234_s19 }
 0xde4   :  { %v2288_v47 = vmul.f32 %v3608_v57, %v2241_v39  ;;  %vm2293_vm15 = vweird.f32 %v3608_v57 }
 0xde5   :  { %vm2294_vm2 = vmor %vm2292_vm1, %vm2293_vm15 }
 0xde6   :  { %v2289_v25 = vsub.f32 1.0, %v2288_v47 }
 0xde8   :  { %v2290_v36 = vmul.f32 %v3608_v57, %v2289_v25 }
 0xdea   :  { %v2291_v50 = vadd.f32 %v3608_v57, %v2290_v36  ;;  %v1929_v5 = vpop.f32.mrf.mxu1  ;;  %v2139_v4 = vpop.f32.mrf.mxu0 }
 0xdec   :  { %v2295_v31 = vsel %vm2294_vm2, %v3608_v57, %v2291_v50 }
 0xded   :  { %v2300_v40 = vsel %vm2297_vm3, %v2299_v46, %v2295_v31 }
 0xdee   :  { %v2301_v27 = vmul.f32 %v4845_v10, %v2300_v40 }
 0xdf0   :  { %3278 = vmatmul.msk.f32.gmra.mxu1 %vm62_vm0, %v2301_v27 }
 0xdf2   :  { %v1932_v48 = vpop.f32.mrf.mxu1  ;;  %v2142_v12 = vpop.f32.mrf.mxu0 }
 0xe13   :  { %v2343_v30 = vpop.f32.mrf.mxu1 }
 0xe14   :  { %2585 = vrot.lane.b32.xlu0 %v2343_v30, %s3655_s28 }
 0xe2f   :  { %v2346_v7 = vpop.f32.mrf.mxu1 }
 0xe30   :  { %2587 = vrot.lane.b32.xlu0 %v2346_v7, %s3655_s28 }
 0xe34   :  { %v2553_v38 = vpop.f32.mrf.mxu0  ;;  %v2570_v44 = vpop.permute.xlu2 %2569 }
 0xe35   :  { %2601 = vrot.lane.b32.xlu1 %v2553_v38, %s5235_s3  ;;  %v2613_v22 = vsel %vm251_vm14, %v1923_v8, %v2570_v44 }
 0xe37   :  { %v2349_v15 = vpop.f32.mrf.mxu1 }
 0xe38   :  { %2573 = vrot.lane.b32.xlu0 %v2139_v4, %s5234_s19 }
 0xe3c   :  { %v2556_v10 = vpop.f32.mrf.mxu0 }
 0xe3d   :  { %2603 = vrot.lane.b32.xlu2 %v2556_v10, %s5235_s3  ;;  %v2572_v62 = vpop.permute.xlu2 %2571 }
 0xe3e   :  { %v2614_v26 = vsel %vm251_vm14, %v1926_v11, %v2572_v62 }
 0xe40   :  { %2575 = vrot.lane.b32.xlu0 %v2142_v12, %s5234_s19 }
 0xe44   :  { %v2559_v29 = vpop.f32.mrf.mxu0 }
 0xe45   :  { %2589 = vrot.lane.b32.xlu2 %v2349_v15, %s3655_s28  ;;  %2605 = vrot.lane.b32.xlu1 %v2559_v29, %s5235_s3 }
 0xe4c   :  { %v2562_v24 = vpop.f32.mrf.mxu0 }
 0xe4d   :  { %2607 = vrot.lane.b32.xlu1 %v2562_v24, %s5235_s3 }
 0xe6d   :  { %v2352_v13 = vpop.f32.mrf.mxu1 }
 0xe6e   :  { %2591 = vrot.lane.b32.xlu2 %v2352_v13, %s3655_s28 }
 0xe86   :  { %v2586_v0 = vpop.permute.xlu0 %2585 }
 0xe87   :  { %v2617_v1 = vsel %vm1132_vm8, %v2613_v22, %v2586_v0  ;;  %v3303_v0 = vld [vmem:[%s5199_s11 + $0x28] sm:$0xff]  ;;  %v3302_v22 = vld [vmem:[%s5199_s11 + $0x20] sm:$0xff] }
 0xe88   :  { %2822 = vmatpush.msrb.mxu1 %v3303_v0 }
 0xe8a   :  { %2823 = vmatpush.msrb.mxu1 %v3302_v22 }
 0xe97   :  { %v2604_v63 = vpop.permute.xlu2 %2603 }
 0xe9f   :  { %v2590_v54 = vpop.permute.xlu2 %2589 }
 0xea2   :  { %v2588_v28 = vpop.permute.xlu0 %2587 }
 0xea3   :  { %v2618_v42 = vsel %vm1132_vm8, %v2614_v26, %v2588_v28 }
 0xea4   :  { %v2622_v34 = vsel %vm1137_vm9, %v2618_v42, %v2604_v63 }
 0xea7   :  { %v2602_v21 = vpop.permute.xlu1 %2601 }
 0xea8   :  { %v2621_v16 = vsel %vm1137_vm9, %v2617_v1, %v2602_v21 }
 0xea9   :  { %3296 = vmatmul.msk.f32.vlgmr.msrb.gmra.mxu2 %vm62_vm0, %v2621_v16 }
 0xeaa   :  { %v2574_v56 = vpop.permute.xlu0 %2573 }
 0xeab   :  { %v2615_v35 = vsel %vm251_vm14, %v1929_v5, %v2574_v56 }
 0xeac   :  { %v2619_v43 = vsel %vm1132_vm8, %v2615_v35, %v2590_v54 }
 0xeb1   :  { %3297 = vmatmul.msk.f32.gmra.mxu2 %vm62_vm0, %v2622_v34 }
 0xeb2   :  { %v2576_v53 = vpop.permute.xlu0 %2575 }
 0xeb3   :  { %v2616_v41 = vsel %vm251_vm14, %v1932_v48, %v2576_v53 }
 0xeb7   :  { %v2606_v18 = vpop.permute.xlu1 %2605 }
 0xeb8   :  { %v2623_v61 = vsel %vm1137_vm9, %v2619_v43, %v2606_v18 }
 0xeb9   :  { %3298 = vmatmul.msk.f32.gmra.mxu2 %vm62_vm0, %v2623_v61 }
 0xebf   :  { %v2608_v2 = vpop.permute.xlu1 %2607 }
 0xec8   :  { %v2592_v45 = vpop.permute.xlu2 %2591 }
 0xec9   :  { %v2620_v60 = vsel %vm1132_vm8, %v2616_v41, %v2592_v45  ;;  %v3433_v41 = vld [vmem:[%s5196_s9 + $0x1] ss:$0 sm:$0xff] }
 0xeca   :  { %v2624_v3 = vsel %vm1137_vm9, %v2620_v60, %v2608_v2 }
 0xecb   :  { %3299 = vmatmul.msk.f32.gmra.mxu2 %vm62_vm0, %v2624_v3  ;;  %v3434_v3 = vld [vmem:[%s5197_s10 + $0x1] ss:$0 sm:$0xff] }
 0xf2c   :  { %v2664_v55 = vpop.f32.mrf.mxu2 }
 0xf2d   :  { %v2665_v9 = vadd.f32 %v3432_v23, %v2664_v55 }
 0xf2f   :  { %v2676_v52 = vadd.f32 %v2665_v9, %v4530_v37 }
 0xf31   :  { %v2684_v39 = vsel %vm62_vm0, %v2676_v52, 0.0 }
 0xf32   :  { %2685 = vadd.xlane.f32.xlu0 %v2684_v39 }
 0xf34   :  { %v2667_v57 = vpop.f32.mrf.mxu2 }
 0xf35   :  { %v2668_v47 = vadd.f32 %v3432_v23, %v2667_v57 }
 0xf37   :  { %v2677_v17 = vadd.f32 %v2668_v47, %v4535_v32 }
 0xf39   :  { %v2687_v25 = vsel %vm62_vm0, %v2677_v17, 0.0 }
 0xf3a   :  { %2688 = vadd.xlane.f32.xlu2 %v2687_v25 }
 0xf3c   :  { %v2670_v58 = vpop.f32.mrf.mxu2 }
 0xf3d   :  { %v2671_v36 = vadd.f32 %v3432_v23, %v2670_v58 }
 0xf3f   :  { %v2678_v59 = vadd.f32 %v2671_v36, %v4540_v51 }
 0xf41   :  { %v2690_v50 = vsel %vm62_vm0, %v2678_v59, 0.0 }
 0xf42   :  { %2691 = vadd.xlane.f32.xlu1 %v2690_v50 }
 0xf4e   :  { %v2673_v46 = vpop.f32.mrf.mxu2 }
 0xf4f   :  { %v2674_v31 = vadd.f32 %v3432_v23, %v2673_v46 }
 0xf51   :  { %v2679_v37 = vadd.f32 %v2674_v31, %v4546_v49 }
 0xf53   :  { %v2693_v40 = vsel %vm62_vm0, %v2679_v37, 0.0 }
 0xf54   :  { %2694 = vadd.xlane.f32.xlu0 %v2693_v40 }
 0xfa5   :  { %v2686_v27 = vpop.xlane.xlu0 %2685 }
 0xfa6   :  { %v2696_v32 = vmul.f32 %v2686_v27, %v3762_v14 }
 0xfa8   :  { %v2700_v8 = vsub.f32 %v2676_v52, %v2696_v32 }
 0xfaa   :  { %v2704_v11 = vmul.f32 %v2700_v8, %v2700_v8 }
 0xfac   :  { %v2708_v5 = vsel %vm62_vm0, %v2704_v11, 0.0 }
 0xfad   :  { %2709 = vadd.xlane.f32.xlu2 %v2708_v5  ;;  %v2689_v48 = vpop.xlane.xlu2 %2688 }
 0xfae   :  { %v2697_v51 = vmul.f32 %v2689_v48, %v3762_v14 }
 0xfb0   :  { %v4990_v30 = vsub.f32 %v2677_v17, %v2697_v51 }
 0xfb2   :  { %v2705_v4 = vmul.f32 %v4990_v30, %v4990_v30 }
 0xfb4   :  { %v2711_v49 = vsel %vm62_vm0, %v2705_v4, 0.0 }
 0xfb5   :  { %2712 = vadd.xlane.f32.xlu1 %v2711_v49  ;;  %v2692_v12 = vpop.xlane.xlu1 %2691 }
 0xfb6   :  { %v2698_v7 = vmul.f32 %v2692_v12, %v3762_v14 }
 0xfb8   :  { %v4996_v38 = vsub.f32 %v2678_v59, %v2698_v7 }
 0xfba   :  { %v2706_v10 = vmul.f32 %v4996_v38, %v4996_v38 }
 0xfbc   :  { %v2714_v15 = vsel %vm62_vm0, %v2706_v10, 0.0 }
 0xfbd   :  { %2715 = vadd.xlane.f32.xlu0 %v2714_v15 }
 0xfc7   :  { %v2695_v29 = vpop.xlane.xlu0 %2694 }
 0xfc8   :  { %v2699_v24 = vmul.f32 %v2695_v29, %v3762_v14  ;;  %v5051_v29 = vld [vmem:[%s5198_s12 + $0x1] ss:$0 sm:$0xff] }
 0xfca   :  { %v5002_v13 = vsub.f32 %v2679_v37, %v2699_v24 }
 0xfcc   :  { %v2707_v19 = vmul.f32 %v5002_v13, %v5002_v13 }
 0xfce   :  { %v2717_v33 = vsel %vm62_vm0, %v2707_v19, 0.0 }
 0xfcf   :  { %2718 = vadd.xlane.f32.xlu2 %v2717_v33 }
0x1020   :  { %v2710_v44 = vpop.xlane.xlu2 %2709 }
0x1021   :  { %v2720_v62 = vmul.f32 %v2710_v44, %v3762_v14 }
0x1023   :  { %v2724_v1 = vadd.f32 1e-12, %v2720_v62 }
0x1025   :  { %3609 = vrsqrt.f32 %v2724_v1  ;;  %vm2734_vm8 = vweird.f32 %v2724_v1 }
0x1028   :  { %v2713_v28 = vpop.xlane.xlu1 %2712 }
0x1029   :  { %v2721_v21 = vmul.f32 %v2713_v28, %v3762_v14 }
0x102b   :  { %v3610_v16 = vpop.eup %3609  ;;  %v2725_v26 = vadd.f32 1e-12, %v2721_v21  ;;  %v3318_v21 = vld [vmem:[%s5201_s13 + $0x78] sm:$0xff] }
0x102c   :  { %v2729_v63 = vmul.f32 %v3610_v16, %v2724_v1  ;;  %vm2735_vm14 = vweird.f32 %v3610_v16  ;;  %3031 = vmatpush.msrb.mxu3 %v3318_v21 }
0x102d   :  { %3611 = vrsqrt.f32 %v2725_v26  ;;  %vm2736_vm9 = vmor %vm2734_vm8, %vm2735_vm14  ;;  %vm2744_vm5 = vweird.f32 %v2725_v26 }
0x102e   :  { %v2730_v42 = vmul.f32 %v3610_v16, %v2729_v63 }
0x1030   :  { %v2731_v34 = vmul.f32 0.5, %v2730_v42  ;;  %v2716_v56 = vpop.xlane.xlu0 %2715 }
0x1031   :  { %v2722_v35 = vmul.f32 %v2716_v56, %v3762_v14 }
0x1032   :  { %v2732_v54 = vsub.f32 1.5, %v2731_v34  ;;  %v3317_v34 = vld [vmem:[%s5201_s13 + $0x70] sm:$0xff] }
0x1033   :  { %v3612_v18 = vpop.eup %3611  ;;  %v2726_v43 = vadd.f32 1e-12, %v2722_v35  ;;  %3032 = vmatpush.msrb.mxu3 %v3317_v34 }
0x1034   :  { %v2733_v61 = vmul.f32 %v3610_v16, %v2732_v54  ;;  %v2739_v53 = vmul.f32 %v3612_v18, %v2725_v26  ;;  %vm2745_vm4 = vweird.f32 %v3612_v18  ;;  %v3316_v54 = vld [vmem:[%s5201_s13 + $0x68] sm:$0xff] }
0x1035   :  { %3613 = vrsqrt.f32 %v2726_v43  ;;  %vm2746_vm6 = vmor %vm2744_vm5, %vm2745_vm4  ;;  %vm2754_vm10 = vweird.f32 %v2726_v43  ;;  %3033 = vmatpush.msrb.mxu3 %v3316_v54 }
0x1036   :  { %v2737_v45 = vsel %vm2736_vm9, %v3610_v16, %v2733_v61  ;;  %v2740_v2 = vmul.f32 %v3612_v18, %v2739_v53 }
0x1037   :  { %v2768_v60 = vmul.f32 %v2737_v45, %v2700_v8 }
0x1038   :  { %v2741_v23 = vmul.f32 0.5, %v2740_v2 }
0x1039   :  { %v2775_v55 = vmul.f32 %v3433_v41, %v2768_v60  ;;  %v3314_v60 = vld [vmem:[%s5201_s13 + $0x58] sm:$0xff] }
0x103a   :  { %v2742_v9 = vsub.f32 1.5, %v2741_v23 }
0x103b   :  { %v3614_v52 = vpop.eup %3613  ;;  %v5028_v39 = vadd.f32 %v3434_v3, %v2775_v55 }
0x103c   :  { %v2743_v57 = vmul.f32 %v3612_v18, %v2742_v9  ;;  %v2749_v47 = vmul.f32 %v3614_v52, %v2726_v43  ;;  %vm2755_vm7 = vweird.f32 %v3614_v52 }
0x103d   :  { %3307 = vmatmul.msk.f32.vlgmr.msrb.gmra.mxu1 %vm62_vm0, %v5028_v39  ;;  %vm2756_vm12 = vmor %vm2754_vm10, %vm2755_vm7 }
0x103e   :  { %v2747_v17 = vsel %vm2746_vm6, %v3612_v18, %v2743_v57  ;;  %v2750_v25 = vmul.f32 %v3614_v52, %v2749_v47  ;;  %v3312_v57 = vld [vmem:[%s5201_s13 + $0x48] sm:$0xff] }
0x103f   :  { %v2769_v58 = vmul.f32 %v2747_v17, %v4990_v30 }
0x1040   :  { %v2751_v36 = vmul.f32 0.5, %v2750_v25 }
0x1041   :  { %v2776_v59 = vmul.f32 %v3433_v41, %v2769_v58 }
0x1042   :  { %v2752_v50 = vsub.f32 1.5, %v2751_v36  ;;  %v2719_v46 = vpop.xlane.xlu2 %2718  ;;  %v3311_v36 = vld [vmem:[%s5201_s13 + $0x40] sm:$0xff] }
0x1043   :  { %v2723_v31 = vmul.f32 %v2719_v46, %v3762_v14  ;;  %v5034_v37 = vadd.f32 %v3434_v3, %v2776_v59 }
0x1044   :  { %v2753_v40 = vmul.f32 %v3614_v52, %v2752_v50 }
0x1045   :  { %v2727_v27 = vadd.f32 1e-12, %v2723_v31  ;;  %3308 = vmatmul.msk.f32.gmra.mxu1 %vm62_vm0, %v5034_v37 }
0x1046   :  { %v2757_v32 = vsel %vm2756_vm12, %v3614_v52, %v2753_v40 }
0x1047   :  { %3615 = vrsqrt.f32 %v2727_v27  ;;  %v2770_v8 = vmul.f32 %v2757_v32, %v4996_v38  ;;  %vm2764_vm15 = vweird.f32 %v2727_v27 }
0x1049   :  { %v2777_v11 = vmul.f32 %v3433_v41, %v2770_v8 }
0x104b   :  { %v5039_v5 = vadd.f32 %v3434_v3, %v2777_v11 }
0x104d   :  { %v3616_v48 = vpop.eup %3615  ;;  %3309 = vmatmul.msk.f32.gmra.mxu1 %vm62_vm0, %v5039_v5 }
0x104e   :  { %v2759_v51 = vmul.f32 %v3616_v48, %v2727_v27  ;;  %vm2765_vm13 = vweird.f32 %v3616_v48 }
0x104f   :  { %vm2766_vm1 = vmor %vm2764_vm15, %vm2765_vm13 }
0x1050   :  { %v2760_v30 = vmul.f32 %v3616_v48, %v2759_v51 }
0x1052   :  { %v2761_v4 = vmul.f32 0.5, %v2760_v30 }
0x1054   :  { %v2762_v49 = vsub.f32 1.5, %v2761_v4 }
0x1056   :  { %v2763_v12 = vmul.f32 %v3616_v48, %v2762_v49 }
0x1058   :  { %v2767_v7 = vsel %vm2766_vm1, %v3616_v48, %v2763_v12 }
0x1059   :  { %v2771_v10 = vmul.f32 %v2767_v7, %v5002_v13 }
0x105b   :  { %v2778_v15 = vmul.f32 %v3433_v41, %v2771_v10  ;;  %v3315_v41 = vld [vmem:[%s5201_s13 + $0x60] sm:$0xff] }
0x105c   :  { %3034 = vmatpush.msrb.mxu3 %v3315_v41 }
0x105d   :  { %v5044_v38 = vadd.f32 %v3434_v3, %v2778_v15  ;;  %v3313_v3 = vld [vmem:[%s5201_s13 + $0x50] sm:$0xff] }
0x105e   :  { %3035 = vmatpush.msrb.mxu3 %v3314_v60 }
0x105f   :  { %3310 = vmatmul.msk.f32.gmra.mxu1 %vm62_vm0, %v5044_v38 }
0x1060   :  { %3036 = vmatpush.msrb.mxu3 %v3313_v3 }
0x1062   :  { %3037 = vmatpush.msrb.mxu3 %v3312_v57 }
0x1064   :  { %3038 = vmatpush.msrb.mxu3 %v3311_v36 }
0x10ba   :  { %v2825_v24 = vpop.f32.mrf.mxu1 }
0x10bb   :  { %v5054_v19 = vadd.f32 %v5051_v29, %v2825_v24 }
0x10bd   :  { %v5057_v33 = vmul.f32 0.70710677, %v5054_v19 }
0x10bf   :  { %v2845_v13 = vand.u32 2147483647, %v5057_v33  ;;  %vm2977_vm15 = vcmp.lt.f32.partialorder %v5057_v33, 0.0 }
0x10c1   :  { %v2849_v6 = vmul.f32 0.3275911, %v2845_v13  ;;  %v2953_v17 = vsub.f32 0.0, %v2845_v13 }
0x10c2   :  { %v2828_v20 = vpop.f32.mrf.mxu1 }
0x10c3   :  { %v2853_v44 = vadd.f32 1.0, %v2849_v6  ;;  %v5061_v0 = vadd.f32 %v5051_v29, %v2828_v20  ;;  %v2957_v31 = vmul.f32 %v2953_v17, %v2845_v13 }
0x10c5   :  { %3617 = vrcp.f32 %v2853_v44  ;;  %v5064_v62 = vmul.f32 0.70710677, %v5061_v0  ;;  %v2868_v18 = vand.u32 2147483648, %v2853_v44  ;;  %v2866_v53 = vand.u32 2147483647, %v2853_v44 }
0x10c6   :  { %vm2862_vm3 = vweird.f32 %v2853_v44  ;;  %v2961_v49 = vmul.f32 1.442695, %v2957_v31 }
0x10c7   :  { %v5067_v22 = vand.u32 2147483647, %v5064_v62  ;;  %v2869_v23 = vor.u32 1.1754944e-38, %v2868_v18  ;;  %vm2867_vm8 = vcmp.eq.f32.partialorder %v2866_v53, 8.507059e+37 }
0x10c9   :  { %v2850_v1 = vmul.f32 0.3275911, %v5067_v22  ;;  %v2954_v13 = vsub.f32 0.0, %v5067_v22 }
0x10ca   :  { %v2831_v28 = vpop.f32.mrf.mxu1 }
0x10cb   :  { %v3618_v16 = vpop.eup %3617  ;;  %v5074_v26 = vadd.f32 %v5051_v29, %v2831_v28  ;;  %v2854_v42 = vadd.f32 1.0, %v2850_v1  ;;  %v2958_v34 = vmul.f32 %v2954_v13, %v5067_v22 }
0x10cc   :  { %v2858_v63 = vmul.f32 %v3618_v16, %v2853_v44  ;;  %vm2863_vm2 = vweird.f32 %v3618_v16 }
0x10cd   :  { %v5080_v56 = vmul.f32 0.70710677, %v5074_v26  ;;  %3619 = vrcp.f32 %v2854_v42  ;;  %vm2864_vm14 = vmor %vm2862_vm3, %vm2863_vm2  ;;  %v2883_v46 = vand.u32 2147483648, %v2854_v42  ;;  %v2881_v27 = vand.u32 2147483647, %v2854_v42 }
0x10ce   :  { %v2859_v35 = vsub.f32 1.0, %v2858_v63  ;;  %vm2877_vm4 = vweird.f32 %v2854_v42 }
0x10cf   :  { %v5086_v43 = vand.u32 2147483647, %v5080_v56  ;;  %v2884_v51 = vor.u32 1.1754944e-38, %v2883_v46  ;;  %vm2882_vm6 = vcmp.eq.f32.partialorder %v2881_v27, 8.507059e+37 }
0x10d0   :  { %v2860_v61 = vmul.f32 %v3618_v16, %v2859_v35 }
0x10d1   :  { %v2851_v45 = vmul.f32 0.3275911, %v5086_v43  ;;  %v2955_v41 = vsub.f32 0.0, %v5086_v43 }
0x10d2   :  { %v2861_v2 = vadd.f32 %v3618_v16, %v2860_v61 }
0x10d3   :  { %v2855_v55 = vadd.f32 1.0, %v2851_v45  ;;  %v3620_v9 = vpop.eup %3619  ;;  %v2959_v17 = vmul.f32 %v2955_v41, %v5086_v43 }
0x10d4   :  { %v2865_v52 = vsel %vm2864_vm14, %v3618_v16, %v2861_v2  ;;  %v2873_v25 = vmul.f32 %v3620_v9, %v2854_v42  ;;  %vm2878_vm9 = vweird.f32 %v3620_v9 }
0x10d5   :  { %v2870_v47 = vsel %vm2867_vm8, %v2869_v23, %v2865_v52  ;;  %3621 = vrcp.f32 %v2855_v55  ;;  %vm2879_vm5 = vmor %vm2877_vm4, %vm2878_vm9  ;;  %v2898_v6 = vand.u32 2147483648, %v2855_v55  ;;  %v2896_v21 = vand.u32 2147483647, %v2855_v55 }
0x10d6   :  { %v2917_v58 = vmul.f32 1.0614054, %v2870_v47  ;;  %v2874_v59 = vsub.f32 1.0, %v2873_v25  ;;  %3623 = vpow2.f32 %v2961_v49  ;;  %vm2892_vm10 = vweird.f32 %v2855_v55 }
0x10d7   :  { %v2899_v35 = vor.u32 1.1754944e-38, %v2898_v6  ;;  %vm2897_vm13 = vcmp.eq.f32.partialorder %v2896_v21, 8.507059e+37  ;;  %vm2978_vm8 = vcmp.lt.f32.partialorder %v5064_v62, 0.0  ;;  %vm2979_vm9 = vcmp.lt.f32.partialorder %v5080_v56, 0.0 }
0x10d8   :  { %v2921_v50 = vadd.f32 -1.4531521, %v2917_v58  ;;  %v2875_v40 = vmul.f32 %v3620_v9, %v2874_v59 }
0x10da   :  { %v2925_v32 = vmul.f32 %v2921_v50, %v2870_v47  ;;  %v2876_v11 = vadd.f32 %v3620_v9, %v2875_v40 }
0x10db   :  { %v3622_v8 = vpop.eup %3621 }
0x10dc   :  { %v2929_v48 = vadd.f32 1.4214138, %v2925_v32  ;;  %v2888_v30 = vmul.f32 %v3622_v8, %v2855_v55  ;;  %v2834_v4 = vpop.f32.mrf.mxu1  ;;  %v2880_v7 = vsel %vm2879_vm5, %v3620_v9, %v2876_v11  ;;  %vm2893_vm7 = vweird.f32 %v3622_v8  ;;  %v3624_v9 = vpop.eup %3623 }
0x10dd   :  { %v5105_v12 = vadd.f32 %v5051_v29, %v2834_v4  ;;  %v2885_v24 = vsel %vm2882_vm6, %v2884_v51, %v2880_v7  ;;  %vm2894_vm12 = vmor %vm2892_vm10, %vm2893_vm7  ;;  %v2963_v55 = vmul.f32 1.442695, %v2958_v34 }
0x10de   :  { %v2933_v10 = vmul.f32 %v2929_v48, %v2870_v47  ;;  %v2889_v15 = vsub.f32 1.0, %v2888_v30  ;;  %v2918_v44 = vmul.f32 1.0614054, %v2885_v24 }
0x10df   :  { %v5109_v20 = vmul.f32 0.70710677, %v5105_v12 }
0x10e0   :  { %v2937_v1 = vadd.f32 -0.28449672, %v2933_v10  ;;  %v2890_v28 = vmul.f32 %v3622_v8, %v2889_v15  ;;  %v2922_v16 = vadd.f32 -1.4531521, %v2918_v44 }
0x10e1   :  { %v5112_v29 = vand.u32 2147483647, %v5109_v20  ;;  %vm2980_vm4 = vcmp.lt.f32.partialorder %v5109_v20, 0.0 }
0x10e2   :  { %v2941_v63 = vmul.f32 %v2937_v1, %v2870_v47  ;;  %v2891_v42 = vadd.f32 %v3622_v8, %v2890_v28  ;;  %v2926_v18 = vmul.f32 %v2922_v16, %v2885_v24 }
0x10e3   :  { %v2852_v54 = vmul.f32 0.3275911, %v5112_v29  ;;  %v2956_v16 = vsub.f32 0.0, %v5112_v29 }
0x10e4   :  { %v2945_v61 = vadd.f32 0.2548296, %v2941_v63  ;;  %v2895_v53 = vsel %vm2894_vm12, %v3622_v8, %v2891_v42  ;;  %v2930_v2 = vadd.f32 1.4214138, %v2926_v18  ;;  %v2837_v8 = vmul.f32 0.5, %v5054_v19 }
0x10e5   :  { %v2856_v45 = vadd.f32 1.0, %v2852_v54  ;;  %v2900_v60 = vsel %vm2897_vm13, %v2899_v35, %v2895_v53  ;;  %v2838_v54 = vmul.f32 0.5, %v5061_v0  ;;  %v2960_v41 = vmul.f32 %v2956_v16, %v5112_v29 }
0x10e6   :  { %v2949_v3 = vmul.f32 %v2945_v61, %v2870_v47  ;;  %v2919_v23 = vmul.f32 1.0614054, %v2900_v60  ;;  %v2934_v22 = vmul.f32 %v2930_v2, %v2885_v24  ;;  %v2965_v47 = vmul.f32 1.442695, %v2959_v17 }
0x10e7   :  { %3625 = vrcp.f32 %v2856_v45  ;;  %v2913_v49 = vand.u32 2147483648, %v2856_v45  ;;  %v2911_v15 = vand.u32 2147483647, %v2856_v45  ;;  %vm2907_vm2 = vweird.f32 %v2856_v45 }
0x10e8   :  { %v2969_v52 = vmul.f32 %v3624_v9, %v2949_v3  ;;  %v2923_v57 = vadd.f32 -1.4531521, %v2919_v23  ;;  %v2938_v58 = vadd.f32 -0.28449672, %v2934_v22  ;;  %3627 = vpow2.f32 %v2963_v55 }
0x10e9   :  { %3629 = vpow2.f32 %v2965_v47  ;;  %v2914_v19 = vor.u32 1.1754944e-38, %v2913_v49  ;;  %vm2912_vm14 = vcmp.eq.f32.partialorder %v2911_v15, 8.507059e+37  ;;  %v2839_v55 = vmul.f32 0.5, %v5074_v26  ;;  %v3436_v47 = vld [vmem:[%s5200_s14 + $0x1] ss:$0 sm:$0xff] }
0x10ea   :  { %v2973_v25 = vsub.f32 1.0, %v2969_v52  ;;  %v2927_v36 = vmul.f32 %v2923_v57, %v2900_v60  ;;  %v2942_v50 = vmul.f32 %v2938_v58, %v2885_v24 }
0x10ec   :  { %v2981_v59 = vsub.f32 0.0, %v2973_v25  ;;  %v2931_v46 = vadd.f32 1.4214138, %v2927_v36  ;;  %v2946_v32 = vadd.f32 0.2548296, %v2942_v50 }
0x10ed   :  { %v3626_v31 = vpop.eup %3625 }
0x10ee   :  { %v2985_v40 = vsel %vm2977_vm15, %v2981_v59, %v2973_v25  ;;  %v2903_v27 = vmul.f32 %v3626_v31, %v2856_v45  ;;  %v2935_v48 = vmul.f32 %v2931_v46, %v2900_v60  ;;  %v2950_v43 = vmul.f32 %v2946_v32, %v2885_v24  ;;  %v3628_v30 = vpop.eup %3627 }
0x10ef   :  { %v2989_v11 = vadd.f32 1.0, %v2985_v40  ;;  %vm2908_vm1 = vweird.f32 %v3626_v31  ;;  %v3630_v21 = vpop.eup %3629  ;;  %v2840_v46 = vmul.f32 0.5, %v5105_v12 }
0x10f0   :  { %v2904_v51 = vsub.f32 1.0, %v2903_v27  ;;  %v2939_v7 = vadd.f32 -0.28449672, %v2935_v48  ;;  %v2970_v13 = vmul.f32 %v3628_v30, %v2950_v43  ;;  %vm2909_vm3 = vmor %vm2907_vm2, %vm2908_vm1 }
0x10f1   :  { %v2993_v4 = vmul.f32 %v2989_v11, %v2837_v8 }
0x10f2   :  { %v2905_v10 = vmul.f32 %v3626_v31, %v2904_v51  ;;  %v2943_v33 = vmul.f32 %v2939_v7, %v2900_v60  ;;  %v2974_v6 = vsub.f32 1.0, %v2970_v13 }
0x10f3   :  { %3320 = vmatmul.msk.f32.vlgmr.msrb.gmra.mxu3 %vm1520_vm11, %v2993_v4 }
0x10f4   :  { %v2906_v44 = vadd.f32 %v3626_v31, %v2905_v10  ;;  %v2947_v1 = vadd.f32 0.2548296, %v2943_v33  ;;  %v2982_v28 = vsub.f32 0.0, %v2974_v6 }
0x10f6   :  { %v2910_v24 = vsel %vm2909_vm3, %v3626_v31, %v2906_v44  ;;  %v2951_v63 = vmul.f32 %v2947_v1, %v2900_v60  ;;  %v2986_v34 = vsel %vm2978_vm8, %v2982_v28, %v2974_v6  ;;  %v2967_v60 = vmul.f32 1.442695, %v2960_v41 }
0x10f7   :  { %v2915_v42 = vsel %vm2912_vm14, %v2914_v19, %v2910_v24  ;;  %v2990_v18 = vadd.f32 1.0, %v2986_v34 }
0x10f8   :  { %v2920_v35 = vmul.f32 1.0614054, %v2915_v42  ;;  %v2971_v61 = vmul.f32 %v3630_v21, %v2951_v63  ;;  %3631 = vpow2.f32 %v2967_v60 }
0x10f9   :  { %v2994_v45 = vmul.f32 %v2990_v18, %v2838_v54 }
0x10fa   :  { %v2924_v53 = vadd.f32 -1.4531521, %v2920_v35  ;;  %v2975_v2 = vsub.f32 1.0, %v2971_v61 }
0x10fb   :  { %3321 = vmatmul.msk.f32.gmra.mxu3 %vm1520_vm11, %v2994_v45 }
0x10fc   :  { %v2928_v3 = vmul.f32 %v2924_v53, %v2915_v42  ;;  %v2983_v23 = vsub.f32 0.0, %v2975_v2 }
0x10fe   :  { %v2932_v62 = vadd.f32 1.4214138, %v2928_v3  ;;  %v2987_v9 = vsel %vm2979_vm9, %v2983_v23, %v2975_v2  ;;  %v3632_v58 = vpop.eup %3631 }
0x10ff   :  { %v2991_v52 = vadd.f32 1.0, %v2987_v9 }
0x1100   :  { %v2936_v0 = vmul.f32 %v2932_v62, %v2915_v42 }
0x1101   :  { %v2995_v22 = vmul.f32 %v2991_v52, %v2839_v55 }
0x1102   :  { %v2940_v57 = vadd.f32 -0.28449672, %v2936_v0 }
0x1103   :  { %3322 = vmatmul.msk.f32.gmra.mxu3 %vm1520_vm11, %v2995_v22 }
0x1104   :  { %v2944_v17 = vmul.f32 %v2940_v57, %v2915_v42 }
0x1106   :  { %v2948_v29 = vadd.f32 0.2548296, %v2944_v17  ;;  %v3437_v17 = vld [vmem:[%s5202_s15 + $0x1] ss:$0 sm:$0xff] }
0x1108   :  { %v2952_v25 = vmul.f32 %v2948_v29, %v2915_v42 }
0x110a   :  { %v2972_v36 = vmul.f32 %v3632_v58, %v2952_v25 }
0x110c   :  { %v2976_v59 = vsub.f32 1.0, %v2972_v36  ;;  %v3438_v36 = vld [vmem:[%s5203_s16 + $0x1] ss:$0 sm:$0xff] }
0x110e   :  { %v2984_v50 = vsub.f32 0.0, %v2976_v59 }
0x1110   :  { %v2988_v56 = vsel %vm2980_vm4, %v2984_v50, %v2976_v59 }
0x1111   :  { %v2992_v26 = vadd.f32 1.0, %v2988_v56 }
0x1113   :  { %v2996_v31 = vmul.f32 %v2992_v26, %v2840_v46 }
0x1115   :  { %3323 = vmatmul.msk.f32.gmra.mxu3 %vm1520_vm11, %v2996_v31 }
0x1176   :  { %v3040_v40 = vpop.f32.mrf.mxu3 }
0x1177   :  { %v3041_v27 = vadd.f32 %v3436_v47, %v3040_v40 }
0x1179   :  { %v3052_v32 = vadd.f32 %v3041_v27, %v5028_v39 }
0x117b   :  { %v3060_v8 = vsel %vm62_vm0, %v3052_v32, 0.0 }
0x117c   :  { %3061 = vadd.xlane.f32.xlu1 %v3060_v8 }
0x117e   :  { %v3043_v11 = vpop.f32.mrf.mxu3 }
0x117f   :  { %v3044_v20 = vadd.f32 %v3436_v47, %v3043_v11 }
0x1181   :  { %v3053_v48 = vadd.f32 %v3044_v20, %v5034_v37 }
0x1183   :  { %v3063_v12 = vsel %vm62_vm0, %v3053_v48, 0.0 }
0x1184   :  { %3064 = vadd.xlane.f32.xlu0 %v3063_v12 }
0x1186   :  { %v3046_v51 = vpop.f32.mrf.mxu3 }
0x1187   :  { %v3047_v43 = vadd.f32 %v3436_v47, %v3046_v51 }
0x1189   :  { %v3054_v30 = vadd.f32 %v3047_v43, %v5039_v5 }
0x118b   :  { %v3066_v4 = vsel %vm62_vm0, %v3054_v30, 0.0 }
0x118c   :  { %3067 = vadd.xlane.f32.xlu2 %v3066_v4 }
0x1198   :  { %v3049_v49 = vpop.f32.mrf.mxu3 }
0x1199   :  { %v3050_v7 = vadd.f32 %v3436_v47, %v3049_v49 }
0x119b   :  { %v3055_v39 = vadd.f32 %v3050_v7, %v5044_v38 }
0x119d   :  { %v3069_v10 = vsel %vm62_vm0, %v3055_v39, 0.0 }
0x119e   :  { %3070 = vadd.xlane.f32.xlu1 %v3069_v10 }
0x11ef   :  { %v3062_v15 = vpop.xlane.xlu1 %3061 }
0x11f0   :  { %v3072_v37 = vmul.f32 %v3062_v15, %v3762_v14 }
0x11f2   :  { %v3076_v13 = vsub.f32 %v3052_v32, %v3072_v37 }
0x11f4   :  { %v3080_v33 = vmul.f32 %v3076_v13, %v3076_v13 }
0x11f6   :  { %v3084_v6 = vsel %vm62_vm0, %v3080_v33, 0.0 }
0x11f7   :  { %3085 = vadd.xlane.f32.xlu0 %v3084_v6  ;;  %v3065_v44 = vpop.xlane.xlu0 %3064 }
0x11f8   :  { %v3073_v5 = vmul.f32 %v3065_v44, %v3762_v14 }
0x11fa   :  { %v3077_v19 = vsub.f32 %v3053_v48, %v3073_v5 }
0x11fc   :  { %v3081_v1 = vmul.f32 %v3077_v19, %v3077_v19 }
0x11fe   :  { %v3087_v28 = vsel %vm62_vm0, %v3081_v1, 0.0 }
0x11ff   :  { %v3068_v24 = vpop.xlane.xlu2 %3067  ;;  %3088 = vadd.xlane.f32.xlu2 %v3087_v28 }
0x1200   :  { %v3074_v38 = vmul.f32 %v3068_v24, %v3762_v14 }
0x1202   :  { %v5148_v21 = vsub.f32 %v3054_v30, %v3074_v38 }
0x1204   :  { %v3082_v16 = vmul.f32 %v5148_v21, %v5148_v21 }
0x1206   :  { %v3090_v63 = vsel %vm62_vm0, %v3082_v16, 0.0 }
0x1207   :  { %3091 = vadd.xlane.f32.xlu1 %v3090_v63 }
0x1211   :  { %v3071_v42 = vpop.xlane.xlu1 %3070 }
0x1212   :  { %v3075_v34 = vmul.f32 %v3071_v42, %v3762_v14 }
0x1214   :  { %v5154_v35 = vsub.f32 %v3055_v39, %v3075_v34 }
0x1216   :  { %v3083_v54 = vmul.f32 %v5154_v35, %v5154_v35 }
0x1218   :  { %v3093_v18 = vsel %vm62_vm0, %v3083_v54, 0.0 }
0x1219   :  { %3094 = vadd.xlane.f32.xlu0 %v3093_v18 }
0x126a   :  { %v3086_v61 = vpop.xlane.xlu0 %3085 }
0x126b   :  { %v3096_v53 = vmul.f32 %v3086_v61, %v3762_v14 }
0x126d   :  { %v3100_v41 = vadd.f32 1e-12, %v3096_v53 }
0x126f   :  { %3633 = vrsqrt.f32 %v3100_v41  ;;  %vm3110_vm5 = vweird.f32 %v3100_v41 }
0x1272   :  { %v3089_v45 = vpop.xlane.xlu2 %3088 }
0x1273   :  { %v3097_v3 = vmul.f32 %v3089_v45, %v3762_v14 }
0x1275   :  { %v3634_v2 = vpop.eup %3633  ;;  %v3101_v62 = vadd.f32 1e-12, %v3097_v3 }
0x1276   :  { %v3105_v23 = vmul.f32 %v3634_v2, %v3100_v41  ;;  %vm3111_vm11 = vweird.f32 %v3634_v2 }
0x1277   :  { %3635 = vrsqrt.f32 %v3101_v62  ;;  %vm3112_vm6 = vmor %vm3110_vm5, %vm3111_vm11  ;;  %vm3120_vm10 = vweird.f32 %v3101_v62 }
0x1278   :  { %v3106_v60 = vmul.f32 %v3634_v2, %v3105_v23 }
0x127a   :  { %v3107_v9 = vmul.f32 0.5, %v3106_v60  ;;  %v3092_v52 = vpop.xlane.xlu1 %3091 }
0x127b   :  { %v3098_v0 = vmul.f32 %v3092_v52, %v3762_v14 }
0x127c   :  { %v3108_v55 = vsub.f32 1.5, %v3107_v9 }
0x127d   :  { %v3636_v57 = vpop.eup %3635  ;;  %v3102_v29 = vadd.f32 1e-12, %v3098_v0 }
0x127e   :  { %v3109_v22 = vmul.f32 %v3634_v2, %v3108_v55  ;;  %v3115_v58 = vmul.f32 %v3636_v57, %v3101_v62  ;;  %vm3121_vm7 = vweird.f32 %v3636_v57 }
0x127f   :  { %3637 = vrsqrt.f32 %v3102_v29  ;;  %vm3122_vm12 = vmor %vm3120_vm10, %vm3121_vm7  ;;  %vm3130_vm15 = vweird.f32 %v3102_v29 }
0x1280   :  { %v3113_v25 = vsel %vm3112_vm6, %v3634_v2, %v3109_v22  ;;  %v3116_v50 = vmul.f32 %v3636_v57, %v3115_v58 }
0x1281   :  { %v3144_v59 = vmul.f32 %v3113_v25, %v3076_v13 }
0x1282   :  { %v3117_v46 = vmul.f32 0.5, %v3116_v50 }
0x1283   :  { %v3151_v56 = vmul.f32 %v3437_v17, %v3144_v59 }
0x1284   :  { %v3118_v31 = vsub.f32 1.5, %v3117_v46 }
0x1285   :  { %v3158_v26 = vadd.f32 %v3438_v36, %v3151_v56  ;;  %v3638_v47 = vpop.eup %3637 }
0x1286   :  { %v3119_v40 = vmul.f32 %v3636_v57, %v3118_v31  ;;  %v3125_v27 = vmul.f32 %v3638_v47, %v3102_v29  ;;  %vm3131_vm13 = vweird.f32 %v3638_v47 }
0x1287   :  { %3162 = vst.msk [vmem:[%s5204_s17] sm:$0xff] %vm62_vm0, %v3158_v26  ;;  %vm3132_vm1 = vmor %vm3130_vm15, %vm3131_vm13 }
0x1288   :  { %v3123_v32 = vsel %vm3122_vm12, %v3636_v57, %v3119_v40  ;;  %v3126_v8 = vmul.f32 %v3638_v47, %v3125_v27 }
0x1289   :  { %v3145_v11 = vmul.f32 %v3123_v32, %v3077_v19 }
0x128a   :  { %v3127_v20 = vmul.f32 0.5, %v3126_v8 }
0x128b   :  { %v3152_v12 = vmul.f32 %v3437_v17, %v3145_v11 }
0x128c   :  { %v3095_v48 = vpop.xlane.xlu0 %3094  ;;  %v3128_v43 = vsub.f32 1.5, %v3127_v20 }
0x128d   :  { %v3099_v51 = vmul.f32 %v3095_v48, %v3762_v14  ;;  %v3159_v30 = vadd.f32 %v3438_v36, %v3152_v12 }
0x128e   :  { %v3129_v49 = vmul.f32 %v3638_v47, %v3128_v43 }
0x128f   :  { %v3103_v4 = vadd.f32 1e-12, %v3099_v51  ;;  %3163 = vst.msk [vmem:[%s5204_s17 + $0x8] sm:$0xff] %vm62_vm0, %v3159_v30 }
0x1290   :  { %v3133_v7 = vsel %vm3132_vm1, %v3638_v47, %v3129_v49 }
0x1291   :  { %3639 = vrsqrt.f32 %v3103_v4  ;;  %v3146_v39 = vmul.f32 %v3133_v7, %v5148_v21  ;;  %vm3140_vm3 = vweird.f32 %v3103_v4 }
0x1293   :  { %v3153_v10 = vmul.f32 %v3437_v17, %v3146_v39 }
0x1295   :  { %v3160_v37 = vadd.f32 %v3438_v36, %v3153_v10 }
0x1297   :  { %v3640_v15 = vpop.eup %3639  ;;  %3164 = vst.msk [vmem:[%s5204_s17 + $0x10] sm:$0xff] %vm62_vm0, %v3160_v37 }
0x1298   :  { %v3135_v14 = vmul.f32 %v3640_v15, %v3103_v4  ;;  %vm3141_vm2 = vweird.f32 %v3640_v15 }
0x1299   :  { %vm3142_vm14 = vmor %vm3140_vm3, %vm3141_vm2 }
0x129a   :  { %v3136_v13 = vmul.f32 %v3640_v15, %v3135_v14 }
0x129c   :  { %v3137_v33 = vmul.f32 0.5, %v3136_v13 }
0x129e   :  { %v3138_v6 = vsub.f32 1.5, %v3137_v33 }
0x12a0   :  { %v3139_v44 = vmul.f32 %v3640_v15, %v3138_v6 }
0x12a2   :  { %v3143_v5 = vsel %vm3142_vm14, %v3640_v15, %v3139_v44 }
0x12a3   :  { %v3147_v19 = vmul.f32 %v3143_v5, %v5154_v35 }
0x12a5   :  { %v3154_v1 = vmul.f32 %v3437_v17, %v3147_v19 }
0x12a7   :  { %v3161_v28 = vadd.f32 %v3438_v36, %v3154_v1 }
0x12a9   :  { %3165 = vst.msk [vmem:[%s5204_s17 + $0x18] sm:$0xff] %vm62_vm0, %v3161_v28 }

</bundles_post_ra>
